<compile_context>
chip_gen: v6e
topology: v6e:2x2x1
jax: 0.10.0
libtpu: 0.0.40
codegen_flags: <defaults>
</compile_context>

<pallas_src>
import functools

import jax
import jax.numpy as jnp
from jax.experimental import pallas as pl
from jax.experimental.pallas import tpu as pltpu

C_IN, C_OUT, K = 2, 4, 5           # k = k//2*2+1 == 5
H_CH = K * 2                       # hidden channels of conv1 (=10); divisible by C_IN


def _binarize(v):
    # torch.sign with sign(0) forced to +1
    return jnp.where(v >= 0, 1.0, -1.0).astype(v.dtype)


# ------------------------------ fused Pallas kernel -------------------------------

def _haar_kernel(x_ref, w1_ref, b1_ref, w2_ref, b2_ref, w3_ref, b3_ref,
                 o_ref, xpad_ref, *, first, hgt, wid, sub_rows, sub_cols, off):
    """One batch element end-to-end.  Weights/biases are pre-binarized/rounded and
    live in SMEM (read as scalars); activations stay in vregs / VMEM scratch."""
    pad = K // 2

    # ---- stage 0: optional binary activation of the (already mean-centred) input ----
    x = x_ref[0]                                     # (C_IN, H, W) f32
    if first:
        x = _binarize(x)

    # ---- zero-padded input in VMEM scratch (no HBM pad round-trip) ----
    xpad_ref[...] = jnp.zeros(xpad_ref.shape, jnp.float32)
    xpad_ref[:, pad:pad + hgt, pad:pad + wid] = x

    # ---- conv1: grouped KxK conv (groups = C_IN) as unrolled VPU scalar-FMA taps ----
    # PyTorch grouping: output channel h uses input channel h // (H_CH // C_IN).
    opg = H_CH // C_IN
    acc1 = [jnp.full((hgt, wid), b1_ref[h], jnp.float32) for h in range(H_CH)]
    for t in range(K * K):                           # statically unrolled tap loop
        dy, dx = t // K, t % K
        for g in range(C_IN):
            win = xpad_ref[g, dy:dy + hgt, dx:dx + wid]        # (H, W) shifted window
            for m in range(opg):
                h = g * opg + m
                acc1[h] = acc1[h] + w1_ref[h, t] * win
    y1 = [_binarize(a) for a in acc1]

    # ---- conv2: 1x1 conv (H_CH -> C_OUT), computed only on the HxW interior.
    # Its zero-padded border outputs are never sampled by conv3 (stride 3, pad 1). ----
    y2 = []
    for c in range(C_OUT):
        acc = jnp.full((hgt, wid), b2_ref[c], jnp.float32)
        for h in range(H_CH):
            acc = acc + w2_ref[c, h] * y1[h]
        y2.append(_binarize(acc))

    # ---- conv3: 1x1 conv, stride 3, pad 1.  Gather the strided 6x6 subgrid of y2
    # via static unit slices + concat (no strided/gather lowering risk);
    # the output ring hits conv3's zero padding -> constant sign(round(b3)). ----
    ns = len(sub_rows)
    y2s = []
    for c in range(C_OUT):
        rows = jnp.concatenate([y2[c][r:r + 1, :] for r in sub_rows], axis=0)   # (ns, W)
        y2s.append(jnp.concatenate([rows[:, q:q + 1] for q in sub_cols], axis=1))  # (ns, ns)

    oh, ow = o_ref.shape[2], o_ref.shape[3]
    for c in range(C_OUT):
        acc = jnp.full((ns, ns), b3_ref[c], jnp.float32)
        for cc in range(C_OUT):
            acc = acc + w3_ref[c, cc] * y2s[cc]
        ring = jnp.where(b3_ref[c] >= 0, 1.0, -1.0)            # sign(bias) on the ring
        o_ref[0, c, :, :] = jnp.full((oh, ow), ring, jnp.float32)
        o_ref[0, c, off:off + ns, off:off + ns] = _binarize(acc)


# --------------------------------- Pallas wrapper ----------------------------------

@functools.partial(jax.jit, static_argnames=("first",))
def haar_block_pallas(x_nchw, params, first=False):
    n, c_in, hgt, wid = x_nchw.shape
    assert c_in == C_IN and hgt == wid
    x = x_nchw.astype(jnp.float32)
    if first:
        # torch input.mean() is over the whole (N, C, H, W) batch -> one tiny XLA
        # reduction here (a global cross-batch value can't live inside the per-batch grid).
        x = x - jnp.mean(x)

    pad = K // 2
    h2, w2sz = hgt + 2 * pad, wid + 2 * pad          # conv2 output grid (20x20)
    out_h = (h2 + 2 - 1) // 3 + 1                    # conv3: pad 1, stride 3
    out_w = (w2sz + 2 - 1) // 3 + 1

    # Static geometry: which conv3 sample positions land on real data (all of them
    # must fall inside conv2's interior for this specialization), and where the
    # interior block sits inside the output.
    sub_rows, sub_cols, off_r, off_c = [], [], None, None
    for i in range(out_h):
        r = 3 * i - 1                                # coord on conv2's padded grid
        if 0 <= r < h2:
            assert pad <= r < pad + hgt, "unsupported geometry"
            if off_r is None:
                off_r = i
            sub_rows.append(r - pad)                 # coord on the HxW interior grid
    for j in range(out_w):
        q = 3 * j - 1
        if 0 <= q < w2sz:
            assert pad <= q < pad + wid, "unsupported geometry"
            if off_c is None:
                off_c = j
            sub_cols.append(q - pad)
    assert off_r == off_c and len(sub_rows) == len(sub_cols)

    # One-time weight transforms (hoisted out of the kernel hot path).
    w1 = _binarize(params["w1"]).reshape(H_CH, K * K)
    b1 = jnp.round(params["b1"])
    w2 = _binarize(params["w2"]).reshape(C_OUT, H_CH)
    b2 = jnp.round(params["b2"])
    w3 = _binarize(params["w3"]).reshape(C_OUT, C_OUT)
    b3 = jnp.round(params["b3"])

    kernel = functools.partial(
        _haar_kernel, first=first, hgt=hgt, wid=wid,
        sub_rows=tuple(sub_rows), sub_cols=tuple(sub_cols), off=off_r)

    smem = pl.BlockSpec(memory_space=pltpu.MemorySpace.SMEM)
    return pl.pallas_call(
        kernel,
        out_shape=jax.ShapeDtypeStruct((n, C_OUT, out_h, out_w), jnp.float32),
        grid_spec=pltpu.PrefetchScalarGridSpec(
            num_scalar_prefetch=0,
            grid=(n,),
            in_specs=[
                pl.BlockSpec((1, C_IN, hgt, wid), lambda b: (b, 0, 0, 0)),  # x
                smem, smem, smem, smem, smem, smem,                         # weights/biases
            ],
            out_specs=pl.BlockSpec((1, C_OUT, out_h, out_w),
                                   lambda b: (b, 0, 0, 0)),
            scratch_shapes=[pltpu.VMEM((C_IN, h2, w2sz), jnp.float32)],     # padded input
        ),
        compiler_params=pltpu.CompilerParams(
            dimension_semantics=("parallel",)),      # batch axis -> 2 TCs on v7x
    )(x, w1, b1, w2, b2, w3, b3)


# ------------------------------- pure-JAX reference --------------------------------

def _quantconv2d_ref(x, w, b, stride, padding, groups):
    y = jax.lax.conv_general_dilated(
        x, _binarize(w), (stride, stride),
        [(padding, padding), (padding, padding)],
        dimension_numbers=("NCHW", "OIHW", "NCHW"),
        feature_group_count=groups,
        precision=jax.lax.Precision.HIGHEST)
    y = y + jnp.round(b)[None, :, None, None]
    return _binarize(y)


def haar_block_ref(x, params, first=False):
    if first:
        x = _binarize(x - jnp.mean(x))
    y = _quantconv2d_ref(x, params["w1"], params["b1"], 1, K // 2, C_IN)
    y = _quantconv2d_ref(y, params["w2"], params["b2"], 1, K // 2, 1)
    return _quantconv2d_ref(y, params["w3"], params["b3"], 3, 1, 1)


# -------------------------------------- main ---------------------------------------

if __name__ == "__main__":
    key = jax.random.PRNGKey(0)
    kx, k1, k2, k3, k4, k5, k6 = jax.random.split(key, 7)
    params = {
        "w1": jax.random.normal(k1, (H_CH, 1, K, K), jnp.float32),
        "b1": 2.0 * jax.random.normal(k2, (H_CH,), jnp.float32),
        "w2": jax.random.normal(k3, (C_OUT, H_CH, 1, 1), jnp.float32),
        "b2": 2.0 * jax.random.normal(k4, (C_OUT,), jnp.float32),
        "w3": jax.random.normal(k5, (C_OUT, C_OUT, 1, 1), jnp.float32),
        "b3": 2.0 * jax.random.normal(k6, (C_OUT,), jnp.float32),
    }
    x = jax.random.normal(kx, (2, C_IN, 16, 16), jnp.float32)

    out = jax.block_until_ready(haar_block_pallas(x, params, first=False))
    out_first = jax.block_until_ready(haar_block_pallas(x, params, first=True))

    # 16x16 -> conv1 16x16 -> conv2 (pad 2) 20x20 -> conv3 (pad 1, stride 3) 8x8
    assert out.shape == (2, C_OUT, 8, 8), out.shape
    assert out_first.shape == (2, C_OUT, 8, 8), out_first.shape
    assert bool(jnp.all(jnp.abs(out) == 1.0))
    assert bool(jnp.all(jnp.abs(out_first) == 1.0))

    ref = haar_block_ref(x, params, first=False)
    ref_first = haar_block_ref(x, params, first=True)
    mism = int(jnp.sum(out != ref)) + int(jnp.sum(out_first != ref_first))
    # allow a tiny slack for float-rounding-order sign flips at exact zeros
    assert mism <= max(4, out.size // 20), f"too many mismatches: {mism}"

    print("KERNEL_OK")
</pallas_src>

<mosaic_0001>
module attributes {stable_mosaic.version = 11 : i64} {
  func.func @_haar_kernel(%arg0: i32, %arg1: memref<1x2x16x16xf32, #tpu.memory_space<vmem>>, %arg2: memref<10x25xf32, #tpu.memory_space<smem>>, %arg3: memref<10xf32, #tpu.memory_space<smem>>, %arg4: memref<4x10xf32, #tpu.memory_space<smem>>, %arg5: memref<4xf32, #tpu.memory_space<smem>>, %arg6: memref<4x4xf32, #tpu.memory_space<smem>>, %arg7: memref<4xf32, #tpu.memory_space<smem>>, %arg8: memref<1x4x8x8xf32, #tpu.memory_space<vmem>>, %arg9: memref<2x20x20xf32, #tpu.memory_space<vmem>>) attributes {dimension_semantics = [#tpu.dimension_semantics<parallel>], iteration_bounds = array<i64: 2>, scalar_prefetch = 0 : i64, scratch_operands = 1 : i64, tpu.core_type = #tpu.core_type<tc>, window_params = [{transform_indices = @transform_0, window_bounds = array<i64: 1, 2, 16, 16>}, {transform_indices = @transform_1, window_bounds = array<i64: 10, 25>}, {transform_indices = @transform_2, window_bounds = array<i64: 10>}, {transform_indices = @transform_3, window_bounds = array<i64: 4, 10>}, {transform_indices = @transform_4, window_bounds = array<i64: 4>}, {transform_indices = @transform_5, window_bounds = array<i64: 4, 4>}, {transform_indices = @transform_6, window_bounds = array<i64: 4>}, {transform_indices = @transform_7, window_bounds = array<i64: 1, 4, 8, 8>}]} {
    %c0 = arith.constant 0 : index
    %c0_0 = arith.constant 0 : index
    %c0_1 = arith.constant 0 : index
    %c0_2 = arith.constant 0 : index
    %0 = vector.load %arg1[%c0, %c0_0, %c0_1, %c0_2] : memref<1x2x16x16xf32, #tpu.memory_space<vmem>>, vector<1x2x16x16xf32>
    %1 = vector.shape_cast %0 : vector<1x2x16x16xf32> to vector<2x16x16xf32>
    %cst = arith.constant 0.000000e+00 : f32
    %2 = vector.broadcast %cst : f32 to vector<2x20x20xf32>
    %c0_3 = arith.constant 0 : index
    %c0_4 = arith.constant 0 : index
    %c0_5 = arith.constant 0 : index
    %3 = vector.load %arg9[%c0_3, %c0_4, %c0_5] : memref<2x20x20xf32, #tpu.memory_space<vmem>>, vector<2x20x20xf32>
    tpu.vector_store %arg9[%c0_3, %c0_4, %c0_5], %2 {strides = array<i32>} : memref<2x20x20xf32, #tpu.memory_space<vmem>>, vector<2x20x20xf32>,
    %c0_6 = arith.constant 0 : index
    %c2 = arith.constant 2 : index
    %c2_7 = arith.constant 2 : index
    %4 = vector.load %arg9[%c0_6, %c2, %c2_7] : memref<2x20x20xf32, #tpu.memory_space<vmem>>, vector<2x16x16xf32>
    tpu.vector_store %arg9[%c0_6, %c2, %c2_7], %1 {strides = array<i32>} : memref<2x20x20xf32, #tpu.memory_space<vmem>>, vector<2x16x16xf32>,
    %c0_8 = arith.constant 0 : index
    %5 = memref.load %arg3[%c0_8] : memref<10xf32, #tpu.memory_space<smem>>
    %6 = vector.broadcast %5 : f32 to vector<16x16xf32>
    %c1 = arith.constant 1 : index
    %7 = memref.load %arg3[%c1] : memref<10xf32, #tpu.memory_space<smem>>
    %8 = vector.broadcast %7 : f32 to vector<16x16xf32>
    %c2_9 = arith.constant 2 : index
    %9 = memref.load %arg3[%c2_9] : memref<10xf32, #tpu.memory_space<smem>>
    %10 = vector.broadcast %9 : f32 to vector<16x16xf32>
    %c3 = arith.constant 3 : index
    %11 = memref.load %arg3[%c3] : memref<10xf32, #tpu.memory_space<smem>>
    %12 = vector.broadcast %11 : f32 to vector<16x16xf32>
    %c4 = arith.constant 4 : index
    %13 = memref.load %arg3[%c4] : memref<10xf32, #tpu.memory_space<smem>>
    %14 = vector.broadcast %13 : f32 to vector<16x16xf32>
    %c5 = arith.constant 5 : index
    %15 = memref.load %arg3[%c5] : memref<10xf32, #tpu.memory_space<smem>>
    %16 = vector.broadcast %15 : f32 to vector<16x16xf32>
    %c6 = arith.constant 6 : index
    %17 = memref.load %arg3[%c6] : memref<10xf32, #tpu.memory_space<smem>>
    %18 = vector.broadcast %17 : f32 to vector<16x16xf32>
    %c7 = arith.constant 7 : index
    %19 = memref.load %arg3[%c7] : memref<10xf32, #tpu.memory_space<smem>>
    %20 = vector.broadcast %19 : f32 to vector<16x16xf32>
    %c8 = arith.constant 8 : index
    %21 = memref.load %arg3[%c8] : memref<10xf32, #tpu.memory_space<smem>>
    %22 = vector.broadcast %21 : f32 to vector<16x16xf32>
    %c9 = arith.constant 9 : index
    %23 = memref.load %arg3[%c9] : memref<10xf32, #tpu.memory_space<smem>>
    %24 = vector.broadcast %23 : f32 to vector<16x16xf32>
    %c0_10 = arith.constant 0 : index
    %c0_11 = arith.constant 0 : index
    %c0_12 = arith.constant 0 : index
    %25 = vector.load %arg9[%c0_10, %c0_11, %c0_12] : memref<2x20x20xf32, #tpu.memory_space<vmem>>, vector<1x16x16xf32>
    %26 = vector.shape_cast %25 : vector<1x16x16xf32> to vector<16x16xf32>
    %c0_13 = arith.constant 0 : index
    %c0_14 = arith.constant 0 : index
    %27 = memref.load %arg2[%c0_13, %c0_14] : memref<10x25xf32, #tpu.memory_space<smem>>
    %28 = vector.broadcast %27 : f32 to vector<16x16xf32>
    %29 = arith.mulf %28, %26 : vector<16x16xf32>
    %30 = arith.addf %6, %29 : vector<16x16xf32>
    %c1_15 = arith.constant 1 : index
    %c0_16 = arith.constant 0 : index
    %31 = memref.load %arg2[%c1_15, %c0_16] : memref<10x25xf32, #tpu.memory_space<smem>>
    %32 = vector.broadcast %31 : f32 to vector<16x16xf32>
    %33 = arith.mulf %32, %26 : vector<16x16xf32>
    %34 = arith.addf %8, %33 : vector<16x16xf32>
    %c2_17 = arith.constant 2 : index
    %c0_18 = arith.constant 0 : index
    %35 = memref.load %arg2[%c2_17, %c0_18] : memref<10x25xf32, #tpu.memory_space<smem>>
    %36 = vector.broadcast %35 : f32 to vector<16x16xf32>
    %37 = arith.mulf %36, %26 : vector<16x16xf32>
    %38 = arith.addf %10, %37 : vector<16x16xf32>
    %c3_19 = arith.constant 3 : index
    %c0_20 = arith.constant 0 : index
    %39 = memref.load %arg2[%c3_19, %c0_20] : memref<10x25xf32, #tpu.memory_space<smem>>
    %40 = vector.broadcast %39 : f32 to vector<16x16xf32>
    %41 = arith.mulf %40, %26 : vector<16x16xf32>
    %42 = arith.addf %12, %41 : vector<16x16xf32>
    %c4_21 = arith.constant 4 : index
    %c0_22 = arith.constant 0 : index
    %43 = memref.load %arg2[%c4_21, %c0_22] : memref<10x25xf32, #tpu.memory_space<smem>>
    %44 = vector.broadcast %43 : f32 to vector<16x16xf32>
    %45 = arith.mulf %44, %26 : vector<16x16xf32>
    %46 = arith.addf %14, %45 : vector<16x16xf32>
    %c1_23 = arith.constant 1 : index
    %c0_24 = arith.constant 0 : index
    %c0_25 = arith.constant 0 : index
    %47 = vector.load %arg9[%c1_23, %c0_24, %c0_25] : memref<2x20x20xf32, #tpu.memory_space<vmem>>, vector<1x16x16xf32>
    %48 = vector.shape_cast %47 : vector<1x16x16xf32> to vector<16x16xf32>
    %c5_26 = arith.constant 5 : index
    %c0_27 = arith.constant 0 : index
    %49 = memref.load %arg2[%c5_26, %c0_27] : memref<10x25xf32, #tpu.memory_space<smem>>
    %50 = vector.broadcast %49 : f32 to vector<16x16xf32>
    %51 = arith.mulf %50, %48 : vector<16x16xf32>
    %52 = arith.addf %16, %51 : vector<16x16xf32>
    %c6_28 = arith.constant 6 : index
    %c0_29 = arith.constant 0 : index
    %53 = memref.load %arg2[%c6_28, %c0_29] : memref<10x25xf32, #tpu.memory_space<smem>>
    %54 = vector.broadcast %53 : f32 to vector<16x16xf32>
    %55 = arith.mulf %54, %48 : vector<16x16xf32>
    %56 = arith.addf %18, %55 : vector<16x16xf32>
    %c7_30 = arith.constant 7 : index
    %c0_31 = arith.constant 0 : index
    %57 = memref.load %arg2[%c7_30, %c0_31] : memref<10x25xf32, #tpu.memory_space<smem>>
    %58 = vector.broadcast %57 : f32 to vector<16x16xf32>
    %59 = arith.mulf %58, %48 : vector<16x16xf32>
    %60 = arith.addf %20, %59 : vector<16x16xf32>
    %c8_32 = arith.constant 8 : index
    %c0_33 = arith.constant 0 : index
    %61 = memref.load %arg2[%c8_32, %c0_33] : memref<10x25xf32, #tpu.memory_space<smem>>
    %62 = vector.broadcast %61 : f32 to vector<16x16xf32>
    %63 = arith.mulf %62, %48 : vector<16x16xf32>
    %64 = arith.addf %22, %63 : vector<16x16xf32>
    %c9_34 = arith.constant 9 : index
    %c0_35 = arith.constant 0 : index
    %65 = memref.load %arg2[%c9_34, %c0_35] : memref<10x25xf32, #tpu.memory_space<smem>>
    %66 = vector.broadcast %65 : f32 to vector<16x16xf32>
    %67 = arith.mulf %66, %48 : vector<16x16xf32>
    %68 = arith.addf %24, %67 : vector<16x16xf32>
    %c0_36 = arith.constant 0 : index
    %c0_37 = arith.constant 0 : index
    %c1_38 = arith.constant 1 : index
    %69 = vector.load %arg9[%c0_36, %c0_37, %c1_38] : memref<2x20x20xf32, #tpu.memory_space<vmem>>, vector<1x16x16xf32>
    %70 = vector.shape_cast %69 : vector<1x16x16xf32> to vector<16x16xf32>
    %c0_39 = arith.constant 0 : index
    %c1_40 = arith.constant 1 : index
    %71 = memref.load %arg2[%c0_39, %c1_40] : memref<10x25xf32, #tpu.memory_space<smem>>
    %72 = vector.broadcast %71 : f32 to vector<16x16xf32>
    %73 = arith.mulf %72, %70 : vector<16x16xf32>
    %74 = arith.addf %30, %73 : vector<16x16xf32>
    %c1_41 = arith.constant 1 : index
    %c1_42 = arith.constant 1 : index
    %75 = memref.load %arg2[%c1_41, %c1_42] : memref<10x25xf32, #tpu.memory_space<smem>>
    %76 = vector.broadcast %75 : f32 to vector<16x16xf32>
    %77 = arith.mulf %76, %70 : vector<16x16xf32>
    %78 = arith.addf %34, %77 : vector<16x16xf32>
    %c2_43 = arith.constant 2 : index
    %c1_44 = arith.constant 1 : index
    %79 = memref.load %arg2[%c2_43, %c1_44] : memref<10x25xf32, #tpu.memory_space<smem>>
    %80 = vector.broadcast %79 : f32 to vector<16x16xf32>
    %81 = arith.mulf %80, %70 : vector<16x16xf32>
    %82 = arith.addf %38, %81 : vector<16x16xf32>
    %c3_45 = arith.constant 3 : index
    %c1_46 = arith.constant 1 : index
    %83 = memref.load %arg2[%c3_45, %c1_46] : memref<10x25xf32, #tpu.memory_space<smem>>
    %84 = vector.broadcast %83 : f32 to vector<16x16xf32>
    %85 = arith.mulf %84, %70 : vector<16x16xf32>
    %86 = arith.addf %42, %85 : vector<16x16xf32>
    %c4_47 = arith.constant 4 : index
    %c1_48 = arith.constant 1 : index
    %87 = memref.load %arg2[%c4_47, %c1_48] : memref<10x25xf32, #tpu.memory_space<smem>>
    %88 = vector.broadcast %87 : f32 to vector<16x16xf32>
    %89 = arith.mulf %88, %70 : vector<16x16xf32>
    %90 = arith.addf %46, %89 : vector<16x16xf32>
    %c1_49 = arith.constant 1 : index
    %c0_50 = arith.constant 0 : index
    %c1_51 = arith.constant 1 : index
    %91 = vector.load %arg9[%c1_49, %c0_50, %c1_51] : memref<2x20x20xf32, #tpu.memory_space<vmem>>, vector<1x16x16xf32>
    %92 = vector.shape_cast %91 : vector<1x16x16xf32> to vector<16x16xf32>
    %c5_52 = arith.constant 5 : index
    %c1_53 = arith.constant 1 : index
    %93 = memref.load %arg2[%c5_52, %c1_53] : memref<10x25xf32, #tpu.memory_space<smem>>
    %94 = vector.broadcast %93 : f32 to vector<16x16xf32>
    %95 = arith.mulf %94, %92 : vector<16x16xf32>
    %96 = arith.addf %52, %95 : vector<16x16xf32>
    %c6_54 = arith.constant 6 : index
    %c1_55 = arith.constant 1 : index
    %97 = memref.load %arg2[%c6_54, %c1_55] : memref<10x25xf32, #tpu.memory_space<smem>>
    %98 = vector.broadcast %97 : f32 to vector<16x16xf32>
    %99 = arith.mulf %98, %92 : vector<16x16xf32>
    %100 = arith.addf %56, %99 : vector<16x16xf32>
    %c7_56 = arith.constant 7 : index
    %c1_57 = arith.constant 1 : index
    %101 = memref.load %arg2[%c7_56, %c1_57] : memref<10x25xf32, #tpu.memory_space<smem>>
    %102 = vector.broadcast %101 : f32 to vector<16x16xf32>
    %103 = arith.mulf %102, %92 : vector<16x16xf32>
    %104 = arith.addf %60, %103 : vector<16x16xf32>
    %c8_58 = arith.constant 8 : index
    %c1_59 = arith.constant 1 : index
    %105 = memref.load %arg2[%c8_58, %c1_59] : memref<10x25xf32, #tpu.memory_space<smem>>
    %106 = vector.broadcast %105 : f32 to vector<16x16xf32>
    %107 = arith.mulf %106, %92 : vector<16x16xf32>
    %108 = arith.addf %64, %107 : vector<16x16xf32>
    %c9_60 = arith.constant 9 : index
    %c1_61 = arith.constant 1 : index
    %109 = memref.load %arg2[%c9_60, %c1_61] : memref<10x25xf32, #tpu.memory_space<smem>>
    %110 = vector.broadcast %109 : f32 to vector<16x16xf32>
    %111 = arith.mulf %110, %92 : vector<16x16xf32>
    %112 = arith.addf %68, %111 : vector<16x16xf32>
    %c0_62 = arith.constant 0 : index
    %c0_63 = arith.constant 0 : index
    %c2_64 = arith.constant 2 : index
    %113 = vector.load %arg9[%c0_62, %c0_63, %c2_64] : memref<2x20x20xf32, #tpu.memory_space<vmem>>, vector<1x16x16xf32>
    %114 = vector.shape_cast %113 : vector<1x16x16xf32> to vector<16x16xf32>
    %c0_65 = arith.constant 0 : index
    %c2_66 = arith.constant 2 : index
    %115 = memref.load %arg2[%c0_65, %c2_66] : memref<10x25xf32, #tpu.memory_space<smem>>
    %116 = vector.broadcast %115 : f32 to vector<16x16xf32>
    %117 = arith.mulf %116, %114 : vector<16x16xf32>
    %118 = arith.addf %74, %117 : vector<16x16xf32>
    %c1_67 = arith.constant 1 : index
    %c2_68 = arith.constant 2 : index
    %119 = memref.load %arg2[%c1_67, %c2_68] : memref<10x25xf32, #tpu.memory_space<smem>>
    %120 = vector.broadcast %119 : f32 to vector<16x16xf32>
    %121 = arith.mulf %120, %114 : vector<16x16xf32>
    %122 = arith.addf %78, %121 : vector<16x16xf32>
    %c2_69 = arith.constant 2 : index
    %c2_70 = arith.constant 2 : index
    %123 = memref.load %arg2[%c2_69, %c2_70] : memref<10x25xf32, #tpu.memory_space<smem>>
    %124 = vector.broadcast %123 : f32 to vector<16x16xf32>
    %125 = arith.mulf %124, %114 : vector<16x16xf32>
    %126 = arith.addf %82, %125 : vector<16x16xf32>
    %c3_71 = arith.constant 3 : index
    %c2_72 = arith.constant 2 : index
    %127 = memref.load %arg2[%c3_71, %c2_72] : memref<10x25xf32, #tpu.memory_space<smem>>
    %128 = vector.broadcast %127 : f32 to vector<16x16xf32>
    %129 = arith.mulf %128, %114 : vector<16x16xf32>
    %130 = arith.addf %86, %129 : vector<16x16xf32>
    %c4_73 = arith.constant 4 : index
    %c2_74 = arith.constant 2 : index
    %131 = memref.load %arg2[%c4_73, %c2_74] : memref<10x25xf32, #tpu.memory_space<smem>>
    %132 = vector.broadcast %131 : f32 to vector<16x16xf32>
    %133 = arith.mulf %132, %114 : vector<16x16xf32>
    %134 = arith.addf %90, %133 : vector<16x16xf32>
    %c1_75 = arith.constant 1 : index
    %c0_76 = arith.constant 0 : index
    %c2_77 = arith.constant 2 : index
    %135 = vector.load %arg9[%c1_75, %c0_76, %c2_77] : memref<2x20x20xf32, #tpu.memory_space<vmem>>, vector<1x16x16xf32>
    %136 = vector.shape_cast %135 : vector<1x16x16xf32> to vector<16x16xf32>
    %c5_78 = arith.constant 5 : index
    %c2_79 = arith.constant 2 : index
    %137 = memref.load %arg2[%c5_78, %c2_79] : memref<10x25xf32, #tpu.memory_space<smem>>
    %138 = vector.broadcast %137 : f32 to vector<16x16xf32>
    %139 = arith.mulf %138, %136 : vector<16x16xf32>
    %140 = arith.addf %96, %139 : vector<16x16xf32>
    %c6_80 = arith.constant 6 : index
    %c2_81 = arith.constant 2 : index
    %141 = memref.load %arg2[%c6_80, %c2_81] : memref<10x25xf32, #tpu.memory_space<smem>>
    %142 = vector.broadcast %141 : f32 to vector<16x16xf32>
    %143 = arith.mulf %142, %136 : vector<16x16xf32>
    %144 = arith.addf %100, %143 : vector<16x16xf32>
    %c7_82 = arith.constant 7 : index
    %c2_83 = arith.constant 2 : index
    %145 = memref.load %arg2[%c7_82, %c2_83] : memref<10x25xf32, #tpu.memory_space<smem>>
    %146 = vector.broadcast %145 : f32 to vector<16x16xf32>
    %147 = arith.mulf %146, %136 : vector<16x16xf32>
    %148 = arith.addf %104, %147 : vector<16x16xf32>
    %c8_84 = arith.constant 8 : index
    %c2_85 = arith.constant 2 : index
    %149 = memref.load %arg2[%c8_84, %c2_85] : memref<10x25xf32, #tpu.memory_space<smem>>
    %150 = vector.broadcast %149 : f32 to vector<16x16xf32>
    %151 = arith.mulf %150, %136 : vector<16x16xf32>
    %152 = arith.addf %108, %151 : vector<16x16xf32>
    %c9_86 = arith.constant 9 : index
    %c2_87 = arith.constant 2 : index
    %153 = memref.load %arg2[%c9_86, %c2_87] : memref<10x25xf32, #tpu.memory_space<smem>>
    %154 = vector.broadcast %153 : f32 to vector<16x16xf32>
    %155 = arith.mulf %154, %136 : vector<16x16xf32>
    %156 = arith.addf %112, %155 : vector<16x16xf32>
    %c0_88 = arith.constant 0 : index
    %c0_89 = arith.constant 0 : index
    %c3_90 = arith.constant 3 : index
    %157 = vector.load %arg9[%c0_88, %c0_89, %c3_90] : memref<2x20x20xf32, #tpu.memory_space<vmem>>, vector<1x16x16xf32>
    %158 = vector.shape_cast %157 : vector<1x16x16xf32> to vector<16x16xf32>
    %c0_91 = arith.constant 0 : index
    %c3_92 = arith.constant 3 : index
    %159 = memref.load %arg2[%c0_91, %c3_92] : memref<10x25xf32, #tpu.memory_space<smem>>
    %160 = vector.broadcast %159 : f32 to vector<16x16xf32>
    %161 = arith.mulf %160, %158 : vector<16x16xf32>
    %162 = arith.addf %118, %161 : vector<16x16xf32>
    %c1_93 = arith.constant 1 : index
    %c3_94 = arith.constant 3 : index
    %163 = memref.load %arg2[%c1_93, %c3_94] : memref<10x25xf32, #tpu.memory_space<smem>>
    %164 = vector.broadcast %163 : f32 to vector<16x16xf32>
    %165 = arith.mulf %164, %158 : vector<16x16xf32>
    %166 = arith.addf %122, %165 : vector<16x16xf32>
    %c2_95 = arith.constant 2 : index
    %c3_96 = arith.constant 3 : index
    %167 = memref.load %arg2[%c2_95, %c3_96] : memref<10x25xf32, #tpu.memory_space<smem>>
    %168 = vector.broadcast %167 : f32 to vector<16x16xf32>
    %169 = arith.mulf %168, %158 : vector<16x16xf32>
    %170 = arith.addf %126, %169 : vector<16x16xf32>
    %c3_97 = arith.constant 3 : index
    %c3_98 = arith.constant 3 : index
    %171 = memref.load %arg2[%c3_97, %c3_98] : memref<10x25xf32, #tpu.memory_space<smem>>
    %172 = vector.broadcast %171 : f32 to vector<16x16xf32>
    %173 = arith.mulf %172, %158 : vector<16x16xf32>
    %174 = arith.addf %130, %173 : vector<16x16xf32>
    %c4_99 = arith.constant 4 : index
    %c3_100 = arith.constant 3 : index
    %175 = memref.load %arg2[%c4_99, %c3_100] : memref<10x25xf32, #tpu.memory_space<smem>>
    %176 = vector.broadcast %175 : f32 to vector<16x16xf32>
    %177 = arith.mulf %176, %158 : vector<16x16xf32>
    %178 = arith.addf %134, %177 : vector<16x16xf32>
    %c1_101 = arith.constant 1 : index
    %c0_102 = arith.constant 0 : index
    %c3_103 = arith.constant 3 : index
    %179 = vector.load %arg9[%c1_101, %c0_102, %c3_103] : memref<2x20x20xf32, #tpu.memory_space<vmem>>, vector<1x16x16xf32>
    %180 = vector.shape_cast %179 : vector<1x16x16xf32> to vector<16x16xf32>
    %c5_104 = arith.constant 5 : index
    %c3_105 = arith.constant 3 : index
    %181 = memref.load %arg2[%c5_104, %c3_105] : memref<10x25xf32, #tpu.memory_space<smem>>
    %182 = vector.broadcast %181 : f32 to vector<16x16xf32>
    %183 = arith.mulf %182, %180 : vector<16x16xf32>
    %184 = arith.addf %140, %183 : vector<16x16xf32>
    %c6_106 = arith.constant 6 : index
    %c3_107 = arith.constant 3 : index
    %185 = memref.load %arg2[%c6_106, %c3_107] : memref<10x25xf32, #tpu.memory_space<smem>>
    %186 = vector.broadcast %185 : f32 to vector<16x16xf32>
    %187 = arith.mulf %186, %180 : vector<16x16xf32>
    %188 = arith.addf %144, %187 : vector<16x16xf32>
    %c7_108 = arith.constant 7 : index
    %c3_109 = arith.constant 3 : index
    %189 = memref.load %arg2[%c7_108, %c3_109] : memref<10x25xf32, #tpu.memory_space<smem>>
    %190 = vector.broadcast %189 : f32 to vector<16x16xf32>
    %191 = arith.mulf %190, %180 : vector<16x16xf32>
    %192 = arith.addf %148, %191 : vector<16x16xf32>
    %c8_110 = arith.constant 8 : index
    %c3_111 = arith.constant 3 : index
    %193 = memref.load %arg2[%c8_110, %c3_111] : memref<10x25xf32, #tpu.memory_space<smem>>
    %194 = vector.broadcast %193 : f32 to vector<16x16xf32>
    %195 = arith.mulf %194, %180 : vector<16x16xf32>
    %196 = arith.addf %152, %195 : vector<16x16xf32>
    %c9_112 = arith.constant 9 : index
    %c3_113 = arith.constant 3 : index
    %197 = memref.load %arg2[%c9_112, %c3_113] : memref<10x25xf32, #tpu.memory_space<smem>>
    %198 = vector.broadcast %197 : f32 to vector<16x16xf32>
    %199 = arith.mulf %198, %180 : vector<16x16xf32>
    %200 = arith.addf %156, %199 : vector<16x16xf32>
    %c0_114 = arith.constant 0 : index
    %c0_115 = arith.constant 0 : index
    %c4_116 = arith.constant 4 : index
    %201 = vector.load %arg9[%c0_114, %c0_115, %c4_116] : memref<2x20x20xf32, #tpu.memory_space<vmem>>, vector<1x16x16xf32>
    %202 = vector.shape_cast %201 : vector<1x16x16xf32> to vector<16x16xf32>
    %c0_117 = arith.constant 0 : index
    %c4_118 = arith.constant 4 : index
    %203 = memref.load %arg2[%c0_117, %c4_118] : memref<10x25xf32, #tpu.memory_space<smem>>
    %204 = vector.broadcast %203 : f32 to vector<16x16xf32>
    %205 = arith.mulf %204, %202 : vector<16x16xf32>
    %206 = arith.addf %162, %205 : vector<16x16xf32>
    %c1_119 = arith.constant 1 : index
    %c4_120 = arith.constant 4 : index
    %207 = memref.load %arg2[%c1_119, %c4_120] : memref<10x25xf32, #tpu.memory_space<smem>>
    %208 = vector.broadcast %207 : f32 to vector<16x16xf32>
    %209 = arith.mulf %208, %202 : vector<16x16xf32>
    %210 = arith.addf %166, %209 : vector<16x16xf32>
    %c2_121 = arith.constant 2 : index
    %c4_122 = arith.constant 4 : index
    %211 = memref.load %arg2[%c2_121, %c4_122] : memref<10x25xf32, #tpu.memory_space<smem>>
    %212 = vector.broadcast %211 : f32 to vector<16x16xf32>
    %213 = arith.mulf %212, %202 : vector<16x16xf32>
    %214 = arith.addf %170, %213 : vector<16x16xf32>
    %c3_123 = arith.constant 3 : index
    %c4_124 = arith.constant 4 : index
    %215 = memref.load %arg2[%c3_123, %c4_124] : memref<10x25xf32, #tpu.memory_space<smem>>
    %216 = vector.broadcast %215 : f32 to vector<16x16xf32>
    %217 = arith.mulf %216, %202 : vector<16x16xf32>
    %218 = arith.addf %174, %217 : vector<16x16xf32>
    %c4_125 = arith.constant 4 : index
    %c4_126 = arith.constant 4 : index
    %219 = memref.load %arg2[%c4_125, %c4_126] : memref<10x25xf32, #tpu.memory_space<smem>>
    %220 = vector.broadcast %219 : f32 to vector<16x16xf32>
    %221 = arith.mulf %220, %202 : vector<16x16xf32>
    %222 = arith.addf %178, %221 : vector<16x16xf32>
    %c1_127 = arith.constant 1 : index
    %c0_128 = arith.constant 0 : index
    %c4_129 = arith.constant 4 : index
    %223 = vector.load %arg9[%c1_127, %c0_128, %c4_129] : memref<2x20x20xf32, #tpu.memory_space<vmem>>, vector<1x16x16xf32>
    %224 = vector.shape_cast %223 : vector<1x16x16xf32> to vector<16x16xf32>
    %c5_130 = arith.constant 5 : index
    %c4_131 = arith.constant 4 : index
    %225 = memref.load %arg2[%c5_130, %c4_131] : memref<10x25xf32, #tpu.memory_space<smem>>
    %226 = vector.broadcast %225 : f32 to vector<16x16xf32>
    %227 = arith.mulf %226, %224 : vector<16x16xf32>
    %228 = arith.addf %184, %227 : vector<16x16xf32>
    %c6_132 = arith.constant 6 : index
    %c4_133 = arith.constant 4 : index
    %229 = memref.load %arg2[%c6_132, %c4_133] : memref<10x25xf32, #tpu.memory_space<smem>>
    %230 = vector.broadcast %229 : f32 to vector<16x16xf32>
    %231 = arith.mulf %230, %224 : vector<16x16xf32>
    %232 = arith.addf %188, %231 : vector<16x16xf32>
    %c7_134 = arith.constant 7 : index
    %c4_135 = arith.constant 4 : index
    %233 = memref.load %arg2[%c7_134, %c4_135] : memref<10x25xf32, #tpu.memory_space<smem>>
    %234 = vector.broadcast %233 : f32 to vector<16x16xf32>
    %235 = arith.mulf %234, %224 : vector<16x16xf32>
    %236 = arith.addf %192, %235 : vector<16x16xf32>
    %c8_136 = arith.constant 8 : index
    %c4_137 = arith.constant 4 : index
    %237 = memref.load %arg2[%c8_136, %c4_137] : memref<10x25xf32, #tpu.memory_space<smem>>
    %238 = vector.broadcast %237 : f32 to vector<16x16xf32>
    %239 = arith.mulf %238, %224 : vector<16x16xf32>
    %240 = arith.addf %196, %239 : vector<16x16xf32>
    %c9_138 = arith.constant 9 : index
    %c4_139 = arith.constant 4 : index
    %241 = memref.load %arg2[%c9_138, %c4_139] : memref<10x25xf32, #tpu.memory_space<smem>>
    %242 = vector.broadcast %241 : f32 to vector<16x16xf32>
    %243 = arith.mulf %242, %224 : vector<16x16xf32>
    %244 = arith.addf %200, %243 : vector<16x16xf32>
    %c0_140 = arith.constant 0 : index
    %c1_141 = arith.constant 1 : index
    %c0_142 = arith.constant 0 : index
    %245 = vector.load %arg9[%c0_140, %c1_141, %c0_142] : memref<2x20x20xf32, #tpu.memory_space<vmem>>, vector<1x16x16xf32>
    %246 = vector.shape_cast %245 : vector<1x16x16xf32> to vector<16x16xf32>
    %c0_143 = arith.constant 0 : index
    %c5_144 = arith.constant 5 : index
    %247 = memref.load %arg2[%c0_143, %c5_144] : memref<10x25xf32, #tpu.memory_space<smem>>
    %248 = vector.broadcast %247 : f32 to vector<16x16xf32>
    %249 = arith.mulf %248, %246 : vector<16x16xf32>
    %250 = arith.addf %206, %249 : vector<16x16xf32>
    %c1_145 = arith.constant 1 : index
    %c5_146 = arith.constant 5 : index
    %251 = memref.load %arg2[%c1_145, %c5_146] : memref<10x25xf32, #tpu.memory_space<smem>>
    %252 = vector.broadcast %251 : f32 to vector<16x16xf32>
    %253 = arith.mulf %252, %246 : vector<16x16xf32>
    %254 = arith.addf %210, %253 : vector<16x16xf32>
    %c2_147 = arith.constant 2 : index
    %c5_148 = arith.constant 5 : index
    %255 = memref.load %arg2[%c2_147, %c5_148] : memref<10x25xf32, #tpu.memory_space<smem>>
    %256 = vector.broadcast %255 : f32 to vector<16x16xf32>
    %257 = arith.mulf %256, %246 : vector<16x16xf32>
    %258 = arith.addf %214, %257 : vector<16x16xf32>
    %c3_149 = arith.constant 3 : index
    %c5_150 = arith.constant 5 : index
    %259 = memref.load %arg2[%c3_149, %c5_150] : memref<10x25xf32, #tpu.memory_space<smem>>
    %260 = vector.broadcast %259 : f32 to vector<16x16xf32>
    %261 = arith.mulf %260, %246 : vector<16x16xf32>
    %262 = arith.addf %218, %261 : vector<16x16xf32>
    %c4_151 = arith.constant 4 : index
    %c5_152 = arith.constant 5 : index
    %263 = memref.load %arg2[%c4_151, %c5_152] : memref<10x25xf32, #tpu.memory_space<smem>>
    %264 = vector.broadcast %263 : f32 to vector<16x16xf32>
    %265 = arith.mulf %264, %246 : vector<16x16xf32>
    %266 = arith.addf %222, %265 : vector<16x16xf32>
    %c1_153 = arith.constant 1 : index
    %c1_154 = arith.constant 1 : index
    %c0_155 = arith.constant 0 : index
    %267 = vector.load %arg9[%c1_153, %c1_154, %c0_155] : memref<2x20x20xf32, #tpu.memory_space<vmem>>, vector<1x16x16xf32>
    %268 = vector.shape_cast %267 : vector<1x16x16xf32> to vector<16x16xf32>
    %c5_156 = arith.constant 5 : index
    %c5_157 = arith.constant 5 : index
    %269 = memref.load %arg2[%c5_156, %c5_157] : memref<10x25xf32, #tpu.memory_space<smem>>
    %270 = vector.broadcast %269 : f32 to vector<16x16xf32>
    %271 = arith.mulf %270, %268 : vector<16x16xf32>
    %272 = arith.addf %228, %271 : vector<16x16xf32>
    %c6_158 = arith.constant 6 : index
    %c5_159 = arith.constant 5 : index
    %273 = memref.load %arg2[%c6_158, %c5_159] : memref<10x25xf32, #tpu.memory_space<smem>>
    %274 = vector.broadcast %273 : f32 to vector<16x16xf32>
    %275 = arith.mulf %274, %268 : vector<16x16xf32>
    %276 = arith.addf %232, %275 : vector<16x16xf32>
    %c7_160 = arith.constant 7 : index
    %c5_161 = arith.constant 5 : index
    %277 = memref.load %arg2[%c7_160, %c5_161] : memref<10x25xf32, #tpu.memory_space<smem>>
    %278 = vector.broadcast %277 : f32 to vector<16x16xf32>
    %279 = arith.mulf %278, %268 : vector<16x16xf32>
    %280 = arith.addf %236, %279 : vector<16x16xf32>
    %c8_162 = arith.constant 8 : index
    %c5_163 = arith.constant 5 : index
    %281 = memref.load %arg2[%c8_162, %c5_163] : memref<10x25xf32, #tpu.memory_space<smem>>
    %282 = vector.broadcast %281 : f32 to vector<16x16xf32>
    %283 = arith.mulf %282, %268 : vector<16x16xf32>
    %284 = arith.addf %240, %283 : vector<16x16xf32>
    %c9_164 = arith.constant 9 : index
    %c5_165 = arith.constant 5 : index
    %285 = memref.load %arg2[%c9_164, %c5_165] : memref<10x25xf32, #tpu.memory_space<smem>>
    %286 = vector.broadcast %285 : f32 to vector<16x16xf32>
    %287 = arith.mulf %286, %268 : vector<16x16xf32>
    %288 = arith.addf %244, %287 : vector<16x16xf32>
    %c0_166 = arith.constant 0 : index
    %c1_167 = arith.constant 1 : index
    %c1_168 = arith.constant 1 : index
    %289 = vector.load %arg9[%c0_166, %c1_167, %c1_168] : memref<2x20x20xf32, #tpu.memory_space<vmem>>, vector<1x16x16xf32>
    %290 = vector.shape_cast %289 : vector<1x16x16xf32> to vector<16x16xf32>
    %c0_169 = arith.constant 0 : index
    %c6_170 = arith.constant 6 : index
    %291 = memref.load %arg2[%c0_169, %c6_170] : memref<10x25xf32, #tpu.memory_space<smem>>
    %292 = vector.broadcast %291 : f32 to vector<16x16xf32>
    %293 = arith.mulf %292, %290 : vector<16x16xf32>
    %294 = arith.addf %250, %293 : vector<16x16xf32>
    %c1_171 = arith.constant 1 : index
    %c6_172 = arith.constant 6 : index
    %295 = memref.load %arg2[%c1_171, %c6_172] : memref<10x25xf32, #tpu.memory_space<smem>>
    %296 = vector.broadcast %295 : f32 to vector<16x16xf32>
    %297 = arith.mulf %296, %290 : vector<16x16xf32>
    %298 = arith.addf %254, %297 : vector<16x16xf32>
    %c2_173 = arith.constant 2 : index
    %c6_174 = arith.constant 6 : index
    %299 = memref.load %arg2[%c2_173, %c6_174] : memref<10x25xf32, #tpu.memory_space<smem>>
    %300 = vector.broadcast %299 : f32 to vector<16x16xf32>
    %301 = arith.mulf %300, %290 : vector<16x16xf32>
    %302 = arith.addf %258, %301 : vector<16x16xf32>
    %c3_175 = arith.constant 3 : index
    %c6_176 = arith.constant 6 : index
    %303 = memref.load %arg2[%c3_175, %c6_176] : memref<10x25xf32, #tpu.memory_space<smem>>
    %304 = vector.broadcast %303 : f32 to vector<16x16xf32>
    %305 = arith.mulf %304, %290 : vector<16x16xf32>
    %306 = arith.addf %262, %305 : vector<16x16xf32>
    %c4_177 = arith.constant 4 : index
    %c6_178 = arith.constant 6 : index
    %307 = memref.load %arg2[%c4_177, %c6_178] : memref<10x25xf32, #tpu.memory_space<smem>>
    %308 = vector.broadcast %307 : f32 to vector<16x16xf32>
    %309 = arith.mulf %308, %290 : vector<16x16xf32>
    %310 = arith.addf %266, %309 : vector<16x16xf32>
    %c1_179 = arith.constant 1 : index
    %c1_180 = arith.constant 1 : index
    %c1_181 = arith.constant 1 : index
    %311 = vector.load %arg9[%c1_179, %c1_180, %c1_181] : memref<2x20x20xf32, #tpu.memory_space<vmem>>, vector<1x16x16xf32>
    %312 = vector.shape_cast %311 : vector<1x16x16xf32> to vector<16x16xf32>
    %c5_182 = arith.constant 5 : index
    %c6_183 = arith.constant 6 : index
    %313 = memref.load %arg2[%c5_182, %c6_183] : memref<10x25xf32, #tpu.memory_space<smem>>
    %314 = vector.broadcast %313 : f32 to vector<16x16xf32>
    %315 = arith.mulf %314, %312 : vector<16x16xf32>
    %316 = arith.addf %272, %315 : vector<16x16xf32>
    %c6_184 = arith.constant 6 : index
    %c6_185 = arith.constant 6 : index
    %317 = memref.load %arg2[%c6_184, %c6_185] : memref<10x25xf32, #tpu.memory_space<smem>>
    %318 = vector.broadcast %317 : f32 to vector<16x16xf32>
    %319 = arith.mulf %318, %312 : vector<16x16xf32>
    %320 = arith.addf %276, %319 : vector<16x16xf32>
    %c7_186 = arith.constant 7 : index
    %c6_187 = arith.constant 6 : index
    %321 = memref.load %arg2[%c7_186, %c6_187] : memref<10x25xf32, #tpu.memory_space<smem>>
    %322 = vector.broadcast %321 : f32 to vector<16x16xf32>
    %323 = arith.mulf %322, %312 : vector<16x16xf32>
    %324 = arith.addf %280, %323 : vector<16x16xf32>
    %c8_188 = arith.constant 8 : index
    %c6_189 = arith.constant 6 : index
    %325 = memref.load %arg2[%c8_188, %c6_189] : memref<10x25xf32, #tpu.memory_space<smem>>
    %326 = vector.broadcast %325 : f32 to vector<16x16xf32>
    %327 = arith.mulf %326, %312 : vector<16x16xf32>
    %328 = arith.addf %284, %327 : vector<16x16xf32>
    %c9_190 = arith.constant 9 : index
    %c6_191 = arith.constant 6 : index
    %329 = memref.load %arg2[%c9_190, %c6_191] : memref<10x25xf32, #tpu.memory_space<smem>>
    %330 = vector.broadcast %329 : f32 to vector<16x16xf32>
    %331 = arith.mulf %330, %312 : vector<16x16xf32>
    %332 = arith.addf %288, %331 : vector<16x16xf32>
    %c0_192 = arith.constant 0 : index
    %c1_193 = arith.constant 1 : index
    %c2_194 = arith.constant 2 : index
    %333 = vector.load %arg9[%c0_192, %c1_193, %c2_194] : memref<2x20x20xf32, #tpu.memory_space<vmem>>, vector<1x16x16xf32>
    %334 = vector.shape_cast %333 : vector<1x16x16xf32> to vector<16x16xf32>
    %c0_195 = arith.constant 0 : index
    %c7_196 = arith.constant 7 : index
    %335 = memref.load %arg2[%c0_195, %c7_196] : memref<10x25xf32, #tpu.memory_space<smem>>
    %336 = vector.broadcast %335 : f32 to vector<16x16xf32>
    %337 = arith.mulf %336, %334 : vector<16x16xf32>
    %338 = arith.addf %294, %337 : vector<16x16xf32>
    %c1_197 = arith.constant 1 : index
    %c7_198 = arith.constant 7 : index
    %339 = memref.load %arg2[%c1_197, %c7_198] : memref<10x25xf32, #tpu.memory_space<smem>>
    %340 = vector.broadcast %339 : f32 to vector<16x16xf32>
    %341 = arith.mulf %340, %334 : vector<16x16xf32>
    %342 = arith.addf %298, %341 : vector<16x16xf32>
    %c2_199 = arith.constant 2 : index
    %c7_200 = arith.constant 7 : index
    %343 = memref.load %arg2[%c2_199, %c7_200] : memref<10x25xf32, #tpu.memory_space<smem>>
    %344 = vector.broadcast %343 : f32 to vector<16x16xf32>
    %345 = arith.mulf %344, %334 : vector<16x16xf32>
    %346 = arith.addf %302, %345 : vector<16x16xf32>
    %c3_201 = arith.constant 3 : index
    %c7_202 = arith.constant 7 : index
    %347 = memref.load %arg2[%c3_201, %c7_202] : memref<10x25xf32, #tpu.memory_space<smem>>
    %348 = vector.broadcast %347 : f32 to vector<16x16xf32>
    %349 = arith.mulf %348, %334 : vector<16x16xf32>
    %350 = arith.addf %306, %349 : vector<16x16xf32>
    %c4_203 = arith.constant 4 : index
    %c7_204 = arith.constant 7 : index
    %351 = memref.load %arg2[%c4_203, %c7_204] : memref<10x25xf32, #tpu.memory_space<smem>>
    %352 = vector.broadcast %351 : f32 to vector<16x16xf32>
    %353 = arith.mulf %352, %334 : vector<16x16xf32>
    %354 = arith.addf %310, %353 : vector<16x16xf32>
    %c1_205 = arith.constant 1 : index
    %c1_206 = arith.constant 1 : index
    %c2_207 = arith.constant 2 : index
    %355 = vector.load %arg9[%c1_205, %c1_206, %c2_207] : memref<2x20x20xf32, #tpu.memory_space<vmem>>, vector<1x16x16xf32>
    %356 = vector.shape_cast %355 : vector<1x16x16xf32> to vector<16x16xf32>
    %c5_208 = arith.constant 5 : index
    %c7_209 = arith.constant 7 : index
    %357 = memref.load %arg2[%c5_208, %c7_209] : memref<10x25xf32, #tpu.memory_space<smem>>
    %358 = vector.broadcast %357 : f32 to vector<16x16xf32>
    %359 = arith.mulf %358, %356 : vector<16x16xf32>
    %360 = arith.addf %316, %359 : vector<16x16xf32>
    %c6_210 = arith.constant 6 : index
    %c7_211 = arith.constant 7 : index
    %361 = memref.load %arg2[%c6_210, %c7_211] : memref<10x25xf32, #tpu.memory_space<smem>>
    %362 = vector.broadcast %361 : f32 to vector<16x16xf32>
    %363 = arith.mulf %362, %356 : vector<16x16xf32>
    %364 = arith.addf %320, %363 : vector<16x16xf32>
    %c7_212 = arith.constant 7 : index
    %c7_213 = arith.constant 7 : index
    %365 = memref.load %arg2[%c7_212, %c7_213] : memref<10x25xf32, #tpu.memory_space<smem>>
    %366 = vector.broadcast %365 : f32 to vector<16x16xf32>
    %367 = arith.mulf %366, %356 : vector<16x16xf32>
    %368 = arith.addf %324, %367 : vector<16x16xf32>
    %c8_214 = arith.constant 8 : index
    %c7_215 = arith.constant 7 : index
    %369 = memref.load %arg2[%c8_214, %c7_215] : memref<10x25xf32, #tpu.memory_space<smem>>
    %370 = vector.broadcast %369 : f32 to vector<16x16xf32>
    %371 = arith.mulf %370, %356 : vector<16x16xf32>
    %372 = arith.addf %328, %371 : vector<16x16xf32>
    %c9_216 = arith.constant 9 : index
    %c7_217 = arith.constant 7 : index
    %373 = memref.load %arg2[%c9_216, %c7_217] : memref<10x25xf32, #tpu.memory_space<smem>>
    %374 = vector.broadcast %373 : f32 to vector<16x16xf32>
    %375 = arith.mulf %374, %356 : vector<16x16xf32>
    %376 = arith.addf %332, %375 : vector<16x16xf32>
    %c0_218 = arith.constant 0 : index
    %c1_219 = arith.constant 1 : index
    %c3_220 = arith.constant 3 : index
    %377 = vector.load %arg9[%c0_218, %c1_219, %c3_220] : memref<2x20x20xf32, #tpu.memory_space<vmem>>, vector<1x16x16xf32>
    %378 = vector.shape_cast %377 : vector<1x16x16xf32> to vector<16x16xf32>
    %c0_221 = arith.constant 0 : index
    %c8_222 = arith.constant 8 : index
    %379 = memref.load %arg2[%c0_221, %c8_222] : memref<10x25xf32, #tpu.memory_space<smem>>
    %380 = vector.broadcast %379 : f32 to vector<16x16xf32>
    %381 = arith.mulf %380, %378 : vector<16x16xf32>
    %382 = arith.addf %338, %381 : vector<16x16xf32>
    %c1_223 = arith.constant 1 : index
    %c8_224 = arith.constant 8 : index
    %383 = memref.load %arg2[%c1_223, %c8_224] : memref<10x25xf32, #tpu.memory_space<smem>>
    %384 = vector.broadcast %383 : f32 to vector<16x16xf32>
    %385 = arith.mulf %384, %378 : vector<16x16xf32>
    %386 = arith.addf %342, %385 : vector<16x16xf32>
    %c2_225 = arith.constant 2 : index
    %c8_226 = arith.constant 8 : index
    %387 = memref.load %arg2[%c2_225, %c8_226] : memref<10x25xf32, #tpu.memory_space<smem>>
    %388 = vector.broadcast %387 : f32 to vector<16x16xf32>
    %389 = arith.mulf %388, %378 : vector<16x16xf32>
    %390 = arith.addf %346, %389 : vector<16x16xf32>
    %c3_227 = arith.constant 3 : index
    %c8_228 = arith.constant 8 : index
    %391 = memref.load %arg2[%c3_227, %c8_228] : memref<10x25xf32, #tpu.memory_space<smem>>
    %392 = vector.broadcast %391 : f32 to vector<16x16xf32>
    %393 = arith.mulf %392, %378 : vector<16x16xf32>
    %394 = arith.addf %350, %393 : vector<16x16xf32>
    %c4_229 = arith.constant 4 : index
    %c8_230 = arith.constant 8 : index
    %395 = memref.load %arg2[%c4_229, %c8_230] : memref<10x25xf32, #tpu.memory_space<smem>>
    %396 = vector.broadcast %395 : f32 to vector<16x16xf32>
    %397 = arith.mulf %396, %378 : vector<16x16xf32>
    %398 = arith.addf %354, %397 : vector<16x16xf32>
    %c1_231 = arith.constant 1 : index
    %c1_232 = arith.constant 1 : index
    %c3_233 = arith.constant 3 : index
    %399 = vector.load %arg9[%c1_231, %c1_232, %c3_233] : memref<2x20x20xf32, #tpu.memory_space<vmem>>, vector<1x16x16xf32>
    %400 = vector.shape_cast %399 : vector<1x16x16xf32> to vector<16x16xf32>
    %c5_234 = arith.constant 5 : index
    %c8_235 = arith.constant 8 : index
    %401 = memref.load %arg2[%c5_234, %c8_235] : memref<10x25xf32, #tpu.memory_space<smem>>
    %402 = vector.broadcast %401 : f32 to vector<16x16xf32>
    %403 = arith.mulf %402, %400 : vector<16x16xf32>
    %404 = arith.addf %360, %403 : vector<16x16xf32>
    %c6_236 = arith.constant 6 : index
    %c8_237 = arith.constant 8 : index
    %405 = memref.load %arg2[%c6_236, %c8_237] : memref<10x25xf32, #tpu.memory_space<smem>>
    %406 = vector.broadcast %405 : f32 to vector<16x16xf32>
    %407 = arith.mulf %406, %400 : vector<16x16xf32>
    %408 = arith.addf %364, %407 : vector<16x16xf32>
    %c7_238 = arith.constant 7 : index
    %c8_239 = arith.constant 8 : index
    %409 = memref.load %arg2[%c7_238, %c8_239] : memref<10x25xf32, #tpu.memory_space<smem>>
    %410 = vector.broadcast %409 : f32 to vector<16x16xf32>
    %411 = arith.mulf %410, %400 : vector<16x16xf32>
    %412 = arith.addf %368, %411 : vector<16x16xf32>
    %c8_240 = arith.constant 8 : index
    %c8_241 = arith.constant 8 : index
    %413 = memref.load %arg2[%c8_240, %c8_241] : memref<10x25xf32, #tpu.memory_space<smem>>
    %414 = vector.broadcast %413 : f32 to vector<16x16xf32>
    %415 = arith.mulf %414, %400 : vector<16x16xf32>
    %416 = arith.addf %372, %415 : vector<16x16xf32>
    %c9_242 = arith.constant 9 : index
    %c8_243 = arith.constant 8 : index
    %417 = memref.load %arg2[%c9_242, %c8_243] : memref<10x25xf32, #tpu.memory_space<smem>>
    %418 = vector.broadcast %417 : f32 to vector<16x16xf32>
    %419 = arith.mulf %418, %400 : vector<16x16xf32>
    %420 = arith.addf %376, %419 : vector<16x16xf32>
    %c0_244 = arith.constant 0 : index
    %c1_245 = arith.constant 1 : index
    %c4_246 = arith.constant 4 : index
    %421 = vector.load %arg9[%c0_244, %c1_245, %c4_246] : memref<2x20x20xf32, #tpu.memory_space<vmem>>, vector<1x16x16xf32>
    %422 = vector.shape_cast %421 : vector<1x16x16xf32> to vector<16x16xf32>
    %c0_247 = arith.constant 0 : index
    %c9_248 = arith.constant 9 : index
    %423 = memref.load %arg2[%c0_247, %c9_248] : memref<10x25xf32, #tpu.memory_space<smem>>
    %424 = vector.broadcast %423 : f32 to vector<16x16xf32>
    %425 = arith.mulf %424, %422 : vector<16x16xf32>
    %426 = arith.addf %382, %425 : vector<16x16xf32>
    %c1_249 = arith.constant 1 : index
    %c9_250 = arith.constant 9 : index
    %427 = memref.load %arg2[%c1_249, %c9_250] : memref<10x25xf32, #tpu.memory_space<smem>>
    %428 = vector.broadcast %427 : f32 to vector<16x16xf32>
    %429 = arith.mulf %428, %422 : vector<16x16xf32>
    %430 = arith.addf %386, %429 : vector<16x16xf32>
    %c2_251 = arith.constant 2 : index
    %c9_252 = arith.constant 9 : index
    %431 = memref.load %arg2[%c2_251, %c9_252] : memref<10x25xf32, #tpu.memory_space<smem>>
    %432 = vector.broadcast %431 : f32 to vector<16x16xf32>
    %433 = arith.mulf %432, %422 : vector<16x16xf32>
    %434 = arith.addf %390, %433 : vector<16x16xf32>
    %c3_253 = arith.constant 3 : index
    %c9_254 = arith.constant 9 : index
    %435 = memref.load %arg2[%c3_253, %c9_254] : memref<10x25xf32, #tpu.memory_space<smem>>
    %436 = vector.broadcast %435 : f32 to vector<16x16xf32>
    %437 = arith.mulf %436, %422 : vector<16x16xf32>
    %438 = arith.addf %394, %437 : vector<16x16xf32>
    %c4_255 = arith.constant 4 : index
    %c9_256 = arith.constant 9 : index
    %439 = memref.load %arg2[%c4_255, %c9_256] : memref<10x25xf32, #tpu.memory_space<smem>>
    %440 = vector.broadcast %439 : f32 to vector<16x16xf32>
    %441 = arith.mulf %440, %422 : vector<16x16xf32>
    %442 = arith.addf %398, %441 : vector<16x16xf32>
    %c1_257 = arith.constant 1 : index
    %c1_258 = arith.constant 1 : index
    %c4_259 = arith.constant 4 : index
    %443 = vector.load %arg9[%c1_257, %c1_258, %c4_259] : memref<2x20x20xf32, #tpu.memory_space<vmem>>, vector<1x16x16xf32>
    %444 = vector.shape_cast %443 : vector<1x16x16xf32> to vector<16x16xf32>
    %c5_260 = arith.constant 5 : index
    %c9_261 = arith.constant 9 : index
    %445 = memref.load %arg2[%c5_260, %c9_261] : memref<10x25xf32, #tpu.memory_space<smem>>
    %446 = vector.broadcast %445 : f32 to vector<16x16xf32>
    %447 = arith.mulf %446, %444 : vector<16x16xf32>
    %448 = arith.addf %404, %447 : vector<16x16xf32>
    %c6_262 = arith.constant 6 : index
    %c9_263 = arith.constant 9 : index
    %449 = memref.load %arg2[%c6_262, %c9_263] : memref<10x25xf32, #tpu.memory_space<smem>>
    %450 = vector.broadcast %449 : f32 to vector<16x16xf32>
    %451 = arith.mulf %450, %444 : vector<16x16xf32>
    %452 = arith.addf %408, %451 : vector<16x16xf32>
    %c7_264 = arith.constant 7 : index
    %c9_265 = arith.constant 9 : index
    %453 = memref.load %arg2[%c7_264, %c9_265] : memref<10x25xf32, #tpu.memory_space<smem>>
    %454 = vector.broadcast %453 : f32 to vector<16x16xf32>
    %455 = arith.mulf %454, %444 : vector<16x16xf32>
    %456 = arith.addf %412, %455 : vector<16x16xf32>
    %c8_266 = arith.constant 8 : index
    %c9_267 = arith.constant 9 : index
    %457 = memref.load %arg2[%c8_266, %c9_267] : memref<10x25xf32, #tpu.memory_space<smem>>
    %458 = vector.broadcast %457 : f32 to vector<16x16xf32>
    %459 = arith.mulf %458, %444 : vector<16x16xf32>
    %460 = arith.addf %416, %459 : vector<16x16xf32>
    %c9_268 = arith.constant 9 : index
    %c9_269 = arith.constant 9 : index
    %461 = memref.load %arg2[%c9_268, %c9_269] : memref<10x25xf32, #tpu.memory_space<smem>>
    %462 = vector.broadcast %461 : f32 to vector<16x16xf32>
    %463 = arith.mulf %462, %444 : vector<16x16xf32>
    %464 = arith.addf %420, %463 : vector<16x16xf32>
    %c0_270 = arith.constant 0 : index
    %c2_271 = arith.constant 2 : index
    %c0_272 = arith.constant 0 : index
    %465 = vector.load %arg9[%c0_270, %c2_271, %c0_272] : memref<2x20x20xf32, #tpu.memory_space<vmem>>, vector<1x16x16xf32>
    %466 = vector.shape_cast %465 : vector<1x16x16xf32> to vector<16x16xf32>
    %c0_273 = arith.constant 0 : index
    %c10 = arith.constant 10 : index
    %467 = memref.load %arg2[%c0_273, %c10] : memref<10x25xf32, #tpu.memory_space<smem>>
    %468 = vector.broadcast %467 : f32 to vector<16x16xf32>
    %469 = arith.mulf %468, %466 : vector<16x16xf32>
    %470 = arith.addf %426, %469 : vector<16x16xf32>
    %c1_274 = arith.constant 1 : index
    %c10_275 = arith.constant 10 : index
    %471 = memref.load %arg2[%c1_274, %c10_275] : memref<10x25xf32, #tpu.memory_space<smem>>
    %472 = vector.broadcast %471 : f32 to vector<16x16xf32>
    %473 = arith.mulf %472, %466 : vector<16x16xf32>
    %474 = arith.addf %430, %473 : vector<16x16xf32>
    %c2_276 = arith.constant 2 : index
    %c10_277 = arith.constant 10 : index
    %475 = memref.load %arg2[%c2_276, %c10_277] : memref<10x25xf32, #tpu.memory_space<smem>>
    %476 = vector.broadcast %475 : f32 to vector<16x16xf32>
    %477 = arith.mulf %476, %466 : vector<16x16xf32>
    %478 = arith.addf %434, %477 : vector<16x16xf32>
    %c3_278 = arith.constant 3 : index
    %c10_279 = arith.constant 10 : index
    %479 = memref.load %arg2[%c3_278, %c10_279] : memref<10x25xf32, #tpu.memory_space<smem>>
    %480 = vector.broadcast %479 : f32 to vector<16x16xf32>
    %481 = arith.mulf %480, %466 : vector<16x16xf32>
    %482 = arith.addf %438, %481 : vector<16x16xf32>
    %c4_280 = arith.constant 4 : index
    %c10_281 = arith.constant 10 : index
    %483 = memref.load %arg2[%c4_280, %c10_281] : memref<10x25xf32, #tpu.memory_space<smem>>
    %484 = vector.broadcast %483 : f32 to vector<16x16xf32>
    %485 = arith.mulf %484, %466 : vector<16x16xf32>
    %486 = arith.addf %442, %485 : vector<16x16xf32>
    %c1_282 = arith.constant 1 : index
    %c2_283 = arith.constant 2 : index
    %c0_284 = arith.constant 0 : index
    %487 = vector.load %arg9[%c1_282, %c2_283, %c0_284] : memref<2x20x20xf32, #tpu.memory_space<vmem>>, vector<1x16x16xf32>
    %488 = vector.shape_cast %487 : vector<1x16x16xf32> to vector<16x16xf32>
    %c5_285 = arith.constant 5 : index
    %c10_286 = arith.constant 10 : index
    %489 = memref.load %arg2[%c5_285, %c10_286] : memref<10x25xf32, #tpu.memory_space<smem>>
    %490 = vector.broadcast %489 : f32 to vector<16x16xf32>
    %491 = arith.mulf %490, %488 : vector<16x16xf32>
    %492 = arith.addf %448, %491 : vector<16x16xf32>
    %c6_287 = arith.constant 6 : index
    %c10_288 = arith.constant 10 : index
    %493 = memref.load %arg2[%c6_287, %c10_288] : memref<10x25xf32, #tpu.memory_space<smem>>
    %494 = vector.broadcast %493 : f32 to vector<16x16xf32>
    %495 = arith.mulf %494, %488 : vector<16x16xf32>
    %496 = arith.addf %452, %495 : vector<16x16xf32>
    %c7_289 = arith.constant 7 : index
    %c10_290 = arith.constant 10 : index
    %497 = memref.load %arg2[%c7_289, %c10_290] : memref<10x25xf32, #tpu.memory_space<smem>>
    %498 = vector.broadcast %497 : f32 to vector<16x16xf32>
    %499 = arith.mulf %498, %488 : vector<16x16xf32>
    %500 = arith.addf %456, %499 : vector<16x16xf32>
    %c8_291 = arith.constant 8 : index
    %c10_292 = arith.constant 10 : index
    %501 = memref.load %arg2[%c8_291, %c10_292] : memref<10x25xf32, #tpu.memory_space<smem>>
    %502 = vector.broadcast %501 : f32 to vector<16x16xf32>
    %503 = arith.mulf %502, %488 : vector<16x16xf32>
    %504 = arith.addf %460, %503 : vector<16x16xf32>
    %c9_293 = arith.constant 9 : index
    %c10_294 = arith.constant 10 : index
    %505 = memref.load %arg2[%c9_293, %c10_294] : memref<10x25xf32, #tpu.memory_space<smem>>
    %506 = vector.broadcast %505 : f32 to vector<16x16xf32>
    %507 = arith.mulf %506, %488 : vector<16x16xf32>
    %508 = arith.addf %464, %507 : vector<16x16xf32>
    %c0_295 = arith.constant 0 : index
    %c2_296 = arith.constant 2 : index
    %c1_297 = arith.constant 1 : index
    %509 = vector.load %arg9[%c0_295, %c2_296, %c1_297] : memref<2x20x20xf32, #tpu.memory_space<vmem>>, vector<1x16x16xf32>
    %510 = vector.shape_cast %509 : vector<1x16x16xf32> to vector<16x16xf32>
    %c0_298 = arith.constant 0 : index
    %c11 = arith.constant 11 : index
    %511 = memref.load %arg2[%c0_298, %c11] : memref<10x25xf32, #tpu.memory_space<smem>>
    %512 = vector.broadcast %511 : f32 to vector<16x16xf32>
    %513 = arith.mulf %512, %510 : vector<16x16xf32>
    %514 = arith.addf %470, %513 : vector<16x16xf32>
    %c1_299 = arith.constant 1 : index
    %c11_300 = arith.constant 11 : index
    %515 = memref.load %arg2[%c1_299, %c11_300] : memref<10x25xf32, #tpu.memory_space<smem>>
    %516 = vector.broadcast %515 : f32 to vector<16x16xf32>
    %517 = arith.mulf %516, %510 : vector<16x16xf32>
    %518 = arith.addf %474, %517 : vector<16x16xf32>
    %c2_301 = arith.constant 2 : index
    %c11_302 = arith.constant 11 : index
    %519 = memref.load %arg2[%c2_301, %c11_302] : memref<10x25xf32, #tpu.memory_space<smem>>
    %520 = vector.broadcast %519 : f32 to vector<16x16xf32>
    %521 = arith.mulf %520, %510 : vector<16x16xf32>
    %522 = arith.addf %478, %521 : vector<16x16xf32>
    %c3_303 = arith.constant 3 : index
    %c11_304 = arith.constant 11 : index
    %523 = memref.load %arg2[%c3_303, %c11_304] : memref<10x25xf32, #tpu.memory_space<smem>>
    %524 = vector.broadcast %523 : f32 to vector<16x16xf32>
    %525 = arith.mulf %524, %510 : vector<16x16xf32>
    %526 = arith.addf %482, %525 : vector<16x16xf32>
    %c4_305 = arith.constant 4 : index
    %c11_306 = arith.constant 11 : index
    %527 = memref.load %arg2[%c4_305, %c11_306] : memref<10x25xf32, #tpu.memory_space<smem>>
    %528 = vector.broadcast %527 : f32 to vector<16x16xf32>
    %529 = arith.mulf %528, %510 : vector<16x16xf32>
    %530 = arith.addf %486, %529 : vector<16x16xf32>
    %c1_307 = arith.constant 1 : index
    %c2_308 = arith.constant 2 : index
    %c1_309 = arith.constant 1 : index
    %531 = vector.load %arg9[%c1_307, %c2_308, %c1_309] : memref<2x20x20xf32, #tpu.memory_space<vmem>>, vector<1x16x16xf32>
    %532 = vector.shape_cast %531 : vector<1x16x16xf32> to vector<16x16xf32>
    %c5_310 = arith.constant 5 : index
    %c11_311 = arith.constant 11 : index
    %533 = memref.load %arg2[%c5_310, %c11_311] : memref<10x25xf32, #tpu.memory_space<smem>>
    %534 = vector.broadcast %533 : f32 to vector<16x16xf32>
    %535 = arith.mulf %534, %532 : vector<16x16xf32>
    %536 = arith.addf %492, %535 : vector<16x16xf32>
    %c6_312 = arith.constant 6 : index
    %c11_313 = arith.constant 11 : index
    %537 = memref.load %arg2[%c6_312, %c11_313] : memref<10x25xf32, #tpu.memory_space<smem>>
    %538 = vector.broadcast %537 : f32 to vector<16x16xf32>
    %539 = arith.mulf %538, %532 : vector<16x16xf32>
    %540 = arith.addf %496, %539 : vector<16x16xf32>
    %c7_314 = arith.constant 7 : index
    %c11_315 = arith.constant 11 : index
    %541 = memref.load %arg2[%c7_314, %c11_315] : memref<10x25xf32, #tpu.memory_space<smem>>
    %542 = vector.broadcast %541 : f32 to vector<16x16xf32>
    %543 = arith.mulf %542, %532 : vector<16x16xf32>
    %544 = arith.addf %500, %543 : vector<16x16xf32>
    %c8_316 = arith.constant 8 : index
    %c11_317 = arith.constant 11 : index
    %545 = memref.load %arg2[%c8_316, %c11_317] : memref<10x25xf32, #tpu.memory_space<smem>>
    %546 = vector.broadcast %545 : f32 to vector<16x16xf32>
    %547 = arith.mulf %546, %532 : vector<16x16xf32>
    %548 = arith.addf %504, %547 : vector<16x16xf32>
    %c9_318 = arith.constant 9 : index
    %c11_319 = arith.constant 11 : index
    %549 = memref.load %arg2[%c9_318, %c11_319] : memref<10x25xf32, #tpu.memory_space<smem>>
    %550 = vector.broadcast %549 : f32 to vector<16x16xf32>
    %551 = arith.mulf %550, %532 : vector<16x16xf32>
    %552 = arith.addf %508, %551 : vector<16x16xf32>
    %c0_320 = arith.constant 0 : index
    %c2_321 = arith.constant 2 : index
    %c2_322 = arith.constant 2 : index
    %553 = vector.load %arg9[%c0_320, %c2_321, %c2_322] : memref<2x20x20xf32, #tpu.memory_space<vmem>>, vector<1x16x16xf32>
    %554 = vector.shape_cast %553 : vector<1x16x16xf32> to vector<16x16xf32>
    %c0_323 = arith.constant 0 : index
    %c12 = arith.constant 12 : index
    %555 = memref.load %arg2[%c0_323, %c12] : memref<10x25xf32, #tpu.memory_space<smem>>
    %556 = vector.broadcast %555 : f32 to vector<16x16xf32>
    %557 = arith.mulf %556, %554 : vector<16x16xf32>
    %558 = arith.addf %514, %557 : vector<16x16xf32>
    %c1_324 = arith.constant 1 : index
    %c12_325 = arith.constant 12 : index
    %559 = memref.load %arg2[%c1_324, %c12_325] : memref<10x25xf32, #tpu.memory_space<smem>>
    %560 = vector.broadcast %559 : f32 to vector<16x16xf32>
    %561 = arith.mulf %560, %554 : vector<16x16xf32>
    %562 = arith.addf %518, %561 : vector<16x16xf32>
    %c2_326 = arith.constant 2 : index
    %c12_327 = arith.constant 12 : index
    %563 = memref.load %arg2[%c2_326, %c12_327] : memref<10x25xf32, #tpu.memory_space<smem>>
    %564 = vector.broadcast %563 : f32 to vector<16x16xf32>
    %565 = arith.mulf %564, %554 : vector<16x16xf32>
    %566 = arith.addf %522, %565 : vector<16x16xf32>
    %c3_328 = arith.constant 3 : index
    %c12_329 = arith.constant 12 : index
    %567 = memref.load %arg2[%c3_328, %c12_329] : memref<10x25xf32, #tpu.memory_space<smem>>
    %568 = vector.broadcast %567 : f32 to vector<16x16xf32>
    %569 = arith.mulf %568, %554 : vector<16x16xf32>
    %570 = arith.addf %526, %569 : vector<16x16xf32>
    %c4_330 = arith.constant 4 : index
    %c12_331 = arith.constant 12 : index
    %571 = memref.load %arg2[%c4_330, %c12_331] : memref<10x25xf32, #tpu.memory_space<smem>>
    %572 = vector.broadcast %571 : f32 to vector<16x16xf32>
    %573 = arith.mulf %572, %554 : vector<16x16xf32>
    %574 = arith.addf %530, %573 : vector<16x16xf32>
    %c1_332 = arith.constant 1 : index
    %c2_333 = arith.constant 2 : index
    %c2_334 = arith.constant 2 : index
    %575 = vector.load %arg9[%c1_332, %c2_333, %c2_334] : memref<2x20x20xf32, #tpu.memory_space<vmem>>, vector<1x16x16xf32>
    %576 = vector.shape_cast %575 : vector<1x16x16xf32> to vector<16x16xf32>
    %c5_335 = arith.constant 5 : index
    %c12_336 = arith.constant 12 : index
    %577 = memref.load %arg2[%c5_335, %c12_336] : memref<10x25xf32, #tpu.memory_space<smem>>
    %578 = vector.broadcast %577 : f32 to vector<16x16xf32>
    %579 = arith.mulf %578, %576 : vector<16x16xf32>
    %580 = arith.addf %536, %579 : vector<16x16xf32>
    %c6_337 = arith.constant 6 : index
    %c12_338 = arith.constant 12 : index
    %581 = memref.load %arg2[%c6_337, %c12_338] : memref<10x25xf32, #tpu.memory_space<smem>>
    %582 = vector.broadcast %581 : f32 to vector<16x16xf32>
    %583 = arith.mulf %582, %576 : vector<16x16xf32>
    %584 = arith.addf %540, %583 : vector<16x16xf32>
    %c7_339 = arith.constant 7 : index
    %c12_340 = arith.constant 12 : index
    %585 = memref.load %arg2[%c7_339, %c12_340] : memref<10x25xf32, #tpu.memory_space<smem>>
    %586 = vector.broadcast %585 : f32 to vector<16x16xf32>
    %587 = arith.mulf %586, %576 : vector<16x16xf32>
    %588 = arith.addf %544, %587 : vector<16x16xf32>
    %c8_341 = arith.constant 8 : index
    %c12_342 = arith.constant 12 : index
    %589 = memref.load %arg2[%c8_341, %c12_342] : memref<10x25xf32, #tpu.memory_space<smem>>
    %590 = vector.broadcast %589 : f32 to vector<16x16xf32>
    %591 = arith.mulf %590, %576 : vector<16x16xf32>
    %592 = arith.addf %548, %591 : vector<16x16xf32>
    %c9_343 = arith.constant 9 : index
    %c12_344 = arith.constant 12 : index
    %593 = memref.load %arg2[%c9_343, %c12_344] : memref<10x25xf32, #tpu.memory_space<smem>>
    %594 = vector.broadcast %593 : f32 to vector<16x16xf32>
    %595 = arith.mulf %594, %576 : vector<16x16xf32>
    %596 = arith.addf %552, %595 : vector<16x16xf32>
    %c0_345 = arith.constant 0 : index
    %c2_346 = arith.constant 2 : index
    %c3_347 = arith.constant 3 : index
    %597 = vector.load %arg9[%c0_345, %c2_346, %c3_347] : memref<2x20x20xf32, #tpu.memory_space<vmem>>, vector<1x16x16xf32>
    %598 = vector.shape_cast %597 : vector<1x16x16xf32> to vector<16x16xf32>
    %c0_348 = arith.constant 0 : index
    %c13 = arith.constant 13 : index
    %599 = memref.load %arg2[%c0_348, %c13] : memref<10x25xf32, #tpu.memory_space<smem>>
    %600 = vector.broadcast %599 : f32 to vector<16x16xf32>
    %601 = arith.mulf %600, %598 : vector<16x16xf32>
    %602 = arith.addf %558, %601 : vector<16x16xf32>
    %c1_349 = arith.constant 1 : index
    %c13_350 = arith.constant 13 : index
    %603 = memref.load %arg2[%c1_349, %c13_350] : memref<10x25xf32, #tpu.memory_space<smem>>
    %604 = vector.broadcast %603 : f32 to vector<16x16xf32>
    %605 = arith.mulf %604, %598 : vector<16x16xf32>
    %606 = arith.addf %562, %605 : vector<16x16xf32>
    %c2_351 = arith.constant 2 : index
    %c13_352 = arith.constant 13 : index
    %607 = memref.load %arg2[%c2_351, %c13_352] : memref<10x25xf32, #tpu.memory_space<smem>>
    %608 = vector.broadcast %607 : f32 to vector<16x16xf32>
    %609 = arith.mulf %608, %598 : vector<16x16xf32>
    %610 = arith.addf %566, %609 : vector<16x16xf32>
    %c3_353 = arith.constant 3 : index
    %c13_354 = arith.constant 13 : index
    %611 = memref.load %arg2[%c3_353, %c13_354] : memref<10x25xf32, #tpu.memory_space<smem>>
    %612 = vector.broadcast %611 : f32 to vector<16x16xf32>
    %613 = arith.mulf %612, %598 : vector<16x16xf32>
    %614 = arith.addf %570, %613 : vector<16x16xf32>
    %c4_355 = arith.constant 4 : index
    %c13_356 = arith.constant 13 : index
    %615 = memref.load %arg2[%c4_355, %c13_356] : memref<10x25xf32, #tpu.memory_space<smem>>
    %616 = vector.broadcast %615 : f32 to vector<16x16xf32>
    %617 = arith.mulf %616, %598 : vector<16x16xf32>
    %618 = arith.addf %574, %617 : vector<16x16xf32>
    %c1_357 = arith.constant 1 : index
    %c2_358 = arith.constant 2 : index
    %c3_359 = arith.constant 3 : index
    %619 = vector.load %arg9[%c1_357, %c2_358, %c3_359] : memref<2x20x20xf32, #tpu.memory_space<vmem>>, vector<1x16x16xf32>
    %620 = vector.shape_cast %619 : vector<1x16x16xf32> to vector<16x16xf32>
    %c5_360 = arith.constant 5 : index
    %c13_361 = arith.constant 13 : index
    %621 = memref.load %arg2[%c5_360, %c13_361] : memref<10x25xf32, #tpu.memory_space<smem>>
    %622 = vector.broadcast %621 : f32 to vector<16x16xf32>
    %623 = arith.mulf %622, %620 : vector<16x16xf32>
    %624 = arith.addf %580, %623 : vector<16x16xf32>
    %c6_362 = arith.constant 6 : index
    %c13_363 = arith.constant 13 : index
    %625 = memref.load %arg2[%c6_362, %c13_363] : memref<10x25xf32, #tpu.memory_space<smem>>
    %626 = vector.broadcast %625 : f32 to vector<16x16xf32>
    %627 = arith.mulf %626, %620 : vector<16x16xf32>
    %628 = arith.addf %584, %627 : vector<16x16xf32>
    %c7_364 = arith.constant 7 : index
    %c13_365 = arith.constant 13 : index
    %629 = memref.load %arg2[%c7_364, %c13_365] : memref<10x25xf32, #tpu.memory_space<smem>>
    %630 = vector.broadcast %629 : f32 to vector<16x16xf32>
    %631 = arith.mulf %630, %620 : vector<16x16xf32>
    %632 = arith.addf %588, %631 : vector<16x16xf32>
    %c8_366 = arith.constant 8 : index
    %c13_367 = arith.constant 13 : index
    %633 = memref.load %arg2[%c8_366, %c13_367] : memref<10x25xf32, #tpu.memory_space<smem>>
    %634 = vector.broadcast %633 : f32 to vector<16x16xf32>
    %635 = arith.mulf %634, %620 : vector<16x16xf32>
    %636 = arith.addf %592, %635 : vector<16x16xf32>
    %c9_368 = arith.constant 9 : index
    %c13_369 = arith.constant 13 : index
    %637 = memref.load %arg2[%c9_368, %c13_369] : memref<10x25xf32, #tpu.memory_space<smem>>
    %638 = vector.broadcast %637 : f32 to vector<16x16xf32>
    %639 = arith.mulf %638, %620 : vector<16x16xf32>
    %640 = arith.addf %596, %639 : vector<16x16xf32>
    %c0_370 = arith.constant 0 : index
    %c2_371 = arith.constant 2 : index
    %c4_372 = arith.constant 4 : index
    %641 = vector.load %arg9[%c0_370, %c2_371, %c4_372] : memref<2x20x20xf32, #tpu.memory_space<vmem>>, vector<1x16x16xf32>
    %642 = vector.shape_cast %641 : vector<1x16x16xf32> to vector<16x16xf32>
    %c0_373 = arith.constant 0 : index
    %c14 = arith.constant 14 : index
    %643 = memref.load %arg2[%c0_373, %c14] : memref<10x25xf32, #tpu.memory_space<smem>>
    %644 = vector.broadcast %643 : f32 to vector<16x16xf32>
    %645 = arith.mulf %644, %642 : vector<16x16xf32>
    %646 = arith.addf %602, %645 : vector<16x16xf32>
    %c1_374 = arith.constant 1 : index
    %c14_375 = arith.constant 14 : index
    %647 = memref.load %arg2[%c1_374, %c14_375] : memref<10x25xf32, #tpu.memory_space<smem>>
    %648 = vector.broadcast %647 : f32 to vector<16x16xf32>
    %649 = arith.mulf %648, %642 : vector<16x16xf32>
    %650 = arith.addf %606, %649 : vector<16x16xf32>
    %c2_376 = arith.constant 2 : index
    %c14_377 = arith.constant 14 : index
    %651 = memref.load %arg2[%c2_376, %c14_377] : memref<10x25xf32, #tpu.memory_space<smem>>
    %652 = vector.broadcast %651 : f32 to vector<16x16xf32>
    %653 = arith.mulf %652, %642 : vector<16x16xf32>
    %654 = arith.addf %610, %653 : vector<16x16xf32>
    %c3_378 = arith.constant 3 : index
    %c14_379 = arith.constant 14 : index
    %655 = memref.load %arg2[%c3_378, %c14_379] : memref<10x25xf32, #tpu.memory_space<smem>>
    %656 = vector.broadcast %655 : f32 to vector<16x16xf32>
    %657 = arith.mulf %656, %642 : vector<16x16xf32>
    %658 = arith.addf %614, %657 : vector<16x16xf32>
    %c4_380 = arith.constant 4 : index
    %c14_381 = arith.constant 14 : index
    %659 = memref.load %arg2[%c4_380, %c14_381] : memref<10x25xf32, #tpu.memory_space<smem>>
    %660 = vector.broadcast %659 : f32 to vector<16x16xf32>
    %661 = arith.mulf %660, %642 : vector<16x16xf32>
    %662 = arith.addf %618, %661 : vector<16x16xf32>
    %c1_382 = arith.constant 1 : index
    %c2_383 = arith.constant 2 : index
    %c4_384 = arith.constant 4 : index
    %663 = vector.load %arg9[%c1_382, %c2_383, %c4_384] : memref<2x20x20xf32, #tpu.memory_space<vmem>>, vector<1x16x16xf32>
    %664 = vector.shape_cast %663 : vector<1x16x16xf32> to vector<16x16xf32>
    %c5_385 = arith.constant 5 : index
    %c14_386 = arith.constant 14 : index
    %665 = memref.load %arg2[%c5_385, %c14_386] : memref<10x25xf32, #tpu.memory_space<smem>>
    %666 = vector.broadcast %665 : f32 to vector<16x16xf32>
    %667 = arith.mulf %666, %664 : vector<16x16xf32>
    %668 = arith.addf %624, %667 : vector<16x16xf32>
    %c6_387 = arith.constant 6 : index
    %c14_388 = arith.constant 14 : index
    %669 = memref.load %arg2[%c6_387, %c14_388] : memref<10x25xf32, #tpu.memory_space<smem>>
    %670 = vector.broadcast %669 : f32 to vector<16x16xf32>
    %671 = arith.mulf %670, %664 : vector<16x16xf32>
    %672 = arith.addf %628, %671 : vector<16x16xf32>
    %c7_389 = arith.constant 7 : index
    %c14_390 = arith.constant 14 : index
    %673 = memref.load %arg2[%c7_389, %c14_390] : memref<10x25xf32, #tpu.memory_space<smem>>
    %674 = vector.broadcast %673 : f32 to vector<16x16xf32>
    %675 = arith.mulf %674, %664 : vector<16x16xf32>
    %676 = arith.addf %632, %675 : vector<16x16xf32>
    %c8_391 = arith.constant 8 : index
    %c14_392 = arith.constant 14 : index
    %677 = memref.load %arg2[%c8_391, %c14_392] : memref<10x25xf32, #tpu.memory_space<smem>>
    %678 = vector.broadcast %677 : f32 to vector<16x16xf32>
    %679 = arith.mulf %678, %664 : vector<16x16xf32>
    %680 = arith.addf %636, %679 : vector<16x16xf32>
    %c9_393 = arith.constant 9 : index
    %c14_394 = arith.constant 14 : index
    %681 = memref.load %arg2[%c9_393, %c14_394] : memref<10x25xf32, #tpu.memory_space<smem>>
    %682 = vector.broadcast %681 : f32 to vector<16x16xf32>
    %683 = arith.mulf %682, %664 : vector<16x16xf32>
    %684 = arith.addf %640, %683 : vector<16x16xf32>
    %c0_395 = arith.constant 0 : index
    %c3_396 = arith.constant 3 : index
    %c0_397 = arith.constant 0 : index
    %685 = vector.load %arg9[%c0_395, %c3_396, %c0_397] : memref<2x20x20xf32, #tpu.memory_space<vmem>>, vector<1x16x16xf32>
    %686 = vector.shape_cast %685 : vector<1x16x16xf32> to vector<16x16xf32>
    %c0_398 = arith.constant 0 : index
    %c15 = arith.constant 15 : index
    %687 = memref.load %arg2[%c0_398, %c15] : memref<10x25xf32, #tpu.memory_space<smem>>
    %688 = vector.broadcast %687 : f32 to vector<16x16xf32>
    %689 = arith.mulf %688, %686 : vector<16x16xf32>
    %690 = arith.addf %646, %689 : vector<16x16xf32>
    %c1_399 = arith.constant 1 : index
    %c15_400 = arith.constant 15 : index
    %691 = memref.load %arg2[%c1_399, %c15_400] : memref<10x25xf32, #tpu.memory_space<smem>>
    %692 = vector.broadcast %691 : f32 to vector<16x16xf32>
    %693 = arith.mulf %692, %686 : vector<16x16xf32>
    %694 = arith.addf %650, %693 : vector<16x16xf32>
    %c2_401 = arith.constant 2 : index
    %c15_402 = arith.constant 15 : index
    %695 = memref.load %arg2[%c2_401, %c15_402] : memref<10x25xf32, #tpu.memory_space<smem>>
    %696 = vector.broadcast %695 : f32 to vector<16x16xf32>
    %697 = arith.mulf %696, %686 : vector<16x16xf32>
    %698 = arith.addf %654, %697 : vector<16x16xf32>
    %c3_403 = arith.constant 3 : index
    %c15_404 = arith.constant 15 : index
    %699 = memref.load %arg2[%c3_403, %c15_404] : memref<10x25xf32, #tpu.memory_space<smem>>
    %700 = vector.broadcast %699 : f32 to vector<16x16xf32>
    %701 = arith.mulf %700, %686 : vector<16x16xf32>
    %702 = arith.addf %658, %701 : vector<16x16xf32>
    %c4_405 = arith.constant 4 : index
    %c15_406 = arith.constant 15 : index
    %703 = memref.load %arg2[%c4_405, %c15_406] : memref<10x25xf32, #tpu.memory_space<smem>>
    %704 = vector.broadcast %703 : f32 to vector<16x16xf32>
    %705 = arith.mulf %704, %686 : vector<16x16xf32>
    %706 = arith.addf %662, %705 : vector<16x16xf32>
    %c1_407 = arith.constant 1 : index
    %c3_408 = arith.constant 3 : index
    %c0_409 = arith.constant 0 : index
    %707 = vector.load %arg9[%c1_407, %c3_408, %c0_409] : memref<2x20x20xf32, #tpu.memory_space<vmem>>, vector<1x16x16xf32>
    %708 = vector.shape_cast %707 : vector<1x16x16xf32> to vector<16x16xf32>
    %c5_410 = arith.constant 5 : index
    %c15_411 = arith.constant 15 : index
    %709 = memref.load %arg2[%c5_410, %c15_411] : memref<10x25xf32, #tpu.memory_space<smem>>
    %710 = vector.broadcast %709 : f32 to vector<16x16xf32>
    %711 = arith.mulf %710, %708 : vector<16x16xf32>
    %712 = arith.addf %668, %711 : vector<16x16xf32>
    %c6_412 = arith.constant 6 : index
    %c15_413 = arith.constant 15 : index
    %713 = memref.load %arg2[%c6_412, %c15_413] : memref<10x25xf32, #tpu.memory_space<smem>>
    %714 = vector.broadcast %713 : f32 to vector<16x16xf32>
    %715 = arith.mulf %714, %708 : vector<16x16xf32>
    %716 = arith.addf %672, %715 : vector<16x16xf32>
    %c7_414 = arith.constant 7 : index
    %c15_415 = arith.constant 15 : index
    %717 = memref.load %arg2[%c7_414, %c15_415] : memref<10x25xf32, #tpu.memory_space<smem>>
    %718 = vector.broadcast %717 : f32 to vector<16x16xf32>
    %719 = arith.mulf %718, %708 : vector<16x16xf32>
    %720 = arith.addf %676, %719 : vector<16x16xf32>
    %c8_416 = arith.constant 8 : index
    %c15_417 = arith.constant 15 : index
    %721 = memref.load %arg2[%c8_416, %c15_417] : memref<10x25xf32, #tpu.memory_space<smem>>
    %722 = vector.broadcast %721 : f32 to vector<16x16xf32>
    %723 = arith.mulf %722, %708 : vector<16x16xf32>
    %724 = arith.addf %680, %723 : vector<16x16xf32>
    %c9_418 = arith.constant 9 : index
    %c15_419 = arith.constant 15 : index
    %725 = memref.load %arg2[%c9_418, %c15_419] : memref<10x25xf32, #tpu.memory_space<smem>>
    %726 = vector.broadcast %725 : f32 to vector<16x16xf32>
    %727 = arith.mulf %726, %708 : vector<16x16xf32>
    %728 = arith.addf %684, %727 : vector<16x16xf32>
    %c0_420 = arith.constant 0 : index
    %c3_421 = arith.constant 3 : index
    %c1_422 = arith.constant 1 : index
    %729 = vector.load %arg9[%c0_420, %c3_421, %c1_422] : memref<2x20x20xf32, #tpu.memory_space<vmem>>, vector<1x16x16xf32>
    %730 = vector.shape_cast %729 : vector<1x16x16xf32> to vector<16x16xf32>
    %c0_423 = arith.constant 0 : index
    %c16 = arith.constant 16 : index
    %731 = memref.load %arg2[%c0_423, %c16] : memref<10x25xf32, #tpu.memory_space<smem>>
    %732 = vector.broadcast %731 : f32 to vector<16x16xf32>
    %733 = arith.mulf %732, %730 : vector<16x16xf32>
    %734 = arith.addf %690, %733 : vector<16x16xf32>
    %c1_424 = arith.constant 1 : index
    %c16_425 = arith.constant 16 : index
    %735 = memref.load %arg2[%c1_424, %c16_425] : memref<10x25xf32, #tpu.memory_space<smem>>
    %736 = vector.broadcast %735 : f32 to vector<16x16xf32>
    %737 = arith.mulf %736, %730 : vector<16x16xf32>
    %738 = arith.addf %694, %737 : vector<16x16xf32>
    %c2_426 = arith.constant 2 : index
    %c16_427 = arith.constant 16 : index
    %739 = memref.load %arg2[%c2_426, %c16_427] : memref<10x25xf32, #tpu.memory_space<smem>>
    %740 = vector.broadcast %739 : f32 to vector<16x16xf32>
    %741 = arith.mulf %740, %730 : vector<16x16xf32>
    %742 = arith.addf %698, %741 : vector<16x16xf32>
    %c3_428 = arith.constant 3 : index
    %c16_429 = arith.constant 16 : index
    %743 = memref.load %arg2[%c3_428, %c16_429] : memref<10x25xf32, #tpu.memory_space<smem>>
    %744 = vector.broadcast %743 : f32 to vector<16x16xf32>
    %745 = arith.mulf %744, %730 : vector<16x16xf32>
    %746 = arith.addf %702, %745 : vector<16x16xf32>
    %c4_430 = arith.constant 4 : index
    %c16_431 = arith.constant 16 : index
    %747 = memref.load %arg2[%c4_430, %c16_431] : memref<10x25xf32, #tpu.memory_space<smem>>
    %748 = vector.broadcast %747 : f32 to vector<16x16xf32>
    %749 = arith.mulf %748, %730 : vector<16x16xf32>
    %750 = arith.addf %706, %749 : vector<16x16xf32>
    %c1_432 = arith.constant 1 : index
    %c3_433 = arith.constant 3 : index
    %c1_434 = arith.constant 1 : index
    %751 = vector.load %arg9[%c1_432, %c3_433, %c1_434] : memref<2x20x20xf32, #tpu.memory_space<vmem>>, vector<1x16x16xf32>
    %752 = vector.shape_cast %751 : vector<1x16x16xf32> to vector<16x16xf32>
    %c5_435 = arith.constant 5 : index
    %c16_436 = arith.constant 16 : index
    %753 = memref.load %arg2[%c5_435, %c16_436] : memref<10x25xf32, #tpu.memory_space<smem>>
    %754 = vector.broadcast %753 : f32 to vector<16x16xf32>
    %755 = arith.mulf %754, %752 : vector<16x16xf32>
    %756 = arith.addf %712, %755 : vector<16x16xf32>
    %c6_437 = arith.constant 6 : index
    %c16_438 = arith.constant 16 : index
    %757 = memref.load %arg2[%c6_437, %c16_438] : memref<10x25xf32, #tpu.memory_space<smem>>
    %758 = vector.broadcast %757 : f32 to vector<16x16xf32>
    %759 = arith.mulf %758, %752 : vector<16x16xf32>
    %760 = arith.addf %716, %759 : vector<16x16xf32>
    %c7_439 = arith.constant 7 : index
    %c16_440 = arith.constant 16 : index
    %761 = memref.load %arg2[%c7_439, %c16_440] : memref<10x25xf32, #tpu.memory_space<smem>>
    %762 = vector.broadcast %761 : f32 to vector<16x16xf32>
    %763 = arith.mulf %762, %752 : vector<16x16xf32>
    %764 = arith.addf %720, %763 : vector<16x16xf32>
    %c8_441 = arith.constant 8 : index
    %c16_442 = arith.constant 16 : index
    %765 = memref.load %arg2[%c8_441, %c16_442] : memref<10x25xf32, #tpu.memory_space<smem>>
    %766 = vector.broadcast %765 : f32 to vector<16x16xf32>
    %767 = arith.mulf %766, %752 : vector<16x16xf32>
    %768 = arith.addf %724, %767 : vector<16x16xf32>
    %c9_443 = arith.constant 9 : index
    %c16_444 = arith.constant 16 : index
    %769 = memref.load %arg2[%c9_443, %c16_444] : memref<10x25xf32, #tpu.memory_space<smem>>
    %770 = vector.broadcast %769 : f32 to vector<16x16xf32>
    %771 = arith.mulf %770, %752 : vector<16x16xf32>
    %772 = arith.addf %728, %771 : vector<16x16xf32>
    %c0_445 = arith.constant 0 : index
    %c3_446 = arith.constant 3 : index
    %c2_447 = arith.constant 2 : index
    %773 = vector.load %arg9[%c0_445, %c3_446, %c2_447] : memref<2x20x20xf32, #tpu.memory_space<vmem>>, vector<1x16x16xf32>
    %774 = vector.shape_cast %773 : vector<1x16x16xf32> to vector<16x16xf32>
    %c0_448 = arith.constant 0 : index
    %c17 = arith.constant 17 : index
    %775 = memref.load %arg2[%c0_448, %c17] : memref<10x25xf32, #tpu.memory_space<smem>>
    %776 = vector.broadcast %775 : f32 to vector<16x16xf32>
    %777 = arith.mulf %776, %774 : vector<16x16xf32>
    %778 = arith.addf %734, %777 : vector<16x16xf32>
    %c1_449 = arith.constant 1 : index
    %c17_450 = arith.constant 17 : index
    %779 = memref.load %arg2[%c1_449, %c17_450] : memref<10x25xf32, #tpu.memory_space<smem>>
    %780 = vector.broadcast %779 : f32 to vector<16x16xf32>
    %781 = arith.mulf %780, %774 : vector<16x16xf32>
    %782 = arith.addf %738, %781 : vector<16x16xf32>
    %c2_451 = arith.constant 2 : index
    %c17_452 = arith.constant 17 : index
    %783 = memref.load %arg2[%c2_451, %c17_452] : memref<10x25xf32, #tpu.memory_space<smem>>
    %784 = vector.broadcast %783 : f32 to vector<16x16xf32>
    %785 = arith.mulf %784, %774 : vector<16x16xf32>
    %786 = arith.addf %742, %785 : vector<16x16xf32>
    %c3_453 = arith.constant 3 : index
    %c17_454 = arith.constant 17 : index
    %787 = memref.load %arg2[%c3_453, %c17_454] : memref<10x25xf32, #tpu.memory_space<smem>>
    %788 = vector.broadcast %787 : f32 to vector<16x16xf32>
    %789 = arith.mulf %788, %774 : vector<16x16xf32>
    %790 = arith.addf %746, %789 : vector<16x16xf32>
    %c4_455 = arith.constant 4 : index
    %c17_456 = arith.constant 17 : index
    %791 = memref.load %arg2[%c4_455, %c17_456] : memref<10x25xf32, #tpu.memory_space<smem>>
    %792 = vector.broadcast %791 : f32 to vector<16x16xf32>
    %793 = arith.mulf %792, %774 : vector<16x16xf32>
    %794 = arith.addf %750, %793 : vector<16x16xf32>
    %c1_457 = arith.constant 1 : index
    %c3_458 = arith.constant 3 : index
    %c2_459 = arith.constant 2 : index
    %795 = vector.load %arg9[%c1_457, %c3_458, %c2_459] : memref<2x20x20xf32, #tpu.memory_space<vmem>>, vector<1x16x16xf32>
    %796 = vector.shape_cast %795 : vector<1x16x16xf32> to vector<16x16xf32>
    %c5_460 = arith.constant 5 : index
    %c17_461 = arith.constant 17 : index
    %797 = memref.load %arg2[%c5_460, %c17_461] : memref<10x25xf32, #tpu.memory_space<smem>>
    %798 = vector.broadcast %797 : f32 to vector<16x16xf32>
    %799 = arith.mulf %798, %796 : vector<16x16xf32>
    %800 = arith.addf %756, %799 : vector<16x16xf32>
    %c6_462 = arith.constant 6 : index
    %c17_463 = arith.constant 17 : index
    %801 = memref.load %arg2[%c6_462, %c17_463] : memref<10x25xf32, #tpu.memory_space<smem>>
    %802 = vector.broadcast %801 : f32 to vector<16x16xf32>
    %803 = arith.mulf %802, %796 : vector<16x16xf32>
    %804 = arith.addf %760, %803 : vector<16x16xf32>
    %c7_464 = arith.constant 7 : index
    %c17_465 = arith.constant 17 : index
    %805 = memref.load %arg2[%c7_464, %c17_465] : memref<10x25xf32, #tpu.memory_space<smem>>
    %806 = vector.broadcast %805 : f32 to vector<16x16xf32>
    %807 = arith.mulf %806, %796 : vector<16x16xf32>
    %808 = arith.addf %764, %807 : vector<16x16xf32>
    %c8_466 = arith.constant 8 : index
    %c17_467 = arith.constant 17 : index
    %809 = memref.load %arg2[%c8_466, %c17_467] : memref<10x25xf32, #tpu.memory_space<smem>>
    %810 = vector.broadcast %809 : f32 to vector<16x16xf32>
    %811 = arith.mulf %810, %796 : vector<16x16xf32>
    %812 = arith.addf %768, %811 : vector<16x16xf32>
    %c9_468 = arith.constant 9 : index
    %c17_469 = arith.constant 17 : index
    %813 = memref.load %arg2[%c9_468, %c17_469] : memref<10x25xf32, #tpu.memory_space<smem>>
    %814 = vector.broadcast %813 : f32 to vector<16x16xf32>
    %815 = arith.mulf %814, %796 : vector<16x16xf32>
    %816 = arith.addf %772, %815 : vector<16x16xf32>
    %c0_470 = arith.constant 0 : index
    %c3_471 = arith.constant 3 : index
    %c3_472 = arith.constant 3 : index
    %817 = vector.load %arg9[%c0_470, %c3_471, %c3_472] : memref<2x20x20xf32, #tpu.memory_space<vmem>>, vector<1x16x16xf32>
    %818 = vector.shape_cast %817 : vector<1x16x16xf32> to vector<16x16xf32>
    %c0_473 = arith.constant 0 : index
    %c18 = arith.constant 18 : index
    %819 = memref.load %arg2[%c0_473, %c18] : memref<10x25xf32, #tpu.memory_space<smem>>
    %820 = vector.broadcast %819 : f32 to vector<16x16xf32>
    %821 = arith.mulf %820, %818 : vector<16x16xf32>
    %822 = arith.addf %778, %821 : vector<16x16xf32>
    %c1_474 = arith.constant 1 : index
    %c18_475 = arith.constant 18 : index
    %823 = memref.load %arg2[%c1_474, %c18_475] : memref<10x25xf32, #tpu.memory_space<smem>>
    %824 = vector.broadcast %823 : f32 to vector<16x16xf32>
    %825 = arith.mulf %824, %818 : vector<16x16xf32>
    %826 = arith.addf %782, %825 : vector<16x16xf32>
    %c2_476 = arith.constant 2 : index
    %c18_477 = arith.constant 18 : index
    %827 = memref.load %arg2[%c2_476, %c18_477] : memref<10x25xf32, #tpu.memory_space<smem>>
    %828 = vector.broadcast %827 : f32 to vector<16x16xf32>
    %829 = arith.mulf %828, %818 : vector<16x16xf32>
    %830 = arith.addf %786, %829 : vector<16x16xf32>
    %c3_478 = arith.constant 3 : index
    %c18_479 = arith.constant 18 : index
    %831 = memref.load %arg2[%c3_478, %c18_479] : memref<10x25xf32, #tpu.memory_space<smem>>
    %832 = vector.broadcast %831 : f32 to vector<16x16xf32>
    %833 = arith.mulf %832, %818 : vector<16x16xf32>
    %834 = arith.addf %790, %833 : vector<16x16xf32>
    %c4_480 = arith.constant 4 : index
    %c18_481 = arith.constant 18 : index
    %835 = memref.load %arg2[%c4_480, %c18_481] : memref<10x25xf32, #tpu.memory_space<smem>>
    %836 = vector.broadcast %835 : f32 to vector<16x16xf32>
    %837 = arith.mulf %836, %818 : vector<16x16xf32>
    %838 = arith.addf %794, %837 : vector<16x16xf32>
    %c1_482 = arith.constant 1 : index
    %c3_483 = arith.constant 3 : index
    %c3_484 = arith.constant 3 : index
    %839 = vector.load %arg9[%c1_482, %c3_483, %c3_484] : memref<2x20x20xf32, #tpu.memory_space<vmem>>, vector<1x16x16xf32>
    %840 = vector.shape_cast %839 : vector<1x16x16xf32> to vector<16x16xf32>
    %c5_485 = arith.constant 5 : index
    %c18_486 = arith.constant 18 : index
    %841 = memref.load %arg2[%c5_485, %c18_486] : memref<10x25xf32, #tpu.memory_space<smem>>
    %842 = vector.broadcast %841 : f32 to vector<16x16xf32>
    %843 = arith.mulf %842, %840 : vector<16x16xf32>
    %844 = arith.addf %800, %843 : vector<16x16xf32>
    %c6_487 = arith.constant 6 : index
    %c18_488 = arith.constant 18 : index
    %845 = memref.load %arg2[%c6_487, %c18_488] : memref<10x25xf32, #tpu.memory_space<smem>>
    %846 = vector.broadcast %845 : f32 to vector<16x16xf32>
    %847 = arith.mulf %846, %840 : vector<16x16xf32>
    %848 = arith.addf %804, %847 : vector<16x16xf32>
    %c7_489 = arith.constant 7 : index
    %c18_490 = arith.constant 18 : index
    %849 = memref.load %arg2[%c7_489, %c18_490] : memref<10x25xf32, #tpu.memory_space<smem>>
    %850 = vector.broadcast %849 : f32 to vector<16x16xf32>
    %851 = arith.mulf %850, %840 : vector<16x16xf32>
    %852 = arith.addf %808, %851 : vector<16x16xf32>
    %c8_491 = arith.constant 8 : index
    %c18_492 = arith.constant 18 : index
    %853 = memref.load %arg2[%c8_491, %c18_492] : memref<10x25xf32, #tpu.memory_space<smem>>
    %854 = vector.broadcast %853 : f32 to vector<16x16xf32>
    %855 = arith.mulf %854, %840 : vector<16x16xf32>
    %856 = arith.addf %812, %855 : vector<16x16xf32>
    %c9_493 = arith.constant 9 : index
    %c18_494 = arith.constant 18 : index
    %857 = memref.load %arg2[%c9_493, %c18_494] : memref<10x25xf32, #tpu.memory_space<smem>>
    %858 = vector.broadcast %857 : f32 to vector<16x16xf32>
    %859 = arith.mulf %858, %840 : vector<16x16xf32>
    %860 = arith.addf %816, %859 : vector<16x16xf32>
    %c0_495 = arith.constant 0 : index
    %c3_496 = arith.constant 3 : index
    %c4_497 = arith.constant 4 : index
    %861 = vector.load %arg9[%c0_495, %c3_496, %c4_497] : memref<2x20x20xf32, #tpu.memory_space<vmem>>, vector<1x16x16xf32>
    %862 = vector.shape_cast %861 : vector<1x16x16xf32> to vector<16x16xf32>
    %c0_498 = arith.constant 0 : index
    %c19 = arith.constant 19 : index
    %863 = memref.load %arg2[%c0_498, %c19] : memref<10x25xf32, #tpu.memory_space<smem>>
    %864 = vector.broadcast %863 : f32 to vector<16x16xf32>
    %865 = arith.mulf %864, %862 : vector<16x16xf32>
    %866 = arith.addf %822, %865 : vector<16x16xf32>
    %c1_499 = arith.constant 1 : index
    %c19_500 = arith.constant 19 : index
    %867 = memref.load %arg2[%c1_499, %c19_500] : memref<10x25xf32, #tpu.memory_space<smem>>
    %868 = vector.broadcast %867 : f32 to vector<16x16xf32>
    %869 = arith.mulf %868, %862 : vector<16x16xf32>
    %870 = arith.addf %826, %869 : vector<16x16xf32>
    %c2_501 = arith.constant 2 : index
    %c19_502 = arith.constant 19 : index
    %871 = memref.load %arg2[%c2_501, %c19_502] : memref<10x25xf32, #tpu.memory_space<smem>>
    %872 = vector.broadcast %871 : f32 to vector<16x16xf32>
    %873 = arith.mulf %872, %862 : vector<16x16xf32>
    %874 = arith.addf %830, %873 : vector<16x16xf32>
    %c3_503 = arith.constant 3 : index
    %c19_504 = arith.constant 19 : index
    %875 = memref.load %arg2[%c3_503, %c19_504] : memref<10x25xf32, #tpu.memory_space<smem>>
    %876 = vector.broadcast %875 : f32 to vector<16x16xf32>
    %877 = arith.mulf %876, %862 : vector<16x16xf32>
    %878 = arith.addf %834, %877 : vector<16x16xf32>
    %c4_505 = arith.constant 4 : index
    %c19_506 = arith.constant 19 : index
    %879 = memref.load %arg2[%c4_505, %c19_506] : memref<10x25xf32, #tpu.memory_space<smem>>
    %880 = vector.broadcast %879 : f32 to vector<16x16xf32>
    %881 = arith.mulf %880, %862 : vector<16x16xf32>
    %882 = arith.addf %838, %881 : vector<16x16xf32>
    %c1_507 = arith.constant 1 : index
    %c3_508 = arith.constant 3 : index
    %c4_509 = arith.constant 4 : index
    %883 = vector.load %arg9[%c1_507, %c3_508, %c4_509] : memref<2x20x20xf32, #tpu.memory_space<vmem>>, vector<1x16x16xf32>
    %884 = vector.shape_cast %883 : vector<1x16x16xf32> to vector<16x16xf32>
    %c5_510 = arith.constant 5 : index
    %c19_511 = arith.constant 19 : index
    %885 = memref.load %arg2[%c5_510, %c19_511] : memref<10x25xf32, #tpu.memory_space<smem>>
    %886 = vector.broadcast %885 : f32 to vector<16x16xf32>
    %887 = arith.mulf %886, %884 : vector<16x16xf32>
    %888 = arith.addf %844, %887 : vector<16x16xf32>
    %c6_512 = arith.constant 6 : index
    %c19_513 = arith.constant 19 : index
    %889 = memref.load %arg2[%c6_512, %c19_513] : memref<10x25xf32, #tpu.memory_space<smem>>
    %890 = vector.broadcast %889 : f32 to vector<16x16xf32>
    %891 = arith.mulf %890, %884 : vector<16x16xf32>
    %892 = arith.addf %848, %891 : vector<16x16xf32>
    %c7_514 = arith.constant 7 : index
    %c19_515 = arith.constant 19 : index
    %893 = memref.load %arg2[%c7_514, %c19_515] : memref<10x25xf32, #tpu.memory_space<smem>>
    %894 = vector.broadcast %893 : f32 to vector<16x16xf32>
    %895 = arith.mulf %894, %884 : vector<16x16xf32>
    %896 = arith.addf %852, %895 : vector<16x16xf32>
    %c8_516 = arith.constant 8 : index
    %c19_517 = arith.constant 19 : index
    %897 = memref.load %arg2[%c8_516, %c19_517] : memref<10x25xf32, #tpu.memory_space<smem>>
    %898 = vector.broadcast %897 : f32 to vector<16x16xf32>
    %899 = arith.mulf %898, %884 : vector<16x16xf32>
    %900 = arith.addf %856, %899 : vector<16x16xf32>
    %c9_518 = arith.constant 9 : index
    %c19_519 = arith.constant 19 : index
    %901 = memref.load %arg2[%c9_518, %c19_519] : memref<10x25xf32, #tpu.memory_space<smem>>
    %902 = vector.broadcast %901 : f32 to vector<16x16xf32>
    %903 = arith.mulf %902, %884 : vector<16x16xf32>
    %904 = arith.addf %860, %903 : vector<16x16xf32>
    %c0_520 = arith.constant 0 : index
    %c4_521 = arith.constant 4 : index
    %c0_522 = arith.constant 0 : index
    %905 = vector.load %arg9[%c0_520, %c4_521, %c0_522] : memref<2x20x20xf32, #tpu.memory_space<vmem>>, vector<1x16x16xf32>
    %906 = vector.shape_cast %905 : vector<1x16x16xf32> to vector<16x16xf32>
    %c0_523 = arith.constant 0 : index
    %c20 = arith.constant 20 : index
    %907 = memref.load %arg2[%c0_523, %c20] : memref<10x25xf32, #tpu.memory_space<smem>>
    %908 = vector.broadcast %907 : f32 to vector<16x16xf32>
    %909 = arith.mulf %908, %906 : vector<16x16xf32>
    %910 = arith.addf %866, %909 : vector<16x16xf32>
    %c1_524 = arith.constant 1 : index
    %c20_525 = arith.constant 20 : index
    %911 = memref.load %arg2[%c1_524, %c20_525] : memref<10x25xf32, #tpu.memory_space<smem>>
    %912 = vector.broadcast %911 : f32 to vector<16x16xf32>
    %913 = arith.mulf %912, %906 : vector<16x16xf32>
    %914 = arith.addf %870, %913 : vector<16x16xf32>
    %c2_526 = arith.constant 2 : index
    %c20_527 = arith.constant 20 : index
    %915 = memref.load %arg2[%c2_526, %c20_527] : memref<10x25xf32, #tpu.memory_space<smem>>
    %916 = vector.broadcast %915 : f32 to vector<16x16xf32>
    %917 = arith.mulf %916, %906 : vector<16x16xf32>
    %918 = arith.addf %874, %917 : vector<16x16xf32>
    %c3_528 = arith.constant 3 : index
    %c20_529 = arith.constant 20 : index
    %919 = memref.load %arg2[%c3_528, %c20_529] : memref<10x25xf32, #tpu.memory_space<smem>>
    %920 = vector.broadcast %919 : f32 to vector<16x16xf32>
    %921 = arith.mulf %920, %906 : vector<16x16xf32>
    %922 = arith.addf %878, %921 : vector<16x16xf32>
    %c4_530 = arith.constant 4 : index
    %c20_531 = arith.constant 20 : index
    %923 = memref.load %arg2[%c4_530, %c20_531] : memref<10x25xf32, #tpu.memory_space<smem>>
    %924 = vector.broadcast %923 : f32 to vector<16x16xf32>
    %925 = arith.mulf %924, %906 : vector<16x16xf32>
    %926 = arith.addf %882, %925 : vector<16x16xf32>
    %c1_532 = arith.constant 1 : index
    %c4_533 = arith.constant 4 : index
    %c0_534 = arith.constant 0 : index
    %927 = vector.load %arg9[%c1_532, %c4_533, %c0_534] : memref<2x20x20xf32, #tpu.memory_space<vmem>>, vector<1x16x16xf32>
    %928 = vector.shape_cast %927 : vector<1x16x16xf32> to vector<16x16xf32>
    %c5_535 = arith.constant 5 : index
    %c20_536 = arith.constant 20 : index
    %929 = memref.load %arg2[%c5_535, %c20_536] : memref<10x25xf32, #tpu.memory_space<smem>>
    %930 = vector.broadcast %929 : f32 to vector<16x16xf32>
    %931 = arith.mulf %930, %928 : vector<16x16xf32>
    %932 = arith.addf %888, %931 : vector<16x16xf32>
    %c6_537 = arith.constant 6 : index
    %c20_538 = arith.constant 20 : index
    %933 = memref.load %arg2[%c6_537, %c20_538] : memref<10x25xf32, #tpu.memory_space<smem>>
    %934 = vector.broadcast %933 : f32 to vector<16x16xf32>
    %935 = arith.mulf %934, %928 : vector<16x16xf32>
    %936 = arith.addf %892, %935 : vector<16x16xf32>
    %c7_539 = arith.constant 7 : index
    %c20_540 = arith.constant 20 : index
    %937 = memref.load %arg2[%c7_539, %c20_540] : memref<10x25xf32, #tpu.memory_space<smem>>
    %938 = vector.broadcast %937 : f32 to vector<16x16xf32>
    %939 = arith.mulf %938, %928 : vector<16x16xf32>
    %940 = arith.addf %896, %939 : vector<16x16xf32>
    %c8_541 = arith.constant 8 : index
    %c20_542 = arith.constant 20 : index
    %941 = memref.load %arg2[%c8_541, %c20_542] : memref<10x25xf32, #tpu.memory_space<smem>>
    %942 = vector.broadcast %941 : f32 to vector<16x16xf32>
    %943 = arith.mulf %942, %928 : vector<16x16xf32>
    %944 = arith.addf %900, %943 : vector<16x16xf32>
    %c9_543 = arith.constant 9 : index
    %c20_544 = arith.constant 20 : index
    %945 = memref.load %arg2[%c9_543, %c20_544] : memref<10x25xf32, #tpu.memory_space<smem>>
    %946 = vector.broadcast %945 : f32 to vector<16x16xf32>
    %947 = arith.mulf %946, %928 : vector<16x16xf32>
    %948 = arith.addf %904, %947 : vector<16x16xf32>
    %c0_545 = arith.constant 0 : index
    %c4_546 = arith.constant 4 : index
    %c1_547 = arith.constant 1 : index
    %949 = vector.load %arg9[%c0_545, %c4_546, %c1_547] : memref<2x20x20xf32, #tpu.memory_space<vmem>>, vector<1x16x16xf32>
    %950 = vector.shape_cast %949 : vector<1x16x16xf32> to vector<16x16xf32>
    %c0_548 = arith.constant 0 : index
    %c21 = arith.constant 21 : index
    %951 = memref.load %arg2[%c0_548, %c21] : memref<10x25xf32, #tpu.memory_space<smem>>
    %952 = vector.broadcast %951 : f32 to vector<16x16xf32>
    %953 = arith.mulf %952, %950 : vector<16x16xf32>
    %954 = arith.addf %910, %953 : vector<16x16xf32>
    %c1_549 = arith.constant 1 : index
    %c21_550 = arith.constant 21 : index
    %955 = memref.load %arg2[%c1_549, %c21_550] : memref<10x25xf32, #tpu.memory_space<smem>>
    %956 = vector.broadcast %955 : f32 to vector<16x16xf32>
    %957 = arith.mulf %956, %950 : vector<16x16xf32>
    %958 = arith.addf %914, %957 : vector<16x16xf32>
    %c2_551 = arith.constant 2 : index
    %c21_552 = arith.constant 21 : index
    %959 = memref.load %arg2[%c2_551, %c21_552] : memref<10x25xf32, #tpu.memory_space<smem>>
    %960 = vector.broadcast %959 : f32 to vector<16x16xf32>
    %961 = arith.mulf %960, %950 : vector<16x16xf32>
    %962 = arith.addf %918, %961 : vector<16x16xf32>
    %c3_553 = arith.constant 3 : index
    %c21_554 = arith.constant 21 : index
    %963 = memref.load %arg2[%c3_553, %c21_554] : memref<10x25xf32, #tpu.memory_space<smem>>
    %964 = vector.broadcast %963 : f32 to vector<16x16xf32>
    %965 = arith.mulf %964, %950 : vector<16x16xf32>
    %966 = arith.addf %922, %965 : vector<16x16xf32>
    %c4_555 = arith.constant 4 : index
    %c21_556 = arith.constant 21 : index
    %967 = memref.load %arg2[%c4_555, %c21_556] : memref<10x25xf32, #tpu.memory_space<smem>>
    %968 = vector.broadcast %967 : f32 to vector<16x16xf32>
    %969 = arith.mulf %968, %950 : vector<16x16xf32>
    %970 = arith.addf %926, %969 : vector<16x16xf32>
    %c1_557 = arith.constant 1 : index
    %c4_558 = arith.constant 4 : index
    %c1_559 = arith.constant 1 : index
    %971 = vector.load %arg9[%c1_557, %c4_558, %c1_559] : memref<2x20x20xf32, #tpu.memory_space<vmem>>, vector<1x16x16xf32>
    %972 = vector.shape_cast %971 : vector<1x16x16xf32> to vector<16x16xf32>
    %c5_560 = arith.constant 5 : index
    %c21_561 = arith.constant 21 : index
    %973 = memref.load %arg2[%c5_560, %c21_561] : memref<10x25xf32, #tpu.memory_space<smem>>
    %974 = vector.broadcast %973 : f32 to vector<16x16xf32>
    %975 = arith.mulf %974, %972 : vector<16x16xf32>
    %976 = arith.addf %932, %975 : vector<16x16xf32>
    %c6_562 = arith.constant 6 : index
    %c21_563 = arith.constant 21 : index
    %977 = memref.load %arg2[%c6_562, %c21_563] : memref<10x25xf32, #tpu.memory_space<smem>>
    %978 = vector.broadcast %977 : f32 to vector<16x16xf32>
    %979 = arith.mulf %978, %972 : vector<16x16xf32>
    %980 = arith.addf %936, %979 : vector<16x16xf32>
    %c7_564 = arith.constant 7 : index
    %c21_565 = arith.constant 21 : index
    %981 = memref.load %arg2[%c7_564, %c21_565] : memref<10x25xf32, #tpu.memory_space<smem>>
    %982 = vector.broadcast %981 : f32 to vector<16x16xf32>
    %983 = arith.mulf %982, %972 : vector<16x16xf32>
    %984 = arith.addf %940, %983 : vector<16x16xf32>
    %c8_566 = arith.constant 8 : index
    %c21_567 = arith.constant 21 : index
    %985 = memref.load %arg2[%c8_566, %c21_567] : memref<10x25xf32, #tpu.memory_space<smem>>
    %986 = vector.broadcast %985 : f32 to vector<16x16xf32>
    %987 = arith.mulf %986, %972 : vector<16x16xf32>
    %988 = arith.addf %944, %987 : vector<16x16xf32>
    %c9_568 = arith.constant 9 : index
    %c21_569 = arith.constant 21 : index
    %989 = memref.load %arg2[%c9_568, %c21_569] : memref<10x25xf32, #tpu.memory_space<smem>>
    %990 = vector.broadcast %989 : f32 to vector<16x16xf32>
    %991 = arith.mulf %990, %972 : vector<16x16xf32>
    %992 = arith.addf %948, %991 : vector<16x16xf32>
    %c0_570 = arith.constant 0 : index
    %c4_571 = arith.constant 4 : index
    %c2_572 = arith.constant 2 : index
    %993 = vector.load %arg9[%c0_570, %c4_571, %c2_572] : memref<2x20x20xf32, #tpu.memory_space<vmem>>, vector<1x16x16xf32>
    %994 = vector.shape_cast %993 : vector<1x16x16xf32> to vector<16x16xf32>
    %c0_573 = arith.constant 0 : index
    %c22 = arith.constant 22 : index
    %995 = memref.load %arg2[%c0_573, %c22] : memref<10x25xf32, #tpu.memory_space<smem>>
    %996 = vector.broadcast %995 : f32 to vector<16x16xf32>
    %997 = arith.mulf %996, %994 : vector<16x16xf32>
    %998 = arith.addf %954, %997 : vector<16x16xf32>
    %c1_574 = arith.constant 1 : index
    %c22_575 = arith.constant 22 : index
    %999 = memref.load %arg2[%c1_574, %c22_575] : memref<10x25xf32, #tpu.memory_space<smem>>
    %1000 = vector.broadcast %999 : f32 to vector<16x16xf32>
    %1001 = arith.mulf %1000, %994 : vector<16x16xf32>
    %1002 = arith.addf %958, %1001 : vector<16x16xf32>
    %c2_576 = arith.constant 2 : index
    %c22_577 = arith.constant 22 : index
    %1003 = memref.load %arg2[%c2_576, %c22_577] : memref<10x25xf32, #tpu.memory_space<smem>>
    %1004 = vector.broadcast %1003 : f32 to vector<16x16xf32>
    %1005 = arith.mulf %1004, %994 : vector<16x16xf32>
    %1006 = arith.addf %962, %1005 : vector<16x16xf32>
    %c3_578 = arith.constant 3 : index
    %c22_579 = arith.constant 22 : index
    %1007 = memref.load %arg2[%c3_578, %c22_579] : memref<10x25xf32, #tpu.memory_space<smem>>
    %1008 = vector.broadcast %1007 : f32 to vector<16x16xf32>
    %1009 = arith.mulf %1008, %994 : vector<16x16xf32>
    %1010 = arith.addf %966, %1009 : vector<16x16xf32>
    %c4_580 = arith.constant 4 : index
    %c22_581 = arith.constant 22 : index
    %1011 = memref.load %arg2[%c4_580, %c22_581] : memref<10x25xf32, #tpu.memory_space<smem>>
    %1012 = vector.broadcast %1011 : f32 to vector<16x16xf32>
    %1013 = arith.mulf %1012, %994 : vector<16x16xf32>
    %1014 = arith.addf %970, %1013 : vector<16x16xf32>
    %c1_582 = arith.constant 1 : index
    %c4_583 = arith.constant 4 : index
    %c2_584 = arith.constant 2 : index
    %1015 = vector.load %arg9[%c1_582, %c4_583, %c2_584] : memref<2x20x20xf32, #tpu.memory_space<vmem>>, vector<1x16x16xf32>
    %1016 = vector.shape_cast %1015 : vector<1x16x16xf32> to vector<16x16xf32>
    %c5_585 = arith.constant 5 : index
    %c22_586 = arith.constant 22 : index
    %1017 = memref.load %arg2[%c5_585, %c22_586] : memref<10x25xf32, #tpu.memory_space<smem>>
    %1018 = vector.broadcast %1017 : f32 to vector<16x16xf32>
    %1019 = arith.mulf %1018, %1016 : vector<16x16xf32>
    %1020 = arith.addf %976, %1019 : vector<16x16xf32>
    %c6_587 = arith.constant 6 : index
    %c22_588 = arith.constant 22 : index
    %1021 = memref.load %arg2[%c6_587, %c22_588] : memref<10x25xf32, #tpu.memory_space<smem>>
    %1022 = vector.broadcast %1021 : f32 to vector<16x16xf32>
    %1023 = arith.mulf %1022, %1016 : vector<16x16xf32>
    %1024 = arith.addf %980, %1023 : vector<16x16xf32>
    %c7_589 = arith.constant 7 : index
    %c22_590 = arith.constant 22 : index
    %1025 = memref.load %arg2[%c7_589, %c22_590] : memref<10x25xf32, #tpu.memory_space<smem>>
    %1026 = vector.broadcast %1025 : f32 to vector<16x16xf32>
    %1027 = arith.mulf %1026, %1016 : vector<16x16xf32>
    %1028 = arith.addf %984, %1027 : vector<16x16xf32>
    %c8_591 = arith.constant 8 : index
    %c22_592 = arith.constant 22 : index
    %1029 = memref.load %arg2[%c8_591, %c22_592] : memref<10x25xf32, #tpu.memory_space<smem>>
    %1030 = vector.broadcast %1029 : f32 to vector<16x16xf32>
    %1031 = arith.mulf %1030, %1016 : vector<16x16xf32>
    %1032 = arith.addf %988, %1031 : vector<16x16xf32>
    %c9_593 = arith.constant 9 : index
    %c22_594 = arith.constant 22 : index
    %1033 = memref.load %arg2[%c9_593, %c22_594] : memref<10x25xf32, #tpu.memory_space<smem>>
    %1034 = vector.broadcast %1033 : f32 to vector<16x16xf32>
    %1035 = arith.mulf %1034, %1016 : vector<16x16xf32>
    %1036 = arith.addf %992, %1035 : vector<16x16xf32>
    %c0_595 = arith.constant 0 : index
    %c4_596 = arith.constant 4 : index
    %c3_597 = arith.constant 3 : index
    %1037 = vector.load %arg9[%c0_595, %c4_596, %c3_597] : memref<2x20x20xf32, #tpu.memory_space<vmem>>, vector<1x16x16xf32>
    %1038 = vector.shape_cast %1037 : vector<1x16x16xf32> to vector<16x16xf32>
    %c0_598 = arith.constant 0 : index
    %c23 = arith.constant 23 : index
    %1039 = memref.load %arg2[%c0_598, %c23] : memref<10x25xf32, #tpu.memory_space<smem>>
    %1040 = vector.broadcast %1039 : f32 to vector<16x16xf32>
    %1041 = arith.mulf %1040, %1038 : vector<16x16xf32>
    %1042 = arith.addf %998, %1041 : vector<16x16xf32>
    %c1_599 = arith.constant 1 : index
    %c23_600 = arith.constant 23 : index
    %1043 = memref.load %arg2[%c1_599, %c23_600] : memref<10x25xf32, #tpu.memory_space<smem>>
    %1044 = vector.broadcast %1043 : f32 to vector<16x16xf32>
    %1045 = arith.mulf %1044, %1038 : vector<16x16xf32>
    %1046 = arith.addf %1002, %1045 : vector<16x16xf32>
    %c2_601 = arith.constant 2 : index
    %c23_602 = arith.constant 23 : index
    %1047 = memref.load %arg2[%c2_601, %c23_602] : memref<10x25xf32, #tpu.memory_space<smem>>
    %1048 = vector.broadcast %1047 : f32 to vector<16x16xf32>
    %1049 = arith.mulf %1048, %1038 : vector<16x16xf32>
    %1050 = arith.addf %1006, %1049 : vector<16x16xf32>
    %c3_603 = arith.constant 3 : index
    %c23_604 = arith.constant 23 : index
    %1051 = memref.load %arg2[%c3_603, %c23_604] : memref<10x25xf32, #tpu.memory_space<smem>>
    %1052 = vector.broadcast %1051 : f32 to vector<16x16xf32>
    %1053 = arith.mulf %1052, %1038 : vector<16x16xf32>
    %1054 = arith.addf %1010, %1053 : vector<16x16xf32>
    %c4_605 = arith.constant 4 : index
    %c23_606 = arith.constant 23 : index
    %1055 = memref.load %arg2[%c4_605, %c23_606] : memref<10x25xf32, #tpu.memory_space<smem>>
    %1056 = vector.broadcast %1055 : f32 to vector<16x16xf32>
    %1057 = arith.mulf %1056, %1038 : vector<16x16xf32>
    %1058 = arith.addf %1014, %1057 : vector<16x16xf32>
    %c1_607 = arith.constant 1 : index
    %c4_608 = arith.constant 4 : index
    %c3_609 = arith.constant 3 : index
    %1059 = vector.load %arg9[%c1_607, %c4_608, %c3_609] : memref<2x20x20xf32, #tpu.memory_space<vmem>>, vector<1x16x16xf32>
    %1060 = vector.shape_cast %1059 : vector<1x16x16xf32> to vector<16x16xf32>
    %c5_610 = arith.constant 5 : index
    %c23_611 = arith.constant 23 : index
    %1061 = memref.load %arg2[%c5_610, %c23_611] : memref<10x25xf32, #tpu.memory_space<smem>>
    %1062 = vector.broadcast %1061 : f32 to vector<16x16xf32>
    %1063 = arith.mulf %1062, %1060 : vector<16x16xf32>
    %1064 = arith.addf %1020, %1063 : vector<16x16xf32>
    %c6_612 = arith.constant 6 : index
    %c23_613 = arith.constant 23 : index
    %1065 = memref.load %arg2[%c6_612, %c23_613] : memref<10x25xf32, #tpu.memory_space<smem>>
    %1066 = vector.broadcast %1065 : f32 to vector<16x16xf32>
    %1067 = arith.mulf %1066, %1060 : vector<16x16xf32>
    %1068 = arith.addf %1024, %1067 : vector<16x16xf32>
    %c7_614 = arith.constant 7 : index
    %c23_615 = arith.constant 23 : index
    %1069 = memref.load %arg2[%c7_614, %c23_615] : memref<10x25xf32, #tpu.memory_space<smem>>
    %1070 = vector.broadcast %1069 : f32 to vector<16x16xf32>
    %1071 = arith.mulf %1070, %1060 : vector<16x16xf32>
    %1072 = arith.addf %1028, %1071 : vector<16x16xf32>
    %c8_616 = arith.constant 8 : index
    %c23_617 = arith.constant 23 : index
    %1073 = memref.load %arg2[%c8_616, %c23_617] : memref<10x25xf32, #tpu.memory_space<smem>>
    %1074 = vector.broadcast %1073 : f32 to vector<16x16xf32>
    %1075 = arith.mulf %1074, %1060 : vector<16x16xf32>
    %1076 = arith.addf %1032, %1075 : vector<16x16xf32>
    %c9_618 = arith.constant 9 : index
    %c23_619 = arith.constant 23 : index
    %1077 = memref.load %arg2[%c9_618, %c23_619] : memref<10x25xf32, #tpu.memory_space<smem>>
    %1078 = vector.broadcast %1077 : f32 to vector<16x16xf32>
    %1079 = arith.mulf %1078, %1060 : vector<16x16xf32>
    %1080 = arith.addf %1036, %1079 : vector<16x16xf32>
    %c0_620 = arith.constant 0 : index
    %c4_621 = arith.constant 4 : index
    %c4_622 = arith.constant 4 : index
    %1081 = vector.load %arg9[%c0_620, %c4_621, %c4_622] : memref<2x20x20xf32, #tpu.memory_space<vmem>>, vector<1x16x16xf32>
    %1082 = vector.shape_cast %1081 : vector<1x16x16xf32> to vector<16x16xf32>
    %c0_623 = arith.constant 0 : index
    %c24 = arith.constant 24 : index
    %1083 = memref.load %arg2[%c0_623, %c24] : memref<10x25xf32, #tpu.memory_space<smem>>
    %1084 = vector.broadcast %1083 : f32 to vector<16x16xf32>
    %1085 = arith.mulf %1084, %1082 : vector<16x16xf32>
    %1086 = arith.addf %1042, %1085 : vector<16x16xf32>
    %c1_624 = arith.constant 1 : index
    %c24_625 = arith.constant 24 : index
    %1087 = memref.load %arg2[%c1_624, %c24_625] : memref<10x25xf32, #tpu.memory_space<smem>>
    %1088 = vector.broadcast %1087 : f32 to vector<16x16xf32>
    %1089 = arith.mulf %1088, %1082 : vector<16x16xf32>
    %1090 = arith.addf %1046, %1089 : vector<16x16xf32>
    %c2_626 = arith.constant 2 : index
    %c24_627 = arith.constant 24 : index
    %1091 = memref.load %arg2[%c2_626, %c24_627] : memref<10x25xf32, #tpu.memory_space<smem>>
    %1092 = vector.broadcast %1091 : f32 to vector<16x16xf32>
    %1093 = arith.mulf %1092, %1082 : vector<16x16xf32>
    %1094 = arith.addf %1050, %1093 : vector<16x16xf32>
    %c3_628 = arith.constant 3 : index
    %c24_629 = arith.constant 24 : index
    %1095 = memref.load %arg2[%c3_628, %c24_629] : memref<10x25xf32, #tpu.memory_space<smem>>
    %1096 = vector.broadcast %1095 : f32 to vector<16x16xf32>
    %1097 = arith.mulf %1096, %1082 : vector<16x16xf32>
    %1098 = arith.addf %1054, %1097 : vector<16x16xf32>
    %c4_630 = arith.constant 4 : index
    %c24_631 = arith.constant 24 : index
    %1099 = memref.load %arg2[%c4_630, %c24_631] : memref<10x25xf32, #tpu.memory_space<smem>>
    %1100 = vector.broadcast %1099 : f32 to vector<16x16xf32>
    %1101 = arith.mulf %1100, %1082 : vector<16x16xf32>
    %1102 = arith.addf %1058, %1101 : vector<16x16xf32>
    %c1_632 = arith.constant 1 : index
    %c4_633 = arith.constant 4 : index
    %c4_634 = arith.constant 4 : index
    %1103 = vector.load %arg9[%c1_632, %c4_633, %c4_634] : memref<2x20x20xf32, #tpu.memory_space<vmem>>, vector<1x16x16xf32>
    %1104 = vector.shape_cast %1103 : vector<1x16x16xf32> to vector<16x16xf32>
    %c5_635 = arith.constant 5 : index
    %c24_636 = arith.constant 24 : index
    %1105 = memref.load %arg2[%c5_635, %c24_636] : memref<10x25xf32, #tpu.memory_space<smem>>
    %1106 = vector.broadcast %1105 : f32 to vector<16x16xf32>
    %1107 = arith.mulf %1106, %1104 : vector<16x16xf32>
    %1108 = arith.addf %1064, %1107 : vector<16x16xf32>
    %c6_637 = arith.constant 6 : index
    %c24_638 = arith.constant 24 : index
    %1109 = memref.load %arg2[%c6_637, %c24_638] : memref<10x25xf32, #tpu.memory_space<smem>>
    %1110 = vector.broadcast %1109 : f32 to vector<16x16xf32>
    %1111 = arith.mulf %1110, %1104 : vector<16x16xf32>
    %1112 = arith.addf %1068, %1111 : vector<16x16xf32>
    %c7_639 = arith.constant 7 : index
    %c24_640 = arith.constant 24 : index
    %1113 = memref.load %arg2[%c7_639, %c24_640] : memref<10x25xf32, #tpu.memory_space<smem>>
    %1114 = vector.broadcast %1113 : f32 to vector<16x16xf32>
    %1115 = arith.mulf %1114, %1104 : vector<16x16xf32>
    %1116 = arith.addf %1072, %1115 : vector<16x16xf32>
    %c8_641 = arith.constant 8 : index
    %c24_642 = arith.constant 24 : index
    %1117 = memref.load %arg2[%c8_641, %c24_642] : memref<10x25xf32, #tpu.memory_space<smem>>
    %1118 = vector.broadcast %1117 : f32 to vector<16x16xf32>
    %1119 = arith.mulf %1118, %1104 : vector<16x16xf32>
    %1120 = arith.addf %1076, %1119 : vector<16x16xf32>
    %c9_643 = arith.constant 9 : index
    %c24_644 = arith.constant 24 : index
    %1121 = memref.load %arg2[%c9_643, %c24_644] : memref<10x25xf32, #tpu.memory_space<smem>>
    %1122 = vector.broadcast %1121 : f32 to vector<16x16xf32>
    %1123 = arith.mulf %1122, %1104 : vector<16x16xf32>
    %1124 = arith.addf %1080, %1123 : vector<16x16xf32>
    %cst_645 = arith.constant 0.000000e+00 : f32
    %1125 = vector.broadcast %cst_645 : f32 to vector<16x16xf32>
    %1126 = arith.cmpf oge, %1086, %1125 : vector<16x16xf32>
    %cst_646 = arith.constant 1.000000e+00 : f32
    %cst_647 = arith.constant -1.000000e+00 : f32
    %1127 = vector.broadcast %cst_646 : f32 to vector<16x16xf32>
    %1128 = vector.broadcast %cst_647 : f32 to vector<16x16xf32>
    %1129 = arith.select %1126, %1127, %1128 : vector<16x16xi1>, vector<16x16xf32>
    %cst_648 = arith.constant 0.000000e+00 : f32
    %1130 = vector.broadcast %cst_648 : f32 to vector<16x16xf32>
    %1131 = arith.cmpf oge, %1090, %1130 : vector<16x16xf32>
    %cst_649 = arith.constant 1.000000e+00 : f32
    %cst_650 = arith.constant -1.000000e+00 : f32
    %1132 = vector.broadcast %cst_649 : f32 to vector<16x16xf32>
    %1133 = vector.broadcast %cst_650 : f32 to vector<16x16xf32>
    %1134 = arith.select %1131, %1132, %1133 : vector<16x16xi1>, vector<16x16xf32>
    %cst_651 = arith.constant 0.000000e+00 : f32
    %1135 = vector.broadcast %cst_651 : f32 to vector<16x16xf32>
    %1136 = arith.cmpf oge, %1094, %1135 : vector<16x16xf32>
    %cst_652 = arith.constant 1.000000e+00 : f32
    %cst_653 = arith.constant -1.000000e+00 : f32
    %1137 = vector.broadcast %cst_652 : f32 to vector<16x16xf32>
    %1138 = vector.broadcast %cst_653 : f32 to vector<16x16xf32>
    %1139 = arith.select %1136, %1137, %1138 : vector<16x16xi1>, vector<16x16xf32>
    %cst_654 = arith.constant 0.000000e+00 : f32
    %1140 = vector.broadcast %cst_654 : f32 to vector<16x16xf32>
    %1141 = arith.cmpf oge, %1098, %1140 : vector<16x16xf32>
    %cst_655 = arith.constant 1.000000e+00 : f32
    %cst_656 = arith.constant -1.000000e+00 : f32
    %1142 = vector.broadcast %cst_655 : f32 to vector<16x16xf32>
    %1143 = vector.broadcast %cst_656 : f32 to vector<16x16xf32>
    %1144 = arith.select %1141, %1142, %1143 : vector<16x16xi1>, vector<16x16xf32>
    %cst_657 = arith.constant 0.000000e+00 : f32
    %1145 = vector.broadcast %cst_657 : f32 to vector<16x16xf32>
    %1146 = arith.cmpf oge, %1102, %1145 : vector<16x16xf32>
    %cst_658 = arith.constant 1.000000e+00 : f32
    %cst_659 = arith.constant -1.000000e+00 : f32
    %1147 = vector.broadcast %cst_658 : f32 to vector<16x16xf32>
    %1148 = vector.broadcast %cst_659 : f32 to vector<16x16xf32>
    %1149 = arith.select %1146, %1147, %1148 : vector<16x16xi1>, vector<16x16xf32>
    %cst_660 = arith.constant 0.000000e+00 : f32
    %1150 = vector.broadcast %cst_660 : f32 to vector<16x16xf32>
    %1151 = arith.cmpf oge, %1108, %1150 : vector<16x16xf32>
    %cst_661 = arith.constant 1.000000e+00 : f32
    %cst_662 = arith.constant -1.000000e+00 : f32
    %1152 = vector.broadcast %cst_661 : f32 to vector<16x16xf32>
    %1153 = vector.broadcast %cst_662 : f32 to vector<16x16xf32>
    %1154 = arith.select %1151, %1152, %1153 : vector<16x16xi1>, vector<16x16xf32>
    %cst_663 = arith.constant 0.000000e+00 : f32
    %1155 = vector.broadcast %cst_663 : f32 to vector<16x16xf32>
    %1156 = arith.cmpf oge, %1112, %1155 : vector<16x16xf32>
    %cst_664 = arith.constant 1.000000e+00 : f32
    %cst_665 = arith.constant -1.000000e+00 : f32
    %1157 = vector.broadcast %cst_664 : f32 to vector<16x16xf32>
    %1158 = vector.broadcast %cst_665 : f32 to vector<16x16xf32>
    %1159 = arith.select %1156, %1157, %1158 : vector<16x16xi1>, vector<16x16xf32>
    %cst_666 = arith.constant 0.000000e+00 : f32
    %1160 = vector.broadcast %cst_666 : f32 to vector<16x16xf32>
    %1161 = arith.cmpf oge, %1116, %1160 : vector<16x16xf32>
    %cst_667 = arith.constant 1.000000e+00 : f32
    %cst_668 = arith.constant -1.000000e+00 : f32
    %1162 = vector.broadcast %cst_667 : f32 to vector<16x16xf32>
    %1163 = vector.broadcast %cst_668 : f32 to vector<16x16xf32>
    %1164 = arith.select %1161, %1162, %1163 : vector<16x16xi1>, vector<16x16xf32>
    %cst_669 = arith.constant 0.000000e+00 : f32
    %1165 = vector.broadcast %cst_669 : f32 to vector<16x16xf32>
    %1166 = arith.cmpf oge, %1120, %1165 : vector<16x16xf32>
    %cst_670 = arith.constant 1.000000e+00 : f32
    %cst_671 = arith.constant -1.000000e+00 : f32
    %1167 = vector.broadcast %cst_670 : f32 to vector<16x16xf32>
    %1168 = vector.broadcast %cst_671 : f32 to vector<16x16xf32>
    %1169 = arith.select %1166, %1167, %1168 : vector<16x16xi1>, vector<16x16xf32>
    %cst_672 = arith.constant 0.000000e+00 : f32
    %1170 = vector.broadcast %cst_672 : f32 to vector<16x16xf32>
    %1171 = arith.cmpf oge, %1124, %1170 : vector<16x16xf32>
    %cst_673 = arith.constant 1.000000e+00 : f32
    %cst_674 = arith.constant -1.000000e+00 : f32
    %1172 = vector.broadcast %cst_673 : f32 to vector<16x16xf32>
    %1173 = vector.broadcast %cst_674 : f32 to vector<16x16xf32>
    %1174 = arith.select %1171, %1172, %1173 : vector<16x16xi1>, vector<16x16xf32>
    %c0_675 = arith.constant 0 : index
    %1175 = memref.load %arg5[%c0_675] : memref<4xf32, #tpu.memory_space<smem>>
    %1176 = vector.broadcast %1175 : f32 to vector<16x16xf32>
    %c0_676 = arith.constant 0 : index
    %c0_677 = arith.constant 0 : index
    %1177 = memref.load %arg4[%c0_676, %c0_677] : memref<4x10xf32, #tpu.memory_space<smem>>
    %1178 = vector.broadcast %1177 : f32 to vector<16x16xf32>
    %1179 = arith.mulf %1178, %1129 : vector<16x16xf32>
    %1180 = arith.addf %1176, %1179 : vector<16x16xf32>
    %c0_678 = arith.constant 0 : index
    %c1_679 = arith.constant 1 : index
    %1181 = memref.load %arg4[%c0_678, %c1_679] : memref<4x10xf32, #tpu.memory_space<smem>>
    %1182 = vector.broadcast %1181 : f32 to vector<16x16xf32>
    %1183 = arith.mulf %1182, %1134 : vector<16x16xf32>
    %1184 = arith.addf %1180, %1183 : vector<16x16xf32>
    %c0_680 = arith.constant 0 : index
    %c2_681 = arith.constant 2 : index
    %1185 = memref.load %arg4[%c0_680, %c2_681] : memref<4x10xf32, #tpu.memory_space<smem>>
    %1186 = vector.broadcast %1185 : f32 to vector<16x16xf32>
    %1187 = arith.mulf %1186, %1139 : vector<16x16xf32>
    %1188 = arith.addf %1184, %1187 : vector<16x16xf32>
    %c0_682 = arith.constant 0 : index
    %c3_683 = arith.constant 3 : index
    %1189 = memref.load %arg4[%c0_682, %c3_683] : memref<4x10xf32, #tpu.memory_space<smem>>
    %1190 = vector.broadcast %1189 : f32 to vector<16x16xf32>
    %1191 = arith.mulf %1190, %1144 : vector<16x16xf32>
    %1192 = arith.addf %1188, %1191 : vector<16x16xf32>
    %c0_684 = arith.constant 0 : index
    %c4_685 = arith.constant 4 : index
    %1193 = memref.load %arg4[%c0_684, %c4_685] : memref<4x10xf32, #tpu.memory_space<smem>>
    %1194 = vector.broadcast %1193 : f32 to vector<16x16xf32>
    %1195 = arith.mulf %1194, %1149 : vector<16x16xf32>
    %1196 = arith.addf %1192, %1195 : vector<16x16xf32>
    %c0_686 = arith.constant 0 : index
    %c5_687 = arith.constant 5 : index
    %1197 = memref.load %arg4[%c0_686, %c5_687] : memref<4x10xf32, #tpu.memory_space<smem>>
    %1198 = vector.broadcast %1197 : f32 to vector<16x16xf32>
    %1199 = arith.mulf %1198, %1154 : vector<16x16xf32>
    %1200 = arith.addf %1196, %1199 : vector<16x16xf32>
    %c0_688 = arith.constant 0 : index
    %c6_689 = arith.constant 6 : index
    %1201 = memref.load %arg4[%c0_688, %c6_689] : memref<4x10xf32, #tpu.memory_space<smem>>
    %1202 = vector.broadcast %1201 : f32 to vector<16x16xf32>
    %1203 = arith.mulf %1202, %1159 : vector<16x16xf32>
    %1204 = arith.addf %1200, %1203 : vector<16x16xf32>
    %c0_690 = arith.constant 0 : index
    %c7_691 = arith.constant 7 : index
    %1205 = memref.load %arg4[%c0_690, %c7_691] : memref<4x10xf32, #tpu.memory_space<smem>>
    %1206 = vector.broadcast %1205 : f32 to vector<16x16xf32>
    %1207 = arith.mulf %1206, %1164 : vector<16x16xf32>
    %1208 = arith.addf %1204, %1207 : vector<16x16xf32>
    %c0_692 = arith.constant 0 : index
    %c8_693 = arith.constant 8 : index
    %1209 = memref.load %arg4[%c0_692, %c8_693] : memref<4x10xf32, #tpu.memory_space<smem>>
    %1210 = vector.broadcast %1209 : f32 to vector<16x16xf32>
    %1211 = arith.mulf %1210, %1169 : vector<16x16xf32>
    %1212 = arith.addf %1208, %1211 : vector<16x16xf32>
    %c0_694 = arith.constant 0 : index
    %c9_695 = arith.constant 9 : index
    %1213 = memref.load %arg4[%c0_694, %c9_695] : memref<4x10xf32, #tpu.memory_space<smem>>
    %1214 = vector.broadcast %1213 : f32 to vector<16x16xf32>
    %1215 = arith.mulf %1214, %1174 : vector<16x16xf32>
    %1216 = arith.addf %1212, %1215 : vector<16x16xf32>
    %cst_696 = arith.constant 0.000000e+00 : f32
    %1217 = vector.broadcast %cst_696 : f32 to vector<16x16xf32>
    %1218 = arith.cmpf oge, %1216, %1217 : vector<16x16xf32>
    %cst_697 = arith.constant 1.000000e+00 : f32
    %cst_698 = arith.constant -1.000000e+00 : f32
    %1219 = vector.broadcast %cst_697 : f32 to vector<16x16xf32>
    %1220 = vector.broadcast %cst_698 : f32 to vector<16x16xf32>
    %1221 = arith.select %1218, %1219, %1220 : vector<16x16xi1>, vector<16x16xf32>
    %c1_699 = arith.constant 1 : index
    %1222 = memref.load %arg5[%c1_699] : memref<4xf32, #tpu.memory_space<smem>>
    %1223 = vector.broadcast %1222 : f32 to vector<16x16xf32>
    %c1_700 = arith.constant 1 : index
    %c0_701 = arith.constant 0 : index
    %1224 = memref.load %arg4[%c1_700, %c0_701] : memref<4x10xf32, #tpu.memory_space<smem>>
    %1225 = vector.broadcast %1224 : f32 to vector<16x16xf32>
    %1226 = arith.mulf %1225, %1129 : vector<16x16xf32>
    %1227 = arith.addf %1223, %1226 : vector<16x16xf32>
    %c1_702 = arith.constant 1 : index
    %c1_703 = arith.constant 1 : index
    %1228 = memref.load %arg4[%c1_702, %c1_703] : memref<4x10xf32, #tpu.memory_space<smem>>
    %1229 = vector.broadcast %1228 : f32 to vector<16x16xf32>
    %1230 = arith.mulf %1229, %1134 : vector<16x16xf32>
    %1231 = arith.addf %1227, %1230 : vector<16x16xf32>
    %c1_704 = arith.constant 1 : index
    %c2_705 = arith.constant 2 : index
    %1232 = memref.load %arg4[%c1_704, %c2_705] : memref<4x10xf32, #tpu.memory_space<smem>>
    %1233 = vector.broadcast %1232 : f32 to vector<16x16xf32>
    %1234 = arith.mulf %1233, %1139 : vector<16x16xf32>
    %1235 = arith.addf %1231, %1234 : vector<16x16xf32>
    %c1_706 = arith.constant 1 : index
    %c3_707 = arith.constant 3 : index
    %1236 = memref.load %arg4[%c1_706, %c3_707] : memref<4x10xf32, #tpu.memory_space<smem>>
    %1237 = vector.broadcast %1236 : f32 to vector<16x16xf32>
    %1238 = arith.mulf %1237, %1144 : vector<16x16xf32>
    %1239 = arith.addf %1235, %1238 : vector<16x16xf32>
    %c1_708 = arith.constant 1 : index
    %c4_709 = arith.constant 4 : index
    %1240 = memref.load %arg4[%c1_708, %c4_709] : memref<4x10xf32, #tpu.memory_space<smem>>
    %1241 = vector.broadcast %1240 : f32 to vector<16x16xf32>
    %1242 = arith.mulf %1241, %1149 : vector<16x16xf32>
    %1243 = arith.addf %1239, %1242 : vector<16x16xf32>
    %c1_710 = arith.constant 1 : index
    %c5_711 = arith.constant 5 : index
    %1244 = memref.load %arg4[%c1_710, %c5_711] : memref<4x10xf32, #tpu.memory_space<smem>>
    %1245 = vector.broadcast %1244 : f32 to vector<16x16xf32>
    %1246 = arith.mulf %1245, %1154 : vector<16x16xf32>
    %1247 = arith.addf %1243, %1246 : vector<16x16xf32>
    %c1_712 = arith.constant 1 : index
    %c6_713 = arith.constant 6 : index
    %1248 = memref.load %arg4[%c1_712, %c6_713] : memref<4x10xf32, #tpu.memory_space<smem>>
    %1249 = vector.broadcast %1248 : f32 to vector<16x16xf32>
    %1250 = arith.mulf %1249, %1159 : vector<16x16xf32>
    %1251 = arith.addf %1247, %1250 : vector<16x16xf32>
    %c1_714 = arith.constant 1 : index
    %c7_715 = arith.constant 7 : index
    %1252 = memref.load %arg4[%c1_714, %c7_715] : memref<4x10xf32, #tpu.memory_space<smem>>
    %1253 = vector.broadcast %1252 : f32 to vector<16x16xf32>
    %1254 = arith.mulf %1253, %1164 : vector<16x16xf32>
    %1255 = arith.addf %1251, %1254 : vector<16x16xf32>
    %c1_716 = arith.constant 1 : index
    %c8_717 = arith.constant 8 : index
    %1256 = memref.load %arg4[%c1_716, %c8_717] : memref<4x10xf32, #tpu.memory_space<smem>>
    %1257 = vector.broadcast %1256 : f32 to vector<16x16xf32>
    %1258 = arith.mulf %1257, %1169 : vector<16x16xf32>
    %1259 = arith.addf %1255, %1258 : vector<16x16xf32>
    %c1_718 = arith.constant 1 : index
    %c9_719 = arith.constant 9 : index
    %1260 = memref.load %arg4[%c1_718, %c9_719] : memref<4x10xf32, #tpu.memory_space<smem>>
    %1261 = vector.broadcast %1260 : f32 to vector<16x16xf32>
    %1262 = arith.mulf %1261, %1174 : vector<16x16xf32>
    %1263 = arith.addf %1259, %1262 : vector<16x16xf32>
    %cst_720 = arith.constant 0.000000e+00 : f32
    %1264 = vector.broadcast %cst_720 : f32 to vector<16x16xf32>
    %1265 = arith.cmpf oge, %1263, %1264 : vector<16x16xf32>
    %cst_721 = arith.constant 1.000000e+00 : f32
    %cst_722 = arith.constant -1.000000e+00 : f32
    %1266 = vector.broadcast %cst_721 : f32 to vector<16x16xf32>
    %1267 = vector.broadcast %cst_722 : f32 to vector<16x16xf32>
    %1268 = arith.select %1265, %1266, %1267 : vector<16x16xi1>, vector<16x16xf32>
    %c2_723 = arith.constant 2 : index
    %1269 = memref.load %arg5[%c2_723] : memref<4xf32, #tpu.memory_space<smem>>
    %1270 = vector.broadcast %1269 : f32 to vector<16x16xf32>
    %c2_724 = arith.constant 2 : index
    %c0_725 = arith.constant 0 : index
    %1271 = memref.load %arg4[%c2_724, %c0_725] : memref<4x10xf32, #tpu.memory_space<smem>>
    %1272 = vector.broadcast %1271 : f32 to vector<16x16xf32>
    %1273 = arith.mulf %1272, %1129 : vector<16x16xf32>
    %1274 = arith.addf %1270, %1273 : vector<16x16xf32>
    %c2_726 = arith.constant 2 : index
    %c1_727 = arith.constant 1 : index
    %1275 = memref.load %arg4[%c2_726, %c1_727] : memref<4x10xf32, #tpu.memory_space<smem>>
    %1276 = vector.broadcast %1275 : f32 to vector<16x16xf32>
    %1277 = arith.mulf %1276, %1134 : vector<16x16xf32>
    %1278 = arith.addf %1274, %1277 : vector<16x16xf32>
    %c2_728 = arith.constant 2 : index
    %c2_729 = arith.constant 2 : index
    %1279 = memref.load %arg4[%c2_728, %c2_729] : memref<4x10xf32, #tpu.memory_space<smem>>
    %1280 = vector.broadcast %1279 : f32 to vector<16x16xf32>
    %1281 = arith.mulf %1280, %1139 : vector<16x16xf32>
    %1282 = arith.addf %1278, %1281 : vector<16x16xf32>
    %c2_730 = arith.constant 2 : index
    %c3_731 = arith.constant 3 : index
    %1283 = memref.load %arg4[%c2_730, %c3_731] : memref<4x10xf32, #tpu.memory_space<smem>>
    %1284 = vector.broadcast %1283 : f32 to vector<16x16xf32>
    %1285 = arith.mulf %1284, %1144 : vector<16x16xf32>
    %1286 = arith.addf %1282, %1285 : vector<16x16xf32>
    %c2_732 = arith.constant 2 : index
    %c4_733 = arith.constant 4 : index
    %1287 = memref.load %arg4[%c2_732, %c4_733] : memref<4x10xf32, #tpu.memory_space<smem>>
    %1288 = vector.broadcast %1287 : f32 to vector<16x16xf32>
    %1289 = arith.mulf %1288, %1149 : vector<16x16xf32>
    %1290 = arith.addf %1286, %1289 : vector<16x16xf32>
    %c2_734 = arith.constant 2 : index
    %c5_735 = arith.constant 5 : index
    %1291 = memref.load %arg4[%c2_734, %c5_735] : memref<4x10xf32, #tpu.memory_space<smem>>
    %1292 = vector.broadcast %1291 : f32 to vector<16x16xf32>
    %1293 = arith.mulf %1292, %1154 : vector<16x16xf32>
    %1294 = arith.addf %1290, %1293 : vector<16x16xf32>
    %c2_736 = arith.constant 2 : index
    %c6_737 = arith.constant 6 : index
    %1295 = memref.load %arg4[%c2_736, %c6_737] : memref<4x10xf32, #tpu.memory_space<smem>>
    %1296 = vector.broadcast %1295 : f32 to vector<16x16xf32>
    %1297 = arith.mulf %1296, %1159 : vector<16x16xf32>
    %1298 = arith.addf %1294, %1297 : vector<16x16xf32>
    %c2_738 = arith.constant 2 : index
    %c7_739 = arith.constant 7 : index
    %1299 = memref.load %arg4[%c2_738, %c7_739] : memref<4x10xf32, #tpu.memory_space<smem>>
    %1300 = vector.broadcast %1299 : f32 to vector<16x16xf32>
    %1301 = arith.mulf %1300, %1164 : vector<16x16xf32>
    %1302 = arith.addf %1298, %1301 : vector<16x16xf32>
    %c2_740 = arith.constant 2 : index
    %c8_741 = arith.constant 8 : index
    %1303 = memref.load %arg4[%c2_740, %c8_741] : memref<4x10xf32, #tpu.memory_space<smem>>
    %1304 = vector.broadcast %1303 : f32 to vector<16x16xf32>
    %1305 = arith.mulf %1304, %1169 : vector<16x16xf32>
    %1306 = arith.addf %1302, %1305 : vector<16x16xf32>
    %c2_742 = arith.constant 2 : index
    %c9_743 = arith.constant 9 : index
    %1307 = memref.load %arg4[%c2_742, %c9_743] : memref<4x10xf32, #tpu.memory_space<smem>>
    %1308 = vector.broadcast %1307 : f32 to vector<16x16xf32>
    %1309 = arith.mulf %1308, %1174 : vector<16x16xf32>
    %1310 = arith.addf %1306, %1309 : vector<16x16xf32>
    %cst_744 = arith.constant 0.000000e+00 : f32
    %1311 = vector.broadcast %cst_744 : f32 to vector<16x16xf32>
    %1312 = arith.cmpf oge, %1310, %1311 : vector<16x16xf32>
    %cst_745 = arith.constant 1.000000e+00 : f32
    %cst_746 = arith.constant -1.000000e+00 : f32
    %1313 = vector.broadcast %cst_745 : f32 to vector<16x16xf32>
    %1314 = vector.broadcast %cst_746 : f32 to vector<16x16xf32>
    %1315 = arith.select %1312, %1313, %1314 : vector<16x16xi1>, vector<16x16xf32>
    %c3_747 = arith.constant 3 : index
    %1316 = memref.load %arg5[%c3_747] : memref<4xf32, #tpu.memory_space<smem>>
    %1317 = vector.broadcast %1316 : f32 to vector<16x16xf32>
    %c3_748 = arith.constant 3 : index
    %c0_749 = arith.constant 0 : index
    %1318 = memref.load %arg4[%c3_748, %c0_749] : memref<4x10xf32, #tpu.memory_space<smem>>
    %1319 = vector.broadcast %1318 : f32 to vector<16x16xf32>
    %1320 = arith.mulf %1319, %1129 : vector<16x16xf32>
    %1321 = arith.addf %1317, %1320 : vector<16x16xf32>
    %c3_750 = arith.constant 3 : index
    %c1_751 = arith.constant 1 : index
    %1322 = memref.load %arg4[%c3_750, %c1_751] : memref<4x10xf32, #tpu.memory_space<smem>>
    %1323 = vector.broadcast %1322 : f32 to vector<16x16xf32>
    %1324 = arith.mulf %1323, %1134 : vector<16x16xf32>
    %1325 = arith.addf %1321, %1324 : vector<16x16xf32>
    %c3_752 = arith.constant 3 : index
    %c2_753 = arith.constant 2 : index
    %1326 = memref.load %arg4[%c3_752, %c2_753] : memref<4x10xf32, #tpu.memory_space<smem>>
    %1327 = vector.broadcast %1326 : f32 to vector<16x16xf32>
    %1328 = arith.mulf %1327, %1139 : vector<16x16xf32>
    %1329 = arith.addf %1325, %1328 : vector<16x16xf32>
    %c3_754 = arith.constant 3 : index
    %c3_755 = arith.constant 3 : index
    %1330 = memref.load %arg4[%c3_754, %c3_755] : memref<4x10xf32, #tpu.memory_space<smem>>
    %1331 = vector.broadcast %1330 : f32 to vector<16x16xf32>
    %1332 = arith.mulf %1331, %1144 : vector<16x16xf32>
    %1333 = arith.addf %1329, %1332 : vector<16x16xf32>
    %c3_756 = arith.constant 3 : index
    %c4_757 = arith.constant 4 : index
    %1334 = memref.load %arg4[%c3_756, %c4_757] : memref<4x10xf32, #tpu.memory_space<smem>>
    %1335 = vector.broadcast %1334 : f32 to vector<16x16xf32>
    %1336 = arith.mulf %1335, %1149 : vector<16x16xf32>
    %1337 = arith.addf %1333, %1336 : vector<16x16xf32>
    %c3_758 = arith.constant 3 : index
    %c5_759 = arith.constant 5 : index
    %1338 = memref.load %arg4[%c3_758, %c5_759] : memref<4x10xf32, #tpu.memory_space<smem>>
    %1339 = vector.broadcast %1338 : f32 to vector<16x16xf32>
    %1340 = arith.mulf %1339, %1154 : vector<16x16xf32>
    %1341 = arith.addf %1337, %1340 : vector<16x16xf32>
    %c3_760 = arith.constant 3 : index
    %c6_761 = arith.constant 6 : index
    %1342 = memref.load %arg4[%c3_760, %c6_761] : memref<4x10xf32, #tpu.memory_space<smem>>
    %1343 = vector.broadcast %1342 : f32 to vector<16x16xf32>
    %1344 = arith.mulf %1343, %1159 : vector<16x16xf32>
    %1345 = arith.addf %1341, %1344 : vector<16x16xf32>
    %c3_762 = arith.constant 3 : index
    %c7_763 = arith.constant 7 : index
    %1346 = memref.load %arg4[%c3_762, %c7_763] : memref<4x10xf32, #tpu.memory_space<smem>>
    %1347 = vector.broadcast %1346 : f32 to vector<16x16xf32>
    %1348 = arith.mulf %1347, %1164 : vector<16x16xf32>
    %1349 = arith.addf %1345, %1348 : vector<16x16xf32>
    %c3_764 = arith.constant 3 : index
    %c8_765 = arith.constant 8 : index
    %1350 = memref.load %arg4[%c3_764, %c8_765] : memref<4x10xf32, #tpu.memory_space<smem>>
    %1351 = vector.broadcast %1350 : f32 to vector<16x16xf32>
    %1352 = arith.mulf %1351, %1169 : vector<16x16xf32>
    %1353 = arith.addf %1349, %1352 : vector<16x16xf32>
    %c3_766 = arith.constant 3 : index
    %c9_767 = arith.constant 9 : index
    %1354 = memref.load %arg4[%c3_766, %c9_767] : memref<4x10xf32, #tpu.memory_space<smem>>
    %1355 = vector.broadcast %1354 : f32 to vector<16x16xf32>
    %1356 = arith.mulf %1355, %1174 : vector<16x16xf32>
    %1357 = arith.addf %1353, %1356 : vector<16x16xf32>
    %cst_768 = arith.constant 0.000000e+00 : f32
    %1358 = vector.broadcast %cst_768 : f32 to vector<16x16xf32>
    %1359 = arith.cmpf oge, %1357, %1358 : vector<16x16xf32>
    %cst_769 = arith.constant 1.000000e+00 : f32
    %cst_770 = arith.constant -1.000000e+00 : f32
    %1360 = vector.broadcast %cst_769 : f32 to vector<16x16xf32>
    %1361 = vector.broadcast %cst_770 : f32 to vector<16x16xf32>
    %1362 = arith.select %1359, %1360, %1361 : vector<16x16xi1>, vector<16x16xf32>
    %1363 = vector.extract_strided_slice %1221 {offsets = [0, 0], sizes = [1, 16], strides = [1, 1]} : vector<16x16xf32> to vector<1x16xf32>
    %1364 = vector.extract_strided_slice %1221 {offsets = [3, 0], sizes = [1, 16], strides = [1, 1]} : vector<16x16xf32> to vector<1x16xf32>
    %1365 = vector.extract_strided_slice %1221 {offsets = [6, 0], sizes = [1, 16], strides = [1, 1]} : vector<16x16xf32> to vector<1x16xf32>
    %1366 = vector.extract_strided_slice %1221 {offsets = [9, 0], sizes = [1, 16], strides = [1, 1]} : vector<16x16xf32> to vector<1x16xf32>
    %1367 = vector.extract_strided_slice %1221 {offsets = [12, 0], sizes = [1, 16], strides = [1, 1]} : vector<16x16xf32> to vector<1x16xf32>
    %1368 = vector.extract_strided_slice %1221 {offsets = [15, 0], sizes = [1, 16], strides = [1, 1]} : vector<16x16xf32> to vector<1x16xf32>
    %1369 = tpu.concatenate %1363, %1364, %1365, %1366, %1367, %1368 in 0 : vector<1x16xf32>, vector<1x16xf32>, vector<1x16xf32>, vector<1x16xf32>, vector<1x16xf32>, vector<1x16xf32> -> vector<6x16xf32>
    %1370 = vector.extract_strided_slice %1369 {offsets = [0, 0], sizes = [6, 1], strides = [1, 1]} : vector<6x16xf32> to vector<6x1xf32>
    %1371 = vector.extract_strided_slice %1369 {offsets = [0, 3], sizes = [6, 1], strides = [1, 1]} : vector<6x16xf32> to vector<6x1xf32>
    %1372 = vector.extract_strided_slice %1369 {offsets = [0, 6], sizes = [6, 1], strides = [1, 1]} : vector<6x16xf32> to vector<6x1xf32>
    %1373 = vector.extract_strided_slice %1369 {offsets = [0, 9], sizes = [6, 1], strides = [1, 1]} : vector<6x16xf32> to vector<6x1xf32>
    %1374 = vector.extract_strided_slice %1369 {offsets = [0, 12], sizes = [6, 1], strides = [1, 1]} : vector<6x16xf32> to vector<6x1xf32>
    %1375 = vector.extract_strided_slice %1369 {offsets = [0, 15], sizes = [6, 1], strides = [1, 1]} : vector<6x16xf32> to vector<6x1xf32>
    %1376 = tpu.concatenate %1370, %1371, %1372, %1373, %1374, %1375 in 1 : vector<6x1xf32>, vector<6x1xf32>, vector<6x1xf32>, vector<6x1xf32>, vector<6x1xf32>, vector<6x1xf32> -> vector<6x6xf32>
    %1377 = vector.extract_strided_slice %1268 {offsets = [0, 0], sizes = [1, 16], strides = [1, 1]} : vector<16x16xf32> to vector<1x16xf32>
    %1378 = vector.extract_strided_slice %1268 {offsets = [3, 0], sizes = [1, 16], strides = [1, 1]} : vector<16x16xf32> to vector<1x16xf32>
    %1379 = vector.extract_strided_slice %1268 {offsets = [6, 0], sizes = [1, 16], strides = [1, 1]} : vector<16x16xf32> to vector<1x16xf32>
    %1380 = vector.extract_strided_slice %1268 {offsets = [9, 0], sizes = [1, 16], strides = [1, 1]} : vector<16x16xf32> to vector<1x16xf32>
    %1381 = vector.extract_strided_slice %1268 {offsets = [12, 0], sizes = [1, 16], strides = [1, 1]} : vector<16x16xf32> to vector<1x16xf32>
    %1382 = vector.extract_strided_slice %1268 {offsets = [15, 0], sizes = [1, 16], strides = [1, 1]} : vector<16x16xf32> to vector<1x16xf32>
    %1383 = tpu.concatenate %1377, %1378, %1379, %1380, %1381, %1382 in 0 : vector<1x16xf32>, vector<1x16xf32>, vector<1x16xf32>, vector<1x16xf32>, vector<1x16xf32>, vector<1x16xf32> -> vector<6x16xf32>
    %1384 = vector.extract_strided_slice %1383 {offsets = [0, 0], sizes = [6, 1], strides = [1, 1]} : vector<6x16xf32> to vector<6x1xf32>
    %1385 = vector.extract_strided_slice %1383 {offsets = [0, 3], sizes = [6, 1], strides = [1, 1]} : vector<6x16xf32> to vector<6x1xf32>
    %1386 = vector.extract_strided_slice %1383 {offsets = [0, 6], sizes = [6, 1], strides = [1, 1]} : vector<6x16xf32> to vector<6x1xf32>
    %1387 = vector.extract_strided_slice %1383 {offsets = [0, 9], sizes = [6, 1], strides = [1, 1]} : vector<6x16xf32> to vector<6x1xf32>
    %1388 = vector.extract_strided_slice %1383 {offsets = [0, 12], sizes = [6, 1], strides = [1, 1]} : vector<6x16xf32> to vector<6x1xf32>
    %1389 = vector.extract_strided_slice %1383 {offsets = [0, 15], sizes = [6, 1], strides = [1, 1]} : vector<6x16xf32> to vector<6x1xf32>
    %1390 = tpu.concatenate %1384, %1385, %1386, %1387, %1388, %1389 in 1 : vector<6x1xf32>, vector<6x1xf32>, vector<6x1xf32>, vector<6x1xf32>, vector<6x1xf32>, vector<6x1xf32> -> vector<6x6xf32>
    %1391 = vector.extract_strided_slice %1315 {offsets = [0, 0], sizes = [1, 16], strides = [1, 1]} : vector<16x16xf32> to vector<1x16xf32>
    %1392 = vector.extract_strided_slice %1315 {offsets = [3, 0], sizes = [1, 16], strides = [1, 1]} : vector<16x16xf32> to vector<1x16xf32>
    %1393 = vector.extract_strided_slice %1315 {offsets = [6, 0], sizes = [1, 16], strides = [1, 1]} : vector<16x16xf32> to vector<1x16xf32>
    %1394 = vector.extract_strided_slice %1315 {offsets = [9, 0], sizes = [1, 16], strides = [1, 1]} : vector<16x16xf32> to vector<1x16xf32>
    %1395 = vector.extract_strided_slice %1315 {offsets = [12, 0], sizes = [1, 16], strides = [1, 1]} : vector<16x16xf32> to vector<1x16xf32>
    %1396 = vector.extract_strided_slice %1315 {offsets = [15, 0], sizes = [1, 16], strides = [1, 1]} : vector<16x16xf32> to vector<1x16xf32>
    %1397 = tpu.concatenate %1391, %1392, %1393, %1394, %1395, %1396 in 0 : vector<1x16xf32>, vector<1x16xf32>, vector<1x16xf32>, vector<1x16xf32>, vector<1x16xf32>, vector<1x16xf32> -> vector<6x16xf32>
    %1398 = vector.extract_strided_slice %1397 {offsets = [0, 0], sizes = [6, 1], strides = [1, 1]} : vector<6x16xf32> to vector<6x1xf32>
    %1399 = vector.extract_strided_slice %1397 {offsets = [0, 3], sizes = [6, 1], strides = [1, 1]} : vector<6x16xf32> to vector<6x1xf32>
    %1400 = vector.extract_strided_slice %1397 {offsets = [0, 6], sizes = [6, 1], strides = [1, 1]} : vector<6x16xf32> to vector<6x1xf32>
    %1401 = vector.extract_strided_slice %1397 {offsets = [0, 9], sizes = [6, 1], strides = [1, 1]} : vector<6x16xf32> to vector<6x1xf32>
    %1402 = vector.extract_strided_slice %1397 {offsets = [0, 12], sizes = [6, 1], strides = [1, 1]} : vector<6x16xf32> to vector<6x1xf32>
    %1403 = vector.extract_strided_slice %1397 {offsets = [0, 15], sizes = [6, 1], strides = [1, 1]} : vector<6x16xf32> to vector<6x1xf32>
    %1404 = tpu.concatenate %1398, %1399, %1400, %1401, %1402, %1403 in 1 : vector<6x1xf32>, vector<6x1xf32>, vector<6x1xf32>, vector<6x1xf32>, vector<6x1xf32>, vector<6x1xf32> -> vector<6x6xf32>
    %1405 = vector.extract_strided_slice %1362 {offsets = [0, 0], sizes = [1, 16], strides = [1, 1]} : vector<16x16xf32> to vector<1x16xf32>
    %1406 = vector.extract_strided_slice %1362 {offsets = [3, 0], sizes = [1, 16], strides = [1, 1]} : vector<16x16xf32> to vector<1x16xf32>
    %1407 = vector.extract_strided_slice %1362 {offsets = [6, 0], sizes = [1, 16], strides = [1, 1]} : vector<16x16xf32> to vector<1x16xf32>
    %1408 = vector.extract_strided_slice %1362 {offsets = [9, 0], sizes = [1, 16], strides = [1, 1]} : vector<16x16xf32> to vector<1x16xf32>
    %1409 = vector.extract_strided_slice %1362 {offsets = [12, 0], sizes = [1, 16], strides = [1, 1]} : vector<16x16xf32> to vector<1x16xf32>
    %1410 = vector.extract_strided_slice %1362 {offsets = [15, 0], sizes = [1, 16], strides = [1, 1]} : vector<16x16xf32> to vector<1x16xf32>
    %1411 = tpu.concatenate %1405, %1406, %1407, %1408, %1409, %1410 in 0 : vector<1x16xf32>, vector<1x16xf32>, vector<1x16xf32>, vector<1x16xf32>, vector<1x16xf32>, vector<1x16xf32> -> vector<6x16xf32>
    %1412 = vector.extract_strided_slice %1411 {offsets = [0, 0], sizes = [6, 1], strides = [1, 1]} : vector<6x16xf32> to vector<6x1xf32>
    %1413 = vector.extract_strided_slice %1411 {offsets = [0, 3], sizes = [6, 1], strides = [1, 1]} : vector<6x16xf32> to vector<6x1xf32>
    %1414 = vector.extract_strided_slice %1411 {offsets = [0, 6], sizes = [6, 1], strides = [1, 1]} : vector<6x16xf32> to vector<6x1xf32>
    %1415 = vector.extract_strided_slice %1411 {offsets = [0, 9], sizes = [6, 1], strides = [1, 1]} : vector<6x16xf32> to vector<6x1xf32>
    %1416 = vector.extract_strided_slice %1411 {offsets = [0, 12], sizes = [6, 1], strides = [1, 1]} : vector<6x16xf32> to vector<6x1xf32>
    %1417 = vector.extract_strided_slice %1411 {offsets = [0, 15], sizes = [6, 1], strides = [1, 1]} : vector<6x16xf32> to vector<6x1xf32>
    %1418 = tpu.concatenate %1412, %1413, %1414, %1415, %1416, %1417 in 1 : vector<6x1xf32>, vector<6x1xf32>, vector<6x1xf32>, vector<6x1xf32>, vector<6x1xf32>, vector<6x1xf32> -> vector<6x6xf32>
    %c0_771 = arith.constant 0 : index
    %1419 = memref.load %arg7[%c0_771] : memref<4xf32, #tpu.memory_space<smem>>
    %1420 = vector.broadcast %1419 : f32 to vector<6x6xf32>
    %c0_772 = arith.constant 0 : index
    %c0_773 = arith.constant 0 : index
    %1421 = memref.load %arg6[%c0_772, %c0_773] : memref<4x4xf32, #tpu.memory_space<smem>>
    %1422 = vector.broadcast %1421 : f32 to vector<6x6xf32>
    %1423 = arith.mulf %1422, %1376 : vector<6x6xf32>
    %1424 = arith.addf %1420, %1423 : vector<6x6xf32>
    %c0_774 = arith.constant 0 : index
    %c1_775 = arith.constant 1 : index
    %1425 = memref.load %arg6[%c0_774, %c1_775] : memref<4x4xf32, #tpu.memory_space<smem>>
    %1426 = vector.broadcast %1425 : f32 to vector<6x6xf32>
    %1427 = arith.mulf %1426, %1390 : vector<6x6xf32>
    %1428 = arith.addf %1424, %1427 : vector<6x6xf32>
    %c0_776 = arith.constant 0 : index
    %c2_777 = arith.constant 2 : index
    %1429 = memref.load %arg6[%c0_776, %c2_777] : memref<4x4xf32, #tpu.memory_space<smem>>
    %1430 = vector.broadcast %1429 : f32 to vector<6x6xf32>
    %1431 = arith.mulf %1430, %1404 : vector<6x6xf32>
    %1432 = arith.addf %1428, %1431 : vector<6x6xf32>
    %c0_778 = arith.constant 0 : index
    %c3_779 = arith.constant 3 : index
    %1433 = memref.load %arg6[%c0_778, %c3_779] : memref<4x4xf32, #tpu.memory_space<smem>>
    %1434 = vector.broadcast %1433 : f32 to vector<6x6xf32>
    %1435 = arith.mulf %1434, %1418 : vector<6x6xf32>
    %1436 = arith.addf %1432, %1435 : vector<6x6xf32>
    %c0_780 = arith.constant 0 : index
    %1437 = memref.load %arg7[%c0_780] : memref<4xf32, #tpu.memory_space<smem>>
    %cst_781 = arith.constant 0.000000e+00 : f32
    %1438 = arith.cmpf oge, %1437, %cst_781 : f32
    %cst_782 = arith.constant 1.000000e+00 : f32
    %cst_783 = arith.constant -1.000000e+00 : f32
    %1439 = arith.select %1438, %cst_782, %cst_783 : f32
    %1440 = vector.broadcast %1439 : f32 to vector<8x8xf32>
    %c0_784 = arith.constant 0 : index
    %c0_785 = arith.constant 0 : index
    %c0_786 = arith.constant 0 : index
    %c0_787 = arith.constant 0 : index
    %1441 = vector.load %arg8[%c0_784, %c0_785, %c0_786, %c0_787] : memref<1x4x8x8xf32, #tpu.memory_space<vmem>>, vector<1x1x8x8xf32>
    %1442 = vector.shape_cast %1441 : vector<1x1x8x8xf32> to vector<8x8xf32>
    %1443 = vector.shape_cast %1440 : vector<8x8xf32> to vector<1x1x8x8xf32>
    tpu.vector_store %arg8[%c0_784, %c0_785, %c0_786, %c0_787], %1443 {strides = array<i32>} : memref<1x4x8x8xf32, #tpu.memory_space<vmem>>, vector<1x1x8x8xf32>,
    %cst_788 = arith.constant 0.000000e+00 : f32
    %1444 = vector.broadcast %cst_788 : f32 to vector<6x6xf32>
    %1445 = arith.cmpf oge, %1436, %1444 : vector<6x6xf32>
    %cst_789 = arith.constant 1.000000e+00 : f32
    %cst_790 = arith.constant -1.000000e+00 : f32
    %1446 = vector.broadcast %cst_789 : f32 to vector<6x6xf32>
    %1447 = vector.broadcast %cst_790 : f32 to vector<6x6xf32>
    %1448 = arith.select %1445, %1446, %1447 : vector<6x6xi1>, vector<6x6xf32>
    %c0_791 = arith.constant 0 : index
    %c0_792 = arith.constant 0 : index
    %c1_793 = arith.constant 1 : index
    %c1_794 = arith.constant 1 : index
    %1449 = vector.load %arg8[%c0_791, %c0_792, %c1_793, %c1_794] : memref<1x4x8x8xf32, #tpu.memory_space<vmem>>, vector<1x1x6x6xf32>
    %1450 = vector.shape_cast %1449 : vector<1x1x6x6xf32> to vector<6x6xf32>
    %1451 = vector.shape_cast %1448 : vector<6x6xf32> to vector<1x1x6x6xf32>
    tpu.vector_store %arg8[%c0_791, %c0_792, %c1_793, %c1_794], %1451 {strides = array<i32>} : memref<1x4x8x8xf32, #tpu.memory_space<vmem>>, vector<1x1x6x6xf32>,
    %c1_795 = arith.constant 1 : index
    %1452 = memref.load %arg7[%c1_795] : memref<4xf32, #tpu.memory_space<smem>>
    %1453 = vector.broadcast %1452 : f32 to vector<6x6xf32>
    %c1_796 = arith.constant 1 : index
    %c0_797 = arith.constant 0 : index
    %1454 = memref.load %arg6[%c1_796, %c0_797] : memref<4x4xf32, #tpu.memory_space<smem>>
    %1455 = vector.broadcast %1454 : f32 to vector<6x6xf32>
    %1456 = arith.mulf %1455, %1376 : vector<6x6xf32>
    %1457 = arith.addf %1453, %1456 : vector<6x6xf32>
    %c1_798 = arith.constant 1 : index
    %c1_799 = arith.constant 1 : index
    %1458 = memref.load %arg6[%c1_798, %c1_799] : memref<4x4xf32, #tpu.memory_space<smem>>
    %1459 = vector.broadcast %1458 : f32 to vector<6x6xf32>
    %1460 = arith.mulf %1459, %1390 : vector<6x6xf32>
    %1461 = arith.addf %1457, %1460 : vector<6x6xf32>
    %c1_800 = arith.constant 1 : index
    %c2_801 = arith.constant 2 : index
    %1462 = memref.load %arg6[%c1_800, %c2_801] : memref<4x4xf32, #tpu.memory_space<smem>>
    %1463 = vector.broadcast %1462 : f32 to vector<6x6xf32>
    %1464 = arith.mulf %1463, %1404 : vector<6x6xf32>
    %1465 = arith.addf %1461, %1464 : vector<6x6xf32>
    %c1_802 = arith.constant 1 : index
    %c3_803 = arith.constant 3 : index
    %1466 = memref.load %arg6[%c1_802, %c3_803] : memref<4x4xf32, #tpu.memory_space<smem>>
    %1467 = vector.broadcast %1466 : f32 to vector<6x6xf32>
    %1468 = arith.mulf %1467, %1418 : vector<6x6xf32>
    %1469 = arith.addf %1465, %1468 : vector<6x6xf32>
    %c1_804 = arith.constant 1 : index
    %1470 = memref.load %arg7[%c1_804] : memref<4xf32, #tpu.memory_space<smem>>
    %cst_805 = arith.constant 0.000000e+00 : f32
    %1471 = arith.cmpf oge, %1470, %cst_805 : f32
    %cst_806 = arith.constant 1.000000e+00 : f32
    %cst_807 = arith.constant -1.000000e+00 : f32
    %1472 = arith.select %1471, %cst_806, %cst_807 : f32
    %1473 = vector.broadcast %1472 : f32 to vector<8x8xf32>
    %c0_808 = arith.constant 0 : index
    %c1_809 = arith.constant 1 : index
    %c0_810 = arith.constant 0 : index
    %c0_811 = arith.constant 0 : index
    %1474 = vector.load %arg8[%c0_808, %c1_809, %c0_810, %c0_811] : memref<1x4x8x8xf32, #tpu.memory_space<vmem>>, vector<1x1x8x8xf32>
    %1475 = vector.shape_cast %1474 : vector<1x1x8x8xf32> to vector<8x8xf32>
    %1476 = vector.shape_cast %1473 : vector<8x8xf32> to vector<1x1x8x8xf32>
    tpu.vector_store %arg8[%c0_808, %c1_809, %c0_810, %c0_811], %1476 {strides = array<i32>} : memref<1x4x8x8xf32, #tpu.memory_space<vmem>>, vector<1x1x8x8xf32>,
    %cst_812 = arith.constant 0.000000e+00 : f32
    %1477 = vector.broadcast %cst_812 : f32 to vector<6x6xf32>
    %1478 = arith.cmpf oge, %1469, %1477 : vector<6x6xf32>
    %cst_813 = arith.constant 1.000000e+00 : f32
    %cst_814 = arith.constant -1.000000e+00 : f32
    %1479 = vector.broadcast %cst_813 : f32 to vector<6x6xf32>
    %1480 = vector.broadcast %cst_814 : f32 to vector<6x6xf32>
    %1481 = arith.select %1478, %1479, %1480 : vector<6x6xi1>, vector<6x6xf32>
    %c0_815 = arith.constant 0 : index
    %c1_816 = arith.constant 1 : index
    %c1_817 = arith.constant 1 : index
    %c1_818 = arith.constant 1 : index
    %1482 = vector.load %arg8[%c0_815, %c1_816, %c1_817, %c1_818] : memref<1x4x8x8xf32, #tpu.memory_space<vmem>>, vector<1x1x6x6xf32>
    %1483 = vector.shape_cast %1482 : vector<1x1x6x6xf32> to vector<6x6xf32>
    %1484 = vector.shape_cast %1481 : vector<6x6xf32> to vector<1x1x6x6xf32>
    tpu.vector_store %arg8[%c0_815, %c1_816, %c1_817, %c1_818], %1484 {strides = array<i32>} : memref<1x4x8x8xf32, #tpu.memory_space<vmem>>, vector<1x1x6x6xf32>,
    %c2_819 = arith.constant 2 : index
    %1485 = memref.load %arg7[%c2_819] : memref<4xf32, #tpu.memory_space<smem>>
    %1486 = vector.broadcast %1485 : f32 to vector<6x6xf32>
    %c2_820 = arith.constant 2 : index
    %c0_821 = arith.constant 0 : index
    %1487 = memref.load %arg6[%c2_820, %c0_821] : memref<4x4xf32, #tpu.memory_space<smem>>
    %1488 = vector.broadcast %1487 : f32 to vector<6x6xf32>
    %1489 = arith.mulf %1488, %1376 : vector<6x6xf32>
    %1490 = arith.addf %1486, %1489 : vector<6x6xf32>
    %c2_822 = arith.constant 2 : index
    %c1_823 = arith.constant 1 : index
    %1491 = memref.load %arg6[%c2_822, %c1_823] : memref<4x4xf32, #tpu.memory_space<smem>>
    %1492 = vector.broadcast %1491 : f32 to vector<6x6xf32>
    %1493 = arith.mulf %1492, %1390 : vector<6x6xf32>
    %1494 = arith.addf %1490, %1493 : vector<6x6xf32>
    %c2_824 = arith.constant 2 : index
    %c2_825 = arith.constant 2 : index
    %1495 = memref.load %arg6[%c2_824, %c2_825] : memref<4x4xf32, #tpu.memory_space<smem>>
    %1496 = vector.broadcast %1495 : f32 to vector<6x6xf32>
    %1497 = arith.mulf %1496, %1404 : vector<6x6xf32>
    %1498 = arith.addf %1494, %1497 : vector<6x6xf32>
    %c2_826 = arith.constant 2 : index
    %c3_827 = arith.constant 3 : index
    %1499 = memref.load %arg6[%c2_826, %c3_827] : memref<4x4xf32, #tpu.memory_space<smem>>
    %1500 = vector.broadcast %1499 : f32 to vector<6x6xf32>
    %1501 = arith.mulf %1500, %1418 : vector<6x6xf32>
    %1502 = arith.addf %1498, %1501 : vector<6x6xf32>
    %c2_828 = arith.constant 2 : index
    %1503 = memref.load %arg7[%c2_828] : memref<4xf32, #tpu.memory_space<smem>>
    %cst_829 = arith.constant 0.000000e+00 : f32
    %1504 = arith.cmpf oge, %1503, %cst_829 : f32
    %cst_830 = arith.constant 1.000000e+00 : f32
    %cst_831 = arith.constant -1.000000e+00 : f32
    %1505 = arith.select %1504, %cst_830, %cst_831 : f32
    %1506 = vector.broadcast %1505 : f32 to vector<8x8xf32>
    %c0_832 = arith.constant 0 : index
    %c2_833 = arith.constant 2 : index
    %c0_834 = arith.constant 0 : index
    %c0_835 = arith.constant 0 : index
    %1507 = vector.load %arg8[%c0_832, %c2_833, %c0_834, %c0_835] : memref<1x4x8x8xf32, #tpu.memory_space<vmem>>, vector<1x1x8x8xf32>
    %1508 = vector.shape_cast %1507 : vector<1x1x8x8xf32> to vector<8x8xf32>
    %1509 = vector.shape_cast %1506 : vector<8x8xf32> to vector<1x1x8x8xf32>
    tpu.vector_store %arg8[%c0_832, %c2_833, %c0_834, %c0_835], %1509 {strides = array<i32>} : memref<1x4x8x8xf32, #tpu.memory_space<vmem>>, vector<1x1x8x8xf32>,
    %cst_836 = arith.constant 0.000000e+00 : f32
    %1510 = vector.broadcast %cst_836 : f32 to vector<6x6xf32>
    %1511 = arith.cmpf oge, %1502, %1510 : vector<6x6xf32>
    %cst_837 = arith.constant 1.000000e+00 : f32
    %cst_838 = arith.constant -1.000000e+00 : f32
    %1512 = vector.broadcast %cst_837 : f32 to vector<6x6xf32>
    %1513 = vector.broadcast %cst_838 : f32 to vector<6x6xf32>
    %1514 = arith.select %1511, %1512, %1513 : vector<6x6xi1>, vector<6x6xf32>
    %c0_839 = arith.constant 0 : index
    %c2_840 = arith.constant 2 : index
    %c1_841 = arith.constant 1 : index
    %c1_842 = arith.constant 1 : index
    %1515 = vector.load %arg8[%c0_839, %c2_840, %c1_841, %c1_842] : memref<1x4x8x8xf32, #tpu.memory_space<vmem>>, vector<1x1x6x6xf32>
    %1516 = vector.shape_cast %1515 : vector<1x1x6x6xf32> to vector<6x6xf32>
    %1517 = vector.shape_cast %1514 : vector<6x6xf32> to vector<1x1x6x6xf32>
    tpu.vector_store %arg8[%c0_839, %c2_840, %c1_841, %c1_842], %1517 {strides = array<i32>} : memref<1x4x8x8xf32, #tpu.memory_space<vmem>>, vector<1x1x6x6xf32>,
    %c3_843 = arith.constant 3 : index
    %1518 = memref.load %arg7[%c3_843] : memref<4xf32, #tpu.memory_space<smem>>
    %1519 = vector.broadcast %1518 : f32 to vector<6x6xf32>
    %c3_844 = arith.constant 3 : index
    %c0_845 = arith.constant 0 : index
    %1520 = memref.load %arg6[%c3_844, %c0_845] : memref<4x4xf32, #tpu.memory_space<smem>>
    %1521 = vector.broadcast %1520 : f32 to vector<6x6xf32>
    %1522 = arith.mulf %1521, %1376 : vector<6x6xf32>
    %1523 = arith.addf %1519, %1522 : vector<6x6xf32>
    %c3_846 = arith.constant 3 : index
    %c1_847 = arith.constant 1 : index
    %1524 = memref.load %arg6[%c3_846, %c1_847] : memref<4x4xf32, #tpu.memory_space<smem>>
    %1525 = vector.broadcast %1524 : f32 to vector<6x6xf32>
    %1526 = arith.mulf %1525, %1390 : vector<6x6xf32>
    %1527 = arith.addf %1523, %1526 : vector<6x6xf32>
    %c3_848 = arith.constant 3 : index
    %c2_849 = arith.constant 2 : index
    %1528 = memref.load %arg6[%c3_848, %c2_849] : memref<4x4xf32, #tpu.memory_space<smem>>
    %1529 = vector.broadcast %1528 : f32 to vector<6x6xf32>
    %1530 = arith.mulf %1529, %1404 : vector<6x6xf32>
    %1531 = arith.addf %1527, %1530 : vector<6x6xf32>
    %c3_850 = arith.constant 3 : index
    %c3_851 = arith.constant 3 : index
    %1532 = memref.load %arg6[%c3_850, %c3_851] : memref<4x4xf32, #tpu.memory_space<smem>>
    %1533 = vector.broadcast %1532 : f32 to vector<6x6xf32>
    %1534 = arith.mulf %1533, %1418 : vector<6x6xf32>
    %1535 = arith.addf %1531, %1534 : vector<6x6xf32>
    %c3_852 = arith.constant 3 : index
    %1536 = memref.load %arg7[%c3_852] : memref<4xf32, #tpu.memory_space<smem>>
    %cst_853 = arith.constant 0.000000e+00 : f32
    %1537 = arith.cmpf oge, %1536, %cst_853 : f32
    %cst_854 = arith.constant 1.000000e+00 : f32
    %cst_855 = arith.constant -1.000000e+00 : f32
    %1538 = arith.select %1537, %cst_854, %cst_855 : f32
    %1539 = vector.broadcast %1538 : f32 to vector<8x8xf32>
    %c0_856 = arith.constant 0 : index
    %c3_857 = arith.constant 3 : index
    %c0_858 = arith.constant 0 : index
    %c0_859 = arith.constant 0 : index
    %1540 = vector.load %arg8[%c0_856, %c3_857, %c0_858, %c0_859] : memref<1x4x8x8xf32, #tpu.memory_space<vmem>>, vector<1x1x8x8xf32>
    %1541 = vector.shape_cast %1540 : vector<1x1x8x8xf32> to vector<8x8xf32>
    %1542 = vector.shape_cast %1539 : vector<8x8xf32> to vector<1x1x8x8xf32>
    tpu.vector_store %arg8[%c0_856, %c3_857, %c0_858, %c0_859], %1542 {strides = array<i32>} : memref<1x4x8x8xf32, #tpu.memory_space<vmem>>, vector<1x1x8x8xf32>,
    %cst_860 = arith.constant 0.000000e+00 : f32
    %1543 = vector.broadcast %cst_860 : f32 to vector<6x6xf32>
    %1544 = arith.cmpf oge, %1535, %1543 : vector<6x6xf32>
    %cst_861 = arith.constant 1.000000e+00 : f32
    %cst_862 = arith.constant -1.000000e+00 : f32
    %1545 = vector.broadcast %cst_861 : f32 to vector<6x6xf32>
    %1546 = vector.broadcast %cst_862 : f32 to vector<6x6xf32>
    %1547 = arith.select %1544, %1545, %1546 : vector<6x6xi1>, vector<6x6xf32>
    %c0_863 = arith.constant 0 : index
    %c3_864 = arith.constant 3 : index
    %c1_865 = arith.constant 1 : index
    %c1_866 = arith.constant 1 : index
    %1548 = vector.load %arg8[%c0_863, %c3_864, %c1_865, %c1_866] : memref<1x4x8x8xf32, #tpu.memory_space<vmem>>, vector<1x1x6x6xf32>
    %1549 = vector.shape_cast %1548 : vector<1x1x6x6xf32> to vector<6x6xf32>
    %1550 = vector.shape_cast %1547 : vector<6x6xf32> to vector<1x1x6x6xf32>
    tpu.vector_store %arg8[%c0_863, %c3_864, %c1_865, %c1_866], %1550 {strides = array<i32>} : memref<1x4x8x8xf32, #tpu.memory_space<vmem>>, vector<1x1x6x6xf32>,
    return
  }
  func.func @transform_0(%arg0: i32) -> (i32, i32, i32, i32) {
    %c0_i32 = arith.constant 0 : i32
    %c0_i32_0 = arith.constant 0 : i32
    %c0_i32_1 = arith.constant 0 : i32
    %c0_i32_2 = arith.constant 0 : i32
    return %arg0, %c0_i32, %c0_i32_0, %c0_i32_1 : i32, i32, i32, i32
  }
  func.func @transform_1(%arg0: i32) -> (i32, i32) {
    %c0_i32 = arith.constant 0 : i32
    %c0_i32_0 = arith.constant 0 : i32
    %c0_i32_1 = arith.constant 0 : i32
    return %c0_i32, %c0_i32_0 : i32, i32
  }
  func.func @transform_2(%arg0: i32) -> i32 {
    %c0_i32 = arith.constant 0 : i32
    %c0_i32_0 = arith.constant 0 : i32
    return %c0_i32 : i32
  }
  func.func @transform_3(%arg0: i32) -> (i32, i32) {
    %c0_i32 = arith.constant 0 : i32
    %c0_i32_0 = arith.constant 0 : i32
    %c0_i32_1 = arith.constant 0 : i32
    return %c0_i32, %c0_i32_0 : i32, i32
  }
  func.func @transform_4(%arg0: i32) -> i32 {
    %c0_i32 = arith.constant 0 : i32
    %c0_i32_0 = arith.constant 0 : i32
    return %c0_i32 : i32
  }
  func.func @transform_5(%arg0: i32) -> (i32, i32) {
    %c0_i32 = arith.constant 0 : i32
    %c0_i32_0 = arith.constant 0 : i32
    %c0_i32_1 = arith.constant 0 : i32
    return %c0_i32, %c0_i32_0 : i32, i32
  }
  func.func @transform_6(%arg0: i32) -> i32 {
    %c0_i32 = arith.constant 0 : i32
    %c0_i32_0 = arith.constant 0 : i32
    return %c0_i32 : i32
  }
  func.func @transform_7(%arg0: i32) -> (i32, i32, i32, i32) {
    %c0_i32 = arith.constant 0 : i32
    %c0_i32_0 = arith.constant 0 : i32
    %c0_i32_1 = arith.constant 0 : i32
    %c0_i32_2 = arith.constant 0 : i32
    return %arg0, %c0_i32, %c0_i32_0, %c0_i32_1 : i32, i32, i32, i32
  }
}

</mosaic_0001>

<bundles_post_ra>
// kernel: haar_block_pallas.1
= control target key start
LH: loop header
LB: loop body
LE: loop exit
PB: predicated region body
PF: predicated region fallthrough
CT: control target
= control target key end

     0   :  { %s8347_s0 = inlined_call_operand.vmem [shape: f32[2,2,16,16], index: 0, kind: input, shape index: {}]   ;;  %s8348_s1 = inlined_call_operand.vmem [shape: f32[10,25], index: 1, kind: input, shape index: {}]   ;;  %s8349_s2 = inlined_call_operand.vmem [shape: f32[10], index: 2, kind: input, shape index: {}]   ;;  %s8350_s3 = inlined_call_operand.vmem [shape: f32[4,10], index: 3, kind: input, shape index: {}]   ;;  %s8351_s4 = inlined_call_operand.vmem [shape: f32[4], index: 4, kind: input, shape index: {}]   ;;  %s8352_s5 = inlined_call_operand.vmem [shape: f32[4,4], index: 5, kind: input, shape index: {}]   ;;  %s8353_s6 = inlined_call_operand.vmem [shape: f32[4], index: 6, kind: input, shape index: {}]   ;;  %s8354_s7 = inlined_call_operand.hbm [shape: f32[2,4,8,8], index: 7, kind: output, shape index: {}]  }
   0x1   :  { %8381 = sst [smem:[#allocation62_spill]] %s8347_s0 }
   0x2   :  { %8382 = sst [smem:[#allocation63_spill]] %s8348_s1 }
   0x3   :  { %8383 = sst [smem:[#allocation64_spill]] %s8349_s2 }
   0x4   :  { %8384 = sst [smem:[#allocation65_spill]] %s8350_s3 }
   0x5   :  { %8385 = sst [smem:[#allocation66_spill]] %s8351_s4 }
   0x6   :  { %8386 = sst [smem:[#allocation67_spill]] %s8352_s5 }
   0x7   :  { %8387 = sst [smem:[#allocation68_spill]] %s8353_s6 }
   0x8   :  { %8388 = sst [smem:[#allocation69_spill]] %s8354_s7 }
   0x9   :  { %12 = vsyncpa [#allocation5], 0 }
   0xa   :  { %13 = vsyncpa [#allocation7], 0 }
   0xb   :  { %14 = vsyncpa [#allocation10], 0 }
   0xc   :  { %15 = vsyncpa [#allocation13], 0 }
   0xd   :  { %16 = vsyncpa [#allocation4], 0 }
   0xe   :  { %18 = vsyncpa [#allocation4 + $0x1], 0  ;;  %s5000_s24 = smov 0   ;;  %s5002_s25 = smov 0  }
   0xf   :  { %s5004_s26 = smov 0   ;;  %s5006_s27 = smov 0  }
  0x10 LB: > { %8389 = sst [smem:[#allocation20_spill]] %s4924_s24  ;;  %s5021_s28 = sadd.s32 4294967295, %s4936_s27   ;;  %s4936_s27 = sphi %s5006_s27, %s8725_s27   ;;  %s4932_s26 = sphi %s5004_s26, %s8728_s26   ;;  %s4928_s25 = sphi %s5002_s25, %s8727_s25   ;;  %s4924_s24 = sphi %s5000_s24, %s8726_s24  }
  0x11   : > { %8390 = sst [smem:[#allocation21_spill]] %s4928_s25  ;;  %s4245_s29 = sadd.s32 4294967294, %s4936_s27  }
  0x12   : > { %8391 = sst [smem:[#allocation22_spill]] %s4932_s26  ;;  %s5025_s30 = sadd.s32 1, %s4936_s27  }
  0x13   : > { %8392 = sst [smem:[#allocation23_spill]] %s4936_s27  ;;  %s183_s8 = sadd.s32 1, %s4932_s26 }
  0x14   : > { %8393 = sst [smem:[#allocation24_spill]] %s5021_s28  ;;  %s180_s9 = ssub.s32 %s4936_s27, %s5025_s30 }
  0x15   : > { %8394 = sst [smem:[#allocation25_spill]] %s5025_s30  ;;  %p193_p0 = scmp.ne.s32.totalorder %s4932_s26, %s4928_s25 }
  0x16   : > { %p181_p1 = scmp.eq.s32.totalorder %s180_s9, 0  ;;  %p194_p2 = scmp.eq.s32.totalorder %s5021_s28, 1 }
  0x17   : > { %p199_p3 = scmp.ne.s32.totalorder %s4928_s25, %s4924_s24  ;;  %p200_p4 = scmp.eq.s32.totalorder %s4245_s29, 1 }
  0x18   : > { %s5036_s10 = scalar_select %p181_p1, %s4932_s26, %s183_s8  }
  0x19   : > { %p5038_p5 = por %p194_p2, %p193_p0  ;;  %p5042_p6 = por %p200_p4, %p199_p3 }
  0x1a   : > { %8395 = sst [smem:[#allocation26_spill]] %s5036_s10  ;;  %p4246_p7 = scmp.ge.s32.totalorder %s4936_s27, 1 }
  0x1b   : > { %s8396_s11 = scalar_select %p5038_p5, 1, 0 }
  0x1c   : > { %s8398_s12 = scalar_select %p5042_p6, 1, 0 }
  0x1d   : > { %8397 = sst [smem:[#allocation27_spill]] %s8396_s11  ;;  %p207_p8 = scmp.lt.s32.totalorder %s4936_s27, 3 }
  0x1e   : > { %8399 = sst [smem:[#allocation28_spill]] %s8398_s12  ;;  %p8355_p9 = scmp.eq.s32.totalorder %s5021_s28, 0 }
  0x1f   : > { %p5049_p10 = pnand %p4246_p7, %p207_p8  ;;  %s8401_s2 = sld [smem:[#allocation64_spill]] }
  0x20   : > { %s8402_s4 = sld [smem:[#allocation66_spill]] }
  0x21   : > { %s8400_s13 = scalar_select %p5049_p10, 1, 0 }
  0x22   : > { %p4621_p11 = pneg %p5049_p10  ;;  %s8404_s1 = sld [smem:[#allocation63_spill]] }
  0x24   : > { %p5063_p12 = pnand %p8355_p9, %p4621_p11 }
  0x25   : > { %s233_s16 = sshll.u32 %s8401_s2, 4  ;;  %s234_s16 = int_to_ptr.vmem [resolvable:$true] %s233_s16 }
  0x26   : > { %s255_s19 = sshll.u32 %s8402_s4, 4  ;;  %s4770_s29 = scalar_lea.vmem %s234_s16, 16  ;;  %s256_s19 = int_to_ptr.vmem [resolvable:$true] %s255_s19 }
  0x27   : > { %p4771_p13 = scmp.ne.s32.totalorder %s234_s16, %s4770_s29  ;;  %p5074_p0 = pneg %p5063_p12 }
  0x28   : > { %s219_s23 = sshll.u32 %s8404_s1, 4  ;;  %p4778_p3 = scmp.lt.s32.totalorder %s234_s16, %s234_s16  ;;  %s5070_s23 = int_to_ptr.vmem [resolvable:$true] %s219_s23 }
  0x29   : > { %p4773_p1 = pnand %p5074_p0, %p4771_p13  ;;  %p4779_p4 = scmp.lt.s32.totalorder %s4770_s29, %s4770_s29 }
  0x2b   : > { %p4774_p2 = pneg %p4773_p1  ;;  %p4780_p7 = por %p4779_p4, %p4778_p3 }
  0x2d   : > { %p4781_p8 = pnand %p4780_p7, %p4774_p2 }
  0x2f   : > { %4784 = shalt.err (!%p4781_p8)
}
  0x30   : > { %s4938_s9 = smov [#allocation6]   ;;  %s4785_s14 = scalar_lea.vmem %s256_s19, 16 }
  0x31   : > { %4627 = dma.vmem_to_smem (!%p5063_p12), %s234_s16, 16, %s4938_s9, [#allocation7]  }
  0x32   : > { %p4786_p11 = scmp.ne.s32.totalorder %s256_s19, %s4785_s14  ;;  %p4793_p5 = scmp.lt.s32.totalorder %s256_s19, %s256_s19 }
  0x33   : > { %p4794_p10 = scmp.lt.s32.totalorder %s4785_s14, %s4785_s14 }
  0x34   : > { %p4788_p9 = pnand %p4786_p11, %p5074_p0 }
  0x35   : > { %p4795_p13 = por %p4794_p10, %p4793_p5 }
  0x36   : > { %p4789_p6 = pneg %p4788_p9 }
  0x38   : > { %p4796_p1 = pnand %p4795_p13, %p4789_p6 }
  0x3a   : > { %4799 = shalt.err (!%p4796_p1)
}
  0x3b   : > { %s4939_s15 = smov [#allocation9]   ;;  %s8406_s3 = sld [smem:[#allocation65_spill]] }
  0x3c   : > { %4633 = dma.vmem_to_smem (!%p5063_p12), %s256_s19, 16, %s4939_s15, [#allocation10]  }
  0x3d   : > { %s4800_s21 = scalar_lea.vmem %s5070_s23, 256  ;;  %p4808_p5 = scmp.lt.s32.totalorder %s5070_s23, %s5070_s23 }
  0x3e   : > { %p4801_p2 = scmp.ne.s32.totalorder %s5070_s23, %s4800_s21  ;;  %p4809_p6 = scmp.lt.s32.totalorder %s4800_s21, %s4800_s21 }
  0x40   : > { %p4803_p9 = pnand %p4801_p2, %p5074_p0  ;;  %p4810_p10 = por %p4809_p6, %p4808_p5 }
  0x41   : > { %s244_s18 = sshll.u32 %s8406_s3, 4  ;;  %s245_s18 = int_to_ptr.vmem [resolvable:$true] %s244_s18 }
  0x42   : > { %p4804_p3 = pneg %p4803_p9 }
  0x44   : > { %p4811_p4 = pnand %p4810_p10, %p4804_p3 }
  0x46   : > { %4814 = shalt.err (!%p4811_p4)
}
  0x47   : > { %s4940_s22 = smov [#allocation3]   ;;  %s4941_s19 = smov 128  }
  0x48   : > { %s4942_s29 = smov 8   ;;  %s4815_s9 = scalar_lea.vmem %s245_s18, 64 }
  0x49   : > { %4624 = dma.vmem_to_smem (!%p5063_p12), %s5070_s23, 256, %s4940_s22, [#allocation5], %s4941_s19, %s4941_s19, %s4942_s29  }
  0x4a   : > { %p4816_p7 = scmp.ne.s32.totalorder %s245_s18, %s4815_s9  ;;  %p4823_p13 = scmp.lt.s32.totalorder %s245_s18, %s245_s18 }
  0x4b   : > { %p4824_p1 = scmp.lt.s32.totalorder %s4815_s9, %s4815_s9 }
  0x4c   : > { %p4818_p8 = pnand %p4816_p7, %p5074_p0 }
  0x4d   : > { %p4825_p2 = por %p4824_p1, %p4823_p13 }
  0x4e   : > { %p4819_p11 = pneg %p4818_p8 }
  0x50   : > { %p4826_p9 = pnand %p4825_p2, %p4819_p11 }
  0x52   : > { %4829 = shalt.err (!%p4826_p9)
}
  0x53   : > { %s4943_s14 = smov [#allocation8]   ;;  %s8407_s5 = sld [smem:[#allocation67_spill]] }
  0x54   : > { %4630 = dma.vmem_to_smem (!%p5063_p12), %s245_s18, 64, %s4943_s14, [#allocation7]  }
  0x55   : > { %s8408_s6 = sld [smem:[#allocation68_spill]] }
  0x59   : > { %s266_s23 = sshll.u32 %s8407_s5, 4  ;;  %s267_s23 = int_to_ptr.vmem [resolvable:$true] %s266_s23 }
  0x5a   : > { %s4830_s19 = scalar_lea.vmem %s267_s23, 64  ;;  %p4838_p10 = scmp.lt.s32.totalorder %s267_s23, %s267_s23 }
  0x5b   : > { %s277_s22 = sshll.u32 %s8408_s6, 4  ;;  %p4831_p3 = scmp.ne.s32.totalorder %s267_s23, %s4830_s19  ;;  %s278_s22 = int_to_ptr.vmem [resolvable:$true] %s277_s22 }
  0x5c   : > { %p4839_p4 = scmp.lt.s32.totalorder %s4830_s19, %s4830_s19 }
  0x5d   : > { %p4833_p5 = pnand %p4831_p3, %p5074_p0 }
  0x5e   : > { %p4840_p7 = por %p4839_p4, %p4838_p10 }
  0x5f   : > { %p4834_p6 = pneg %p4833_p5 }
  0x61   : > { %p4841_p8 = pnand %p4840_p7, %p4834_p6 }
  0x63   : > { %4844 = shalt.err (!%p4841_p8)
}
  0x64   : > { %s4944_s18 = smov [#allocation11]   ;;  %s4845_s29 = scalar_lea.vmem %s278_s22, 16 }
  0x65   : > { %4636 = dma.vmem_to_smem (!%p5063_p12), %s267_s23, 64, %s4944_s18, [#allocation10]  }
  0x66   : > { %p4846_p11 = scmp.ne.s32.totalorder %s278_s22, %s4845_s29  ;;  %p4853_p2 = scmp.lt.s32.totalorder %s278_s22, %s278_s22 }
  0x67   : > { %p4854_p9 = scmp.lt.s32.totalorder %s4845_s29, %s4845_s29 }
  0x68   : > { %p4848_p13 = pnand %p4846_p11, %p5074_p0 }
  0x69   : > { %p4855_p3 = por %p4854_p9, %p4853_p2 }
  0x6a   : > { %p4849_p1 = pneg %p4848_p13 }
  0x6c   : > { %p4856_p5 = pnand %p4855_p3, %p4849_p1 }
  0x6e   : > { %4859 = shalt.err (!%p4856_p5)
}
  0x6f   : > { %s4945_s9 = smov [#allocation12]   ;;  %p8409_p6 = scmp.ne.s32.totalorder %s8400_s13, 0 }
  0x70   : > { %4639 = dma.vmem_to_smem (!%p5063_p12), %s278_s22, 16, %s4945_s9, [#allocation13]  }
  0x71   : > { %298 = sbr.rel (%p8409_p6) target bundleno = 1487 (0x5cf), region = 48 }
  0x76   : > { %p8410_p10 = scmp.eq.s32.totalorder %s5021_s28, 0 }
  0x78   : > { %4903 = dma.done.wait (%p8410_p10), [#allocation5], 256   ;;  %p8411_p4 = pmov %p8410_p10 }
  0x7a   : > { %4905 = vsyncadd (%p8411_p4), [#allocation5], 4294967040  ;;  %p8412_p0 = pmov %p8411_p4 }
  0x7c   : > { %4907 = dma.done.wait (%p8412_p0), [#allocation7], 80   ;;  %p8413_p7 = pmov %p8412_p0 }
  0x7d   : > { %p8414_p8 = pmov %p8412_p0 }
  0x7e   : > { %4909 = vsyncadd (%p8413_p7), [#allocation7], 4294967216 }
  0x7f   : > { %4911 = dma.done.wait (%p8414_p8), [#allocation10], 80   ;;  %p8415_p12 = pmov %p8412_p0 }
  0x80   : > { %p8416_p11 = pmov %p8412_p0 }
  0x81   : > { %4913 = vsyncadd (%p8415_p12), [#allocation10], 4294967216 }
  0x82   : > { %4915 = dma.done.wait (%p8416_p11), [#allocation13], 16   ;;  %p8417_p13 = pmov %p8412_p0 }
  0x84   : > { %4917 = vsyncadd (%p8417_p13), [#allocation13], 4294967280 }
  0x85   : > { %324 = sfence }
  0x86   : > { %p351_p1 = scmp.lt.s32.totalorder %s5021_s28, 1  ;;  %vm360_vm0 = vcmask 162816   ;;  %vm363_vm1 = vcmask 158720   ;;  %v4946_v0 = vmov 0.0   ;;  %s8418_s0 = sld [smem:[#allocation62_spill]]  ;;  %vm384_vm2 = vcmask 146448  }
  0x87   : > { %361 = vst.msk [vmem:[#allocation2] sm:$0xff] %vm360_vm0, %v4946_v0  ;;  %362 = vst.msk [vmem:[#allocation2 + $0x8] sm:$0xff] %vm360_vm0, %v4946_v0  ;;  %s4947_s17 = smov 2   ;;  %s4282_s23 = sld [smem:[#allocation3 + $0x1]] }
  0x88   : > { %365 = vst.msk [vmem:[#allocation2 + $0x18] sm:$0xff] %vm360_vm0, %v4946_v0  ;;  %366 = vst.msk [vmem:[#allocation2 + $0x20] sm:$0xff] %vm360_vm0, %v4946_v0  ;;  %s352_s13 = scalar_select %p351_p1, %s5021_s28, 1 }
  0x89   : > { %364 = vst.msk [vmem:[#allocation2 + $0x10] sm:$0xf] %vm363_vm1, %v4946_v0  ;;  %367 = vst.msk [vmem:[#allocation2 + $0x28] sm:$0xf] %vm363_vm1, %v4946_v0  ;;  %s4283_s16 = sld [smem:[#allocation3 + $0x81]]  ;;  %s8368_s19 = smov 127  }
  0x8a   : > { %s4593_s20 = sshll.u32 %s352_s13, 5  ;;  %s4284_s21 = sld [smem:[#allocation3 + $0x101]] }
  0x8b   : > { %s4285_s22 = sld [smem:[#allocation3 + $0x181]]  ;;  %s8438_s10 = smov 126  }
  0x8c   : > { %s355_s15 = scalar_lea.vmem %s8418_s0, %s4593_s20  ;;  %s4286_s18 = sld [smem:[#allocation3 + $0x201]] }
  0x8d   : > { %v356_v1 = vld [vmem:[%s355_s15] sm:$0xff]  ;;  %v358_v2 = vld [vmem:[%s355_s15 + $0x10] sm:$0xff]  ;;  %v357_v3 = vld [vmem:[%s355_s15 + $0x8] sm:$0xff]  ;;  %v475_v9 = vstv %s4282_s23  ;;  %s4287_s29 = sld [smem:[#allocation3 + $0x281]] }
  0x8e   : > { %372 = vrot.lane.b32.xlu0 %v356_v1, %s4947_s17  ;;  %376 = vrot.lane.b32.xlu1 %v358_v2, %s4947_s17  ;;  %v359_v4 = vld [vmem:[%s355_s15 + $0x18] sm:$0xff]  ;;  %s4288_s9 = sld [smem:[#allocation3 + $0x301]] }
  0x8f   : > { %v489_v12 = vstv %s4283_s16  ;;  %s4289_s13 = sld [smem:[#allocation3 + $0x381]]  ;;  %s8362_s16 = smov 126  }
  0x90   : > { %v503_v16 = vstv %s4284_s21  ;;  %s4290_s20 = sld [smem:[#allocation3 + $0x401]] }
  0x91   : > { %v517_v19 = vstv %s4285_s22  ;;  %s4291_s8 = sld [smem:[#allocation3 + $0x481]] }
  0x92   : > { %374 = vrot.lane.b32.xlu0 %v357_v3, %s4947_s17  ;;  %378 = vrot.lane.b32.xlu1 %v359_v4, %s4947_s17  ;;  %v531_v22 = vstv %s4286_s18  ;;  %s4292_s14 = sld [smem:[#allocation3 + $0x2]] }
  0x93   : > { %v545_v24 = vstv %s4287_s29  ;;  %s4293_s15 = sld [smem:[#allocation3 + $0x82]] }
  0x94   : > { %v559_v30 = vstv %s4288_s9  ;;  %s4294_s17 = sld [smem:[#allocation3 + $0x102]] }
  0x95   : > { %v573_v33 = vstv %s4289_s13  ;;  %s4295_s23 = sld [smem:[#allocation3 + $0x182]] }
  0x96   : > { %v587_v36 = vstv %s4290_s20  ;;  %s4296_s21 = sld [smem:[#allocation3 + $0x202]] }
  0x97   : > { %v601_v39 = vstv %s4291_s8  ;;  %s4297_s22 = sld [smem:[#allocation3 + $0x282]] }
  0x98   : > { %v615_v42 = vstv %s4292_s14  ;;  %s4298_s18 = sld [smem:[#allocation3 + $0x302]] }
  0x99   : > { %v629_v45 = vstv %s4293_s15  ;;  %s4299_s29 = sld [smem:[#allocation3 + $0x382]] }
  0x9a   : > { %v643_v48 = vstv %s4294_s17  ;;  %s4300_s9 = sld [smem:[#allocation3 + $0x402]]  ;;  %s8360_s17 = smov 125  }
  0x9b   : > { %v657_v51 = vstv %s4295_s23  ;;  %s4301_s13 = sld [smem:[#allocation3 + $0x482]] }
  0x9c   : > { %v671_v54 = vstv %s4296_s21  ;;  %s4302_s20 = sld [smem:[#allocation3 + $0x3]] }
  0x9d   : > { %v685_v57 = vstv %s4297_s22  ;;  %s4303_s8 = sld [smem:[#allocation3 + $0x83]] }
  0x9e   : > { %v699_v60 = vstv %s4298_s18  ;;  %s4304_s14 = sld [smem:[#allocation3 + $0x103]] }
  0x9f   : > { %v713_v63 = vstv %s4299_s29  ;;  %s4305_s15 = sld [smem:[#allocation3 + $0x183]] }
  0xa0   : > { %v727_v2 = vstv %s4300_s9  ;;  %s4306_s23 = sld [smem:[#allocation3 + $0x203]] }
  0xa1   : > { %s4307_s21 = sld [smem:[#allocation3 + $0x283]] }
  0xa2   : > { %s4308_s22 = sld [smem:[#allocation3 + $0x303]] }
  0xa3   : > { %s4309_s18 = sld [smem:[#allocation3 + $0x383]] }
  0xa4   : > { %s4310_s29 = sld [smem:[#allocation3 + $0x403]] }
  0xa5   : > { %s4311_s9 = sld [smem:[#allocation3 + $0x483]] }
  0xa6   : > { %s5485_s0 = sld [smem:[#allocation6 + $0x5]] }
  0xa7   : > { %s5489_s1 = sld [smem:[#allocation3 + $0x280]] }
  0xa8   : > { %s5491_s2 = sld [smem:[#allocation6 + $0x6]] }
  0xa9   : > { %s5502_s3 = sld [smem:[#allocation3 + $0x300]] }
  0xaa   : > { %s5506_s4 = sld [smem:[#allocation6 + $0x7]] }
  0xab   : > { %s5508_s5 = sld [smem:[#allocation3 + $0x380]] }
  0xac   : > { %s5519_s6 = sld [smem:[#allocation6 + $0x8]] }
  0xad   : > { %s5523_s26 = sld [smem:[#allocation3 + $0x400]] }
  0xae   : > { %s5525_s30 = sld [smem:[#allocation6 + $0x9]] }
  0xaf   : > { %s5536_s12 = sld [smem:[#allocation3 + $0x480]] }
  0xb0   : > { %s5551_s24 = sld [smem:[#allocation3 + $0x387]] }
  0xb1   : > { %s5555_s27 = sld [smem:[#allocation3 + $0x407]] }
  0xb2   : > { %s5557_s7 = sld [smem:[#allocation3 + $0x487]] }
  0xb3   : > { %s5568_s11 = sld [smem:[#allocation3 + $0x88]] }
  0xb4   : > { %s5572_s28 = sld [smem:[#allocation3 + $0x108]] }
  0xb5   : > { %s5578_s25 = sld [smem:[#allocation3 + $0x188]] }
 0x100   : > { %v373_v5 = vpop.permute.xlu0 %372  ;;  %v377_v6 = vpop.permute.xlu1 %376 }
 0x101   : > { %385 = vst.msk [vmem:[#allocation2 + $0x2] sm:$0xff] %vm384_vm2, %v373_v5  ;;  %387 = vst.msk [vmem:[#allocation2 + $0x1a] sm:$0xff] %vm384_vm2, %v377_v6  ;;  %v741_v5 = vstv %s4301_s13  ;;  %s4312_s13 = sld [smem:[#allocation3 + $0x4]] }
 0x104   : > { %v375_v7 = vpop.permute.xlu0 %374  ;;  %v379_v8 = vpop.permute.xlu1 %378 }
 0x105   : > { %386 = vst.msk [vmem:[#allocation2 + $0xa] sm:$0xff] %vm384_vm2, %v375_v7  ;;  %388 = vst.msk [vmem:[#allocation2 + $0x22] sm:$0xff] %vm384_vm2, %v379_v8  ;;  %v755_v8 = vstv %s4302_s20  ;;  %s4313_s20 = sld [smem:[#allocation3 + $0x84]] }
 0x108   : > { %v5139_v10 = vld [vmem:[#allocation2] sm:$0xff]  ;;  %v5157_v23 = vld [vmem:[#allocation2 + $0x18] sm:$0xff] }
 0x109   : > { %v476_v11 = vmul.f32 %v475_v9, %v5139_v10  ;;  %v490_v14 = vmul.f32 %v489_v12, %v5139_v10  ;;  %v504_v17 = vmul.f32 %v503_v16, %v5139_v10  ;;  %v518_v20 = vmul.f32 %v517_v19, %v5139_v10 }
 0x10a   : > { %v532_v25 = vmul.f32 %v531_v22, %v5139_v10  ;;  %v546_v27 = vmul.f32 %v545_v24, %v5157_v23  ;;  %v560_v31 = vmul.f32 %v559_v30, %v5157_v23  ;;  %v574_v34 = vmul.f32 %v573_v33, %v5157_v23 }
 0x10b   : > { %480 = vrot.lane.b32.xlu0 %v476_v11, %s8368_s19  ;;  %v588_v37 = vmul.f32 %v587_v36, %v5157_v23  ;;  %v602_v40 = vmul.f32 %v601_v39, %v5157_v23  ;;  %v616_v43 = vmul.f32 %v615_v42, %v5139_v10  ;;  %v630_v46 = vmul.f32 %v629_v45, %v5139_v10 }
 0x10c   : > { %v5143_v13 = vld [vmem:[#allocation2 + $0x8] sm:$0xff]  ;;  %v5165_v29 = vld [vmem:[#allocation2 + $0x20] sm:$0xff]  ;;  %v644_v49 = vmul.f32 %v643_v48, %v5139_v10  ;;  %v658_v52 = vmul.f32 %v657_v51, %v5139_v10  ;;  %v672_v55 = vmul.f32 %v671_v54, %v5139_v10  ;;  %v686_v58 = vmul.f32 %v685_v57, %v5157_v23 }
 0x10d   : > { %v477_v15 = vmul.f32 %v475_v9, %v5143_v13  ;;  %v491_v18 = vmul.f32 %v489_v12, %v5143_v13  ;;  %v505_v21 = vmul.f32 %v503_v16, %v5143_v13  ;;  %v519_v26 = vmul.f32 %v517_v19, %v5143_v13 }
 0x10e   : > { %v533_v28 = vmul.f32 %v531_v22, %v5143_v13  ;;  %v547_v32 = vmul.f32 %v545_v24, %v5165_v29  ;;  %v561_v35 = vmul.f32 %v559_v30, %v5165_v29  ;;  %v575_v38 = vmul.f32 %v573_v33, %v5165_v29 }
 0x10f   : > { %494 = vrot.lane.b32.xlu0 %v490_v14, %s8368_s19  ;;  %482 = vrot.lane.b32.xlu1 %v477_v15, %s8368_s19  ;;  %v589_v41 = vmul.f32 %v587_v36, %v5165_v29  ;;  %v603_v44 = vmul.f32 %v601_v39, %v5165_v29  ;;  %v617_v47 = vmul.f32 %v615_v42, %v5143_v13  ;;  %v769_v12 = vstv %s4303_s8  ;;  %s5265_s8 = sld [smem:[#allocation3 + $0x104]] }
 0x110   : > { %v631_v50 = vmul.f32 %v629_v45, %v5143_v13  ;;  %v645_v53 = vmul.f32 %v643_v48, %v5143_v13  ;;  %v659_v56 = vmul.f32 %v657_v51, %v5143_v13  ;;  %v673_v59 = vmul.f32 %v671_v54, %v5143_v13 }
 0x111   : > { %v700_v61 = vmul.f32 %v699_v60, %v5157_v23  ;;  %v687_v62 = vmul.f32 %v685_v57, %v5165_v29  ;;  %v714_v0 = vmul.f32 %v713_v63, %v5157_v23  ;;  %v701_v1 = vmul.f32 %v699_v60, %v5165_v29 }
 0x112   : > { %v728_v3 = vmul.f32 %v727_v2, %v5157_v23  ;;  %v715_v4 = vmul.f32 %v713_v63, %v5165_v29  ;;  %v742_v6 = vmul.f32 %v741_v5, %v5157_v23  ;;  %v729_v7 = vmul.f32 %v727_v2, %v5165_v29 }
 0x113   : > { %508 = vrot.lane.b32.xlu0 %v504_v17, %s8368_s19  ;;  %496 = vrot.lane.b32.xlu1 %v491_v18, %s8368_s19  ;;  %v756_v9 = vmul.f32 %v755_v8, %v5139_v10  ;;  %v743_v11 = vmul.f32 %v741_v5, %v5165_v29  ;;  %v770_v14 = vmul.f32 %v769_v12, %v5139_v10  ;;  %v783_v16 = vstv %s4304_s14  ;;  %s5275_s14 = sld [smem:[#allocation3 + $0x184]] }
 0x114   : > { %v757_v15 = vmul.f32 %v755_v8, %v5143_v13  ;;  %v784_v17 = vmul.f32 %v783_v16, %v5139_v10  ;;  %v771_v18 = vmul.f32 %v769_v12, %v5143_v13  ;;  %v797_v19 = vstv %s4305_s15  ;;  %s8358_s15 = smov 124  }
 0x115   : > { %v811_v22 = vstv %s4306_s23  ;;  %v839_v30 = vstv %s4308_s22  ;;  %v853_v33 = vstv %s4309_s18  ;;  %v867_v36 = vstv %s4310_s29  ;;  %s4316_s23 = sld [smem:[#allocation3 + $0x204]] }
 0x116   : > { %v812_v24 = vmul.f32 %v811_v22, %v5139_v10  ;;  %v881_v39 = vstv %s4311_s9  ;;  %v869_v42 = vmul.f32 %v867_v36, %v5165_v29  ;;  %v909_v48 = vstv %s4313_s20  ;;  %s4318_s22 = sld [smem:[#allocation3 + $0x304]] }
 0x117   : > { %522 = vrot.lane.b32.xlu0 %v518_v20, %s8368_s19  ;;  %510 = vrot.lane.b32.xlu1 %v505_v21, %s8368_s19  ;;  %v798_v20 = vmul.f32 %v797_v19, %v5139_v10  ;;  %v785_v21 = vmul.f32 %v783_v16, %v5143_v13  ;;  %v910_v51 = vmul.f32 %v909_v48, %v5139_v10  ;;  %s4319_s18 = sld [smem:[#allocation3 + $0x384]] }
 0x118   : > { %v911_v57 = vmul.f32 %v909_v48, %v5143_v13  ;;  %s4320_s29 = sld [smem:[#allocation3 + $0x404]] }
 0x119   : > { %s5327_s9 = sld [smem:[#allocation3 + $0x484]] }
 0x11a   : > { %s5348_s20 = sld [smem:[#allocation3 + $0x86]] }
 0x11b   : > { %536 = vrot.lane.b32.xlu0 %v532_v25, %s8368_s19  ;;  %524 = vrot.lane.b32.xlu1 %v519_v26, %s8368_s19  ;;  %v799_v25 = vmul.f32 %v797_v19, %v5143_v13  ;;  %v825_v26 = vstv %s4307_s21  ;;  %s4317_s21 = sld [smem:[#allocation3 + $0x284]]  ;;  %v951_v63 = vstv %s4316_s23 }
 0x11c   : > { %v952_v2 = vmul.f32 %v951_v63, %v5139_v10  ;;  %v953_v8 = vmul.f32 %v951_v63, %v5143_v13  ;;  %s5383_s23 = sld [smem:[#allocation3 + $0x206]] }
 0x11d   : > { %v993_v16 = vstv %s4319_s18  ;;  %s5417_s18 = sld [smem:[#allocation3 + $0x386]] }
 0x11e   : > { %v994_v19 = vmul.f32 %v993_v16, %v5157_v23 }
 0x11f   : > { %550 = vrot.lane.b32.xlu0 %v546_v27, %s8368_s19  ;;  %538 = vrot.lane.b32.xlu1 %v533_v28, %s8368_s19  ;;  %v826_v27 = vmul.f32 %v825_v26, %v5157_v23  ;;  %v813_v28 = vmul.f32 %v811_v22, %v5143_v13 }
 0x123   : > { %564 = vrot.lane.b32.xlu0 %v560_v31, %s8368_s19  ;;  %552 = vrot.lane.b32.xlu1 %v547_v32, %s8368_s19  ;;  %v840_v31 = vmul.f32 %v839_v30, %v5157_v23  ;;  %v827_v32 = vmul.f32 %v825_v26, %v5165_v29  ;;  %v995_v26 = vmul.f32 %v993_v16, %v5165_v29 }
 0x127   : > { %578 = vrot.lane.b32.xlu0 %v574_v34, %s8368_s19  ;;  %566 = vrot.lane.b32.xlu1 %v561_v35, %s8368_s19  ;;  %v854_v34 = vmul.f32 %v853_v33, %v5157_v23  ;;  %v841_v35 = vmul.f32 %v839_v30, %v5165_v29 }
 0x12b   : > { %592 = vrot.lane.b32.xlu0 %v588_v37, %s8368_s19  ;;  %580 = vrot.lane.b32.xlu1 %v575_v38, %s8368_s19  ;;  %v868_v37 = vmul.f32 %v867_v36, %v5157_v23  ;;  %v855_v38 = vmul.f32 %v853_v33, %v5165_v29  ;;  %v5358_v33 = vld [vmem:[#allocation2 + $0x1] sm:$0xff] }
 0x12f   : > { %606 = vrot.lane.b32.xlu0 %v602_v40, %s8368_s19  ;;  %594 = vrot.lane.b32.xlu1 %v589_v41, %s8368_s19  ;;  %v882_v41 = vmul.f32 %v881_v39, %v5157_v23 }
 0x133   : > { %620 = vrot.lane.b32.xlu0 %v616_v43, %s8362_s16  ;;  %608 = vrot.lane.b32.xlu1 %v603_v44, %s8368_s19  ;;  %v895_v43 = vstv %s4312_s13  ;;  %s5337_s13 = sld [smem:[#allocation3 + $0x6]] }
 0x137   : > { %634 = vrot.lane.b32.xlu0 %v630_v46, %s8362_s16  ;;  %622 = vrot.lane.b32.xlu1 %v617_v47, %s8362_s16  ;;  %v896_v46 = vmul.f32 %v895_v43, %v5139_v10  ;;  %v883_v47 = vmul.f32 %v881_v39, %v5165_v29  ;;  %v5371_v39 = vld [vmem:[#allocation2 + $0x9] sm:$0xff] }
 0x13b   : > { %648 = vrot.lane.b32.xlu0 %v644_v49, %s8362_s16  ;;  %636 = vrot.lane.b32.xlu1 %v631_v50, %s8362_s16 }
 0x13f   : > { %662 = vrot.lane.b32.xlu0 %v658_v52, %s8362_s16  ;;  %650 = vrot.lane.b32.xlu1 %v645_v53, %s8362_s16  ;;  %v897_v52 = vmul.f32 %v895_v43, %v5143_v13  ;;  %v923_v53 = vstv %s5265_s8  ;;  %s5361_s8 = sld [smem:[#allocation3 + $0x106]] }
 0x143   : > { %676 = vrot.lane.b32.xlu0 %v672_v55, %s8362_s16  ;;  %664 = vrot.lane.b32.xlu1 %v659_v56, %s8362_s16  ;;  %v924_v56 = vmul.f32 %v923_v53, %v5139_v10 }
 0x145   : > { %v1127_v48 = vstv %s5361_s8  ;;  %s5440_s8 = sld [smem:[#allocation3 + $0x80]] }
 0x146   : > { %v1129_v63 = vmul.f32 %v1127_v48, %v5371_v39 }
 0x147   : > { %690 = vrot.lane.b32.xlu0 %v686_v58, %s8362_s16  ;;  %678 = vrot.lane.b32.xlu1 %v673_v59, %s8362_s16  ;;  %v937_v58 = vstv %s5275_s14  ;;  %s4335_s14 = sld [smem:[#allocation3 + $0x186]] }
 0x14b   : > { %704 = vrot.lane.b32.xlu0 %v700_v61, %s8362_s16  ;;  %692 = vrot.lane.b32.xlu1 %v687_v62, %s8362_s16  ;;  %v938_v61 = vmul.f32 %v937_v58, %v5139_v10  ;;  %v925_v62 = vmul.f32 %v923_v53, %v5143_v13  ;;  %v1128_v53 = vmul.f32 %v1127_v48, %v5358_v33 }
 0x14f   : > { %718 = vrot.lane.b32.xlu0 %v714_v0, %s8362_s16  ;;  %706 = vrot.lane.b32.xlu1 %v701_v1, %s8362_s16 }
 0x153   : > { %732 = vrot.lane.b32.xlu0 %v728_v3, %s8362_s16  ;;  %720 = vrot.lane.b32.xlu1 %v715_v4, %s8362_s16  ;;  %v939_v3 = vmul.f32 %v937_v58, %v5143_v13  ;;  %v965_v4 = vstv %s4317_s21  ;;  %s5393_s21 = sld [smem:[#allocation3 + $0x286]] }
 0x157   : > { %746 = vrot.lane.b32.xlu0 %v742_v6, %s8362_s16  ;;  %734 = vrot.lane.b32.xlu1 %v729_v7, %s8362_s16  ;;  %v966_v7 = vmul.f32 %v965_v4, %v5157_v23 }
 0x15b   : > { %760 = vrot.lane.b32.xlu0 %v756_v9, %s8360_s17  ;;  %748 = vrot.lane.b32.xlu1 %v743_v11, %s8362_s16  ;;  %v979_v9 = vstv %s4318_s22  ;;  %s5404_s22 = sld [smem:[#allocation3 + $0x306]] }
 0x15c   : > { %s5474_s16 = sld [smem:[#allocation3 + $0x200]] }
 0x15f   : > { %774 = vrot.lane.b32.xlu0 %v770_v14, %s8360_s17  ;;  %762 = vrot.lane.b32.xlu1 %v757_v15, %s8360_s17  ;;  %v980_v14 = vmul.f32 %v979_v9, %v5157_v23  ;;  %v967_v15 = vmul.f32 %v965_v4, %v5165_v29 }
 0x163   : > { %788 = vrot.lane.b32.xlu0 %v784_v17, %s8360_s17  ;;  %776 = vrot.lane.b32.xlu1 %v771_v18, %s8360_s17 }
 0x167   : > { %802 = vrot.lane.b32.xlu0 %v798_v20, %s8360_s17  ;;  %790 = vrot.lane.b32.xlu1 %v785_v21, %s8360_s17  ;;  %v981_v20 = vmul.f32 %v979_v9, %v5165_v29  ;;  %v1007_v21 = vstv %s4320_s29  ;;  %v5414_v9 = vld [vmem:[#allocation2 + $0x19] sm:$0xff]  ;;  %s5421_s29 = sld [smem:[#allocation6]] }
 0x16b   : > { %816 = vrot.lane.b32.xlu0 %v812_v24, %s8360_s17  ;;  %804 = vrot.lane.b32.xlu1 %v799_v25, %s8360_s17  ;;  %v1008_v25 = vmul.f32 %v1007_v21, %v5157_v23 }
 0x16f   : > { %830 = vrot.lane.b32.xlu0 %v826_v27, %s8360_s17  ;;  %818 = vrot.lane.b32.xlu1 %v813_v28, %s8360_s17  ;;  %v1021_v27 = vstv %s5327_s9  ;;  %s5432_s9 = sld [smem:[#allocation3 + $0x406]] }
 0x173   : > { %844 = vrot.lane.b32.xlu0 %v840_v31, %s8360_s17  ;;  %832 = vrot.lane.b32.xlu1 %v827_v32, %s8360_s17  ;;  %v1022_v31 = vmul.f32 %v1021_v27, %v5157_v23  ;;  %v1009_v32 = vmul.f32 %v1007_v21, %v5165_v29  ;;  %v5429_v21 = vld [vmem:[#allocation2 + $0x21] sm:$0xff] }
 0x177   : > { %858 = vrot.lane.b32.xlu0 %v854_v34, %s8360_s17  ;;  %846 = vrot.lane.b32.xlu1 %v841_v35, %s8360_s17  ;;  %v1099_v34 = vstv %s5337_s13  ;;  %s5434_s13 = sld [smem:[#allocation3]] }
 0x17b   : > { %872 = vrot.lane.b32.xlu0 %v868_v37, %s8360_s17  ;;  %860 = vrot.lane.b32.xlu1 %v855_v38, %s8360_s17  ;;  %v1100_v37 = vmul.f32 %v1099_v34, %v5358_v33  ;;  %v1023_v38 = vmul.f32 %v1021_v27, %v5165_v29 }
 0x17d   : > { %v5261_v40 = vpop.permute.xlu0 %480 }
 0x17f   : > { %886 = vrot.lane.b32.xlu0 %v882_v41, %s8360_s17  ;;  %874 = vrot.lane.b32.xlu1 %v869_v42, %s8360_s17  ;;  %v1113_v41 = vstv %s5348_s20  ;;  %s5438_s20 = sld [smem:[#allocation6 + $0x1]] }
 0x181   : > { %v5269_v44 = vpop.permute.xlu1 %482  ;;  %v5271_v45 = vpop.permute.xlu0 %494 }
 0x183   : > { %900 = vrot.lane.b32.xlu0 %v896_v46, %s8358_s15  ;;  %888 = vrot.lane.b32.xlu1 %v883_v47, %s8360_s17  ;;  %v1114_v46 = vmul.f32 %v1113_v41, %v5358_v33  ;;  %v1101_v47 = vmul.f32 %v1099_v34, %v5371_v39  ;;  %v1197_v34 = vstv %s5417_s18  ;;  %s5466_s18 = sld [smem:[#allocation3 + $0x7]] }
 0x184   : > { %s5472_s17 = sld [smem:[#allocation6 + $0x4]] }
 0x185   : > { %v5279_v49 = vpop.permute.xlu1 %496  ;;  %v5281_v50 = vpop.permute.xlu0 %508 }
 0x187   : > { %914 = vrot.lane.b32.xlu0 %v910_v51, %s8358_s15  ;;  %902 = vrot.lane.b32.xlu1 %v897_v52, %s8358_s15 }
 0x189   : > { %v5288_v54 = vpop.permute.xlu1 %510  ;;  %v5290_v55 = vpop.permute.xlu0 %522 }
 0x18b   : > { %928 = vrot.lane.b32.xlu0 %v924_v56, %s8358_s15  ;;  %916 = vrot.lane.b32.xlu1 %v911_v57, %s8358_s15  ;;  %v1115_v56 = vmul.f32 %v1113_v41, %v5371_v39  ;;  %v1141_v57 = vstv %s4335_s14  ;;  %s5449_s14 = sld [smem:[#allocation3 + $0x486]]  ;;  %v1198_v41 = vmul.f32 %v1197_v34, %v5414_v9 }
 0x18d   : > { %v5297_v59 = vpop.permute.xlu1 %524  ;;  %v5299_v60 = vpop.permute.xlu0 %536 }
 0x18f   : > { %942 = vrot.lane.b32.xlu0 %v938_v61, %s8358_s15  ;;  %930 = vrot.lane.b32.xlu1 %v925_v62, %s8358_s15  ;;  %v1142_v62 = vmul.f32 %v1141_v57, %v5358_v33 }
 0x191   : > { %v5305_v0 = vpop.permute.xlu1 %538  ;;  %v5307_v1 = vpop.permute.xlu0 %550 }
 0x193   : > { %956 = vrot.lane.b32.xlu0 %v952_v2, %s8358_s15  ;;  %944 = vrot.lane.b32.xlu1 %v939_v3, %s8358_s15  ;;  %v1155_v2 = vstv %s5383_s23  ;;  %s5451_s23 = sld [smem:[#allocation6 + $0x2]] }
 0x195   : > { %v5313_v5 = vpop.permute.xlu1 %552  ;;  %v5315_v6 = vpop.permute.xlu0 %564 }
 0x196   : > { %8419 = vst [vmem:[#allocation29_spill] sm:$0xff] %v5313_v5  ;;  %8420 = vst [vmem:[#allocation30_spill] sm:$0xff] %v5315_v6 }
 0x197   : > { %970 = vrot.lane.b32.xlu0 %v966_v7, %s8358_s15  ;;  %958 = vrot.lane.b32.xlu1 %v953_v8, %s8358_s15  ;;  %v1156_v7 = vmul.f32 %v1155_v2, %v5358_v33  ;;  %v1143_v8 = vmul.f32 %v1141_v57, %v5371_v39 }
 0x199   : > { %v5321_v11 = vpop.permute.xlu1 %566  ;;  %v5323_v12 = vpop.permute.xlu0 %578 }
 0x19a   : > { %8421 = vst [vmem:[#allocation31_spill] sm:$0xff] %v5321_v11  ;;  %8422 = vst [vmem:[#allocation32_spill] sm:$0xff] %v5323_v12 }
 0x19b   : > { %984 = vrot.lane.b32.xlu0 %v980_v14, %s8358_s15  ;;  %972 = vrot.lane.b32.xlu1 %v967_v15, %s8358_s15  ;;  %v1169_v14 = vstv %s5393_s21  ;;  %s5455_s21 = sld [smem:[#allocation3 + $0x100]] }
 0x19d   : > { %v5331_v17 = vpop.permute.xlu1 %580  ;;  %v5333_v18 = vpop.permute.xlu0 %592 }
 0x19e   : > { %8423 = vst [vmem:[#allocation33_spill] sm:$0xff] %v5331_v17  ;;  %8424 = vst [vmem:[#allocation34_spill] sm:$0xff] %v5333_v18 }
 0x19f   : > { %998 = vrot.lane.b32.xlu0 %v994_v19, %s8358_s15  ;;  %986 = vrot.lane.b32.xlu1 %v981_v20, %s8358_s15  ;;  %v1170_v19 = vmul.f32 %v1169_v14, %v5414_v9  ;;  %v1157_v20 = vmul.f32 %v1155_v2, %v5371_v39 }
 0x1a1   : > { %v5341_v22 = vpop.permute.xlu1 %594  ;;  %v5343_v24 = vpop.permute.xlu0 %606 }
 0x1a2   : > { %8425 = vst [vmem:[#allocation35_spill] sm:$0xff] %v5341_v22  ;;  %8426 = vst [vmem:[#allocation36_spill] sm:$0xff] %v5343_v24 }
 0x1a3   : > { %1012 = vrot.lane.b32.xlu0 %v1008_v25, %s8358_s15  ;;  %1000 = vrot.lane.b32.xlu1 %v995_v26, %s8358_s15  ;;  %v1183_v25 = vstv %s5404_s22  ;;  %s5457_s22 = sld [smem:[#allocation6 + $0x3]] }
 0x1a5   : > { %v5352_v28 = vpop.permute.xlu1 %608  ;;  %v5354_v30 = vpop.permute.xlu0 %620 }
 0x1a6   : > { %8427 = vst [vmem:[#allocation37_spill] sm:$0xff] %v5352_v28 }
 0x1a7   : > { %1026 = vrot.lane.b32.xlu0 %v1022_v31, %s8358_s15  ;;  %1014 = vrot.lane.b32.xlu1 %v1009_v32, %s8358_s15  ;;  %v1184_v31 = vmul.f32 %v1183_v25, %v5414_v9  ;;  %v1171_v32 = vmul.f32 %v1169_v14, %v5429_v21  ;;  %v1239_v14 = vstv %s5466_s18  ;;  %s5517_s18 = sld [smem:[#allocation3 + $0x187]] }
 0x1a9   : > { %v5365_v35 = vpop.permute.xlu1 %622  ;;  %v5367_v36 = vpop.permute.xlu0 %634 }
 0x1ab   : > { %1104 = vrot.lane.b32.xlu0 %v1100_v37, %s8368_s19  ;;  %1028 = vrot.lane.b32.xlu1 %v1023_v38, %s8358_s15  ;;  %s5468_s15 = sld [smem:[#allocation3 + $0x180]] }
 0x1ad   : > { %v5376_v42 = vpop.permute.xlu1 %636  ;;  %v5378_v43 = vpop.permute.xlu0 %648 }
 0x1af   : > { %1118 = vrot.lane.b32.xlu0 %v1114_v46, %s8368_s19  ;;  %1106 = vrot.lane.b32.xlu1 %v1101_v47, %s8368_s19  ;;  %v1185_v46 = vmul.f32 %v1183_v25, %v5429_v21  ;;  %v1211_v47 = vstv %s5432_s9  ;;  %s5483_s9 = sld [smem:[#allocation3 + $0x87]] }
 0x1b0   : > { %v1212_v57 = vmul.f32 %v1211_v47, %v5414_v9 }
 0x1b1   : > { %v5387_v51 = vpop.permute.xlu1 %650  ;;  %v5389_v52 = vpop.permute.xlu0 %662  ;;  %v430_v24 = vstv %s5468_s15  ;;  %s4366_s15 = sld [smem:[#allocation3 + $0x209]] }
 0x1b2   : > { %v432_v12 = vmul.f32 %v430_v24, %v5143_v13 }
 0x1b3   : > { %1132 = vrot.lane.b32.xlu0 %v1128_v53, %s8368_s19  ;;  %1120 = vrot.lane.b32.xlu1 %v1115_v56, %s8368_s19  ;;  %v1199_v56 = vmul.f32 %v1197_v34, %v5429_v21 }
 0x1b5   : > { %v5397_v58 = vpop.permute.xlu1 %664  ;;  %v5399_v61 = vpop.permute.xlu0 %676 }
 0x1b7   : > { %1146 = vrot.lane.b32.xlu0 %v1142_v62, %s8368_s19  ;;  %1134 = vrot.lane.b32.xlu1 %v1129_v63, %s8368_s19  ;;  %v1225_v62 = vstv %s5449_s14  ;;  %s5500_s14 = sld [smem:[#allocation3 + $0x107]] }
 0x1b8   : > { %v1227_v25 = vmul.f32 %v1225_v62, %v5429_v21 }
 0x1b9   : > { %v5408_v3 = vpop.permute.xlu1 %678  ;;  %v5410_v4 = vpop.permute.xlu0 %690 }
 0x1ba   : > { %8428 = vst [vmem:[#allocation38_spill] sm:$0xff] %v5410_v4 }
 0x1bb   : > { %1160 = vrot.lane.b32.xlu0 %v1156_v7, %s8368_s19  ;;  %1148 = vrot.lane.b32.xlu1 %v1143_v8, %s8368_s19  ;;  %v1213_v7 = vmul.f32 %v1211_v47, %v5429_v21  ;;  %v1226_v8 = vmul.f32 %v1225_v62, %v5414_v9 }
 0x1bd   : > { %v5423_v15 = vpop.permute.xlu1 %692  ;;  %v5425_v16 = vpop.permute.xlu0 %704 }
 0x1be   : > { %8429 = vst [vmem:[#allocation39_spill] sm:$0xff] %v5423_v15  ;;  %8430 = vst [vmem:[#allocation40_spill] sm:$0xff] %v5425_v16 }
 0x1bf   : > { %1174 = vrot.lane.b32.xlu0 %v1170_v19, %s8368_s19  ;;  %1162 = vrot.lane.b32.xlu1 %v1157_v20, %s8368_s19 }
 0x1c1   : > { %v5442_v26 = vpop.permute.xlu1 %706  ;;  %v5444_v27 = vpop.permute.xlu0 %718 }
 0x1c2   : > { %8431 = vst [vmem:[#allocation41_spill] sm:$0xff] %v5442_v26  ;;  %8432 = vst [vmem:[#allocation42_spill] sm:$0xff] %v5444_v27 }
 0x1c3   : > { %1188 = vrot.lane.b32.xlu0 %v1184_v31, %s8368_s19  ;;  %1176 = vrot.lane.b32.xlu1 %v1171_v32, %s8368_s19  ;;  %v1240_v31 = vmul.f32 %v1239_v14, %v5358_v33  ;;  %v1253_v32 = vstv %s5483_s9  ;;  %s5534_s9 = sld [smem:[#allocation3 + $0x207]] }
 0x1c4   : > { %v1254_v47 = vmul.f32 %v1253_v32, %v5358_v33 }
 0x1c5   : > { %v5459_v37 = vpop.permute.xlu1 %720  ;;  %v5461_v38 = vpop.permute.xlu0 %732 }
 0x1c6   : > { %8433 = vst [vmem:[#allocation43_spill] sm:$0xff] %v5459_v37  ;;  %8434 = vst [vmem:[#allocation44_spill] sm:$0xff] %v5461_v38  ;;  %v436_v38 = vstv %s5474_s16  ;;  %v1337_v37 = vstv %s5551_s24  ;;  %s5647_s24 = sld [smem:[#allocation3 + $0x85]] }
 0x1c7   : > { %1202 = vrot.lane.b32.xlu0 %v1198_v41, %s8368_s19  ;;  %1190 = vrot.lane.b32.xlu1 %v1185_v46, %s8368_s19  ;;  %v1241_v46 = vmul.f32 %v1239_v14, %v5371_v39  ;;  %v1281_v14 = vstv %s5517_s18  ;;  %s5565_s18 = sld [smem:[#allocation3 + $0x8]] }
 0x1c8   : > { %s5676_s16 = sld [smem:[#allocation3 + $0x105]] }
 0x1c9   : > { %v5476_v48 = vpop.permute.xlu1 %734  ;;  %v5478_v53 = vpop.permute.xlu0 %746 }
 0x1ca   : > { %8435 = vst [vmem:[#allocation45_spill] sm:$0xff] %v5476_v48  ;;  %8436 = vst [vmem:[#allocation46_spill] sm:$0xff] %v5478_v53  ;;  %v424_v53 = vstv %s5455_s21  ;;  %s5600_s21 = sld [smem:[#allocation3 + $0x308]] }
 0x1cb   : > { %1204 = vrot.lane.b32.xlu1 %v1199_v56, %s8368_s19  ;;  %1216 = vrot.lane.b32.xlu0 %v1212_v57, %s8368_s19  ;;  %v1267_v56 = vstv %s5500_s14  ;;  %s5548_s14 = sld [smem:[#allocation3 + $0x307]] }
 0x1cd   : > { %v5493_v63 = vpop.permute.xlu1 %748  ;;  %v5495_v2 = vpop.permute.xlu0 %760 }
 0x1ce   : > { %8437 = vst [vmem:[#allocation47_spill] sm:$0xff] %v5493_v63  ;;  %v418_v63 = vstv %s5440_s8  ;;  %s5594_s8 = sld [smem:[#allocation3 + $0x288]] }
 0x1cf   : > { %1218 = vrot.lane.b32.xlu1 %v1213_v7, %s8368_s19  ;;  %1230 = vrot.lane.b32.xlu0 %v1226_v8, %s8368_s19  ;;  %v1255_v7 = vmul.f32 %v1253_v32, %v5371_v39  ;;  %v1268_v8 = vmul.f32 %v1267_v56, %v5358_v33  ;;  %v1269_v32 = vmul.f32 %v1267_v56, %v5371_v39 }
 0x1d1   : > { %v5510_v19 = vpop.permute.xlu1 %762  ;;  %v5512_v20 = vpop.permute.xlu0 %774  ;;  %v1323_v11 = vstv %s5548_s14  ;;  %s6088_s14 = sld [smem:[#allocation3 + $0xb]] }
 0x1d3   : > { %1232 = vrot.lane.b32.xlu1 %v1227_v25, %s8368_s19  ;;  %1244 = vrot.lane.b32.xlu0 %v1240_v31, %s8438_s10  ;;  %s5540_s19 = sld [smem:[#allocation3 + $0x287]] }
 0x1d5   : > { %v5527_v34 = vpop.permute.xlu1 %776  ;;  %v5529_v41 = vpop.permute.xlu0 %788 }
 0x1d7   : > { %1246 = vrot.lane.b32.xlu1 %v1241_v46, %s8438_s10  ;;  %1258 = vrot.lane.b32.xlu0 %v1254_v47, %s8438_s10  ;;  %v1282_v46 = vmul.f32 %v1281_v14, %v5358_v33  ;;  %v1295_v47 = vstv %s5534_s9  ;;  %s4371_s9 = sld [smem:[#allocation3 + $0x489]] }
 0x1d9   : > { %v5542_v57 = vpop.permute.xlu1 %790  ;;  %v5544_v62 = vpop.permute.xlu0 %802  ;;  %v1309_v22 = vstv %s5540_s19  ;;  %s5606_s19 = sld [smem:[#allocation3 + $0x388]] }
 0x1da   : > { %v1310_v26 = vmul.f32 %v1309_v22, %v5414_v9  ;;  %v1311_v28 = vmul.f32 %v1309_v22, %v5429_v21  ;;  %v8445_v22 = vstv %s5421_s29  ;;  %s4367_s29 = sld [smem:[#allocation3 + $0x289]] }
 0x1db   : > { %1260 = vrot.lane.b32.xlu1 %v1255_v7, %s8438_s10  ;;  %1272 = vrot.lane.b32.xlu0 %v1268_v8, %s8438_s10  ;;  %v412_v8 = vstv %s5434_s13  ;;  %v1296_v7 = vmul.f32 %v1295_v47, %v5358_v33  ;;  %s5588_s13 = sld [smem:[#allocation3 + $0x208]]  ;;  %v8446_v16 = vmov %v8445_v22 }
 0x1dc   : > { %v413_v17 = vmul.f32 %v412_v8, %v5139_v10  ;;  %v414_v18 = vmul.f32 %v412_v8, %v5143_v13  ;;  %v425_v8 = vmul.f32 %v424_v53, %v5139_v10 }
 0x1dd   : > { %v5559_v25 = vpop.permute.xlu1 %804  ;;  %v5561_v31 = vpop.permute.xlu0 %816 }
 0x1de   : > { %v415_v15 = vadd.f32 %v413_v17, %v8445_v22  ;;  %v1338_v17 = vmul.f32 %v1337_v37, %v5414_v9 }
 0x1df   : > { %1274 = vrot.lane.b32.xlu1 %v1269_v32, %s8438_s10  ;;  %1286 = vrot.lane.b32.xlu0 %v1282_v46, %s8438_s10  ;;  %v1283_v46 = vmul.f32 %v1281_v14, %v5371_v39  ;;  %v445_v14 = vstv %s5489_s1  ;;  %s5624_s1 = sld [smem:[#allocation3 + $0x5]] }
 0x1e1   : > { %v5582_v48 = vpop.permute.xlu1 %818  ;;  %v5584_v32 = vpop.permute.xlu0 %830 }
 0x1e2   : > { %8439 = vst [vmem:[#allocation48_spill] sm:$0xff] %v5582_v48  ;;  %8440 = vst [vmem:[#allocation49_spill] sm:$0xff] %v5584_v32  ;;  %v426_v32 = vmul.f32 %v424_v53, %v5143_v13  ;;  %v8447_v48 = vstv %s5438_s20  ;;  %s4368_s20 = sld [smem:[#allocation3 + $0x309]] }
 0x1e3   : > { %1288 = vrot.lane.b32.xlu1 %v1283_v46, %s8438_s10  ;;  %1300 = vrot.lane.b32.xlu0 %v1296_v7, %s8438_s10  ;;  %v1297_v7 = vmul.f32 %v1295_v47, %v5371_v39  ;;  %v416_v47 = vadd.f32 %v414_v18, %v8446_v16  ;;  %v8450_v53 = vmov %v8447_v48  ;;  %v437_v18 = vmul.f32 %v436_v38, %v5139_v10 }
 0x1e4   : > { %v438_v16 = vmul.f32 %v436_v38, %v5143_v13  ;;  %v8453_v38 = vstv %s5457_s22  ;;  %s4370_s22 = sld [smem:[#allocation3 + $0x409]] }
 0x1e5   : > { %v5610_v27 = vpop.permute.xlu1 %832  ;;  %v5612_v46 = vpop.permute.xlu0 %844 }
 0x1e6   : > { %8441 = vst [vmem:[#allocation50_spill] sm:$0xff] %v5610_v27  ;;  %8442 = vst [vmem:[#allocation51_spill] sm:$0xff] %v5612_v46  ;;  %v1324_v27 = vmul.f32 %v1323_v11, %v5414_v9  ;;  %v420_v46 = vmul.f32 %v418_v63, %v5143_v13 }
 0x1e7   : > { %1302 = vrot.lane.b32.xlu1 %v1297_v7, %s8438_s10  ;;  %1314 = vrot.lane.b32.xlu0 %v1310_v26, %s8438_s10  ;;  %v419_v7 = vmul.f32 %v418_v63, %v5139_v10  ;;  %v431_v63 = vmul.f32 %v430_v24, %v5139_v10  ;;  %v486_v10 = vadd.f32 %v5261_v40, %v415_v15  ;;  %v8459_v15 = vstv %s5555_s27 }
 0x1e8   : > { %v422_v22 = vadd.f32 %v420_v46, %v8450_v53  ;;  %v1037_v46 = vstv %s5624_s1  ;;  %v1339_v40 = vmul.f32 %v1337_v37, %v5429_v21  ;;  %s6138_s1 = sld [smem:[#allocation3 + $0x28b]] }
 0x1e9   : > { %v5632_v56 = vpop.permute.xlu1 %846  ;;  %v5634_v26 = vpop.permute.xlu0 %858  ;;  %v421_v6 = vadd.f32 %v419_v7, %v8447_v48  ;;  %v8451_v48 = vstv %s5451_s23  ;;  %s4369_s23 = sld [smem:[#allocation3 + $0x389]] }
 0x1ea   : > { %8443 = vst [vmem:[#allocation52_spill] sm:$0xff] %v5632_v56  ;;  %8444 = vst [vmem:[#allocation53_spill] sm:$0xff] %v5634_v26  ;;  %v1325_v56 = vmul.f32 %v1323_v11, %v5429_v21  ;;  %v427_v7 = vadd.f32 %v425_v8, %v8451_v48  ;;  %v446_v26 = vmul.f32 %v445_v14, %v5157_v23  ;;  %v8452_v13 = vmov %v8451_v48 }
 0x1eb   : > { %1316 = vrot.lane.b32.xlu1 %v1311_v28, %s8438_s10  ;;  %1328 = vrot.lane.b32.xlu0 %v1324_v27, %s8438_s10  ;;  %v447_v11 = vmul.f32 %v445_v14, %v5165_v29  ;;  %v428_v24 = vadd.f32 %v426_v32, %v8452_v13  ;;  %v433_v8 = vadd.f32 %v431_v63, %v8453_v38  ;;  %v8454_v14 = vstv %s5502_s3  ;;  %s5727_s3 = sld [smem:[#allocation3 + $0x185]] }
 0x1ec   : > { %v452_v53 = vmul.f32 %v8454_v14, %v5157_v23  ;;  %v1352_v32 = vmul.f32 %v8459_v15, %v5414_v9  ;;  %v8460_v63 = vmov %v8453_v38  ;;  %v8461_v38 = vstv %s5472_s17  ;;  %s8534_s17 = smov 124  }
 0x1ed   : > { %v5658_v28 = vpop.permute.xlu1 %860  ;;  %v5660_v27 = vpop.permute.xlu0 %872  ;;  %v5702_v13 = vadd.f32 %v432_v12, %v8460_v63  ;;  %v8465_v12 = vstv %s5508_s5 }
 0x1ee   : > { %8448 = vst [vmem:[#allocation54_spill] sm:$0xff] %v5658_v28  ;;  %8449 = vst [vmem:[#allocation55_spill] sm:$0xff] %v5660_v27  ;;  %v459_v63 = vmul.f32 %v8465_v12, %v5165_v29 }
 0x1ef   : > { %1330 = vrot.lane.b32.xlu1 %v1325_v56, %s8438_s10  ;;  %1342 = vrot.lane.b32.xlu0 %v1338_v17, %s8438_s10  ;;  %v8455_v56 = vmov %v8454_v14  ;;  %v8456_v17 = vstv %s5508_s5  ;;  %v5706_v14 = vadd.f32 %v437_v18, %v8461_v38  ;;  %v1043_v18 = vstv %s5647_s24  ;;  %s5826_s5 = sld [smem:[#allocation3 + $0x305]] }
 0x1f0   : > { %v453_v48 = vmul.f32 %v8455_v56, %v5165_v29  ;;  %v458_v27 = vmul.f32 %v8456_v17, %v5157_v23  ;;  %v8462_v56 = vmov %v8461_v38  ;;  %s6148_s24 = sld [smem:[#allocation3 + $0x30b]] }
 0x1f1   : > { %v5692_v28 = vpop.permute.xlu1 %874  ;;  %v5694_v5 = vpop.permute.xlu0 %886  ;;  %v5710_v17 = vadd.f32 %v438_v16, %v8462_v56 }
 0x1f2   : > { %8457 = vst [vmem:[#allocation56_spill] sm:$0xff] %v5692_v28  ;;  %8458 = vst [vmem:[#allocation57_spill] sm:$0xff] %v5694_v5  ;;  %v626_v28 = vadd.f32 %v5354_v30, %v486_v10  ;;  %v8463_v5 = vstv %s5485_s0  ;;  %v487_v30 = vadd.f32 %v5269_v44, %v416_v47  ;;  %v8469_v44 = vstv %s5555_s27  ;;  %s5768_s0 = sld [smem:[#allocation3 + $0x205]] }
 0x1f3   : > { %v5715_v4 = vadd.f32 %v446_v26, %v8463_v5  ;;  %v8464_v37 = vmov %v8463_v5  ;;  %1344 = vrot.lane.b32.xlu1 %v1339_v40, %s8438_s10  ;;  %1356 = vrot.lane.b32.xlu0 %v1352_v32, %s8438_s10  ;;  %v500_v5 = vadd.f32 %v5271_v45, %v421_v6  ;;  %v8466_v26 = vstv %s5491_s2  ;;  %s8476_s2 = smov 125   ;;  %s5953_s27 = sld [smem:[#allocation3 + $0x488]] }
 0x1f4   : > { %v5719_v15 = vadd.f32 %v447_v11, %v8464_v37  ;;  %v5733_v16 = vadd.f32 %v452_v53, %v8466_v26  ;;  %v766_v11 = vadd.f32 %v5495_v2, %v626_v28  ;;  %v8467_v10 = vmov %v8466_v26 }
 0x1f5   : > { %v5738_v29 = vadd.f32 %v453_v48, %v8467_v10  ;;  %v8468_v40 = vstv %s5506_s4  ;;  %v5744_v38 = vpop.permute.xlu1 %888  ;;  %v901_v56 = vpop.permute.xlu0 %900  ;;  %v1353_v47 = vmul.f32 %v8469_v44, %v5429_v21  ;;  %v8470_v45 = vstv %s5557_s7  ;;  %s5797_s4 = sld [smem:[#allocation3 + $0x285]] }
 0x1f6   : > { %v5742_v32 = vadd.f32 %v458_v27, %v8468_v40  ;;  %v1366_v6 = vmul.f32 %v8470_v45, %v5414_v9  ;;  %v627_v53 = vadd.f32 %v5365_v35, %v487_v30  ;;  %v640_v2 = vadd.f32 %v5367_v36, %v500_v5  ;;  %s5854_s7 = sld [smem:[#allocation3 + $0x385]] }
 0x1f7   : > { %v906_v28 = vadd.f32 %v901_v56, %v766_v11  ;;  %v1038_v48 = vmul.f32 %v1037_v46, %v5358_v33  ;;  %v501_v27 = vadd.f32 %v5279_v49, %v422_v22  ;;  %v8471_v37 = vmov %v8468_v40  ;;  %1358 = vrot.lane.b32.xlu1 %v1353_v47, %s8438_s10 }
 0x1f8   : > { %v5758_v12 = vadd.f32 %v459_v63, %v8471_v37  ;;  %v8472_v26 = vstv %s5523_s26  ;;  %1370 = vrot.lane.b32.xlu0 %v1366_v6, %s8438_s10  ;;  %v1049_v35 = vstv %s5676_s16  ;;  %v514_v36 = vadd.f32 %v5281_v50, %v427_v7  ;;  %s5884_s26 = sld [smem:[#allocation3 + $0x405]] }
 0x1f9   : > { %v5763_v10 = vmul.f32 %v8472_v26, %v5157_v23  ;;  %v767_v30 = vadd.f32 %v5510_v19, %v627_v53  ;;  %v780_v49 = vadd.f32 %v5512_v20, %v640_v2  ;;  %v5773_v22 = vadd.f32 %v1038_v48, %v906_v28  ;;  %v903_v63 = vpop.permute.xlu1 %902  ;;  %v915_v23 = vpop.permute.xlu0 %914  ;;  %v5787_v53 = vld [vmem:[#allocation2 + $0x20] sm:$0xff]  ;;  %s4389_s16 = sld [smem:[#allocation3 + $0x38b]] }
 0x1fa   : > { %v8473_v5 = vmov %v8470_v45  ;;  %v8474_v40 = vstv %s5565_s18  ;;  %v1039_v44 = vmul.f32 %v1037_v46, %v5371_v39  ;;  %v1044_v50 = vmul.f32 %v1043_v18, %v5358_v33  ;;  %s6098_s18 = sld [smem:[#allocation3 + $0x8b]] }
 0x1fb   : > { %v1367_v11 = vmul.f32 %v8473_v5, %v5429_v21  ;;  %v1380_v56 = vmul.f32 %v8474_v40, %v5358_v33  ;;  %v641_v19 = vadd.f32 %v5376_v42, %v501_v27  ;;  %v654_v7 = vadd.f32 %v5378_v43, %v514_v36 }
 0x1fc   : > { %v907_v20 = vadd.f32 %v903_v63, %v767_v30  ;;  %v920_v47 = vadd.f32 %v915_v23, %v780_v49  ;;  %v515_v45 = vadd.f32 %v5288_v54, %v428_v24  ;;  %v528_v6 = vadd.f32 %v5290_v55, %v433_v8 }
 0x1fd   : > { %v8475_v2 = vmov %v8472_v26  ;;  %1372 = vrot.lane.b32.xlu1 %v1367_v11, %s8438_s10  ;;  %1384 = vrot.lane.b32.xlu0 %v1380_v56, %s8476_s2  ;;  %v1055_v42 = vstv %s5727_s3  ;;  %v781_v43 = vadd.f32 %v5527_v34, %v641_v19  ;;  %v794_v46 = vadd.f32 %v5529_v41, %v654_v7  ;;  %v917_v24 = vpop.permute.xlu1 %916  ;;  %v929_v8 = vpop.permute.xlu0 %928  ;;  %v4766_v11 = vld [vmem:[#allocation2 + $0x18] sm:$0xff]  ;;  %s4390_s3 = sld [smem:[#allocation3 + $0x40b]] }
 0x1fe   : > { %v5792_v28 = vmul.f32 %v5787_v53, %v8475_v2  ;;  %v5801_v54 = vadd.f32 %v1039_v44, %v907_v20  ;;  %v5803_v55 = vadd.f32 %v1044_v50, %v920_v47  ;;  %v8477_v48 = vmov %v8474_v40 }
 0x1ff   : > { %v1381_v27 = vmul.f32 %v8477_v48, %v5371_v39  ;;  %v8478_v37 = vstv %s5568_s11  ;;  %v1045_v36 = vmul.f32 %v1043_v18, %v5371_v39  ;;  %v1050_v34 = vmul.f32 %v1049_v35, %v5358_v33  ;;  %s6017_s11 = sld [smem:[#allocation3 + $0x109]] }
 0x200   : > { %v1394_v26 = vmul.f32 %v8478_v37, %v5358_v33  ;;  %v655_v41 = vadd.f32 %v5387_v51, %v515_v45  ;;  %v668_v30 = vadd.f32 %v5389_v52, %v528_v6  ;;  %v921_v49 = vadd.f32 %v917_v24, %v781_v43 }
 0x201   : > { %v934_v63 = vadd.f32 %v929_v8, %v794_v46  ;;  %v529_v23 = vadd.f32 %v5297_v59, %v5702_v13  ;;  %v542_v5 = vadd.f32 %v5299_v60, %v5706_v14  ;;  %v8479_v40 = vstv %s5536_s12  ;;  %1386 = vrot.lane.b32.xlu1 %v1381_v27, %s8476_s2  ;;  %v931_v60 = vpop.permute.xlu1 %930  ;;  %v943_v14 = vpop.permute.xlu0 %942  ;;  %s4365_s12 = sld [smem:[#allocation3 + $0x189]] }
 0x202   : > { %v5821_v56 = vmul.f32 %v4766_v11, %v8479_v40  ;;  %1398 = vrot.lane.b32.xlu0 %v1394_v26, %s8476_s2  ;;  %v1061_v51 = vstv %s5768_s0  ;;  %v795_v52 = vadd.f32 %v5542_v57, %v655_v41  ;;  %v808_v18 = vadd.f32 %v5544_v62, %v668_v30  ;;  %v8486_v30 = vld [vmem:[#allocation29_spill] sm:$0xff]  ;;  %s4391_s0 = sld [smem:[#allocation3 + $0x48b]] }
 0x203   : > { %v5830_v59 = vadd.f32 %v1045_v36, %v921_v49  ;;  %v5832_v13 = vadd.f32 %v1050_v34, %v934_v63  ;;  %v8480_v44 = vmov %v8478_v37  ;;  %v8481_v19 = vstv %s5572_s28  ;;  %v8487_v63 = vld [vmem:[#allocation30_spill] sm:$0xff]  ;;  %s5983_s28 = sld [smem:[#allocation3 + $0x9]] }
 0x204   : > { %v1395_v50 = vmul.f32 %v8480_v44, %v5371_v39  ;;  %v1408_v7 = vmul.f32 %v8481_v19, %v5358_v33  ;;  %v1051_v20 = vmul.f32 %v1049_v35, %v5371_v39  ;;  %v1056_v57 = vmul.f32 %v1055_v42, %v5358_v33 }
 0x205   : > { %v669_v47 = vadd.f32 %v5397_v58, %v529_v23  ;;  %v682_v62 = vadd.f32 %v5399_v61, %v542_v5  ;;  %v935_v45 = vadd.f32 %v931_v60, %v795_v52  ;;  %v948_v6 = vadd.f32 %v943_v14, %v808_v18  ;;  %v8490_v52 = vld [vmem:[#allocation49_spill] sm:$0xff] }
 0x206   : > { %v543_v2 = vadd.f32 %v5305_v0, %v5710_v17  ;;  %v556_v43 = vadd.f32 %v5307_v1, %v5715_v4  ;;  %v8482_v46 = vstv %s5519_s6  ;;  %1400 = vrot.lane.b32.xlu1 %v1395_v50, %s8476_s2  ;;  %1412 = vrot.lane.b32.xlu0 %v1408_v7, %s8476_s2  ;;  %v1069_v58 = vstv %s5797_s4  ;;  %v945_v1 = vpop.permute.xlu1 %944  ;;  %v957_v4 = vpop.permute.xlu0 %956  ;;  %s4392_s4 = sld [smem:[#allocation3 + $0xc]] }
 0x207   : > { %v466_v24 = vadd.f32 %v5763_v10, %v8482_v46  ;;  %v809_v61 = vadd.f32 %v5559_v25, %v669_v47  ;;  %v822_v35 = vadd.f32 %v5561_v31, %v682_v62  ;;  %v5858_v8 = vadd.f32 %v1051_v20, %v935_v45  ;;  %v8485_v31 = vld [vmem:[#allocation38_spill] sm:$0xff]  ;;  %v8494_v62 = vld [vmem:[#allocation40_spill] sm:$0xff] }
 0x208   : > { %v5860_v0 = vadd.f32 %v1056_v57, %v948_v6  ;;  %v8483_v17 = vmov %v8481_v19  ;;  %v8484_v48 = vstv %s5578_s25  ;;  %v1057_v37 = vmul.f32 %v1055_v42, %v5371_v39  ;;  %v8489_v42 = vld [vmem:[#allocation48_spill] sm:$0xff]  ;;  %v8493_v57 = vld [vmem:[#allocation39_spill] sm:$0xff]  ;;  %s5911_s25 = sld [smem:[#allocation3 + $0x408]] }
 0x209   : > { %v1409_v10 = vmul.f32 %v8483_v17, %v5371_v39  ;;  %v1422_v27 = vmul.f32 %v8484_v48, %v5358_v33  ;;  %v1062_v25 = vmul.f32 %v1061_v51, %v5358_v33  ;;  %v683_v26 = vadd.f32 %v5408_v3, %v543_v2  ;;  %v8498_v17 = vld [vmem:[#allocation50_spill] sm:$0xff] }
 0x20a   : > { %v696_v36 = vadd.f32 %v8485_v31, %v556_v43  ;;  %v949_v34 = vadd.f32 %v945_v1, %v809_v61  ;;  %v962_v41 = vadd.f32 %v957_v4, %v822_v35  ;;  %v557_v49 = vadd.f32 %v8486_v30, %v5719_v15  ;;  %v8495_v43 = vld [vmem:[#allocation31_spill] sm:$0xff]  ;;  %v8496_v61 = vld [vmem:[#allocation32_spill] sm:$0xff]  ;;  %v8502_v30 = vld [vmem:[#allocation41_spill] sm:$0xff] }
 0x20b   : > { %v570_v23 = vadd.f32 %v8487_v63, %v5733_v16  ;;  %v8488_v5 = vmov %v8479_v40  ;;  %1414 = vrot.lane.b32.xlu1 %v1409_v10, %s8476_s2  ;;  %1426 = vrot.lane.b32.xlu0 %v1422_v27, %s8476_s2  ;;  %v1075_v3 = vstv %s5826_s5  ;;  %v823_v40 = vadd.f32 %v8489_v42, %v683_v26  ;;  %v959_v16 = vpop.permute.xlu1 %958  ;;  %v8503_v63 = vld [vmem:[#allocation42_spill] sm:$0xff]  ;;  %s4393_s5 = sld [smem:[#allocation3 + $0x8c]] }
 0x20c   : > { %v5879_v11 = vmul.f32 %v5787_v53, %v8488_v5  ;;  %v836_v18 = vadd.f32 %v8490_v52, %v696_v36  ;;  %v5888_v15 = vadd.f32 %v1057_v37, %v949_v34  ;;  %v5890_v60 = vadd.f32 %v1062_v25, %v962_v41  ;;  %v971_v53 = vpop.permute.xlu0 %970 }
 0x20d   : > { %v8491_v14 = vmov %v8484_v48  ;;  %v8492_v50 = vstv %s5588_s13  ;;  %v1063_v7 = vmul.f32 %v1061_v51, %v5371_v39  ;;  %v1070_v20 = vmul.f32 %v1069_v58, %v5414_v9  ;;  %v8499_v48 = vld [vmem:[#allocation51_spill] sm:$0xff]  ;;  %s4384_s13 = sld [smem:[#allocation3 + $0x10b]] }
 0x20e   : > { %v1423_v44 = vmul.f32 %v8491_v14, %v5371_v39  ;;  %v1436_v19 = vmul.f32 %v8492_v50, %v5358_v33  ;;  %v697_v47 = vadd.f32 %v8493_v57, %v557_v49  ;;  %v710_v45 = vadd.f32 %v8494_v62, %v570_v23 }
 0x20f   : > { %v963_v6 = vadd.f32 %v959_v16, %v823_v40  ;;  %v976_v2 = vadd.f32 %v971_v53, %v836_v18  ;;  %v571_v46 = vadd.f32 %v8495_v43, %v5738_v29  ;;  %v584_v35 = vadd.f32 %v8496_v61, %v5742_v32  ;;  %v973_v32 = vpop.permute.xlu1 %972  ;;  %v8504_v40 = vld [vmem:[#allocation33_spill] sm:$0xff]  ;;  %v8505_v18 = vld [vmem:[#allocation34_spill] sm:$0xff]  ;;  %v8511_v43 = vld [vmem:[#allocation43_spill] sm:$0xff] }
 0x210   : > { %v8497_v1 = vstv %s5519_s6  ;;  %1428 = vrot.lane.b32.xlu1 %v1423_v44, %s8476_s2  ;;  %1440 = vrot.lane.b32.xlu0 %v1436_v19, %s8476_s2  ;;  %v1081_v51 = vstv %s5854_s7  ;;  %v837_v10 = vadd.f32 %v8498_v17, %v697_v47  ;;  %v850_v27 = vadd.f32 %v8499_v48, %v710_v45  ;;  %v985_v25 = vpop.permute.xlu0 %984  ;;  %s5939_s6 = sld [smem:[#allocation3 + $0x485]]  ;;  %v8507_v44 = vld [vmem:[#allocation52_spill] sm:$0xff]  ;;  %v8508_v19 = vld [vmem:[#allocation53_spill] sm:$0xff] }
 0x211   : > { %v467_v4 = vadd.f32 %v5792_v28, %v8497_v1  ;;  %v5916_v37 = vadd.f32 %v1063_v7, %v963_v6  ;;  %v5918_v29 = vadd.f32 %v1070_v20, %v976_v2  ;;  %v8500_v28 = vmov %v8492_v50  ;;  %v8512_v61 = vld [vmem:[#allocation44_spill] sm:$0xff]  ;;  %s4394_s7 = sld [smem:[#allocation3 + $0x10c]] }
 0x212   : > { %v1437_v26 = vmul.f32 %v8500_v28, %v5371_v39  ;;  %v8501_v31 = vstv %s5594_s8  ;;  %v1071_v34 = vmul.f32 %v1069_v58, %v5429_v21  ;;  %v1076_v41 = vmul.f32 %v1075_v3, %v5414_v9  ;;  %s4385_s8 = sld [smem:[#allocation3 + $0x18b]] }
 0x213   : > { %v1450_v36 = vmul.f32 %v8501_v31, %v5414_v9  ;;  %v711_v49 = vadd.f32 %v8502_v30, %v571_v46  ;;  %v724_v23 = vadd.f32 %v8503_v63, %v584_v35  ;;  %v977_v5 = vadd.f32 %v973_v32, %v837_v10  ;;  %v8513_v10 = vld [vmem:[#allocation35_spill] sm:$0xff] }
 0x214   : > { %v990_v42 = vadd.f32 %v985_v25, %v850_v27  ;;  %v585_v52 = vadd.f32 %v8504_v40, %v5758_v12  ;;  %v598_v16 = vadd.f32 %v8505_v18, %v466_v24  ;;  %v8506_v53 = vstv %s5525_s30  ;;  %1442 = vrot.lane.b32.xlu1 %v1437_v26, %s8476_s2  ;;  %v987_v24 = vpop.permute.xlu1 %986  ;;  %v999_v57 = vpop.permute.xlu0 %998  ;;  %v8514_v27 = vld [vmem:[#allocation36_spill] sm:$0xff]  ;;  %v8516_v26 = vld [vmem:[#allocation54_spill] sm:$0xff]  ;;  %s6002_s30 = sld [smem:[#allocation3 + $0x89]] }
 0x215   : > { %v472_v14 = vadd.f32 %v5821_v56, %v8506_v53  ;;  %1454 = vrot.lane.b32.xlu0 %v1450_v36, %s8476_s2  ;;  %v1087_v58 = vstv %s5884_s26  ;;  %v851_v50 = vadd.f32 %v8507_v44, %v711_v49  ;;  %v864_v7 = vadd.f32 %v8508_v19, %v724_v23  ;;  %v8517_v36 = vld [vmem:[#allocation55_spill] sm:$0xff]  ;;  %s4395_s26 = sld [smem:[#allocation3 + $0x18c]] }
 0x216   : > { %v5943_v20 = vadd.f32 %v1071_v34, %v977_v5  ;;  %v5945_v12 = vadd.f32 %v1076_v41, %v990_v42  ;;  %v8509_v56 = vmov %v8501_v31  ;;  %v8510_v62 = vstv %s5600_s21  ;;  %s8542_s21 = smov 127  }
 0x217   : > { %v1451_v47 = vmul.f32 %v8509_v56, %v5429_v21  ;;  %v1464_v45 = vmul.f32 %v8510_v62, %v5414_v9  ;;  %v1077_v6 = vmul.f32 %v1075_v3, %v5429_v21  ;;  %v1082_v2 = vmul.f32 %v1081_v51, %v5414_v9 }
 0x218   : > { %v725_v46 = vadd.f32 %v8511_v43, %v585_v52  ;;  %v738_v35 = vadd.f32 %v8512_v61, %v598_v16  ;;  %v991_v1 = vadd.f32 %v987_v24, %v851_v50  ;;  %v1004_v17 = vadd.f32 %v999_v57, %v864_v7  ;;  %v1013_v49 = vpop.permute.xlu0 %1012  ;;  %v8522_v52 = vld [vmem:[#allocation45_spill] sm:$0xff]  ;;  %v8523_v16 = vld [vmem:[#allocation46_spill] sm:$0xff] }
 0x219   : > { %v599_v48 = vadd.f32 %v8513_v10, %v467_v4  ;;  %v612_v32 = vadd.f32 %v8514_v27, %v472_v14  ;;  %v8515_v25 = vmov %v8506_v53  ;;  %1456 = vrot.lane.b32.xlu1 %v1451_v47, %s8476_s2  ;;  %1468 = vrot.lane.b32.xlu0 %v1464_v45, %s8476_s2  ;;  %v1491_v3 = vstv %s5911_s25  ;;  %v1001_v4 = vpop.permute.xlu1 %1000  ;;  %v8524_v50 = vld [vmem:[#allocation37_spill] sm:$0xff]  ;;  %s4396_s25 = sld [smem:[#allocation3 + $0x20c]] }
 0x21a   : > { %v473_v28 = vadd.f32 %v5879_v11, %v8515_v25  ;;  %v865_v31 = vadd.f32 %v8516_v26, %v725_v46  ;;  %v878_v34 = vadd.f32 %v8517_v36, %v738_v35  ;;  %v5969_v41 = vadd.f32 %v1077_v6, %v991_v1  ;;  %v8526_v57 = vld [vmem:[#allocation57_spill] sm:$0xff]  ;;  %v8530_v1 = vld [vmem:[#allocation47_spill] sm:$0xff] }
 0x21b   : > { %v5971_v30 = vadd.f32 %v1082_v2, %v1004_v17  ;;  %v8520_v63 = vmov %v8510_v62  ;;  %v8521_v11 = vstv %s5606_s19  ;;  %v1083_v42 = vmul.f32 %v1081_v51, %v5429_v21  ;;  %v8525_v51 = vld [vmem:[#allocation56_spill] sm:$0xff]  ;;  %s4386_s19 = sld [smem:[#allocation3 + $0x20b]] }
 0x21c   : > { %8518 = vst [vmem:[#allocation38_spill] sm:$0xff] %v5969_v41  ;;  %v1465_v23 = vmul.f32 %v8520_v63, %v5429_v21  ;;  %v1478_v5 = vmul.f32 %v8521_v11, %v5414_v9  ;;  %v1088_v40 = vmul.f32 %v1087_v58, %v5414_v9  ;;  %v739_v18 = vadd.f32 %v8522_v52, %v599_v48  ;;  %v1027_v6 = vpop.permute.xlu0 %1026 }
 0x21d   : > { %8519 = vst [vmem:[#allocation29_spill] sm:$0xff] %v5971_v30  ;;  %v752_v53 = vadd.f32 %v8523_v16, %v612_v32  ;;  %v1005_v14 = vadd.f32 %v1001_v4, %v865_v31  ;;  %v1018_v44 = vadd.f32 %v1013_v49, %v878_v34  ;;  %v613_v19 = vadd.f32 %v8524_v50, %v473_v28  ;;  %v1015_v45 = vpop.permute.xlu1 %1014 }
 0x21e   : > { %1470 = vrot.lane.b32.xlu1 %v1465_v23, %s8476_s2  ;;  %1482 = vrot.lane.b32.xlu0 %v1478_v5, %s8476_s2  ;;  %v1093_v7 = vstv %s5939_s6  ;;  %v879_v24 = vadd.f32 %v8525_v51, %v739_v18  ;;  %v8529_v2 = vmov %v8521_v11  ;;  %v1492_v46 = vmul.f32 %v1491_v3, %v5414_v9  ;;  %s4397_s6 = sld [smem:[#allocation3 + $0x28c]] }
 0x21f   : > { %v892_v56 = vadd.f32 %v8526_v57, %v752_v53  ;;  %v5991_v47 = vadd.f32 %v1083_v42, %v1005_v14  ;;  %v5993_v62 = vadd.f32 %v1088_v40, %v1018_v44  ;;  %v1479_v43 = vmul.f32 %v8529_v2, %v5429_v21 }
 0x220   : > { %v1505_v61 = vstv %s5953_s27  ;;  %v1089_v35 = vmul.f32 %v1087_v58, %v5429_v21  ;;  %v753_v17 = vadd.f32 %v8530_v1, %v613_v19  ;;  %v1019_v10 = vadd.f32 %v1015_v45, %v879_v24  ;;  %v6012_v26 = vpop.permute.xlu0 %1104  ;;  %s4398_s27 = sld [smem:[#allocation3 + $0x30c]] }
 0x221   : > { %8527 = vst [vmem:[#allocation30_spill] sm:$0xff] %v5991_v47  ;;  %8528 = vst [vmem:[#allocation48_spill] sm:$0xff] %v5993_v62  ;;  %v1032_v48 = vadd.f32 %v1027_v6, %v892_v56  ;;  %v1094_v27 = vmul.f32 %v1093_v7, %v5414_v9  ;;  %v1029_v58 = vpop.permute.xlu1 %1028  ;;  %v1493_v31 = vmul.f32 %v1491_v3, %v5429_v21  ;;  %v1519_v4 = vstv %s5983_s28  ;;  %s6244_s28 = sld [smem:[#allocation3 + $0x38c]] }
 0x222   : > { %1484 = vrot.lane.b32.xlu1 %v1479_v43, %s8476_s2  ;;  %1496 = vrot.lane.b32.xlu0 %v1492_v46, %s8476_s2  ;;  %v893_v32 = vadd.f32 %v5744_v38, %v753_v17  ;;  %v6008_v25 = vadd.f32 %v1089_v35, %v1019_v10  ;;  %v1506_v36 = vmul.f32 %v1505_v61, %v5414_v9  ;;  %v1533_v5 = vstv %s6002_s30  ;;  %s6254_s30 = sld [smem:[#allocation3 + $0x40c]] }
 0x223   : > { %v6010_v28 = vadd.f32 %v1094_v27, %v1032_v48  ;;  %v1095_v49 = vmul.f32 %v1093_v7, %v5429_v21  ;;  %v1507_v3 = vmul.f32 %v1505_v61, %v5429_v21  ;;  %v1520_v11 = vmul.f32 %v1519_v4, %v5358_v33 }
 0x224   : > { %8531 = vst [vmem:[#allocation49_spill] sm:$0xff] %v6008_v25  ;;  %v1033_v34 = vadd.f32 %v1029_v58, %v893_v32  ;;  %v6026_v23 = vpop.permute.xlu0 %1118  ;;  %v1521_v52 = vmul.f32 %v1519_v4, %v5371_v39  ;;  %v1534_v18 = vmul.f32 %v1533_v5, %v5358_v33  ;;  %v1547_v16 = vstv %s6017_s11  ;;  %s6264_s11 = sld [smem:[#allocation3 + $0x48c]] }
 0x225   : > { %8532 = vst [vmem:[#allocation39_spill] sm:$0xff] %v6010_v28  ;;  %v6024_v63 = vpop.permute.xlu1 %1106  ;;  %v1535_v44 = vmul.f32 %v1533_v5, %v5371_v39  ;;  %v1548_v50 = vmul.f32 %v1547_v16, %v5358_v33  ;;  %v1561_v19 = vstv %s4365_s12  ;;  %v1549_v24 = vmul.f32 %v1547_v16, %v5371_v39  ;;  %s6267_s12 = sld [smem:[#allocation3 + $0xa]] }
 0x226   : > { %1498 = vrot.lane.b32.xlu1 %v1493_v31, %s8476_s2  ;;  %1510 = vrot.lane.b32.xlu0 %v1506_v36, %s8476_s2  ;;  %v6022_v38 = vadd.f32 %v1095_v49, %v1033_v34  ;;  %v1562_v57 = vmul.f32 %v1561_v19, %v5358_v33  ;;  %v1575_v56 = vstv %s4366_s15  ;;  %v1563_v2 = vmul.f32 %v1561_v19, %v5371_v39  ;;  %v6108_v19 = vld [vmem:[#allocation2 + $0x2] sm:$0xff]  ;;  %s6277_s15 = sld [smem:[#allocation3 + $0xd]] }
 0x227   : > { %v1576_v43 = vmul.f32 %v1575_v56, %v5358_v33  ;;  %v1589_v46 = vstv %s4367_s29  ;;  %v1577_v1 = vmul.f32 %v1575_v56, %v5371_v39  ;;  %v1603_v10 = vstv %s4368_s20  ;;  %s6280_s29 = sld [smem:[#allocation3 + $0x8a]] }
 0x228   : > { %8533 = vst [vmem:[#allocation40_spill] sm:$0xff] %v6022_v38  ;;  %v6035_v40 = vpop.permute.xlu0 %1132  ;;  %v1590_v17 = vmul.f32 %v1589_v46, %v5414_v9  ;;  %v1591_v27 = vmul.f32 %v1589_v46, %v5429_v21  ;;  %v1604_v32 = vmul.f32 %v1603_v10, %v5414_v9  ;;  %v1617_v58 = vstv %s4369_s23  ;;  %v6119_v46 = vld [vmem:[#allocation2 + $0xa] sm:$0xff]  ;;  %s6284_s20 = sld [smem:[#allocation3 + $0x8d]] }
 0x229   : > { %v6033_v42 = vpop.permute.xlu1 %1120  ;;  %v1605_v36 = vmul.f32 %v1603_v10, %v5429_v21  ;;  %v1618_v34 = vmul.f32 %v1617_v58, %v5414_v9  ;;  %v1631_v4 = vstv %s4370_s22  ;;  %v1891_v62 = vstv %s4394_s7  ;;  %s6294_s23 = sld [smem:[#allocation3 + $0x10a]] }
 0x22a   : > { %1512 = vrot.lane.b32.xlu1 %v1507_v3, %s8476_s2  ;;  %1524 = vrot.lane.b32.xlu0 %v1520_v11, %s8534_s17  ;;  %v1619_v11 = vmul.f32 %v1617_v58, %v5429_v21  ;;  %v1632_v5 = vmul.f32 %v1631_v4, %v5414_v9  ;;  %v1905_v47 = vstv %s4395_s26  ;;  %v1933_v30 = vstv %s4397_s6  ;;  %s6301_s22 = sld [smem:[#allocation3 + $0x10d]] }
 0x22b   : > { %v1947_v41 = vstv %s4398_s27  ;;  %s6476_s7 = sld [smem:[#allocation3 + $0x48d]] }
 0x22c   : > { %v6044_v14 = vpop.permute.xlu0 %1146  ;;  %s6502_s26 = sld [smem:[#allocation3 + $0xe]] }
 0x22d   : > { %v6042_v53 = vpop.permute.xlu1 %1134  ;;  %s6535_s6 = sld [smem:[#allocation3 + $0x10e]] }
 0x22e   : > { %1526 = vrot.lane.b32.xlu1 %v1521_v52, %s8534_s17  ;;  %1538 = vrot.lane.b32.xlu0 %v1534_v18, %s8534_s17  ;;  %v1645_v52 = vstv %s4371_s9  ;;  %s6314_s9 = sld [smem:[#allocation3 + $0x18a]] }
 0x22f   : > { %s4415_s27 = sld [smem:[#allocation3 + $0x18e]] }
 0x230   : > { %v6052_v51 = vpop.permute.xlu0 %1160 }
 0x231   : > { %v6050_v7 = vpop.permute.xlu1 %1148 }
 0x232   : > { %1540 = vrot.lane.b32.xlu1 %v1535_v44, %s8534_s17  ;;  %1552 = vrot.lane.b32.xlu0 %v1548_v50, %s8534_s17  ;;  %v1633_v44 = vmul.f32 %v1631_v4, %v5429_v21  ;;  %v1646_v50 = vmul.f32 %v1645_v52, %v5414_v9  ;;  %v1765_v4 = vstv %s4385_s8  ;;  %s6361_s8 = sld [smem:[#allocation3 + $0x28a]] }
 0x234   : > { %v6060_v6 = vpop.permute.xlu0 %1174 }
 0x235   : > { %v6058_v45 = vpop.permute.xlu1 %1162 }
 0x236   : > { %1554 = vrot.lane.b32.xlu1 %v1549_v24, %s8534_s17  ;;  %1566 = vrot.lane.b32.xlu0 %v1562_v57, %s8534_s17  ;;  %v1723_v24 = vstv %s6088_s14  ;;  %s6325_s14 = sld [smem:[#allocation3 + $0x18d]] }
 0x237   : > { %v1725_v10 = vmul.f32 %v1723_v24, %v6119_v46 }
 0x238   : > { %v6068_v35 = vpop.permute.xlu0 %1188 }
 0x239   : > { %v6066_v61 = vpop.permute.xlu1 %1176 }
 0x23a   : > { %1568 = vrot.lane.b32.xlu1 %v1563_v2, %s8534_s17  ;;  %1580 = vrot.lane.b32.xlu0 %v1576_v43, %s8534_s17  ;;  %v1647_v2 = vmul.f32 %v1645_v52, %v5429_v21  ;;  %v1724_v43 = vmul.f32 %v1723_v24, %v6108_v19 }
 0x23c   : > { %v6076_v48 = vpop.permute.xlu0 %1202 }
 0x23d   : > { %v6074_v33 = vpop.permute.xlu1 %1190  ;;  %8536 = vst [vmem:[#allocation32_spill] sm:$0xff] %v6076_v48 }
 0x23e   : > { %1582 = vrot.lane.b32.xlu1 %v1577_v1, %s8534_s17  ;;  %1594 = vrot.lane.b32.xlu0 %v1590_v17, %s8534_s17  ;;  %8535 = vst [vmem:[#allocation31_spill] sm:$0xff] %v6074_v33  ;;  %v1737_v1 = vstv %s6098_s18  ;;  %s6337_s18 = sld [smem:[#allocation3 + $0x20a]] }
 0x240   : > { %v6084_v31 = vpop.permute.xlu0 %1216 }
 0x241   : > { %v6082_v39 = vpop.permute.xlu1 %1204  ;;  %8538 = vst [vmem:[#allocation51_spill] sm:$0xff] %v6084_v31 }
 0x242   : > { %1596 = vrot.lane.b32.xlu1 %v1591_v27, %s8534_s17  ;;  %1608 = vrot.lane.b32.xlu0 %v1604_v32, %s8534_s17  ;;  %8537 = vst [vmem:[#allocation50_spill] sm:$0xff] %v6082_v39  ;;  %v1738_v27 = vmul.f32 %v1737_v1, %v6108_v19  ;;  %v1751_v32 = vstv %s4384_s13  ;;  %s6349_s13 = sld [smem:[#allocation3 + $0x20d]] }
 0x243   : > { %v1753_v52 = vmul.f32 %v1751_v32, %v6119_v46 }
 0x244   : > { %v6094_v3 = vpop.permute.xlu0 %1230 }
 0x245   : > { %v6092_v49 = vpop.permute.xlu1 %1218  ;;  %8540 = vst [vmem:[#allocation42_spill] sm:$0xff] %v6094_v3  ;;  %v1821_v3 = vstv %s4389_s16  ;;  %s6409_s16 = sld [smem:[#allocation3 + $0x38a]] }
 0x246   : > { %1610 = vrot.lane.b32.xlu1 %v1605_v36, %s8534_s17  ;;  %1622 = vrot.lane.b32.xlu0 %v1618_v34, %s8534_s17  ;;  %8539 = vst [vmem:[#allocation41_spill] sm:$0xff] %v6092_v49  ;;  %v1739_v36 = vmul.f32 %v1737_v1, %v6119_v46  ;;  %v1752_v34 = vmul.f32 %v1751_v32, %v6108_v19  ;;  %v1835_v49 = vstv %s4390_s3  ;;  %s6421_s3 = sld [smem:[#allocation3 + $0x38d]] }
 0x248   : > { %v6104_v16 = vpop.permute.xlu0 %1244 }
 0x249   : > { %v6102_v18 = vpop.permute.xlu1 %1232 }
 0x24a   : > { %1624 = vrot.lane.b32.xlu1 %v1619_v11, %s8534_s17  ;;  %1636 = vrot.lane.b32.xlu0 %v1632_v5, %s8534_s17  ;;  %8541 = vst [vmem:[#allocation33_spill] sm:$0xff] %v6102_v18 }
 0x24c   : > { %v6115_v56 = vpop.permute.xlu0 %1258 }
 0x24d   : > { %v6113_v57 = vpop.permute.xlu1 %1246 }
 0x24e   : > { %1638 = vrot.lane.b32.xlu1 %v1633_v44, %s8534_s17  ;;  %1650 = vrot.lane.b32.xlu0 %v1646_v50, %s8534_s17  ;;  %v1766_v44 = vmul.f32 %v1765_v4, %v6108_v19  ;;  %v1779_v50 = vstv %s4386_s19  ;;  %s6373_s19 = sld [smem:[#allocation3 + $0x28d]] }
 0x24f   : > { %v1780_v1 = vmul.f32 %v1779_v50, %v6108_v19 }
 0x250   : > { %v6126_v17 = vpop.permute.xlu0 %1272 }
 0x251   : > { %v6124_v9 = vpop.permute.xlu1 %1260 }
 0x252   : > { %1652 = vrot.lane.b32.xlu1 %v1647_v2, %s8534_s17  ;;  %1728 = vrot.lane.b32.xlu0 %v1724_v43, %s8542_s21  ;;  %v1767_v43 = vmul.f32 %v1765_v4, %v6119_v46  ;;  %v1807_v4 = vstv %s6148_s24  ;;  %s6397_s24 = sld [smem:[#allocation3 + $0x30d]] }
 0x254   : > { %v6134_v58 = vpop.permute.xlu0 %1286 }
 0x255   : > { %v6132_v21 = vpop.permute.xlu1 %1274 }
 0x256   : > { %1730 = vrot.lane.b32.xlu1 %v1725_v10, %s8542_s21  ;;  %1742 = vrot.lane.b32.xlu0 %v1738_v27, %s8542_s21  ;;  %v6158_v10 = vld [vmem:[#allocation2 + $0x1a] sm:$0xff]  ;;  %v1793_v27 = vstv %s6138_s1  ;;  %s6385_s1 = sld [smem:[#allocation3 + $0x30a]] }
 0x257   : > { %v1808_v38 = vmul.f32 %v1807_v4, %v6158_v10  ;;  %v1934_v33 = vmul.f32 %v1933_v30, %v6158_v10 }
 0x258   : > { %v6144_v5 = vpop.permute.xlu0 %1300 }
 0x259   : > { %v6142_v11 = vpop.permute.xlu1 %1288 }
 0x25a   : > { %1744 = vrot.lane.b32.xlu1 %v1739_v36, %s8542_s21  ;;  %1756 = vrot.lane.b32.xlu0 %v1752_v34, %s8542_s21  ;;  %v1781_v34 = vmul.f32 %v1779_v50, %v6119_v46 }
 0x25c   : > { %v6154_v2 = vpop.permute.xlu0 %1314 }
 0x25d   : > { %v6152_v24 = vpop.permute.xlu1 %1302 }
 0x25e   : > { %1758 = vrot.lane.b32.xlu1 %v1753_v52, %s8542_s21  ;;  %1770 = vrot.lane.b32.xlu0 %v1766_v44, %s8542_s21  ;;  %v1794_v52 = vmul.f32 %v1793_v27, %v6158_v10  ;;  %v6169_v44 = vld [vmem:[#allocation2 + $0x22] sm:$0xff] }
 0x260   : > { %v6165_v36 = vpop.permute.xlu0 %1328 }
 0x261   : > { %v6163_v32 = vpop.permute.xlu1 %1316 }
 0x262   : > { %1772 = vrot.lane.b32.xlu1 %v1767_v43, %s8542_s21  ;;  %1784 = vrot.lane.b32.xlu0 %v1780_v1, %s8542_s21  ;;  %v1795_v1 = vmul.f32 %v1793_v27, %v6169_v44 }
 0x264   : > { %v6176_v43 = vpop.permute.xlu0 %1342 }
 0x265   : > { %v6174_v18 = vpop.permute.xlu1 %1330  ;;  %8544 = vst [vmem:[#allocation52_spill] sm:$0xff] %v6176_v43 }
 0x266   : > { %1786 = vrot.lane.b32.xlu1 %v1781_v34, %s8542_s21  ;;  %1798 = vrot.lane.b32.xlu0 %v1794_v52, %s8542_s21  ;;  %8543 = vst [vmem:[#allocation34_spill] sm:$0xff] %v6174_v18  ;;  %v1809_v34 = vmul.f32 %v1807_v4, %v6169_v44  ;;  %v1822_v52 = vmul.f32 %v1821_v3, %v6158_v10  ;;  %v1919_v18 = vstv %s4396_s25  ;;  %s6520_s25 = sld [smem:[#allocation3 + $0x8e]] }
 0x268   : > { %v6184_v28 = vpop.permute.xlu0 %1356 }
 0x269   : > { %v6182_v50 = vpop.permute.xlu1 %1344  ;;  %8546 = vst [vmem:[#allocation43_spill] sm:$0xff] %v6184_v28 }
 0x26a   : > { %1800 = vrot.lane.b32.xlu1 %v1795_v1, %s8542_s21  ;;  %1812 = vrot.lane.b32.xlu0 %v1808_v38, %s8542_s21  ;;  %8545 = vst [vmem:[#allocation53_spill] sm:$0xff] %v6182_v50  ;;  %v1823_v38 = vmul.f32 %v1821_v3, %v6169_v44  ;;  %v1836_v1 = vmul.f32 %v1835_v49, %v6158_v10  ;;  %v1849_v50 = vstv %s4391_s0  ;;  %s6433_s0 = sld [smem:[#allocation3 + $0x40a]] }
 0x26c   : > { %v6192_v25 = vpop.permute.xlu0 %1370 }
 0x26d   : > { %v6190_v27 = vpop.permute.xlu1 %1358  ;;  %8548 = vst [vmem:[#allocation35_spill] sm:$0xff] %v6192_v25 }
 0x26e   : > { %1814 = vrot.lane.b32.xlu1 %v1809_v34, %s8542_s21  ;;  %1826 = vrot.lane.b32.xlu0 %v1822_v52, %s8542_s21  ;;  %8547 = vst [vmem:[#allocation44_spill] sm:$0xff] %v6190_v27  ;;  %v1837_v34 = vmul.f32 %v1835_v49, %v6169_v44  ;;  %v1850_v52 = vmul.f32 %v1849_v50, %v6158_v10  ;;  %v1863_v27 = vstv %s4392_s4  ;;  %s6452_s4 = sld [smem:[#allocation3 + $0x40d]] }
 0x270   : > { %v6200_v28 = vpop.permute.xlu0 %1384 }
 0x271   : > { %v6198_v4 = vpop.permute.xlu1 %1372 }
 0x272   : > { %1828 = vrot.lane.b32.xlu1 %v1823_v38, %s8542_s21  ;;  %1840 = vrot.lane.b32.xlu0 %v1836_v1, %s8542_s21  ;;  %8549 = vst [vmem:[#allocation36_spill] sm:$0xff] %v6198_v4  ;;  %v1851_v38 = vmul.f32 %v1849_v50, %v6169_v44  ;;  %v1864_v1 = vmul.f32 %v1863_v27, %v6108_v19  ;;  %v1877_v4 = vstv %s4393_s5  ;;  %s6467_s5 = sld [smem:[#allocation3 + $0x48a]] }
 0x274   : > { %v6208_v25 = vpop.permute.xlu0 %1398 }
 0x275   : > { %v6206_v3 = vpop.permute.xlu1 %1386 }
 0x276   : > { %1842 = vrot.lane.b32.xlu1 %v1837_v34, %s8542_s21  ;;  %1854 = vrot.lane.b32.xlu0 %v1850_v52, %s8542_s21  ;;  %v1865_v34 = vmul.f32 %v1863_v27, %v6119_v46  ;;  %v1878_v52 = vmul.f32 %v1877_v4, %v6108_v19 }
 0x278   : > { %v6216_v31 = vpop.permute.xlu0 %1412 }
 0x279   : > { %v6214_v49 = vpop.permute.xlu1 %1400 }
 0x27a   : > { %1856 = vrot.lane.b32.xlu1 %v1851_v38, %s8542_s21  ;;  %1868 = vrot.lane.b32.xlu0 %v1864_v1, %s8438_s10  ;;  %v1879_v38 = vmul.f32 %v1877_v4, %v6119_v46  ;;  %v1892_v1 = vmul.f32 %v1891_v62, %v6108_v19 }
 0x27d   : > { %v6222_v50 = vpop.permute.xlu1 %1414  ;;  %v6224_v39 = vpop.permute.xlu0 %1426 }
 0x27e   : > { %1870 = vrot.lane.b32.xlu1 %v1865_v34, %s8438_s10  ;;  %1882 = vrot.lane.b32.xlu0 %v1878_v52, %s8438_s10  ;;  %v1893_v34 = vmul.f32 %v1891_v62, %v6119_v46  ;;  %v1906_v52 = vmul.f32 %v1905_v47, %v6108_v19 }
 0x282   : > { %1884 = vrot.lane.b32.xlu1 %v1879_v38, %s8438_s10  ;;  %1896 = vrot.lane.b32.xlu0 %v1892_v1, %s8438_s10  ;;  %v6230_v27 = vpop.permute.xlu1 %1428  ;;  %v6232_v43 = vpop.permute.xlu0 %1440  ;;  %v1907_v38 = vmul.f32 %v1905_v47, %v6119_v46  ;;  %v1920_v1 = vmul.f32 %v1919_v18, %v6108_v19 }
 0x286   : > { %1898 = vrot.lane.b32.xlu1 %v1893_v34, %s8438_s10  ;;  %1910 = vrot.lane.b32.xlu0 %v1906_v52, %s8438_s10  ;;  %v6238_v4 = vpop.permute.xlu1 %1442  ;;  %v1921_v52 = vmul.f32 %v1919_v18, %v6119_v46  ;;  %v1961_v18 = vstv %s6244_s28  ;;  %s4416_s28 = sld [smem:[#allocation3 + $0x20e]] }
 0x287   : > { %v6240_v48 = vpop.permute.xlu0 %1454 }
 0x28a   : > { %1912 = vrot.lane.b32.xlu1 %v1907_v38, %s8438_s10  ;;  %1924 = vrot.lane.b32.xlu0 %v1920_v1, %s8438_s10  ;;  %v1935_v1 = vmul.f32 %v1933_v30, %v6169_v44  ;;  %v1962_v30 = vmul.f32 %v1961_v18, %v6158_v10 }
 0x28b   : > { %v6248_v62 = vpop.permute.xlu1 %1456  ;;  %v6250_v34 = vpop.permute.xlu0 %1468 }
 0x28c   : > { %8550 = vst [vmem:[#allocation54_spill] sm:$0xff] %v6248_v62  ;;  %8551 = vst [vmem:[#allocation55_spill] sm:$0xff] %v6250_v34  ;;  %v1948_v34 = vmul.f32 %v1947_v41, %v6158_v10  ;;  %v1989_v62 = vstv %s6264_s11  ;;  %s4418_s11 = sld [smem:[#allocation3 + $0x30e]] }
 0x28e   : > { %1926 = vrot.lane.b32.xlu1 %v1921_v52, %s8438_s10  ;;  %1938 = vrot.lane.b32.xlu0 %v1934_v33, %s8438_s10 }
 0x290   : > { %v6258_v47 = vpop.permute.xlu1 %1470  ;;  %v6260_v38 = vpop.permute.xlu0 %1482 }
 0x291   : > { %8552 = vst [vmem:[#allocation45_spill] sm:$0xff] %v6258_v47  ;;  %8553 = vst [vmem:[#allocation46_spill] sm:$0xff] %v6260_v38  ;;  %v1949_v38 = vmul.f32 %v1947_v41, %v6169_v44  ;;  %v1975_v47 = vstv %s6254_s30  ;;  %s4417_s30 = sld [smem:[#allocation3 + $0x28e]] }
 0x292   : > { %1940 = vrot.lane.b32.xlu1 %v1935_v1, %s8438_s10  ;;  %1952 = vrot.lane.b32.xlu0 %v1948_v34, %s8438_s10  ;;  %v1110_v34 = vadd.f32 %v6012_v26, %v5773_v22  ;;  %v1111_v22 = vadd.f32 %v6024_v63, %v5801_v54  ;;  %v1124_v26 = vadd.f32 %v6026_v23, %v5803_v55  ;;  %v1667_v23 = vstv %s6280_s29  ;;  %s4421_s29 = sld [smem:[#allocation3 + $0x48e]] }
 0x294   : > { %v6271_v52 = vpop.permute.xlu1 %1484  ;;  %v6273_v33 = vpop.permute.xlu0 %1496  ;;  %v1251_v54 = vadd.f32 %v6113_v57, %v1111_v22  ;;  %v1264_v63 = vadd.f32 %v6115_v56, %v1124_v26  ;;  %v1138_v57 = vadd.f32 %v6035_v40, %v5832_v13 }
 0x295   : > { %8554 = vst [vmem:[#allocation37_spill] sm:$0xff] %v6271_v52  ;;  %8555 = vst [vmem:[#allocation56_spill] sm:$0xff] %v6273_v33  ;;  %v1963_v33 = vmul.f32 %v1961_v18, %v6169_v44  ;;  %v1976_v52 = vmul.f32 %v1975_v47, %v6158_v10 }
 0x296   : > { %1954 = vrot.lane.b32.xlu1 %v1949_v38, %s8438_s10  ;;  %1966 = vrot.lane.b32.xlu0 %v1962_v30, %s8438_s10  ;;  %v1250_v38 = vadd.f32 %v6104_v16, %v1110_v34  ;;  %v1661_v30 = vstv %s6267_s12  ;;  %v1977_v34 = vmul.f32 %v1975_v47, %v6169_v44  ;;  %v1991_v47 = vmul.f32 %v1989_v62, %v6169_v44  ;;  %s4419_s12 = sld [smem:[#allocation3 + $0x38e]] }
 0x297   : > { %v1391_v56 = vadd.f32 %v6206_v3, %v1251_v54  ;;  %v1404_v22 = vadd.f32 %v6208_v25, %v1264_v63  ;;  %v1278_v40 = vadd.f32 %v6126_v17, %v1138_v57  ;;  %v2031_v54 = vstv %s6301_s22  ;;  %s4434_s22 = sld [smem:[#allocation3 + $0x110]] }
 0x298   : > { %v6288_v1 = vpop.permute.xlu1 %1498  ;;  %v6290_v41 = vpop.permute.xlu0 %1510  ;;  %v1390_v18 = vadd.f32 %v6200_v28, %v1250_v38  ;;  %v1125_v28 = vadd.f32 %v6033_v42, %v5830_v59  ;;  %v2017_v38 = vstv %s6284_s20  ;;  %s6606_s20 = sld [smem:[#allocation3 + $0x10]] }
 0x299   : > { %8556 = vst [vmem:[#allocation57_spill] sm:$0xff] %v6288_v1  ;;  %8557 = vst [vmem:[#allocation47_spill] sm:$0xff] %v6290_v41  ;;  %v2003_v1 = vstv %s6277_s15  ;;  %v1418_v17 = vadd.f32 %v6216_v31, %v1278_v40  ;;  %v1167_v40 = vadd.f32 %v6058_v45, %v5916_v37  ;;  %s4420_s15 = sld [smem:[#allocation3 + $0x40e]] }
 0x29a   : > { %1968 = vrot.lane.b32.xlu1 %v1963_v33, %s8438_s10  ;;  %1980 = vrot.lane.b32.xlu0 %v1976_v52, %s8438_s10  ;;  %v1990_v33 = vmul.f32 %v1989_v62, %v6158_v10  ;;  %v1662_v52 = vmul.f32 %v1661_v30, %v6108_v19  ;;  %v2004_v42 = vmul.f32 %v2003_v1, %v6108_v19 }
 0x29b   : > { %v1668_v62 = vmul.f32 %v1667_v23, %v6108_v19  ;;  %v1265_v13 = vadd.f32 %v6124_v9, %v1125_v28  ;;  %v1679_v28 = vstv %s6314_s9  ;;  %s4435_s9 = sld [smem:[#allocation3 + $0x190]] }
 0x29c   : > { %v6308_v41 = vpop.permute.xlu1 %1512  ;;  %v1525_v16 = vpop.permute.xlu0 %1524 }
 0x29d   : > { %v1530_v55 = vadd.f32 %v1525_v16, %v1390_v18  ;;  %v1663_v16 = vmul.f32 %v1661_v30, %v6119_v46  ;;  %v2005_v30 = vmul.f32 %v2003_v1, %v6119_v46  ;;  %v1405_v9 = vadd.f32 %v6214_v49, %v1265_v13 }
 0x29e   : > { %1982 = vrot.lane.b32.xlu1 %v1977_v34, %s8438_s10  ;;  %1994 = vrot.lane.b32.xlu0 %v1990_v33, %s8438_s10  ;;  %v1673_v34 = vstv %s6294_s23  ;;  %v1139_v33 = vadd.f32 %v6042_v53, %v5858_v8  ;;  %s6616_s23 = sld [smem:[#allocation3 + $0x90]] }
 0x29f   : > { %v6331_v26 = vadd.f32 %v1662_v52, %v1530_v55  ;;  %v1152_v52 = vadd.f32 %v6044_v14, %v5860_v0  ;;  %v2018_v14 = vmul.f32 %v2017_v38, %v6108_v19  ;;  %v1669_v55 = vmul.f32 %v1667_v23, %v6119_v46 }
 0x2a0   : > { %v1527_v18 = vpop.permute.xlu1 %1526  ;;  %v1539_v59 = vpop.permute.xlu0 %1538  ;;  %v1674_v1 = vmul.f32 %v1673_v34, %v6108_v19  ;;  %v1279_v49 = vadd.f32 %v6132_v21, %v1139_v33  ;;  %v2019_v23 = vmul.f32 %v2017_v38, %v6119_v46  ;;  %v1680_v38 = vmul.f32 %v1679_v28, %v6108_v19 }
 0x2a1   : > { %v1531_v3 = vadd.f32 %v1527_v18, %v1391_v56  ;;  %v1544_v25 = vadd.f32 %v1539_v59, %v1404_v22  ;;  %v1292_v31 = vadd.f32 %v6134_v58, %v1152_v52  ;;  %v1153_v56 = vadd.f32 %v6050_v7, %v5888_v15 }
 0x2a2   : > { %1996 = vrot.lane.b32.xlu1 %v1991_v47, %s8438_s10  ;;  %2008 = vrot.lane.b32.xlu0 %v2004_v42, %s8476_s2  ;;  %v1166_v22 = vadd.f32 %v6052_v51, %v5890_v60  ;;  %v2045_v18 = vstv %s6325_s14  ;;  %v1419_v21 = vadd.f32 %v6222_v50, %v1279_v49  ;;  %v2032_v51 = vmul.f32 %v2031_v54, %v6108_v19  ;;  %s4436_s14 = sld [smem:[#allocation3 + $0x210]] }
 0x2a3   : > { %v6353_v63 = vadd.f32 %v1663_v16, %v1531_v3  ;;  %v6355_v8 = vadd.f32 %v1668_v62, %v1544_v25  ;;  %v1432_v58 = vadd.f32 %v6224_v39, %v1292_v31  ;;  %v1675_v42 = vmul.f32 %v1673_v34, %v6119_v46 }
 0x2a4   : > { %v1541_v53 = vpop.permute.xlu1 %1540  ;;  %v1553_v0 = vpop.permute.xlu0 %1552  ;;  %v1685_v16 = vstv %s6337_s18  ;;  %v1293_v50 = vadd.f32 %v6142_v11, %v1153_v56  ;;  %v1306_v39 = vadd.f32 %v6144_v5, %v1166_v22  ;;  %v1180_v3 = vadd.f32 %v6060_v6, %v5918_v29  ;;  %v8558_v56 = vld [vmem:[#allocation38_spill] sm:$0xff]  ;;  %v8559_v22 = vld [vmem:[#allocation31_spill] sm:$0xff]  ;;  %s6656_s18 = sld [smem:[#allocation3 + $0x290]] }
 0x2a5   : > { %v1545_v47 = vadd.f32 %v1541_v53, %v1405_v9  ;;  %v1558_v57 = vadd.f32 %v1553_v0, %v1418_v17  ;;  %v2033_v34 = vmul.f32 %v2031_v54, %v6119_v46  ;;  %v2059_v25 = vstv %s6349_s13  ;;  %s6666_s13 = sld [smem:[#allocation3 + $0x310]] }
 0x2a6   : > { %2010 = vrot.lane.b32.xlu1 %v2005_v30, %s8476_s2  ;;  %2022 = vrot.lane.b32.xlu0 %v2018_v14, %s8476_s2  ;;  %v1433_v11 = vadd.f32 %v6230_v27, %v1293_v50  ;;  %v1446_v5 = vadd.f32 %v6232_v43, %v1306_v39  ;;  %v2046_v6 = vmul.f32 %v2045_v18, %v6108_v19  ;;  %v1693_v54 = vstv %s6361_s8  ;;  %s4439_s8 = sld [smem:[#allocation3 + $0x390]] }
 0x2a7   : > { %v6377_v59 = vadd.f32 %v1669_v55, %v1545_v47  ;;  %v6379_v15 = vadd.f32 %v1674_v1, %v1558_v57  ;;  %v1681_v52 = vmul.f32 %v1679_v28, %v6119_v46  ;;  %v1686_v30 = vmul.f32 %v1685_v16, %v6108_v19 }
 0x2a8   : > { %v1555_v7 = vpop.permute.xlu1 %1554  ;;  %v1567_v60 = vpop.permute.xlu0 %1566  ;;  %v1307_v27 = vadd.f32 %v6152_v24, %v1167_v40  ;;  %v1320_v43 = vadd.f32 %v6154_v2, %v1180_v3  ;;  %v1181_v53 = vadd.f32 %v6066_v61, %v5943_v20  ;;  %v1194_v0 = vadd.f32 %v6068_v35, %v5945_v12 }
 0x2a9   : > { %v1559_v62 = vadd.f32 %v1555_v7, %v1419_v21  ;;  %v1572_v13 = vadd.f32 %v1567_v60, %v1432_v58  ;;  %v2047_v14 = vmul.f32 %v2045_v18, %v6119_v46  ;;  %v2073_v55 = vstv %s6373_s19  ;;  %v8560_v18 = vld [vmem:[#allocation29_spill] sm:$0xff]  ;;  %v8561_v21 = vld [vmem:[#allocation32_spill] sm:$0xff]  ;;  %s4440_s19 = sld [smem:[#allocation3 + $0x410]] }
 0x2aa   : > { %2024 = vrot.lane.b32.xlu1 %v2019_v23, %s8476_s2  ;;  %2036 = vrot.lane.b32.xlu0 %v2032_v51, %s8476_s2  ;;  %v1447_v24 = vadd.f32 %v6238_v4, %v1307_v27  ;;  %v1460_v2 = vadd.f32 %v6240_v48, %v1320_v43  ;;  %v2060_v35 = vmul.f32 %v2059_v25, %v6108_v19  ;;  %v1699_v31 = vstv %s6385_s1  ;;  %v8562_v51 = vld [vmem:[#allocation54_spill] sm:$0xff]  ;;  %v8568_v27 = vld [vmem:[#allocation48_spill] sm:$0xff]  ;;  %v8569_v43 = vld [vmem:[#allocation51_spill] sm:$0xff]  ;;  %s4441_s1 = sld [smem:[#allocation3 + $0x490]] }
 0x2ab   : > { %v6401_v33 = vadd.f32 %v1675_v42, %v1559_v62  ;;  %v6403_v37 = vadd.f32 %v1680_v38, %v1572_v13  ;;  %v1687_v28 = vmul.f32 %v1685_v16, %v6119_v46  ;;  %v1694_v49 = vmul.f32 %v1693_v54, %v6158_v10  ;;  %v8563_v42 = vld [vmem:[#allocation55_spill] sm:$0xff] }
 0x2ac   : > { %v1569_v45 = vpop.permute.xlu1 %1568  ;;  %v1581_v29 = vpop.permute.xlu0 %1580  ;;  %v1321_v4 = vadd.f32 %v6163_v32, %v1181_v53  ;;  %v1334_v48 = vadd.f32 %v6165_v36, %v1194_v0  ;;  %v1195_v23 = vadd.f32 %v8559_v22, %v8558_v56  ;;  %v1208_v58 = vadd.f32 %v8561_v21, %v8560_v18  ;;  %v8570_v53 = vld [vmem:[#allocation45_spill] sm:$0xff] }
 0x2ad   : > { %v1573_v9 = vadd.f32 %v1569_v45, %v1433_v11  ;;  %v1586_v17 = vadd.f32 %v1581_v29, %v1446_v5  ;;  %v2061_v7 = vmul.f32 %v2059_v25, %v6119_v46  ;;  %v2087_v60 = vstv %s6397_s24  ;;  %v8565_v11 = vld [vmem:[#allocation52_spill] sm:$0xff]  ;;  %v8574_v18 = vld [vmem:[#allocation49_spill] sm:$0xff]  ;;  %s4442_s24 = sld [smem:[#allocation3 + $0x11]] }
 0x2ae   : > { %2038 = vrot.lane.b32.xlu1 %v2033_v34, %s8476_s2  ;;  %2050 = vrot.lane.b32.xlu0 %v2046_v6, %s8476_s2  ;;  %v1461_v32 = vadd.f32 %v8562_v51, %v1321_v4  ;;  %v1474_v36 = vadd.f32 %v8563_v42, %v1334_v48  ;;  %v2074_v62 = vmul.f32 %v2073_v55, %v6158_v10  ;;  %v1705_v3 = vstv %s6409_s16  ;;  %v8564_v34 = vld [vmem:[#allocation34_spill] sm:$0xff]  ;;  %v8572_v48 = vld [vmem:[#allocation53_spill] sm:$0xff]  ;;  %s4443_s16 = sld [smem:[#allocation3 + $0x91]] }
 0x2af   : > { %v6425_v1 = vadd.f32 %v1681_v52, %v1573_v9  ;;  %v6427_v20 = vadd.f32 %v1686_v30, %v1586_v17  ;;  %v1695_v13 = vmul.f32 %v1693_v54, %v6169_v44  ;;  %v1700_v40 = vmul.f32 %v1699_v31, %v6158_v10  ;;  %v8566_v6 = vld [vmem:[#allocation30_spill] sm:$0xff]  ;;  %v8575_v21 = vld [vmem:[#allocation41_spill] sm:$0xff] }
 0x2b0   : > { %v1583_v61 = vpop.permute.xlu1 %1582  ;;  %v1595_v12 = vpop.permute.xlu0 %1594  ;;  %v1335_v25 = vadd.f32 %v8564_v34, %v1195_v23  ;;  %v1348_v5 = vadd.f32 %v8565_v11, %v1208_v58  ;;  %v8567_v52 = vld [vmem:[#allocation50_spill] sm:$0xff]  ;;  %v1222_v9 = vadd.f32 %v8569_v43, %v8568_v27  ;;  %v2075_v54 = vmul.f32 %v2073_v55, %v6169_v44  ;;  %v8578_v42 = vld [vmem:[#allocation37_spill] sm:$0xff]  ;;  %v8584_v43 = vld [vmem:[#allocation40_spill] sm:$0xff] }
 0x2b1   : > { %v1587_v47 = vadd.f32 %v1583_v61, %v1447_v24  ;;  %v1600_v57 = vadd.f32 %v1595_v12, %v1460_v2  ;;  %v1209_v30 = vadd.f32 %v8567_v52, %v8566_v6  ;;  %v2101_v17 = vstv %s6421_s3  ;;  %v8577_v51 = vld [vmem:[#allocation42_spill] sm:$0xff]  ;;  %v8583_v6 = vld [vmem:[#allocation35_spill] sm:$0xff]  ;;  %s4444_s3 = sld [smem:[#allocation3 + $0x111]] }
 0x2b2   : > { %2052 = vrot.lane.b32.xlu1 %v2047_v14, %s8476_s2  ;;  %2064 = vrot.lane.b32.xlu0 %v2060_v35, %s8476_s2  ;;  %v1475_v0 = vadd.f32 %v8570_v53, %v1335_v25  ;;  %v8571_v14 = vld [vmem:[#allocation46_spill] sm:$0xff]  ;;  %v1706_v55 = vmul.f32 %v1705_v3, %v6158_v10  ;;  %v1711_v4 = vstv %s6433_s0  ;;  %v1223_v58 = vadd.f32 %v8575_v21, %v8574_v18  ;;  %s4445_s0 = sld [smem:[#allocation3 + $0x191]] }
 0x2b3   : > { %v6447_v38 = vadd.f32 %v1687_v28, %v1587_v47  ;;  %v6449_v16 = vadd.f32 %v1694_v49, %v1600_v57  ;;  %v1488_v24 = vadd.f32 %v8571_v14, %v1348_v5  ;;  %v2088_v28 = vmul.f32 %v2087_v60, %v6158_v10  ;;  %v8573_v57 = vld [vmem:[#allocation43_spill] sm:$0xff] }
 0x2b4   : > { %v1597_v50 = vpop.permute.xlu1 %1596  ;;  %v1609_v39 = vpop.permute.xlu0 %1608  ;;  %v1701_v49 = vmul.f32 %v1699_v31, %v6169_v44  ;;  %v1349_v47 = vadd.f32 %v8572_v48, %v1209_v30  ;;  %v1362_v56 = vadd.f32 %v8573_v57, %v1222_v9  ;;  %v2089_v31 = vmul.f32 %v2087_v60, %v6169_v44  ;;  %v8585_v9 = vld [vmem:[#allocation33_spill] sm:$0xff]  ;;  %v8587_v14 = vld [vmem:[#allocation47_spill] sm:$0xff] }
 0x2b5   : > { %v1601_v45 = vadd.f32 %v1597_v50, %v1461_v32  ;;  %v1614_v29 = vadd.f32 %v1609_v39, %v1474_v36  ;;  %v8579_v50 = vld [vmem:[#allocation56_spill] sm:$0xff]  ;;  %v2102_v25 = vmul.f32 %v2101_v17, %v6158_v10  ;;  %v2115_v11 = vstv %s6452_s4  ;;  %s4446_s4 = sld [smem:[#allocation3 + $0x211]] }
 0x2b6   : > { %2066 = vrot.lane.b32.xlu1 %v2061_v7, %s8476_s2  ;;  %2078 = vrot.lane.b32.xlu0 %v2074_v62, %s8476_s2  ;;  %v8576_v7 = vld [vmem:[#allocation39_spill] sm:$0xff]  ;;  %v1489_v36 = vadd.f32 %v8578_v42, %v1349_v47  ;;  %v1502_v39 = vadd.f32 %v8579_v50, %v1362_v56  ;;  %v1707_v5 = vmul.f32 %v1705_v3, %v6169_v44  ;;  %v1717_v53 = vstv %s6467_s5  ;;  %v8586_v3 = vld [vmem:[#allocation57_spill] sm:$0xff]  ;;  %v8590_v56 = vld [vmem:[#allocation36_spill] sm:$0xff]  ;;  %s4447_s5 = sld [smem:[#allocation3 + $0x291]] }
 0x2b7   : > { %v6471_v2 = vadd.f32 %v1695_v13, %v1601_v45  ;;  %v6473_v61 = vadd.f32 %v1700_v40, %v1614_v29  ;;  %v1236_v32 = vadd.f32 %v8577_v51, %v8576_v7  ;;  %v1712_v45 = vmul.f32 %v1711_v4, %v6158_v10  ;;  %v8582_v29 = vld [vmem:[#allocation44_spill] sm:$0xff] }
 0x2b8   : > { %v1611_v12 = vpop.permute.xlu1 %1610  ;;  %v1623_v35 = vpop.permute.xlu0 %1622  ;;  %v1363_v60 = vadd.f32 %v8582_v29, %v1223_v58  ;;  %v2116_v48 = vmul.f32 %v2115_v11, %v6158_v10  ;;  %v2129_v47 = vstv %s6476_s7  ;;  %v1713_v57 = vmul.f32 %v1711_v4, %v6169_v44  ;;  %s6754_s7 = sld [smem:[#allocation3 + $0x311]] }
 0x2b9   : > { %v1615_v22 = vadd.f32 %v1611_v12, %v1475_v0  ;;  %v1628_v23 = vadd.f32 %v1623_v35, %v1488_v24  ;;  %v1376_v52 = vadd.f32 %v8583_v6, %v1236_v32  ;;  %v1718_v21 = vmul.f32 %v1717_v53, %v6158_v10 }
 0x2ba   : > { %2080 = vrot.lane.b32.xlu1 %v2075_v54, %s8476_s2  ;;  %2092 = vrot.lane.b32.xlu0 %v2088_v28, %s8476_s2  ;;  %v1237_v54 = vadd.f32 %v8585_v9, %v8584_v43  ;;  %v1503_v0 = vadd.f32 %v8586_v3, %v1363_v60  ;;  %v2117_v32 = vmul.f32 %v2115_v11, %v6169_v44  ;;  %v2157_v11 = vstv %s6520_s25  ;;  %s6775_s25 = sld [smem:[#allocation3 + $0x411]] }
 0x2bb   : > { %v6492_v62 = vadd.f32 %v1701_v49, %v1615_v22  ;;  %v6494_v13 = vadd.f32 %v1706_v55, %v1628_v23  ;;  %v1516_v24 = vadd.f32 %v8587_v14, %v1376_v52  ;;  %v2103_v55 = vmul.f32 %v2101_v17, %v6169_v44 }
 0x2bc   : > { %v1625_v40 = vpop.permute.xlu1 %1624  ;;  %v1637_v34 = vpop.permute.xlu0 %1636  ;;  %v1377_v22 = vadd.f32 %v8590_v56, %v1237_v54  ;;  %v1719_v50 = vmul.f32 %v1717_v53, %v6169_v44  ;;  %v2158_v60 = vmul.f32 %v2157_v11, %v6108_v19  ;;  %v2171_v6 = vstv %s6535_s6  ;;  %s6785_s6 = sld [smem:[#allocation3 + $0x491]] }
 0x2bd   : > { %8580 = vst [vmem:[#allocation38_spill] sm:$0xff] %v6492_v62  ;;  %8581 = vst [vmem:[#allocation31_spill] sm:$0xff] %v6494_v13  ;;  %v1629_v30 = vadd.f32 %v1625_v40, %v1489_v36  ;;  %v1642_v27 = vadd.f32 %v1637_v34, %v1502_v39  ;;  %v2143_v36 = vstv %s6502_s26  ;;  %v2131_v34 = vmul.f32 %v2129_v47, %v6169_v44  ;;  %s6764_s26 = sld [smem:[#allocation3 + $0x391]] }
 0x2be   : > { %2094 = vrot.lane.b32.xlu1 %v2089_v31, %s8476_s2  ;;  %2106 = vrot.lane.b32.xlu0 %v2102_v25, %s8476_s2  ;;  %v1517_v17 = vadd.f32 %v6308_v41, %v1377_v22  ;;  %v2130_v31 = vmul.f32 %v2129_v47, %v6158_v10  ;;  %v2144_v25 = vmul.f32 %v2143_v36, %v6108_v19  ;;  %v2185_v9 = vstv %s4415_s27  ;;  %s6788_s27 = sld [smem:[#allocation3 + $0xf]] }
 0x2bf   : > { %v6511_v12 = vadd.f32 %v1707_v5, %v1629_v30  ;;  %v6513_v35 = vadd.f32 %v1712_v45, %v1642_v27  ;;  %v2145_v29 = vmul.f32 %v2143_v36, %v6119_v46  ;;  %v2159_v27 = vmul.f32 %v2157_v11, %v6119_v46 }
 0x2c0   : > { %v1639_v28 = vpop.permute.xlu1 %1638  ;;  %v1651_v49 = vpop.permute.xlu0 %1650  ;;  %v2172_v43 = vmul.f32 %v2171_v6, %v6108_v19  ;;  %v2173_v3 = vmul.f32 %v2171_v6, %v6119_v46  ;;  %v2199_v14 = vstv %s4416_s28  ;;  %v2255_v36 = vstv %s4420_s15  ;;  %s6792_s28 = sld [smem:[#allocation3 + $0x12]] }
 0x2c1   : > { %8588 = vst [vmem:[#allocation29_spill] sm:$0xff] %v6511_v12  ;;  %8589 = vst [vmem:[#allocation32_spill] sm:$0xff] %v6513_v35  ;;  %v1643_v23 = vadd.f32 %v1639_v28, %v1503_v0  ;;  %v1656_v18 = vadd.f32 %v1651_v49, %v1516_v24  ;;  %v2186_v0 = vmul.f32 %v2185_v9, %v6108_v19  ;;  %v2515_v35 = vstv %s4444_s3  ;;  %s6822_s15 = sld [smem:[#allocation3 + $0x112]] }
 0x2c2   : > { %2108 = vrot.lane.b32.xlu1 %v2103_v55, %s8476_s2  ;;  %2120 = vrot.lane.b32.xlu0 %v2116_v48, %s8476_s2  ;;  %v2187_v49 = vmul.f32 %v2185_v9, %v6119_v46  ;;  %v2200_v55 = vmul.f32 %v2199_v14, %v6108_v19  ;;  %v2213_v48 = vstv %s4417_s30  ;;  %v2201_v56 = vmul.f32 %v2199_v14, %v6119_v46  ;;  %v6626_v9 = vld [vmem:[#allocation2 + $0x3] sm:$0xff]  ;;  %s6801_s30 = sld [smem:[#allocation3 + $0x8f]] }
 0x2c3   : > { %v6526_v58 = vadd.f32 %v1713_v57, %v1643_v23  ;;  %v6528_v7 = vadd.f32 %v1718_v21, %v1656_v18  ;;  %v2214_v22 = vmul.f32 %v2213_v48, %v6158_v10  ;;  %v2227_v23 = vstv %s4418_s11  ;;  %s6805_s11 = sld [smem:[#allocation3 + $0x92]] }
 0x2c4   : > { %v1653_v4 = vpop.permute.xlu1 %1652  ;;  %v6530_v51 = vpop.permute.xlu0 %1728  ;;  %v2215_v21 = vmul.f32 %v2213_v48, %v6169_v44  ;;  %v2256_v11 = vmul.f32 %v2255_v36, %v6158_v10  ;;  %v6637_v48 = vld [vmem:[#allocation2 + $0xb] sm:$0xff]  ;;  %v2529_v12 = vstv %s4445_s0  ;;  %v2557_v13 = vstv %s4447_s5  ;;  %s6997_s3 = sld [smem:[#allocation3 + $0x492]] }
 0x2c5   : > { %8591 = vst [vmem:[#allocation54_spill] sm:$0xff] %v6526_v58  ;;  %8592 = vst [vmem:[#allocation55_spill] sm:$0xff] %v6528_v7  ;;  %v1657_v42 = vadd.f32 %v1653_v4, %v1517_v17  ;;  %v2228_v17 = vmul.f32 %v2227_v23, %v6158_v10  ;;  %v2241_v4 = vstv %s4419_s12  ;;  %v2571_v62 = vstv %s6754_s7  ;;  %s6815_s12 = sld [smem:[#allocation3 + $0x10f]] }
 0x2c6   : > { %2122 = vrot.lane.b32.xlu1 %v2117_v32, %s8476_s2  ;;  %2134 = vrot.lane.b32.xlu0 %v2130_v31, %s8476_s2  ;;  %v2229_v31 = vmul.f32 %v2227_v23, %v6169_v44  ;;  %s7023_s0 = sld [smem:[#allocation3 + $0x13]] }
 0x2c7   : > { %v6540_v41 = vadd.f32 %v1719_v50, %v1657_v42  ;;  %v2242_v42 = vmul.f32 %v2241_v4, %v6158_v10  ;;  %s7056_s5 = sld [smem:[#allocation3 + $0x113]] }
 0x2c8   : > { %v6542_v39 = vpop.permute.xlu1 %1730  ;;  %v6544_v40 = vpop.permute.xlu0 %1742  ;;  %s7070_s7 = sld [smem:[#allocation3 + $0x193]] }
 0x2c9   : > { %8593 = vst [vmem:[#allocation34_spill] sm:$0xff] %v6540_v41 }
 0x2ca   : > { %2136 = vrot.lane.b32.xlu1 %v2131_v34, %s8476_s2  ;;  %2148 = vrot.lane.b32.xlu0 %v2144_v25, %s8534_s17  ;;  %v2243_v25 = vmul.f32 %v2241_v4, %v6169_v44 }
 0x2cc   : > { %v6551_v5 = vpop.permute.xlu1 %1744  ;;  %v6553_v45 = vpop.permute.xlu0 %1756 }
 0x2ce   : > { %2150 = vrot.lane.b32.xlu1 %v2145_v29, %s8534_s17  ;;  %2162 = vrot.lane.b32.xlu0 %v2158_v60, %s8534_s17  ;;  %v2269_v29 = vstv %s4421_s29  ;;  %s6835_s29 = sld [smem:[#allocation3 + $0x18f]] }
 0x2d0   : > { %v6560_v52 = vpop.permute.xlu1 %1758  ;;  %v6562_v30 = vpop.permute.xlu0 %1770 }
 0x2d2   : > { %2164 = vrot.lane.b32.xlu1 %v2159_v27, %s8534_s17  ;;  %2176 = vrot.lane.b32.xlu0 %v2172_v43, %s8534_s17  ;;  %v2257_v27 = vmul.f32 %v2255_v36, %v6169_v44  ;;  %v2270_v43 = vmul.f32 %v2269_v29, %v6158_v10  ;;  %v2389_v36 = vstv %s4435_s9  ;;  %s6883_s9 = sld [smem:[#allocation3 + $0x28f]] }
 0x2d4   : > { %v6568_v54 = vpop.permute.xlu1 %1772  ;;  %v6570_v53 = vpop.permute.xlu0 %1784 }
 0x2d6   : > { %2178 = vrot.lane.b32.xlu1 %v2173_v3, %s8534_s17  ;;  %2190 = vrot.lane.b32.xlu0 %v2186_v0, %s8534_s17  ;;  %v2347_v3 = vstv %s6606_s20  ;;  %s6847_s20 = sld [smem:[#allocation3 + $0x192]] }
 0x2d7   : > { %v2349_v23 = vmul.f32 %v2347_v3, %v6637_v48 }
 0x2d8   : > { %v6576_v24 = vpop.permute.xlu1 %1786  ;;  %v6578_v28 = vpop.permute.xlu0 %1798 }
 0x2da   : > { %2192 = vrot.lane.b32.xlu1 %v2187_v49, %s8534_s17  ;;  %2204 = vrot.lane.b32.xlu0 %v2200_v55, %s8534_s17  ;;  %v2271_v49 = vmul.f32 %v2269_v29, %v6169_v44  ;;  %v2348_v55 = vmul.f32 %v2347_v3, %v6626_v9 }
 0x2dc   : > { %v6584_v47 = vpop.permute.xlu1 %1800  ;;  %v6586_v57 = vpop.permute.xlu0 %1812 }
 0x2de   : > { %2206 = vrot.lane.b32.xlu1 %v2201_v56, %s8534_s17  ;;  %2218 = vrot.lane.b32.xlu0 %v2214_v22, %s8534_s17  ;;  %v2361_v56 = vstv %s6616_s23  ;;  %s6859_s23 = sld [smem:[#allocation3 + $0x20f]] }
 0x2e0   : > { %v6592_v19 = vpop.permute.xlu1 %1814  ;;  %v6594_v18 = vpop.permute.xlu0 %1826 }
 0x2e1   : > { %8594 = vst [vmem:[#allocation52_spill] sm:$0xff] %v6592_v19  ;;  %8595 = vst [vmem:[#allocation30_spill] sm:$0xff] %v6594_v18 }
 0x2e2   : > { %2220 = vrot.lane.b32.xlu1 %v2215_v21, %s8534_s17  ;;  %2232 = vrot.lane.b32.xlu0 %v2228_v17, %s8534_s17  ;;  %v2362_v21 = vmul.f32 %v2361_v56, %v6626_v9  ;;  %v2375_v17 = vstv %s4434_s22  ;;  %s6871_s22 = sld [smem:[#allocation3 + $0x212]] }
 0x2e3   : > { %v2377_v29 = vmul.f32 %v2375_v17, %v6637_v48 }
 0x2e4   : > { %v6600_v46 = vpop.permute.xlu1 %1828  ;;  %v6602_v32 = vpop.permute.xlu0 %1840 }
 0x2e5   : > { %8596 = vst [vmem:[#allocation50_spill] sm:$0xff] %v6600_v46  ;;  %8597 = vst [vmem:[#allocation48_spill] sm:$0xff] %v6602_v32 }
 0x2e6   : > { %2234 = vrot.lane.b32.xlu1 %v2229_v31, %s8534_s17  ;;  %2246 = vrot.lane.b32.xlu0 %v2242_v42, %s8534_s17  ;;  %v2363_v31 = vmul.f32 %v2361_v56, %v6637_v48  ;;  %v2376_v42 = vmul.f32 %v2375_v17, %v6626_v9 }
 0x2e8   : > { %v6610_v50 = vpop.permute.xlu1 %1842  ;;  %v6612_v34 = vpop.permute.xlu0 %1854 }
 0x2e9   : > { %8598 = vst [vmem:[#allocation51_spill] sm:$0xff] %v6610_v50  ;;  %8599 = vst [vmem:[#allocation45_spill] sm:$0xff] %v6612_v34  ;;  %v2445_v34 = vstv %s4439_s8  ;;  %v2459_v50 = vstv %s4440_s19  ;;  %s6931_s8 = sld [smem:[#allocation3 + $0x38f]] }
 0x2ea   : > { %2248 = vrot.lane.b32.xlu1 %v2243_v25, %s8534_s17  ;;  %2260 = vrot.lane.b32.xlu0 %v2256_v11, %s8534_s17  ;;  %s6945_s19 = sld [smem:[#allocation3 + $0x392]] }
 0x2ec   : > { %v6620_v60 = vpop.permute.xlu1 %1856  ;;  %v6622_v6 = vpop.permute.xlu0 %1868 }
 0x2ed   : > { %8600 = vst [vmem:[#allocation46_spill] sm:$0xff] %v6620_v60 }
 0x2ee   : > { %2262 = vrot.lane.b32.xlu1 %v2257_v27, %s8534_s17  ;;  %2274 = vrot.lane.b32.xlu0 %v2270_v43, %s8534_s17  ;;  %v2390_v27 = vmul.f32 %v2389_v36, %v6626_v9  ;;  %v2403_v43 = vstv %s4436_s14  ;;  %s6895_s14 = sld [smem:[#allocation3 + $0x292]] }
 0x2ef   : > { %v2404_v56 = vmul.f32 %v2403_v43, %v6626_v9 }
 0x2f0   : > { %v6631_v0 = vpop.permute.xlu1 %1870  ;;  %v6633_v14 = vpop.permute.xlu0 %1882 }
 0x2f2   : > { %2276 = vrot.lane.b32.xlu1 %v2271_v49, %s8534_s17  ;;  %2352 = vrot.lane.b32.xlu0 %v2348_v55, %s8542_s21  ;;  %v2391_v55 = vmul.f32 %v2389_v36, %v6637_v48  ;;  %v2431_v36 = vstv %s6666_s13  ;;  %s6919_s13 = sld [smem:[#allocation3 + $0x312]] }
 0x2f4   : > { %v6642_v10 = vpop.permute.xlu1 %1884  ;;  %v6644_v22 = vpop.permute.xlu0 %1896 }
 0x2f6   : > { %2354 = vrot.lane.b32.xlu1 %v2349_v23, %s8542_s21  ;;  %2366 = vrot.lane.b32.xlu0 %v2362_v21, %s8542_s21  ;;  %v6676_v23 = vld [vmem:[#allocation2 + $0x1b] sm:$0xff]  ;;  %v2417_v21 = vstv %s6656_s18  ;;  %s6907_s18 = sld [smem:[#allocation3 + $0x30f]] }
 0x2f7   : > { %v2432_v41 = vmul.f32 %v2431_v36, %v6676_v23  ;;  %v2558_v19 = vmul.f32 %v2557_v13, %v6676_v23 }
 0x2f8   : > { %v6650_v44 = vpop.permute.xlu1 %1898  ;;  %v6652_v4 = vpop.permute.xlu0 %1910 }
 0x2fa   : > { %2368 = vrot.lane.b32.xlu1 %v2363_v31, %s8542_s21  ;;  %2380 = vrot.lane.b32.xlu0 %v2376_v42, %s8542_s21  ;;  %v2405_v42 = vmul.f32 %v2403_v43, %v6637_v48 }
 0x2fc   : > { %v6660_v25 = vpop.permute.xlu1 %1912  ;;  %v6662_v11 = vpop.permute.xlu0 %1924 }
 0x2fe   : > { %2382 = vrot.lane.b32.xlu1 %v2377_v29, %s8542_s21  ;;  %2394 = vrot.lane.b32.xlu0 %v2390_v27, %s8542_s21  ;;  %v2418_v29 = vmul.f32 %v2417_v21, %v6676_v23  ;;  %v6687_v27 = vld [vmem:[#allocation2 + $0x23] sm:$0xff] }
 0x300   : > { %v6670_v3 = vpop.permute.xlu1 %1926  ;;  %v6672_v49 = vpop.permute.xlu0 %1938 }
 0x302   : > { %2396 = vrot.lane.b32.xlu1 %v2391_v55, %s8542_s21  ;;  %2408 = vrot.lane.b32.xlu0 %v2404_v56, %s8542_s21  ;;  %v2419_v56 = vmul.f32 %v2417_v21, %v6687_v27 }
 0x304   : > { %v6681_v17 = vpop.permute.xlu1 %1940  ;;  %v6683_v31 = vpop.permute.xlu0 %1952 }
 0x306   : > { %2410 = vrot.lane.b32.xlu1 %v2405_v42, %s8542_s21  ;;  %2422 = vrot.lane.b32.xlu0 %v2418_v29, %s8542_s21  ;;  %v2433_v42 = vmul.f32 %v2431_v36, %v6687_v27  ;;  %v2446_v29 = vmul.f32 %v2445_v34, %v6676_v23 }
 0x308   : > { %v6692_v60 = vpop.permute.xlu1 %1954  ;;  %v6694_v55 = vpop.permute.xlu0 %1966 }
 0x309   : > { %8601 = vst [vmem:[#allocation53_spill] sm:$0xff] %v6692_v60  ;;  %8602 = vst [vmem:[#allocation43_spill] sm:$0xff] %v6694_v55  ;;  %v2543_v60 = vstv %s4446_s4  ;;  %s7041_s4 = sld [smem:[#allocation3 + $0x93]] }
 0x30a   : > { %2424 = vrot.lane.b32.xlu1 %v2419_v56, %s8542_s21  ;;  %2436 = vrot.lane.b32.xlu0 %v2432_v41, %s8542_s21  ;;  %v2447_v41 = vmul.f32 %v2445_v34, %v6687_v27  ;;  %v2460_v56 = vmul.f32 %v2459_v50, %v6676_v23  ;;  %v2544_v18 = vmul.f32 %v2543_v60, %v6626_v9 }
 0x30c   : > { %v6700_v43 = vpop.permute.xlu1 %1968  ;;  %v6702_v7 = vpop.permute.xlu0 %1980 }
 0x30d   : > { %8603 = vst [vmem:[#allocation49_spill] sm:$0xff] %v6700_v43  ;;  %8604 = vst [vmem:[#allocation41_spill] sm:$0xff] %v6702_v7  ;;  %v2473_v43 = vstv %s4441_s1  ;;  %s6955_s1 = sld [smem:[#allocation3 + $0x40f]] }
 0x30e   : > { %2438 = vrot.lane.b32.xlu1 %v2433_v42, %s8542_s21  ;;  %2450 = vrot.lane.b32.xlu0 %v2446_v29, %s8542_s21  ;;  %v2461_v42 = vmul.f32 %v2459_v50, %v6687_v27  ;;  %v2474_v29 = vmul.f32 %v2473_v43, %v6676_v23 }
 0x310   : > { %v6708_v21 = vpop.permute.xlu1 %1982  ;;  %v6710_v58 = vpop.permute.xlu0 %1994 }
 0x311   : > { %8605 = vst [vmem:[#allocation39_spill] sm:$0xff] %v6708_v21  ;;  %8606 = vst [vmem:[#allocation42_spill] sm:$0xff] %v6710_v58  ;;  %v2487_v21 = vstv %s4442_s24  ;;  %s6974_s24 = sld [smem:[#allocation3 + $0x412]] }
 0x312   : > { %2452 = vrot.lane.b32.xlu1 %v2447_v41, %s8542_s21  ;;  %2464 = vrot.lane.b32.xlu0 %v2460_v56, %s8542_s21  ;;  %v2475_v41 = vmul.f32 %v2473_v43, %v6687_v27  ;;  %v2488_v56 = vmul.f32 %v2487_v21, %v6626_v9 }
 0x314   : > { %v6716_v36 = vpop.permute.xlu1 %1996  ;;  %v6718_v7 = vpop.permute.xlu0 %2008 }
 0x315   : > { %8607 = vst [vmem:[#allocation37_spill] sm:$0xff] %v6716_v36  ;;  %v2501_v36 = vstv %s4443_s16  ;;  %s6988_s16 = sld [smem:[#allocation3 + $0x48f]] }
 0x316   : > { %2466 = vrot.lane.b32.xlu1 %v2461_v42, %s8542_s21  ;;  %2478 = vrot.lane.b32.xlu0 %v2474_v29, %s8542_s21  ;;  %v2489_v42 = vmul.f32 %v2487_v21, %v6637_v48  ;;  %v2502_v29 = vmul.f32 %v2501_v36, %v6626_v9 }
 0x318   : > { %v6724_v34 = vpop.permute.xlu1 %2010  ;;  %v6726_v58 = vpop.permute.xlu0 %2022 }
 0x31a   : > { %2480 = vrot.lane.b32.xlu1 %v2475_v41, %s8542_s21  ;;  %2492 = vrot.lane.b32.xlu0 %v2488_v56, %s8438_s10  ;;  %v2503_v41 = vmul.f32 %v2501_v36, %v6637_v48  ;;  %v2516_v56 = vmul.f32 %v2515_v35, %v6626_v9 }
 0x31c   : > { %v6732_v50 = vpop.permute.xlu1 %2024  ;;  %v6734_v32 = vpop.permute.xlu0 %2036 }
 0x31e   : > { %2494 = vrot.lane.b32.xlu1 %v2489_v42, %s8438_s10  ;;  %2506 = vrot.lane.b32.xlu0 %v2502_v29, %s8438_s10  ;;  %v2517_v42 = vmul.f32 %v2515_v35, %v6637_v48  ;;  %v2530_v29 = vmul.f32 %v2529_v12, %v6626_v9 }
 0x320   : > { %v6740_v43 = vpop.permute.xlu1 %2038  ;;  %v6742_v46 = vpop.permute.xlu0 %2050 }
 0x322   : > { %2508 = vrot.lane.b32.xlu1 %v2503_v41, %s8438_s10  ;;  %2520 = vrot.lane.b32.xlu0 %v2516_v56, %s8438_s10  ;;  %v2531_v56 = vmul.f32 %v2529_v12, %v6637_v48 }
 0x324   : > { %v6748_v21 = vpop.permute.xlu1 %2052  ;;  %v6750_v55 = vpop.permute.xlu0 %2064 }
 0x326   : > { %2522 = vrot.lane.b32.xlu1 %v2517_v42, %s8438_s10  ;;  %2534 = vrot.lane.b32.xlu0 %v2530_v29, %s8438_s10  ;;  %v2545_v29 = vmul.f32 %v2543_v60, %v6637_v48  ;;  %v2585_v60 = vstv %s6764_s26  ;;  %s7081_s26 = sld [smem:[#allocation3 + $0x15]] }
 0x328   : > { %v6758_v36 = vpop.permute.xlu1 %2066  ;;  %v6760_v41 = vpop.permute.xlu0 %2078 }
 0x32a   : > { %2536 = vrot.lane.b32.xlu1 %v2531_v56, %s8438_s10  ;;  %2548 = vrot.lane.b32.xlu0 %v2544_v18, %s8438_s10  ;;  %v2559_v18 = vmul.f32 %v2557_v13, %v6687_v27  ;;  %v2573_v13 = vmul.f32 %v2571_v62, %v6687_v27 }
 0x32c   : > { %v6768_v35 = vpop.permute.xlu1 %2080  ;;  %v6770_v42 = vpop.permute.xlu0 %2092 }
 0x32d   : > { %8608 = vst [vmem:[#allocation56_spill] sm:$0xff] %v6768_v35  ;;  %8609 = vst [vmem:[#allocation44_spill] sm:$0xff] %v6770_v42  ;;  %v2572_v42 = vmul.f32 %v2571_v62, %v6676_v23  ;;  %v2587_v62 = vmul.f32 %v2585_v60, %v6687_v27  ;;  %v2613_v35 = vstv %s6785_s6  ;;  %s7102_s6 = sld [smem:[#allocation3 + $0x16]] }
 0x32e   : > { %2550 = vrot.lane.b32.xlu1 %v2545_v29, %s8438_s10  ;;  %2562 = vrot.lane.b32.xlu0 %v2558_v19, %s8438_s10 }
 0x330   : > { %v6779_v12 = vpop.permute.xlu1 %2094  ;;  %v6781_v56 = vpop.permute.xlu0 %2106 }
 0x331   : > { %8610 = vst [vmem:[#allocation35_spill] sm:$0xff] %v6779_v12  ;;  %8611 = vst [vmem:[#allocation40_spill] sm:$0xff] %v6781_v56  ;;  %v2586_v56 = vmul.f32 %v2585_v60, %v6676_v23  ;;  %v2599_v12 = vstv %s6775_s25  ;;  %s7092_s25 = sld [smem:[#allocation3 + $0x95]] }
 0x332   : > { %2564 = vrot.lane.b32.xlu1 %v2559_v18, %s8438_s10  ;;  %2576 = vrot.lane.b32.xlu0 %v2572_v42, %s8438_s10  ;;  %v1734_v42 = vadd.f32 %v6530_v51, %v6331_v26  ;;  %v1735_v26 = vadd.f32 %v6542_v39, %v6353_v63  ;;  %v1748_v51 = vadd.f32 %v6544_v40, %v6355_v8  ;;  %v2291_v40 = vstv %s6801_s30  ;;  %s7132_s30 = sld [smem:[#allocation3 + $0x96]] }
 0x334   : > { %v6794_v19 = vpop.permute.xlu1 %2108  ;;  %v6796_v29 = vpop.permute.xlu0 %2120  ;;  %v1875_v63 = vadd.f32 %v6631_v0, %v1735_v26  ;;  %v1888_v39 = vadd.f32 %v6633_v14, %v1748_v51  ;;  %v1762_v0 = vadd.f32 %v6553_v45, %v6379_v15 }
 0x335   : > { %8612 = vst [vmem:[#allocation33_spill] sm:$0xff] %v6794_v19  ;;  %8613 = vst [vmem:[#allocation57_spill] sm:$0xff] %v6796_v29  ;;  %v2600_v19 = vmul.f32 %v2599_v12, %v6676_v23 }
 0x336   : > { %2578 = vrot.lane.b32.xlu1 %v2573_v13, %s8438_s10  ;;  %2590 = vrot.lane.b32.xlu0 %v2586_v56, %s8438_s10  ;;  %v1874_v13 = vadd.f32 %v6622_v6, %v1734_v42  ;;  %v2285_v56 = vstv %s6788_s27  ;;  %v2015_v14 = vadd.f32 %v6724_v34, %v1875_v63  ;;  %v2028_v26 = vadd.f32 %v6726_v58, %v1888_v39  ;;  %s7107_s27 = sld [smem:[#allocation3 + $0x213]] }
 0x337   : > { %v1902_v45 = vadd.f32 %v6644_v22, %v1762_v0  ;;  %v2293_v39 = vmul.f32 %v2291_v40, %v6637_v48  ;;  %v1777_v0 = vadd.f32 %v6568_v54, %v6425_v1 }
 0x338   : > { %v6809_v18 = vpop.permute.xlu1 %2122  ;;  %v6811_v29 = vpop.permute.xlu0 %2134  ;;  %v2014_v60 = vadd.f32 %v6718_v7, %v1874_v13  ;;  %v1749_v7 = vadd.f32 %v6551_v5, %v6377_v59 }
 0x339   : > { %8614 = vst [vmem:[#allocation47_spill] sm:$0xff] %v6809_v18  ;;  %8615 = vst [vmem:[#allocation36_spill] sm:$0xff] %v6811_v29  ;;  %v2627_v29 = vstv %s6792_s28  ;;  %v2614_v18 = vmul.f32 %v2613_v35, %v6676_v23  ;;  %v2042_v22 = vadd.f32 %v6734_v32, %v1902_v45  ;;  %v1804_v45 = vadd.f32 %v6578_v28, %v6449_v16  ;;  %s7120_s28 = sld [smem:[#allocation3 + $0x115]] }
 0x33a   : > { %2592 = vrot.lane.b32.xlu1 %v2587_v62, %s8438_s10  ;;  %2604 = vrot.lane.b32.xlu0 %v2600_v19, %s8438_s10  ;;  %v2601_v62 = vmul.f32 %v2599_v12, %v6687_v27  ;;  %v2286_v19 = vmul.f32 %v2285_v56, %v6626_v9  ;;  %v2615_v12 = vmul.f32 %v2613_v35, %v6687_v27 }
 0x33b   : > { %v2628_v13 = vmul.f32 %v2627_v29, %v6626_v9  ;;  %v2287_v35 = vmul.f32 %v2285_v56, %v6637_v48  ;;  %v1889_v15 = vadd.f32 %v6642_v10, %v1749_v7  ;;  %v2303_v7 = vstv %s6835_s29  ;;  %s7176_s29 = sld [smem:[#allocation3 + $0x116]] }
 0x33c   : > { %v6830_v6 = vpop.permute.xlu1 %2136  ;;  %v2149_v42 = vpop.permute.xlu0 %2148 }
 0x33d   : > { %8616 = vst [vmem:[#allocation58_spill] sm:$0xff] %v6830_v6  ;;  %v2154_v8 = vadd.f32 %v2149_v42, %v2014_v60  ;;  %v2641_v6 = vstv %s6805_s11  ;;  %v2292_v60 = vmul.f32 %v2291_v40, %v6626_v9  ;;  %v2297_v42 = vstv %s6815_s12  ;;  %s7143_s11 = sld [smem:[#allocation3 + $0x17]] }
 0x33e   : > { %2606 = vrot.lane.b32.xlu1 %v2601_v62, %s8438_s10  ;;  %2618 = vrot.lane.b32.xlu0 %v2614_v18, %s8438_s10  ;;  %v2629_v18 = vmul.f32 %v2627_v29, %v6637_v48  ;;  %v1763_v62 = vadd.f32 %v6560_v52, %v6401_v33  ;;  %v1776_v29 = vadd.f32 %v6562_v30, %v6403_v37  ;;  %s7154_s12 = sld [smem:[#allocation3 + $0x293]] }
 0x33f   : > { %v6853_v59 = vadd.f32 %v2286_v19, %v2154_v8  ;;  %v2642_v56 = vmul.f32 %v2641_v6, %v6626_v9  ;;  %v2655_v19 = vstv %s6822_s15  ;;  %v2029_v10 = vadd.f32 %v6732_v50, %v1889_v15  ;;  %s7165_s15 = sld [smem:[#allocation3 + $0x195]] }
 0x340   : > { %v2151_v5 = vpop.permute.xlu1 %2150  ;;  %v2163_v51 = vpop.permute.xlu0 %2162  ;;  %v2643_v30 = vmul.f32 %v2641_v6, %v6637_v48  ;;  %v2298_v8 = vmul.f32 %v2297_v42, %v6626_v9  ;;  %v1903_v50 = vadd.f32 %v6650_v44, %v1763_v62  ;;  %v1916_v32 = vadd.f32 %v6652_v4, %v1776_v29 }
 0x341   : > { %v2155_v34 = vadd.f32 %v2151_v5, %v2015_v14  ;;  %v2168_v58 = vadd.f32 %v2163_v51, %v2028_v26  ;;  %v1790_v6 = vadd.f32 %v6570_v53, %v6427_v20  ;;  %v2656_v40 = vmul.f32 %v2655_v19, %v6626_v9 }
 0x342   : > { %2620 = vrot.lane.b32.xlu1 %v2615_v12, %s8438_s10  ;;  %2632 = vrot.lane.b32.xlu0 %v2628_v13, %s8476_s2  ;;  %v2669_v14 = vstv %s6847_s20  ;;  %v2043_v44 = vadd.f32 %v6740_v43, %v1903_v50  ;;  %v2056_v4 = vadd.f32 %v6742_v46, %v1916_v32  ;;  %v2657_v53 = vmul.f32 %v2655_v19, %v6637_v48  ;;  %s7186_s20 = sld [smem:[#allocation3 + $0x97]] }
 0x343   : > { %v6875_v63 = vadd.f32 %v2287_v35, %v2155_v34  ;;  %v6877_v33 = vadd.f32 %v2292_v60, %v2168_v58  ;;  %v2299_v5 = vmul.f32 %v2297_v42, %v6637_v48  ;;  %v2304_v51 = vmul.f32 %v2303_v7, %v6626_v9 }
 0x344   : > { %v2165_v52 = vpop.permute.xlu1 %2164  ;;  %v2177_v37 = vpop.permute.xlu0 %2176  ;;  %v1917_v43 = vadd.f32 %v6660_v25, %v1777_v0  ;;  %v1930_v46 = vadd.f32 %v6662_v11, %v1790_v6  ;;  %v1791_v15 = vadd.f32 %v6576_v24, %v6447_v38  ;;  %v2670_v42 = vmul.f32 %v2669_v14, %v6626_v9  ;;  %v8618_v0 = vld [vmem:[#allocation52_spill] sm:$0xff] }
 0x345   : > { %v2169_v12 = vadd.f32 %v2165_v52, %v2029_v10  ;;  %v2182_v13 = vadd.f32 %v2177_v37, %v2042_v22  ;;  %v2683_v34 = vstv %s6871_s22  ;;  %v2671_v28 = vmul.f32 %v2669_v14, %v6637_v48  ;;  %v8620_v14 = vld [vmem:[#allocation30_spill] sm:$0xff]  ;;  %s7200_s22 = sld [smem:[#allocation3 + $0x313]] }
 0x346   : > { %2634 = vrot.lane.b32.xlu1 %v2629_v18, %s8476_s2  ;;  %2646 = vrot.lane.b32.xlu0 %v2642_v56, %s8476_s2  ;;  %v2309_v18 = vstv %s6859_s23  ;;  %v2057_v25 = vadd.f32 %v6748_v21, %v1917_v43  ;;  %v2070_v11 = vadd.f32 %v6750_v55, %v1930_v46  ;;  %v2305_v62 = vmul.f32 %v2303_v7, %v6637_v48  ;;  %s7189_s23 = sld [smem:[#allocation3 + $0x18]] }
 0x347   : > { %v6899_v26 = vadd.f32 %v2293_v39, %v2169_v12  ;;  %v6901_v1 = vadd.f32 %v2298_v8, %v2182_v13  ;;  %v2310_v29 = vmul.f32 %v2309_v18, %v6626_v9  ;;  %v2317_v56 = vstv %s6883_s9  ;;  %v8617_v13 = vld [vmem:[#allocation38_spill] sm:$0xff]  ;;  %s7212_s9 = sld [smem:[#allocation3 + $0x215]] }
 0x348   : > { %v2179_v54 = vpop.permute.xlu1 %2178  ;;  %v2191_v20 = vpop.permute.xlu0 %2190  ;;  %v1931_v21 = vadd.f32 %v6670_v3, %v1791_v15  ;;  %v1944_v55 = vadd.f32 %v6672_v49, %v1804_v45  ;;  %v1805_v22 = vadd.f32 %v6584_v47, %v6471_v2  ;;  %v1818_v52 = vadd.f32 %v6586_v57, %v6473_v61  ;;  %v8623_v45 = vld [vmem:[#allocation53_spill] sm:$0xff] }
 0x349   : > { %v2183_v35 = vadd.f32 %v2179_v54, %v2043_v44  ;;  %v2196_v60 = vadd.f32 %v2191_v20, %v2056_v4  ;;  %v2684_v37 = vmul.f32 %v2683_v34, %v6626_v9  ;;  %v2685_v57 = vmul.f32 %v2683_v34, %v6637_v48  ;;  %v8621_v20 = vld [vmem:[#allocation56_spill] sm:$0xff]  ;;  %v8624_v34 = vld [vmem:[#allocation43_spill] sm:$0xff] }
 0x34a   : > { %2648 = vrot.lane.b32.xlu1 %v2643_v30, %s8476_s2  ;;  %2660 = vrot.lane.b32.xlu0 %v2656_v40, %s8476_s2  ;;  %v2697_v30 = vstv %s6895_s14  ;;  %v2071_v3 = vadd.f32 %v6758_v36, %v1931_v21  ;;  %v2084_v49 = vadd.f32 %v6760_v41, %v1944_v55  ;;  %v2311_v8 = vmul.f32 %v2309_v18, %v6637_v48  ;;  %v8619_v40 = vld [vmem:[#allocation31_spill] sm:$0xff]  ;;  %v8628_v21 = vld [vmem:[#allocation48_spill] sm:$0xff]  ;;  %s7223_s14 = sld [smem:[#allocation3 + $0x196]] }
 0x34b   : > { %v6923_v58 = vadd.f32 %v2299_v5, %v2183_v35  ;;  %v6925_v38 = vadd.f32 %v2304_v51, %v2196_v60  ;;  %v2318_v7 = vmul.f32 %v2317_v56, %v6676_v23  ;;  %v2323_v50 = vstv %s6907_s18  ;;  %s7234_s18 = sld [smem:[#allocation3 + $0x117]] }
 0x34c   : > { %v2193_v24 = vpop.permute.xlu1 %2192  ;;  %v2205_v16 = vpop.permute.xlu0 %2204  ;;  %v1945_v36 = vadd.f32 %v6681_v17, %v1805_v22  ;;  %v1958_v41 = vadd.f32 %v6683_v31, %v1818_v52  ;;  %v1819_v6 = vadd.f32 %v8618_v0, %v8617_v13  ;;  %v1832_v44 = vadd.f32 %v8620_v14, %v8619_v40  ;;  %v8630_v22 = vld [vmem:[#allocation40_spill] sm:$0xff]  ;;  %v8634_v0 = vld [vmem:[#allocation54_spill] sm:$0xff]  ;;  %v8636_v14 = vld [vmem:[#allocation55_spill] sm:$0xff] }
 0x34d   : > { %v2197_v19 = vadd.f32 %v2193_v24, %v2057_v25  ;;  %v2210_v10 = vadd.f32 %v2205_v16, %v2070_v11  ;;  %v2698_v4 = vmul.f32 %v2697_v30, %v6676_v23  ;;  %v2711_v54 = vstv %s6919_s13  ;;  %v8625_v16 = vld [vmem:[#allocation29_spill] sm:$0xff]  ;;  %s7245_s13 = sld [smem:[#allocation3 + $0x98]] }
 0x34e   : > { %2662 = vrot.lane.b32.xlu1 %v2657_v53, %s8476_s2  ;;  %2674 = vrot.lane.b32.xlu0 %v2670_v42, %s8476_s2  ;;  %v2085_v17 = vadd.f32 %v8621_v20, %v1945_v36  ;;  %v8622_v53 = vld [vmem:[#allocation44_spill] sm:$0xff]  ;;  %v2699_v46 = vmul.f32 %v2697_v30, %v6687_v27  ;;  %v2319_v35 = vmul.f32 %v2317_v56, %v6687_v27  ;;  %v2329_v15 = vstv %s6931_s8  ;;  %v8638_v20 = vld [vmem:[#allocation33_spill] sm:$0xff]  ;;  %s7256_s8 = sld [smem:[#allocation3 + $0x393]] }
 0x34f   : > { %v6947_v39 = vadd.f32 %v2305_v62, %v2197_v19  ;;  %v6949_v2 = vadd.f32 %v2310_v29, %v2210_v10  ;;  %v2098_v31 = vadd.f32 %v8622_v53, %v1958_v41  ;;  %v2324_v60 = vmul.f32 %v2323_v50, %v6676_v23  ;;  %v8627_v29 = vld [vmem:[#allocation32_spill] sm:$0xff]  ;;  %v8629_v19 = vld [vmem:[#allocation35_spill] sm:$0xff]  ;;  %v8633_v41 = vld [vmem:[#allocation41_spill] sm:$0xff] }
 0x350   : > { %v2207_v47 = vpop.permute.xlu1 %2206  ;;  %v2219_v61 = vpop.permute.xlu0 %2218  ;;  %v1959_v42 = vadd.f32 %v8623_v45, %v1819_v6  ;;  %v1972_v25 = vadd.f32 %v8624_v34, %v1832_v44  ;;  %v1846_v55 = vadd.f32 %v8628_v21, %v8627_v29  ;;  %v2712_v56 = vmul.f32 %v2711_v54, %v6676_v23  ;;  %v8635_v6 = vld [vmem:[#allocation51_spill] sm:$0xff]  ;;  %v8637_v44 = vld [vmem:[#allocation45_spill] sm:$0xff]  ;;  %v8645_v29 = vld [vmem:[#allocation46_spill] sm:$0xff] }
 0x351   : > { %v2211_v32 = vadd.f32 %v2207_v47, %v2071_v3  ;;  %v2224_v12 = vadd.f32 %v2219_v61, %v2084_v49  ;;  %v2725_v47 = vstv %s6945_s19  ;;  %v2325_v61 = vmul.f32 %v2323_v50, %v6687_v27  ;;  %v8639_v53 = vld [vmem:[#allocation57_spill] sm:$0xff]  ;;  %s7267_s19 = sld [smem:[#allocation3 + $0x295]] }
 0x352   : > { %2676 = vrot.lane.b32.xlu1 %v2671_v28, %s8476_s2  ;;  %2688 = vrot.lane.b32.xlu0 %v2684_v37, %s8476_s2  ;;  %v8626_v28 = vld [vmem:[#allocation50_spill] sm:$0xff]  ;;  %v2099_v10 = vadd.f32 %v8629_v19, %v1959_v42  ;;  %v2112_v52 = vadd.f32 %v8630_v22, %v1972_v25  ;;  %v1847_v40 = vadd.f32 %v8635_v6, %v8634_v0  ;;  %v2739_v42 = vstv %s6974_s24  ;;  %v8642_v25 = vld [vmem:[#allocation39_spill] sm:$0xff]  ;;  %v8647_v19 = vld [vmem:[#allocation36_spill] sm:$0xff]  ;;  %s7291_s24 = sld [smem:[#allocation3 + $0x197]] }
 0x353   : > { %v6969_v5 = vadd.f32 %v2311_v8, %v2211_v32  ;;  %v6971_v51 = vadd.f32 %v2318_v7, %v2224_v12  ;;  %v1833_v62 = vadd.f32 %v8626_v28, %v8625_v16  ;;  %v2335_v8 = vstv %s6955_s1  ;;  %v8632_v7 = vld [vmem:[#allocation49_spill] sm:$0xff]  ;;  %v8651_v6 = vld [vmem:[#allocation58_spill] sm:$0xff]  ;;  %s7278_s1 = sld [smem:[#allocation3 + $0x216]] }
 0x354   : > { %v2221_v18 = vpop.permute.xlu1 %2220  ;;  %v2233_v43 = vpop.permute.xlu0 %2232  ;;  %v1986_v32 = vadd.f32 %v8633_v41, %v1846_v55  ;;  %v2713_v50 = vmul.f32 %v2711_v54, %v6687_v27  ;;  %v2726_v45 = vmul.f32 %v2725_v47, %v6676_v23  ;;  %v2336_v34 = vmul.f32 %v2335_v8, %v6676_v23  ;;  %v8650_v41 = vld [vmem:[#allocation37_spill] sm:$0xff] }
 0x355   : > { %v2225_v11 = vadd.f32 %v2221_v18, %v2085_v17  ;;  %v2238_v24 = vadd.f32 %v2233_v43, %v2098_v31  ;;  %v1973_v36 = vadd.f32 %v8632_v7, %v1833_v62  ;;  %v1987_v54 = vadd.f32 %v8642_v25, %v1847_v40  ;;  %v8644_v62 = vld [vmem:[#allocation34_spill] sm:$0xff] }
 0x356   : > { %2690 = vrot.lane.b32.xlu1 %v2685_v57, %s8476_s2  ;;  %2702 = vrot.lane.b32.xlu0 %v2698_v4, %s8476_s2  ;;  %v2330_v57 = vmul.f32 %v2329_v15, %v6676_v23  ;;  %v1860_v4 = vadd.f32 %v8637_v44, %v8636_v14  ;;  %v2126_v31 = vadd.f32 %v8639_v53, %v1986_v32  ;;  %v2341_v55 = vstv %s6988_s16  ;;  %s7302_s16 = sld [smem:[#allocation3 + $0x118]] }
 0x357   : > { %v6992_v37 = vadd.f32 %v2319_v35, %v2225_v11  ;;  %v6994_v30 = vadd.f32 %v2324_v60, %v2238_v24  ;;  %v2113_v17 = vadd.f32 %v8638_v20, %v1973_v36  ;;  %v8643_v11 = vld [vmem:[#allocation42_spill] sm:$0xff]  ;;  %v1861_v21 = vadd.f32 %v8645_v29, %v8644_v62 }
 0x358   : > { %v2235_v3 = vpop.permute.xlu1 %2234  ;;  %v2247_v49 = vpop.permute.xlu0 %2246  ;;  %v2000_v24 = vadd.f32 %v8643_v11, %v1860_v4  ;;  %v2753_v7 = vstv %s6997_s3  ;;  %v2337_v36 = vmul.f32 %v2335_v8, %v6687_v27  ;;  %v2342_v0 = vmul.f32 %v2341_v55, %v6676_v23  ;;  %s7313_s3 = sld [smem:[#allocation3 + $0x413]] }
 0x359   : > { %8631 = vst [vmem:[#allocation38_spill] sm:$0xff] %v6994_v30  ;;  %v2239_v12 = vadd.f32 %v2235_v3, %v2099_v10  ;;  %v2252_v13 = vadd.f32 %v2247_v49, %v2112_v52  ;;  %v2001_v32 = vadd.f32 %v8650_v41, %v1861_v21  ;;  %v2741_v4 = vmul.f32 %v2739_v42, %v6687_v27 }
 0x35a   : > { %2704 = vrot.lane.b32.xlu1 %v2699_v46, %s8476_s2  ;;  %2716 = vrot.lane.b32.xlu0 %v2712_v56, %s8476_s2  ;;  %v2331_v46 = vmul.f32 %v2329_v15, %v6687_v27  ;;  %v8646_v15 = vld [vmem:[#allocation47_spill] sm:$0xff]  ;;  %v2140_v10 = vadd.f32 %v8647_v19, %v2000_v24  ;;  %v2343_v53 = vmul.f32 %v2341_v55, %v6687_v27  ;;  %v2795_v24 = vstv %s7056_s5  ;;  %s7349_s5 = sld [smem:[#allocation3 + $0x217]] }
 0x35b   : > { %v7013_v18 = vadd.f32 %v2325_v61, %v2239_v12  ;;  %v7015_v43 = vadd.f32 %v2330_v57, %v2252_v13  ;;  %v2127_v56 = vadd.f32 %v8646_v15, %v1987_v54  ;;  %v2727_v61 = vmul.f32 %v2725_v47, %v6687_v27 }
 0x35c   : > { %v2249_v35 = vpop.permute.xlu1 %2248  ;;  %v2261_v60 = vpop.permute.xlu0 %2260  ;;  %v2740_v57 = vmul.f32 %v2739_v42, %v6676_v23  ;;  %v2141_v47 = vadd.f32 %v8651_v6, %v2001_v32  ;;  %v2796_v29 = vmul.f32 %v2795_v24, %v6626_v9  ;;  %v2809_v21 = vstv %s7070_s7  ;;  %s7360_s7 = sld [smem:[#allocation3 + $0x198]] }
 0x35d   : > { %8640 = vst [vmem:[#allocation52_spill] sm:$0xff] %v7013_v18  ;;  %8641 = vst [vmem:[#allocation31_spill] sm:$0xff] %v7015_v43  ;;  %v2253_v16 = vadd.f32 %v2249_v35, %v2113_v17  ;;  %v2266_v28 = vadd.f32 %v2261_v60, %v2126_v31  ;;  %v2767_v17 = vstv %s7023_s0  ;;  %v2810_v19 = vmul.f32 %v2809_v21, %v6626_v9  ;;  %s7324_s0 = sld [smem:[#allocation3 + $0x315]] }
 0x35e   : > { %2718 = vrot.lane.b32.xlu1 %v2713_v50, %s8476_s2  ;;  %2730 = vrot.lane.b32.xlu0 %v2726_v45, %s8476_s2  ;;  %v2754_v50 = vmul.f32 %v2753_v7, %v6676_v23  ;;  %v2755_v45 = vmul.f32 %v2753_v7, %v6687_v27  ;;  %v2768_v42 = vmul.f32 %v2767_v17, %v6626_v9  ;;  %v2985_v41 = vstv %s7092_s25  ;;  %s7375_s25 = sld [smem:[#allocation3 + $0x14]] }
 0x35f   : > { %v7032_v22 = vadd.f32 %v2331_v46, %v2253_v16  ;;  %v7034_v52 = vadd.f32 %v2336_v34, %v2266_v28  ;;  %v2781_v46 = vstv %s7041_s4  ;;  %v2769_v54 = vmul.f32 %v2767_v17, %v6637_v48  ;;  %s7335_s4 = sld [smem:[#allocation3 + $0x296]] }
 0x360   : > { %v2263_v3 = vpop.permute.xlu1 %2262  ;;  %v2275_v49 = vpop.permute.xlu0 %2274  ;;  %v2782_v11 = vmul.f32 %v2781_v46, %v6626_v9  ;;  %v2783_v62 = vmul.f32 %v2781_v46, %v6637_v48  ;;  %v3111_v6 = vstv %s7102_s6  ;;  %v2999_v17 = vstv %s7120_s28  ;;  %s7379_s6 = sld [smem:[#allocation3 + $0x395]] }
 0x361   : > { %8648 = vst [vmem:[#allocation30_spill] sm:$0xff] %v7032_v22  ;;  %8649 = vst [vmem:[#allocation56_spill] sm:$0xff] %v7034_v52  ;;  %v2267_v12 = vadd.f32 %v2263_v3, %v2127_v56  ;;  %v2280_v13 = vadd.f32 %v2275_v49, %v2140_v10  ;;  %v2797_v56 = vmul.f32 %v2795_v24, %v6637_v48  ;;  %v7104_v10 = vld [vmem:[#allocation2 + $0x4] sm:$0xff]  ;;  %v2971_v3 = vstv %s7081_s26  ;;  %s7372_s26 = sld [smem:[#allocation3 + $0x493]] }
 0x362   : > { %2732 = vrot.lane.b32.xlu1 %v2727_v61, %s8476_s2  ;;  %2744 = vrot.lane.b32.xlu0 %v2740_v57, %s8476_s2  ;;  %v2811_v57 = vmul.f32 %v2809_v21, %v6637_v48  ;;  %v2972_v7 = vmul.f32 %v2971_v3, %v7104_v10  ;;  %v3000_v46 = vmul.f32 %v2999_v17, %v7104_v10  ;;  %s7396_s28 = sld [smem:[#allocation3 + $0x316]] }
 0x363   : > { %v7047_v40 = vadd.f32 %v2337_v36, %v2267_v12  ;;  %v7049_v14 = vadd.f32 %v2342_v0, %v2280_v13  ;;  %v7117_v36 = vld [vmem:[#allocation2 + $0xc] sm:$0xff]  ;;  %v2986_v0 = vmul.f32 %v2985_v41, %v7104_v10 }
 0x364   : > { %v2277_v8 = vpop.permute.xlu1 %2276  ;;  %v7051_v44 = vpop.permute.xlu0 %2352  ;;  %v2973_v13 = vmul.f32 %v2971_v3, %v7117_v36  ;;  %v3113_v24 = vmul.f32 %v3111_v6, %v7117_v36 }
 0x365   : > { %8652 = vst [vmem:[#allocation44_spill] sm:$0xff] %v7047_v40  ;;  %8653 = vst [vmem:[#allocation53_spill] sm:$0xff] %v7049_v14  ;;  %v2281_v20 = vadd.f32 %v2277_v8, %v2141_v47  ;;  %v2823_v47 = vstv %s7107_s27  ;;  %s7390_s27 = sld [smem:[#allocation3 + $0x94]] }
 0x366   : > { %2746 = vrot.lane.b32.xlu1 %v2741_v4, %s8476_s2  ;;  %2758 = vrot.lane.b32.xlu0 %v2754_v50, %s8476_s2  ;;  %v3112_v50 = vmul.f32 %v3111_v6, %v7104_v10  ;;  %v2825_v3 = vmul.f32 %v2823_v47, %v6637_v48  ;;  %v3013_v6 = vstv %s7165_s15  ;;  %s7447_s15 = sld [smem:[#allocation3 + $0x218]] }
 0x367   : > { %v7061_v31 = vadd.f32 %v2343_v53, %v2281_v20  ;;  %v2824_v20 = vmul.f32 %v2823_v47, %v6626_v9 }
 0x368   : > { %v7063_v35 = vpop.permute.xlu1 %2354  ;;  %v7065_v60 = vpop.permute.xlu0 %2366 }
 0x369   : > { %8654 = vst [vmem:[#allocation43_spill] sm:$0xff] %v7061_v31  ;;  %v3027_v31 = vstv %s7212_s9  ;;  %s7540_s9 = sld [smem:[#allocation3 + $0x298]] }
 0x36a   : > { %2760 = vrot.lane.b32.xlu1 %v2755_v45, %s8476_s2  ;;  %2772 = vrot.lane.b32.xlu0 %v2768_v42, %s8534_s17  ;;  %v2987_v42 = vmul.f32 %v2985_v41, %v7117_v36  ;;  %v3028_v14 = vmul.f32 %v3027_v31, %v7104_v10 }
 0x36c   : > { %v7074_v34 = vpop.permute.xlu1 %2368  ;;  %v7076_v25 = vpop.permute.xlu0 %2380 }
 0x36e   : > { %2774 = vrot.lane.b32.xlu1 %v2769_v54, %s8534_s17  ;;  %2786 = vrot.lane.b32.xlu0 %v2782_v11, %s8534_s17  ;;  %v3125_v54 = vstv %s7132_s30  ;;  %s7406_s30 = sld [smem:[#allocation3 + $0x114]] }
 0x370   : > { %v7085_v16 = vpop.permute.xlu1 %2382  ;;  %v7087_v28 = vpop.permute.xlu0 %2394 }
 0x372   : > { %2788 = vrot.lane.b32.xlu1 %v2783_v62, %s8534_s17  ;;  %2800 = vrot.lane.b32.xlu0 %v2796_v29, %s8534_s17  ;;  %v3126_v62 = vmul.f32 %v3125_v54, %v7104_v10  ;;  %v3251_v29 = vstv %s7143_s11  ;;  %s7424_s11 = sld [smem:[#allocation3 + $0x297]] }
 0x374   : > { %v7096_v55 = vpop.permute.xlu1 %2396  ;;  %v7098_v15 = vpop.permute.xlu0 %2408 }
 0x376   : > { %2802 = vrot.lane.b32.xlu1 %v2797_v56, %s8534_s17  ;;  %2814 = vrot.lane.b32.xlu0 %v2810_v19, %s8534_s17  ;;  %v3252_v19 = vmul.f32 %v3251_v29, %v7104_v10 }
 0x378   : > { %v7111_v49 = vpop.permute.xlu1 %2410  ;;  %v7113_v61 = vpop.permute.xlu0 %2422 }
 0x37a   : > { %2816 = vrot.lane.b32.xlu1 %v2811_v57, %s8534_s17  ;;  %2976 = vrot.lane.b32.xlu0 %v2972_v7, %s8542_s21  ;;  %v2837_v57 = vstv %s7154_s12  ;;  %s7438_s12 = sld [smem:[#allocation3 + $0x194]] }
 0x37c   : > { %v7124_v32 = vpop.permute.xlu1 %2424  ;;  %v7126_v12 = vpop.permute.xlu0 %2436 }
 0x37d   : > { %8655 = vst [vmem:[#allocation29_spill] sm:$0xff] %v7124_v32  ;;  %8656 = vst [vmem:[#allocation50_spill] sm:$0xff] %v7126_v12  ;;  %v3055_v12 = vstv %s7324_s0  ;;  %v8378_v32 = vstv %s7335_s4  ;;  %s7649_s0 = sld [smem:[#allocation3 + $0x497]] }
 0x37e   : > { %2978 = vrot.lane.b32.xlu1 %v2973_v13, %s8542_s21  ;;  %2990 = vrot.lane.b32.xlu0 %v2986_v0, %s8542_s21  ;;  %v2838_v13 = vmul.f32 %v2837_v57, %v6676_v23  ;;  %v3001_v0 = vmul.f32 %v2999_v17, %v7117_v36  ;;  %v3139_v17 = vstv %s7176_s29  ;;  %s7497_s29 = sld [smem:[#allocation3 + $0x415]] }
 0x380   : > { %v7136_v8 = vpop.permute.xlu1 %2438  ;;  %v7138_v4 = vpop.permute.xlu0 %2450 }
 0x381   : > { %8657 = vst [vmem:[#allocation32_spill] sm:$0xff] %v7136_v8  ;;  %8658 = vst [vmem:[#allocation48_spill] sm:$0xff] %v7138_v4  ;;  %v3419_v4 = vstv %s7302_s16  ;;  %v2879_v8 = vstv %s7313_s3  ;;  %s7631_s16 = sld [smem:[#allocation3 + $0x417]] }
 0x382   : > { %3116 = vrot.lane.b32.xlu1 %v3112_v50, %s8438_s10  ;;  %2828 = vrot.lane.b32.xlu0 %v2824_v20, %s8534_s17  ;;  %v3014_v50 = vmul.f32 %v3013_v6, %v7104_v10  ;;  %v3127_v20 = vmul.f32 %v3125_v54, %v7117_v36  ;;  %v3420_v43 = vmul.f32 %v3419_v4, %v7104_v10  ;;  %s7641_s3 = sld [smem:[#allocation3 + $0x398]] }
 0x384   : > { %v7147_v53 = vpop.permute.xlu1 %2452  ;;  %v7149_v45 = vpop.permute.xlu0 %2464 }
 0x385   : > { %8659 = vst [vmem:[#allocation35_spill] sm:$0xff] %v7147_v53  ;;  %8660 = vst [vmem:[#allocation40_spill] sm:$0xff] %v7149_v45  ;;  %v3279_v45 = vstv %s7234_s18  ;;  %v3405_v53 = vstv %s7245_s13  ;;  %s7559_s18 = sld [smem:[#allocation3 + $0x294]] }
 0x386   : > { %2992 = vrot.lane.b32.xlu1 %v2987_v42, %s8542_s21  ;;  %3004 = vrot.lane.b32.xlu0 %v3000_v46, %s8542_s21  ;;  %v3280_v52 = vmul.f32 %v3279_v45, %v7104_v10  ;;  %s7572_s13 = sld [smem:[#allocation3 + $0x416]] }
 0x388   : > { %v7158_v9 = vpop.permute.xlu1 %2466  ;;  %v7160_v11 = vpop.permute.xlu0 %2478 }
 0x389   : > { %8661 = vst [vmem:[#allocation49_spill] sm:$0xff] %v7158_v9  ;;  %8662 = vst [vmem:[#allocation41_spill] sm:$0xff] %v7160_v11  ;;  %v3153_v9 = vstv %s7223_s14  ;;  %s7554_s14 = sld [smem:[#allocation3 + $0x495]] }
 0x38a   : > { %3118 = vrot.lane.b32.xlu1 %v3113_v24, %s8438_s10  ;;  %3130 = vrot.lane.b32.xlu0 %v3126_v62, %s8438_s10  ;;  %v3140_v24 = vmul.f32 %v3139_v17, %v7104_v10  ;;  %v3253_v62 = vmul.f32 %v3251_v29, %v7117_v36  ;;  %v3154_v40 = vmul.f32 %v3153_v9, %v7104_v10 }
 0x38c   : > { %v7169_v21 = vpop.permute.xlu1 %2480  ;;  %v7171_v56 = vpop.permute.xlu0 %2492 }
 0x38d   : > { %8663 = vst [vmem:[#allocation54_spill] sm:$0xff] %v7169_v21 }
 0x38e   : > { %3256 = vrot.lane.b32.xlu1 %v3252_v19, %s8476_s2  ;;  %2830 = vrot.lane.b32.xlu0 %v2825_v3, %s8534_s17  ;;  %v3265_v19 = vstv %s7186_s20  ;;  %v3391_v3 = vstv %s7189_s23  ;;  %s7502_s20 = sld [smem:[#allocation3 + $0x214]] }
 0x38f   : > { %s7513_s23 = sld [smem:[#allocation3 + $0x396]] }
 0x390   : > { %v7180_v7 = vpop.permute.xlu1 %2494  ;;  %v7182_v41 = vpop.permute.xlu0 %2506 }
 0x392   : > { %2842 = vrot.lane.b32.xlu1 %v2838_v13, %s8534_s17  ;;  %3006 = vrot.lane.b32.xlu0 %v3001_v0, %s8542_s21  ;;  %v3266_v0 = vmul.f32 %v3265_v19, %v7104_v10 }
 0x394   : > { %v7193_v48 = vpop.permute.xlu1 %2508  ;;  %v7195_v47 = vpop.permute.xlu0 %2520 }
 0x396   : > { %3018 = vrot.lane.b32.xlu1 %v3014_v50, %s8542_s21  ;;  %3132 = vrot.lane.b32.xlu0 %v3127_v20, %s8438_s10  ;;  %v3392_v50 = vmul.f32 %v3391_v3, %v7104_v10  ;;  %v2851_v20 = vstv %s7200_s22  ;;  %s7530_s22 = sld [smem:[#allocation3 + $0x317]] }
 0x397   : > { %v2852_v21 = vmul.f32 %v2851_v20, %v6676_v23 }
 0x398   : > { %v7204_v42 = vpop.permute.xlu1 %2522  ;;  %v7206_v46 = vpop.permute.xlu0 %2534 }
 0x39a   : > { %3144 = vrot.lane.b32.xlu1 %v3140_v24, %s8438_s10  ;;  %3258 = vrot.lane.b32.xlu0 %v3253_v62, %s8476_s2  ;;  %v2839_v62 = vmul.f32 %v2837_v57, %v6687_v27 }
 0x39c   : > { %v7216_v54 = vpop.permute.xlu1 %2536  ;;  %v7218_v13 = vpop.permute.xlu0 %2548 }
 0x39e   : > { %3270 = vrot.lane.b32.xlu1 %v3266_v0, %s8476_s2  ;;  %3396 = vrot.lane.b32.xlu0 %v3392_v50, %s8534_s17  ;;  %v3015_v50 = vmul.f32 %v3013_v6, %v7117_v36 }
 0x3a0   : > { %v7227_v29 = vpop.permute.xlu1 %2550  ;;  %v7229_v24 = vpop.permute.xlu0 %2562 }
 0x3a2   : > { %2844 = vrot.lane.b32.xlu1 %v2839_v62, %s8534_s17  ;;  %2856 = vrot.lane.b32.xlu0 %v2852_v21, %s8534_s17  ;;  %v3141_v21 = vmul.f32 %v3139_v17, %v7117_v36 }
 0x3a4   : > { %v7238_v11 = vpop.permute.xlu1 %2564  ;;  %v7240_v0 = vpop.permute.xlu0 %2576 }
 0x3a5   : > { %8664 = vst [vmem:[#allocation51_spill] sm:$0xff] %v7238_v11  ;;  %8665 = vst [vmem:[#allocation55_spill] sm:$0xff] %v7240_v0  ;;  %v4768_v0 = vld [vmem:[#allocation2 + $0x1b] sm:$0xff]  ;;  %v7346_v11 = vld [vmem:[#allocation2 + $0x24] sm:$0xff] }
 0x3a6   : > { %3020 = vrot.lane.b32.xlu1 %v3015_v50, %s8542_s21  ;;  %3032 = vrot.lane.b32.xlu0 %v3028_v14, %s8542_s21  ;;  %v3267_v14 = vmul.f32 %v3265_v19, %v7117_v36 }
 0x3a8   : > { %v7249_v57 = vpop.permute.xlu1 %2578  ;;  %v7251_v62 = vpop.permute.xlu0 %2590 }
 0x3a9   : > { %8666 = vst [vmem:[#allocation45_spill] sm:$0xff] %v7249_v57  ;;  %8667 = vst [vmem:[#allocation33_spill] sm:$0xff] %v7251_v62  ;;  %v3293_v62 = vstv %s7291_s24  ;;  %s7622_s24 = sld [smem:[#allocation3 + $0x314]] }
 0x3aa   : > { %3146 = vrot.lane.b32.xlu1 %v3141_v21, %s8438_s10  ;;  %3158 = vrot.lane.b32.xlu0 %v3154_v40, %s8438_s10  ;;  %v3393_v40 = vmul.f32 %v3391_v3, %v7117_v36  ;;  %v3041_v3 = vstv %s7267_s19  ;;  %v3294_v57 = vmul.f32 %v3293_v62, %v7104_v10  ;;  %s7598_s19 = sld [smem:[#allocation3 + $0x318]] }
 0x3ab   : > { %v3043_v30 = vmul.f32 %v3041_v3, %v7346_v11 }
 0x3ac   : > { %v7260_v6 = vpop.permute.xlu1 %2592  ;;  %v7262_v50 = vpop.permute.xlu0 %2604 }
 0x3ad   : > { %8668 = vst [vmem:[#allocation57_spill] sm:$0xff] %v7260_v6  ;;  %8669 = vst [vmem:[#allocation39_spill] sm:$0xff] %v7262_v50  ;;  %v3406_v50 = vmul.f32 %v3405_v53, %v7104_v10  ;;  %v2865_v6 = vstv %s7256_s8  ;;  %s7583_s8 = sld [smem:[#allocation3 + $0x397]] }
 0x3ae   : > { %3272 = vrot.lane.b32.xlu1 %v3267_v14, %s8476_s2  ;;  %3284 = vrot.lane.b32.xlu0 %v3280_v52, %s8476_s2  ;;  %v2853_v52 = vmul.f32 %v2851_v20, %v6687_v27  ;;  %v3167_v20 = vstv %s7278_s1  ;;  %s7616_s1 = sld [smem:[#allocation3 + $0x496]] }
 0x3af   : > { %v3168_v22 = vmul.f32 %v3167_v20, %v7104_v10 }
 0x3b0   : > { %v7271_v17 = vpop.permute.xlu1 %2606  ;;  %v7273_v21 = vpop.permute.xlu0 %2618 }
 0x3b1   : > { %8670 = vst [vmem:[#allocation42_spill] sm:$0xff] %v7271_v17  ;;  %8671 = vst [vmem:[#allocation34_spill] sm:$0xff] %v7273_v21  ;;  %v2866_v21 = vmul.f32 %v2865_v6, %v6676_v23  ;;  %v7288_v17 = vld [vmem:[#allocation2 + $0x1c] sm:$0xff] }
 0x3b2   : > { %3398 = vrot.lane.b32.xlu1 %v3393_v40, %s8534_s17  ;;  %3410 = vrot.lane.b32.xlu0 %v3406_v50, %s8534_s17  ;;  %v3042_v27 = vmul.f32 %v3041_v3, %v7288_v17  ;;  %v3182_v3 = vmul.f32 %v8378_v32, %v7288_v17 }
 0x3b4   : > { %v7282_v19 = vpop.permute.xlu1 %2620  ;;  %v7284_v14 = vpop.permute.xlu0 %2632 }
 0x3b5   : > { %8672 = vst [vmem:[#allocation46_spill] sm:$0xff] %v7282_v19  ;;  %v3029_v19 = vmul.f32 %v3027_v31, %v7117_v36 }
 0x3b6   : > { %2858 = vrot.lane.b32.xlu1 %v2853_v52, %s8534_s17  ;;  %2870 = vrot.lane.b32.xlu0 %v2866_v21, %s8534_s17  ;;  %v3155_v21 = vmul.f32 %v3153_v9, %v7117_v36 }
 0x3b8   : > { %v7295_v40 = vpop.permute.xlu1 %2634  ;;  %v7297_v50 = vpop.permute.xlu0 %2646 }
 0x3ba   : > { %3034 = vrot.lane.b32.xlu1 %v3029_v19, %s8542_s21  ;;  %3046 = vrot.lane.b32.xlu0 %v3042_v27, %s8542_s21  ;;  %v3281_v27 = vmul.f32 %v3279_v45, %v7117_v36 }
 0x3bc   : > { %v7306_v23 = vpop.permute.xlu1 %2648  ;;  %v7308_v52 = vpop.permute.xlu0 %2660 }
 0x3be   : > { %3160 = vrot.lane.b32.xlu1 %v3155_v21, %s8438_s10  ;;  %3172 = vrot.lane.b32.xlu0 %v3168_v22, %s8438_s10  ;;  %v3407_v22 = vmul.f32 %v3405_v53, %v7117_v36  ;;  %v2880_v53 = vmul.f32 %v4768_v0, %v2879_v8 }
 0x3c0   : > { %v7317_v31 = vpop.permute.xlu1 %2662  ;;  %v7319_v19 = vpop.permute.xlu0 %2674 }
 0x3c2   : > { %3286 = vrot.lane.b32.xlu1 %v3281_v27, %s8476_s2  ;;  %3298 = vrot.lane.b32.xlu0 %v3294_v57, %s8476_s2  ;;  %v7343_v27 = vld [vmem:[#allocation2 + $0x23] sm:$0xff] }
 0x3c3   : > { %v2867_v18 = vmul.f32 %v7343_v27, %v2865_v6  ;;  %v3056_v6 = vmul.f32 %v3055_v12, %v7288_v17 }
 0x3c4   : > { %v7328_v9 = vpop.permute.xlu1 %2676  ;;  %v7330_v21 = vpop.permute.xlu0 %2688 }
 0x3c6   : > { %3412 = vrot.lane.b32.xlu1 %v3407_v22, %s8534_s17  ;;  %3424 = vrot.lane.b32.xlu0 %v3420_v43, %s8534_s17 }
 0x3c8   : > { %v7339_v45 = vpop.permute.xlu1 %2690  ;;  %v7341_v57 = vpop.permute.xlu0 %2702 }
 0x3ca   : > { %2872 = vrot.lane.b32.xlu1 %v2867_v18, %s8534_s17  ;;  %2884 = vrot.lane.b32.xlu0 %v2880_v53, %s8534_s17 }
 0x3cc   : > { %v7353_v43 = vpop.permute.xlu1 %2704  ;;  %v7355_v22 = vpop.permute.xlu0 %2716 }
 0x3cd   : > { %8673 = vst [vmem:[#allocation47_spill] sm:$0xff] %v7353_v43  ;;  %8674 = vst [vmem:[#allocation36_spill] sm:$0xff] %v7355_v22  ;;  %v3169_v43 = vmul.f32 %v3167_v20, %v7117_v36  ;;  %v8379_v22 = vstv %s7349_s5  ;;  %v3295_v20 = vmul.f32 %v3293_v62, %v7117_v36  ;;  %v3421_v62 = vmul.f32 %v3419_v4, %v7117_v36 }
 0x3ce   : > { %3048 = vrot.lane.b32.xlu1 %v3043_v30, %s8542_s21  ;;  %3060 = vrot.lane.b32.xlu0 %v3056_v6, %s8542_s21  ;;  %v3308_v32 = vmul.f32 %v8379_v22, %v7104_v10 }
 0x3d0   : > { %v7364_v18 = vpop.permute.xlu1 %2718  ;;  %v7366_v53 = vpop.permute.xlu0 %2730 }
 0x3d1   : > { %8675 = vst [vmem:[#allocation37_spill] sm:$0xff] %v7366_v53  ;;  %v8380_v53 = vstv %s7360_s7 }
 0x3d2   : > { %3174 = vrot.lane.b32.xlu1 %v3169_v43, %s8438_s10  ;;  %3186 = vrot.lane.b32.xlu0 %v3182_v3, %s8438_s10  ;;  %v2358_v43 = vadd.f32 %v7051_v44, %v6853_v59  ;;  %v3434_v22 = vmul.f32 %v8380_v53, %v7104_v10  ;;  %v2359_v59 = vadd.f32 %v7063_v35, %v6875_v63  ;;  %v3069_v53 = vstv %s7379_s6  ;;  %s7681_s6 = sld [smem:[#allocation9 + $0x2]] }
 0x3d3   : > { %v2372_v44 = vadd.f32 %v7065_v60, %v6877_v33  ;;  %v2915_v60 = vstv %s7390_s27  ;;  %s7689_s27 = sld [smem:[#allocation8 + $0x100]] }
 0x3d4   : > { %v7381_v30 = vpop.permute.xlu1 %2732  ;;  %v7383_v6 = vpop.permute.xlu0 %2744  ;;  %v2499_v63 = vadd.f32 %v7180_v7, %v2359_v59  ;;  %v2386_v7 = vadd.f32 %v7076_v25, %v6901_v1  ;;  %v2916_v59 = vmul.f32 %v2915_v60, %v7104_v10 }
 0x3d5   : > { %8676 = vst [vmem:[#allocation58_spill] sm:$0xff] %v7381_v30  ;;  %8677 = vst [vmem:[#allocation59_spill] sm:$0xff] %v7383_v6  ;;  %v2909_v30 = vstv %s7375_s25  ;;  %v2512_v33 = vadd.f32 %v7182_v41, %v2372_v44  ;;  %v2921_v44 = vstv %s7406_s30  ;;  %s7679_s25 = sld [smem:[#allocation8 + $0x80]] }
 0x3d6   : > { %3300 = vrot.lane.b32.xlu1 %v3295_v20, %s8476_s2  ;;  %3312 = vrot.lane.b32.xlu0 %v3308_v32, %s8476_s2  ;;  %v2498_v32 = vadd.f32 %v7171_v56, %v2358_v43  ;;  %v2893_v20 = vstv %s7372_s26  ;;  %v2881_v43 = vmul.f32 %v7343_v27, %v2879_v8  ;;  %v3057_v8 = vmul.f32 %v3055_v12, %v7346_v11  ;;  %s7666_s26 = sld [smem:[#allocation8]] }
 0x3d7   : > { %v2639_v41 = vadd.f32 %v7295_v40, %v2499_v63  ;;  %v2911_v12 = vmul.f32 %v2909_v30, %v7117_v36  ;;  %v2526_v25 = vadd.f32 %v7195_v47, %v2386_v7  ;;  %v2927_v7 = vstv %s7438_s12  ;;  %s7702_s30 = sld [smem:[#allocation9 + $0x3]] }
 0x3d8   : > { %v7398_v3 = vpop.permute.xlu1 %2746  ;;  %v7400_v6 = vpop.permute.xlu0 %2758  ;;  %v2638_v4 = vadd.f32 %v7284_v14, %v2498_v32  ;;  %v2373_v14 = vadd.f32 %v7074_v34, %v6899_v26  ;;  %s7714_s12 = sld [smem:[#allocation8 + $0x81]] }
 0x3d9   : > { %8678 = vst [vmem:[#allocation60_spill] sm:$0xff] %v7398_v3  ;;  %8679 = vst [vmem:[#allocation61_spill] sm:$0xff] %v7400_v6  ;;  %v2894_v3 = vmul.f32 %v4768_v0, %v2893_v20  ;;  %v3070_v0 = vmul.f32 %v3069_v53, %v7288_v17 }
 0x3da   : > { %3426 = vrot.lane.b32.xlu1 %v3421_v62, %s8534_s17  ;;  %3438 = vrot.lane.b32.xlu0 %v3434_v22, %s8534_s17  ;;  %v2910_v22 = vmul.f32 %v2909_v30, %v7104_v10  ;;  %v2652_v62 = vadd.f32 %v7297_v50, %v2512_v33  ;;  %v2513_v1 = vadd.f32 %v7193_v48, %v2373_v14  ;;  %v8680_v30 = vstv %s7335_s4  ;;  %s7655_s4 = sld [smem:[#allocation3 + $0x418]] }
 0x3db   : > { %v2917_v33 = vmul.f32 %v2915_v60, %v7117_v36 }
 0x3dc   : > { %v7419_v6 = vpop.permute.xlu1 %2760  ;;  %v2773_v56 = vpop.permute.xlu0 %2772  ;;  %v2653_v48 = vadd.f32 %v7306_v23, %v2513_v1 }
 0x3dd   : > { %v2778_v35 = vadd.f32 %v2773_v56, %v2638_v4  ;;  %v2387_v4 = vadd.f32 %v7085_v16, %v6923_v58  ;;  %v2400_v56 = vadd.f32 %v7087_v28, %v6925_v38  ;;  %v3321_v28 = vstv %s7424_s11  ;;  %s7706_s11 = sld [smem:[#allocation8 + $0x1]] }
 0x3de   : > { %2886 = vrot.lane.b32.xlu1 %v2881_v43, %s8534_s17  ;;  %2898 = vrot.lane.b32.xlu0 %v2894_v3, %s8534_s17  ;;  %v3195_v3 = vstv %s7396_s28  ;;  %v3183_v43 = vmul.f32 %v8680_v30, %v7346_v11  ;;  %s7698_s28 = sld [smem:[#allocation8 + $0x180]] }
 0x3df   : > { %v7444_v26 = vadd.f32 %v2910_v22, %v2778_v35  ;;  %v2666_v22 = vadd.f32 %v7308_v52, %v2526_v25  ;;  %v3196_v38 = vmul.f32 %v3195_v3, %v7288_v17  ;;  %v2922_v35 = vmul.f32 %v2921_v44, %v7104_v10 }
 0x3e0   : > { %v2775_v34 = vpop.permute.xlu1 %2774  ;;  %v2787_v32 = vpop.permute.xlu0 %2786  ;;  %v2527_v23 = vadd.f32 %v7204_v42, %v2387_v4  ;;  %v2540_v52 = vadd.f32 %v7206_v46, %v2400_v56  ;;  %v2928_v25 = vmul.f32 %v2927_v7, %v7104_v10  ;;  %v8682_v56 = vstv %s7360_s7  ;;  %s7662_s7 = sld [smem:[#allocation9]] }
 0x3e1   : > { %v2779_v40 = vadd.f32 %v2775_v34, %v2639_v41  ;;  %v2792_v50 = vadd.f32 %v2787_v32, %v2652_v62  ;;  %v8681_v32 = vstv %s7349_s5  ;;  %v3435_v30 = vmul.f32 %v8682_v56, %v7117_v36  ;;  %s7657_s5 = sld [smem:[#allocation3 + $0x498]] }
 0x3e2   : > { %3062 = vrot.lane.b32.xlu1 %v3057_v8, %s8542_s21  ;;  %3074 = vrot.lane.b32.xlu0 %v3070_v0, %s8542_s21  ;;  %v2401_v0 = vadd.f32 %v7096_v55, %v6947_v39  ;;  %v2667_v60 = vadd.f32 %v7317_v31, %v2527_v23  ;;  %v2680_v41 = vadd.f32 %v7319_v19, %v2540_v52  ;;  %v3447_v55 = vstv %s7447_s15  ;;  %s7720_s15 = sld [smem:[#allocation8 + $0x101]] }
 0x3e3   : > { %v7465_v47 = vadd.f32 %v2911_v12, %v2779_v40  ;;  %v7467_v63 = vadd.f32 %v2916_v59, %v2792_v50  ;;  %v3309_v12 = vmul.f32 %v8681_v32, %v7117_v36  ;;  %v3322_v39 = vmul.f32 %v3321_v28, %v7288_v17 }
 0x3e4   : > { %v2789_v58 = vpop.permute.xlu1 %2788  ;;  %v2801_v16 = vpop.permute.xlu0 %2800  ;;  %v2923_v59 = vmul.f32 %v2921_v44, %v7117_v36  ;;  %v2541_v31 = vadd.f32 %v7216_v54, %v2401_v0  ;;  %v3083_v52 = vstv %s7497_s29  ;;  %s7724_s29 = sld [smem:[#allocation8 + $0x181]] }
 0x3e5   : > { %v2793_v14 = vadd.f32 %v2789_v58, %v2653_v48  ;;  %v2806_v8 = vadd.f32 %v2801_v16, %v2666_v22  ;;  %v2414_v22 = vadd.f32 %v7098_v15, %v6949_v2  ;;  %v2933_v2 = vstv %s7502_s20  ;;  %s7730_s20 = sld [smem:[#allocation3 + $0x394]] }
 0x3e6   : > { %3188 = vrot.lane.b32.xlu1 %v3183_v43, %s8438_s10  ;;  %3200 = vrot.lane.b32.xlu0 %v3196_v38, %s8438_s10  ;;  %v2681_v40 = vadd.f32 %v7328_v9, %v2541_v31  ;;  %v3448_v43 = vmul.f32 %v3447_v55, %v7104_v10  ;;  %v2929_v9 = vmul.f32 %v2927_v7, %v7117_v36  ;;  %v3461_v31 = vstv %s7540_s9  ;;  %s7840_s9 = sld [smem:[#allocation8 + $0x102]] }
 0x3e7   : > { %v7484_v62 = vadd.f32 %v2917_v33, %v2793_v14  ;;  %v7486_v42 = vadd.f32 %v2922_v35, %v2806_v8  ;;  %v2895_v33 = vmul.f32 %v7343_v27, %v2893_v20  ;;  %v3071_v35 = vmul.f32 %v3069_v53, %v7346_v11 }
 0x3e8   : > { %v2803_v34 = vpop.permute.xlu1 %2802  ;;  %v2815_v46 = vpop.permute.xlu0 %2814  ;;  %v2554_v23 = vadd.f32 %v7218_v13, %v2414_v22  ;;  %v3084_v27 = vmul.f32 %v3083_v52, %v7288_v17  ;;  %v3197_v53 = vmul.f32 %v3195_v3, %v7346_v11  ;;  %v3209_v20 = vstv %s7513_s23  ;;  %s7813_s23 = sld [smem:[#allocation3 + $0x414]] }
 0x3e9   : > { %v2807_v1 = vadd.f32 %v2803_v34, %v2667_v60  ;;  %v2820_v19 = vadd.f32 %v2815_v46, %v2680_v41  ;;  %v2934_v0 = vmul.f32 %v2933_v2, %v7104_v10  ;;  %v3210_v41 = vmul.f32 %v3209_v20, %v7288_v17 }
 0x3ea   : > { %3314 = vrot.lane.b32.xlu1 %v3309_v12, %s8476_s2  ;;  %3326 = vrot.lane.b32.xlu0 %v3322_v39, %s8476_s2  ;;  %v2694_v15 = vadd.f32 %v7330_v21, %v2554_v23  ;;  %v3323_v3 = vmul.f32 %v3321_v28, %v7346_v11  ;;  %v3335_v34 = vstv %s7530_s22  ;;  %v2415_v10 = vadd.f32 %v7111_v49, %v6969_v5  ;;  %s7832_s22 = sld [smem:[#allocation8 + $0x82]] }
 0x3eb   : > { %v7505_v50 = vadd.f32 %v2923_v59, %v2807_v1  ;;  %v7507_v44 = vadd.f32 %v2928_v25, %v2820_v19  ;;  %v3336_v28 = vmul.f32 %v3335_v34, %v7288_v17  ;;  %v3449_v59 = vmul.f32 %v3447_v55, %v7117_v36 }
 0x3ec   : > { %v2817_v54 = vpop.permute.xlu1 %2816  ;;  %v2977_v4 = vpop.permute.xlu0 %2976  ;;  %v2555_v1 = vadd.f32 %v7227_v29, %v2415_v10  ;;  %v2428_v5 = vadd.f32 %v7113_v61, %v6971_v51  ;;  %v3085_v55 = vmul.f32 %v3083_v52, %v7346_v11  ;;  %v2935_v51 = vmul.f32 %v2933_v2, %v7117_v36 }
 0x3ed   : > { %v2821_v48 = vadd.f32 %v2817_v54, %v2681_v40  ;;  %v2982_v19 = vadd.f32 %v2977_v4, %v7444_v26  ;;  %v3462_v26 = vmul.f32 %v3461_v31, %v7288_v17  ;;  %v3097_v54 = vstv %s7554_s14  ;;  %s7843_s14 = sld [smem:[#allocation8 + $0x182]] }
 0x3ee   : > { %3440 = vrot.lane.b32.xlu1 %v3435_v30, %s8534_s17  ;;  %3452 = vrot.lane.b32.xlu0 %v3448_v43, %s8534_s17  ;;  %v2695_v49 = vadd.f32 %v7339_v45, %v2555_v1  ;;  %v2568_v4 = vadd.f32 %v7229_v24, %v2428_v5  ;;  %v2941_v61 = vstv %s7559_s18  ;;  %v3098_v24 = vmul.f32 %v3097_v54, %v7288_v17  ;;  %v8687_v1 = vld [vmem:[#allocation55_spill] sm:$0xff]  ;;  %s7915_s18 = sld [smem:[#allocation3 + $0x494]] }
 0x3ef   : > { %v7520_v58 = vadd.f32 %v2929_v9, %v2821_v48  ;;  %v3211_v22 = vmul.f32 %v3209_v20, %v7346_v11  ;;  %v3223_v36 = vstv %s7572_s13  ;;  %s7921_s13 = sld [smem:[#allocation8 + $0x3]] }
 0x3f0   : > { %v2979_v16 = vpop.permute.xlu1 %2978  ;;  %v2991_v38 = vpop.permute.xlu0 %2990  ;;  %v2708_v45 = vadd.f32 %v7341_v57, %v2568_v4  ;;  %v3224_v2 = vmul.f32 %v3223_v36, %v7288_v17  ;;  %v2943_v4 = vmul.f32 %v2941_v61, %v7346_v11 }
 0x3f1   : > { %v2983_v46 = vadd.f32 %v2979_v16, %v7465_v47  ;;  %v2996_v32 = vadd.f32 %v2991_v38, %v7467_v63 }
 0x3f2   : > { %2900 = vrot.lane.b32.xlu1 %v2895_v33, %s8534_s17  ;;  %3076 = vrot.lane.b32.xlu0 %v3071_v35, %s8542_s21  ;;  %v2942_v33 = vmul.f32 %v2941_v61, %v7288_v17 }
 0x3f4   : > { %v3117_v14 = vpop.permute.xlu1 %3116  ;;  %v2829_v8 = vpop.permute.xlu0 %2828 }
 0x3f5   : > { %v2834_v13 = vadd.f32 %v2829_v8, %v2694_v15  ;;  %v3122_v47 = vadd.f32 %v3117_v14, %v2982_v19  ;;  %v3349_v8 = vstv %s7583_s8  ;;  %s7929_s8 = sld [smem:[#allocation8 + $0x83]] }
 0x3f6   : > { %3088 = vrot.lane.b32.xlu1 %v3084_v27, %s8542_s21  ;;  %3202 = vrot.lane.b32.xlu0 %v3197_v53, %s8438_s10  ;;  %v3351_v61 = vmul.f32 %v3349_v8, %v7346_v11 }
 0x3f7   : > { %v7546_v7 = vadd.f32 %v2934_v0, %v2834_v13  ;;  %v3350_v13 = vmul.f32 %v3349_v8, %v7288_v17 }
 0x3f8   : > { %v2993_v21 = vpop.permute.xlu1 %2992  ;;  %v7548_v60 = vpop.permute.xlu0 %3004 }
 0x3f9   : > { %v2997_v57 = vadd.f32 %v2993_v21, %v7484_v62  ;;  %v3010_v62 = vadd.f32 %v7548_v60, %v7486_v42  ;;  %v3475_v21 = vstv %s7598_s19  ;;  %v8683_v42 = vld [vmem:[#allocation29_spill] sm:$0xff]  ;;  %s7931_s19 = sld [smem:[#allocation8 + $0x103]] }
 0x3fa   : > { %3214 = vrot.lane.b32.xlu1 %v3210_v41, %s8438_s10  ;;  %3328 = vrot.lane.b32.xlu0 %v3323_v3, %s8476_s2  ;;  %v2429_v60 = vadd.f32 %v8683_v42, %v6992_v37  ;;  %v8684_v41 = vld [vmem:[#allocation38_spill] sm:$0xff]  ;;  %v8686_v37 = vld [vmem:[#allocation51_spill] sm:$0xff]  ;;  %v4952_v42 = vmov -1.0  }
 0x3fb   : > { %v8685_v3 = vld [vmem:[#allocation50_spill] sm:$0xff] }
 0x3fc   : > { %v3119_v12 = vpop.permute.xlu1 %3118  ;;  %v3131_v39 = vpop.permute.xlu0 %3130 }
 0x3fd   : > { %v3123_v25 = vadd.f32 %v3119_v12, %v2983_v46  ;;  %v7570_v40 = vadd.f32 %v3131_v39, %v2996_v32  ;;  %v3476_v32 = vmul.f32 %v3475_v21, %v7288_v17  ;;  %v3099_v12 = vmul.f32 %v3097_v54, %v7346_v11 }
 0x3fe   : > { %3340 = vrot.lane.b32.xlu1 %v3336_v28, %s8476_s2  ;;  %3454 = vrot.lane.b32.xlu0 %v3449_v59, %s8534_s17  ;;  %v3237_v59 = vstv %s7616_s1  ;;  %v3363_v54 = vstv %s7631_s16  ;;  %s7933_s1 = sld [smem:[#allocation8 + $0x183]] }
 0x3ff   : > { %v3365_v8 = vmul.f32 %v3363_v54, %v7346_v11  ;;  %s7985_s16 = sld [smem:[#allocation8 + $0x84]] }
 0x400   : > { %v3257_v63 = vpop.permute.xlu1 %3256  ;;  %v2831_v29 = vpop.permute.xlu0 %2830 }
 0x401   : > { %v3262_v56 = vadd.f32 %v3257_v63, %v3122_v47  ;;  %v2835_v30 = vadd.f32 %v2831_v29, %v2695_v49  ;;  %v8689_v49 = vld [vmem:[#allocation36_spill] sm:$0xff] }
 0x402   : > { %3466 = vrot.lane.b32.xlu1 %v3462_v26, %s8534_s17  ;;  %3090 = vrot.lane.b32.xlu0 %v3085_v55, %s8542_s21  ;;  %v3225_v26 = vmul.f32 %v3223_v36, %v7346_v11  ;;  %v3238_v55 = vmul.f32 %v3237_v59, %v7288_v17 }
 0x403   : > { %v7590_v43 = vadd.f32 %v2935_v51, %v2835_v30 }
 0x404   : > { %v2843_v48 = vpop.permute.xlu1 %2842  ;;  %v3007_v9 = vpop.permute.xlu0 %3006 }
 0x405   : > { %v2848_v16 = vadd.f32 %v2843_v48, %v2708_v45  ;;  %v7595_v38 = vadd.f32 %v3007_v9, %v7505_v50  ;;  %v3337_v50 = vmul.f32 %v3335_v34, %v7346_v11  ;;  %v2442_v34 = vadd.f32 %v8685_v3, %v8684_v41 }
 0x406   : > { %3102 = vrot.lane.b32.xlu1 %v3098_v24, %s8542_s21  ;;  %3216 = vrot.lane.b32.xlu0 %v3211_v22, %s8438_s10  ;;  %v3364_v9 = vmul.f32 %v3363_v54, %v7288_v17  ;;  %v8692_v54 = vld [vmem:[#allocation31_spill] sm:$0xff] }
 0x407   : > { %v7606_v35 = vadd.f32 %v2942_v33, %v2848_v16  ;;  %v2582_v19 = vadd.f32 %v8687_v1, %v2442_v34  ;;  %v3489_v33 = vstv %s7641_s3  ;;  %v3705_v34 = vstv %s7689_s27  ;;  %s7987_s3 = sld [smem:[#allocation8 + $0x104]] }
 0x408   : > { %v3019_v23 = vpop.permute.xlu1 %3018  ;;  %v3133_v52 = vpop.permute.xlu0 %3132  ;;  %s8043_s27 = sld [smem:[#allocation8 + $0x186]] }
 0x409   : > { %v7611_v15 = vadd.f32 %v3019_v23, %v7507_v44  ;;  %v7613_v14 = vadd.f32 %v3133_v52, %v2997_v57  ;;  %v3463_v44 = vmul.f32 %v3461_v31, %v7346_v11  ;;  %v2569_v31 = vadd.f32 %v8686_v37, %v2429_v60 }
 0x40a   : > { %3228 = vrot.lane.b32.xlu1 %v3224_v2, %s8438_s10  ;;  %3342 = vrot.lane.b32.xlu0 %v3337_v50, %s8476_s2  ;;  %v2722_v47 = vadd.f32 %v8689_v49, %v2582_v19  ;;  %v3477_v52 = vmul.f32 %v3475_v21, %v7346_v11  ;;  %v3377_v50 = vstv %s7649_s0  ;;  %v3639_v21 = vstv %s7679_s25  ;;  %s7989_s0 = sld [smem:[#allocation8 + $0x184]] }
 0x40b   : > { %v3703_v37 = vstv %s7681_s6  ;;  %s8039_s25 = sld [smem:[#allocation8 + $0x86]] }
 0x40c   : > { %v3145_v27 = vpop.permute.xlu1 %3144  ;;  %v3259_v53 = vpop.permute.xlu0 %3258  ;;  %s8041_s6 = sld [smem:[#allocation8 + $0x106]] }
 0x40d   : > { %v7626_v20 = vadd.f32 %v3145_v27, %v3010_v62  ;;  %v7628_v0 = vadd.f32 %v3259_v53, %v3123_v25  ;;  %v2947_v25 = vstv %s7622_s24  ;;  %v3378_v53 = vmul.f32 %v3377_v50, %v7288_v17  ;;  %s7980_s24 = sld [smem:[#allocation8 + $0x4]] }
 0x40e   : > { %3354 = vrot.lane.b32.xlu1 %v3350_v13, %s8476_s2  ;;  %3468 = vrot.lane.b32.xlu0 %v3463_v44, %s8534_s17  ;;  %v2948_v51 = vmul.f32 %v2947_v25, %v7288_v17  ;;  %v3503_v13 = vstv %s7655_s4  ;;  %v3517_v44 = vstv %s7657_s5  ;;  %s8009_s4 = sld [smem:[#allocation8 + $0x5]] }
 0x40f   : > { %s8015_s5 = sld [smem:[#allocation8 + $0x85]] }
 0x410   : > { %v3271_v10 = vpop.permute.xlu1 %3270  ;;  %v3397_v46 = vpop.permute.xlu0 %3396 }
 0x411   : > { %v7644_v39 = vadd.f32 %v3271_v10, %v7570_v40  ;;  %v7646_v28 = vadd.f32 %v3397_v46, %v3262_v56  ;;  %v8688_v40 = vld [vmem:[#allocation47_spill] sm:$0xff]  ;;  %v3771_v10 = vstv %s7698_s28  ;;  %v3491_v46 = vmul.f32 %v3489_v33, %v7346_v11  ;;  %s8059_s28 = sld [smem:[#allocation8 + $0x7]] }
 0x412   : > { %3480 = vrot.lane.b32.xlu1 %v3476_v32, %s8534_s17  ;;  %3104 = vrot.lane.b32.xlu0 %v3099_v12, %s8542_s21  ;;  %v2709_v5 = vadd.f32 %v8688_v40, %v2569_v31  ;;  %s7672_s21 = sld [smem:[#allocation9 + $0x1]]  ;;  %v3379_v32 = vmul.f32 %v3377_v50, %v7346_v11  ;;  %v3571_v12 = vstv %s7662_s7 }
 0x413   : > { %vm3530_vm3 = vcmp.ge.f32.partialorder %v7646_v28, 0.0  ;;  %v3518_v28 = vmul.f32 %v3517_v44, %v7288_v17  ;;  %s8017_s7 = sld [smem:[#allocation8 + $0x105]] }
 0x414   : > { %v2845_v63 = vpop.permute.xlu1 %2844  ;;  %v2857_v29 = vpop.permute.xlu0 %2856  ;;  %v3532_v60 = vsel %vm3530_vm3, 1.0, %v4952_v42 }
 0x415   : > { %v2849_v56 = vadd.f32 %v2845_v63, %v2709_v5  ;;  %v2862_v30 = vadd.f32 %v2857_v29, %v2722_v47  ;;  %v3640_v1 = vmul.f32 %v3639_v21, %v3532_v60  ;;  %v3706_v5 = vmul.f32 %v3705_v34, %v3532_v60  ;;  %v8690_v29 = vld [vmem:[#allocation52_spill] sm:$0xff] }
 0x416   : > { %3230 = vrot.lane.b32.xlu1 %v3225_v26, %s8438_s10  ;;  %3242 = vrot.lane.b32.xlu0 %v3238_v55, %s8438_s10  ;;  %v3772_v49 = vmul.f32 %v3771_v10, %v3532_v60  ;;  %v8691_v26 = vld [vmem:[#allocation32_spill] sm:$0xff] }
 0x417   : > { %v7685_v24 = vadd.f32 %v2943_v4, %v2849_v56  ;;  %v7687_v22 = vadd.f32 %v2948_v51, %v2862_v30  ;;  %v2443_v55 = vadd.f32 %v8691_v26, %v8690_v29  ;;  %v8693_v4 = vld [vmem:[#allocation48_spill] sm:$0xff]  ;;  %v3769_v30 = vstv %s7702_s30  ;;  %s8062_s30 = sld [smem:[#allocation8 + $0x87]] }
 0x418   : > { %v3021_v45 = vpop.permute.xlu1 %3020  ;;  %v3033_v48 = vpop.permute.xlu0 %3032  ;;  %v2456_v56 = vadd.f32 %v8693_v4, %v8692_v54  ;;  %v3579_v51 = vstv %s7706_s11  ;;  %s8064_s11 = sld [smem:[#allocation8 + $0x107]] }
 0x419   : > { %v7692_v16 = vadd.f32 %v3021_v45, %v7520_v58  ;;  %v7695_v36 = vadd.f32 %v3033_v48, %v7546_v7  ;;  %v3490_v58 = vmul.f32 %v3489_v33, %v7288_v17  ;;  %v3777_v45 = vstv %s7724_s29  ;;  %v8694_v48 = vld [vmem:[#allocation45_spill] sm:$0xff]  ;;  %s8076_s29 = sld [smem:[#allocation8 + $0x88]] }
 0x41a   : > { %3356 = vrot.lane.b32.xlu1 %v3351_v61, %s8476_s2  ;;  %3368 = vrot.lane.b32.xlu0 %v3364_v9, %s8476_s2  ;;  %v2583_v61 = vadd.f32 %v8694_v48, %v2443_v55  ;;  %v8695_v9 = vld [vmem:[#allocation33_spill] sm:$0xff] }
 0x41b   : > { %v2596_v33 = vadd.f32 %v8695_v9, %v2456_v56  ;;  %v8697_v9 = vld [vmem:[#allocation30_spill] sm:$0xff] }
 0x41c   : > { %v3147_v57 = vpop.permute.xlu1 %3146  ;;  %v3159_v23 = vpop.permute.xlu0 %3158 }
 0x41d   : > { %v7709_v7 = vadd.f32 %v3147_v57, %v7595_v38  ;;  %v7712_v2 = vadd.f32 %v3159_v23, %v7611_v15  ;;  %v3239_v38 = vmul.f32 %v3237_v59, %v7346_v11  ;;  %v3573_v15 = vstv %s7666_s26  ;;  %s8019_s26 = sld [smem:[#allocation8 + $0x185]] }
 0x41e   : > { %3482 = vrot.lane.b32.xlu1 %v3477_v52, %s8534_s17  ;;  %3494 = vrot.lane.b32.xlu0 %v3490_v58, %s8534_s17  ;;  %v3637_v59 = vstv %s7672_s21  ;;  %v3574_v31 = vmul.f32 %v3573_v15, %v3532_v60  ;;  %v2953_v58 = vstv %s7730_s20  ;;  %s8035_s21 = sld [smem:[#allocation8 + $0x6]] }
 0x41f   : > { %s8081_s20 = sld [smem:[#allocation8 + $0x108]] }
 0x420   : > { %v3273_v62 = vpop.permute.xlu1 %3272  ;;  %v3285_v27 = vpop.permute.xlu0 %3284  ;;  %v3576_v50 = vadd.f32 %v3574_v31, %v3571_v12 }
 0x421   : > { %v7737_v41 = vadd.f32 %v3273_v62, %v7613_v14  ;;  %v7740_v3 = vadd.f32 %v3285_v27, %v7626_v20  ;;  %v3504_v14 = vmul.f32 %v3503_v13, %v7288_v17  ;;  %v3505_v20 = vmul.f32 %v3503_v13, %v7346_v11 }
 0x422   : > { %3244 = vrot.lane.b32.xlu1 %v3239_v38, %s8438_s10  ;;  %3370 = vrot.lane.b32.xlu0 %v3365_v8, %s8476_s2  ;;  %v3642_v38 = vadd.f32 %v3640_v1, %v3637_v59  ;;  %v3708_v8 = vadd.f32 %v3706_v5, %v3703_v37  ;;  %v3774_v62 = vadd.f32 %v3772_v49, %v3769_v30 }
 0x423   : > { %v2949_v1 = vmul.f32 %v2947_v25, %v7346_v11 }
 0x424   : > { %v3399_v19 = vpop.permute.xlu1 %3398  ;;  %v3411_v40 = vpop.permute.xlu0 %3410 }
 0x425   : > { %v3403_v47 = vadd.f32 %v3399_v19, %v7628_v0  ;;  %v3416_v63 = vadd.f32 %v3411_v40, %v7644_v39  ;;  %v3645_v0 = vstv %s7714_s12  ;;  %v3711_v39 = vstv %s7720_s15  ;;  %v8696_v19 = vld [vmem:[#allocation37_spill] sm:$0xff]  ;;  %s8066_s12 = sld [smem:[#allocation8 + $0x187]] }
 0x426   : > { %3382 = vrot.lane.b32.xlu1 %v3378_v53, %s8476_s2  ;;  %3496 = vrot.lane.b32.xlu0 %v3491_v46, %s8534_s17  ;;  %v2723_v46 = vadd.f32 %v7364_v18, %v2583_v61  ;;  %v2736_v31 = vadd.f32 %v8696_v19, %v2596_v33  ;;  %v2954_v40 = vmul.f32 %v2953_v58, %v7288_v17  ;;  %v8698_v33 = vld [vmem:[#allocation35_spill] sm:$0xff]  ;;  %s8074_s15 = sld [smem:[#allocation8 + $0x8]] }
 0x427   : > { %vm3534_vm4 = vcmp.ge.f32.partialorder %v3416_v63, 0.0  ;;  %vm3531_vm5 = vcmp.ge.f32.partialorder %v3403_v47, 0.0  ;;  %v2959_v47 = vstv %s7813_s23  ;;  %s8085_s23 = sld [smem:[#allocation8 + $0x188]] }
 0x428   : > { %v3536_v57 = vsel %vm3534_vm4, 1.0, %v4952_v42  ;;  %v2859_v23 = vpop.permute.xlu1 %2858  ;;  %v2871_v52 = vpop.permute.xlu0 %2870 }
 0x429   : > { %v3580_v27 = vmul.f32 %v3579_v51, %v3536_v57  ;;  %v3646_v53 = vmul.f32 %v3645_v0, %v3536_v57  ;;  %v3712_v13 = vmul.f32 %v3711_v39, %v3536_v57  ;;  %v3778_v60 = vmul.f32 %v3777_v45, %v3536_v57 }
 0x42a   : > { %3508 = vrot.lane.b32.xlu1 %v3504_v14, %s8534_s17  ;;  %3384 = vrot.lane.b32.xlu0 %v3379_v32, %s8476_s2  ;;  %v2863_v26 = vadd.f32 %v2859_v23, %v2723_v46  ;;  %v2876_v32 = vadd.f32 %v2871_v52, %v2736_v31  ;;  %s7823_s2 = sld [smem:[#allocation8 + $0x2]]  ;;  %v2457_v57 = vadd.f32 %v8698_v33, %v8697_v9  ;;  %v8699_v23 = vld [vmem:[#allocation56_spill] sm:$0xff]  ;;  %v3651_v31 = vstv %s7832_s22 }
 0x42b   : > { %v7805_v5 = vadd.f32 %v3580_v27, %v3576_v50  ;;  %v7807_v49 = vadd.f32 %v3646_v53, %v3642_v38  ;;  %v7809_v63 = vadd.f32 %v3712_v13, %v3708_v8  ;;  %v7811_v29 = vadd.f32 %v3778_v60, %v3774_v62  ;;  %v8700_v52 = vld [vmem:[#allocation40_spill] sm:$0xff]  ;;  %v8702_v53 = vld [vmem:[#allocation39_spill] sm:$0xff]  ;;  %s8093_s22 = sld [smem:[#allocation8 + $0x89]] }
 0x42c   : > { %v3035_v14 = vpop.permute.xlu1 %3034  ;;  %v3047_v18 = vpop.permute.xlu0 %3046  ;;  %v7825_v54 = vadd.f32 %v2949_v1, %v2863_v26  ;;  %v7827_v4 = vadd.f32 %v2954_v40, %v2876_v32  ;;  %v2470_v50 = vadd.f32 %v8700_v52, %v8699_v23  ;;  %v2955_v62 = vmul.f32 %v2953_v58, %v7346_v11  ;;  %v8703_v40 = vld [vmem:[#allocation58_spill] sm:$0xff] }
 0x42d   : > { %v7816_v55 = vadd.f32 %v3035_v14, %v7590_v43  ;;  %v7819_v25 = vadd.f32 %v3047_v18, %v7606_v35  ;;  %v3519_v43 = vmul.f32 %v3517_v44, %v7346_v11  ;;  %v3533_v44 = vsel %vm3531_vm5, 1.0, %v4952_v42  ;;  %v8704_v18 = vld [vmem:[#allocation59_spill] sm:$0xff] }
 0x42e   : > { %3510 = vrot.lane.b32.xlu1 %v3505_v20, %s8534_s17  ;;  %3522 = vrot.lane.b32.xlu0 %v3518_v28, %s8534_s17  ;;  %v3575_v38 = vmul.f32 %v3573_v15, %v3533_v44  ;;  %v3641_v8 = vmul.f32 %v3639_v21, %v3533_v44  ;;  %v2610_v13 = vadd.f32 %v8702_v53, %v2470_v50 }
 0x42f   : > { %v3707_v60 = vmul.f32 %v3705_v34, %v3533_v44  ;;  %v3773_v15 = vmul.f32 %v3771_v10, %v3533_v44  ;;  %v3717_v34 = vstv %s7840_s9  ;;  %v3783_v10 = vstv %s7843_s14  ;;  %s8102_s9 = sld [smem:[#allocation8 + $0x109]] }
 0x430   : > { %v3161_v56 = vpop.permute.xlu1 %3160  ;;  %v3173_v48 = vpop.permute.xlu0 %3172  ;;  %v3585_v58 = vstv %s7823_s2  ;;  %v2750_v26 = vadd.f32 %v8704_v18, %v2610_v13  ;;  %v3577_v32 = vadd.f32 %v3575_v38, %v3571_v12  ;;  %s8091_s2 = sld [smem:[#allocation8 + $0x9]] }
 0x431   : > { %v7835_v35 = vadd.f32 %v3161_v56, %v7692_v16  ;;  %v7838_v20 = vadd.f32 %v3173_v48, %v7695_v36  ;;  %v3775_v56 = vadd.f32 %v3773_v15, %v3769_v30  ;;  %s8108_s14 = sld [smem:[#allocation8 + $0x189]] }
 0x432   : > { %3524 = vrot.lane.b32.xlu1 %v3519_v43, %s8534_s17 }
 0x434   : > { %v3287_v28 = vpop.permute.xlu1 %3286  ;;  %v3299_v61 = vpop.permute.xlu0 %3298 }
 0x435   : > { %v7848_v16 = vadd.f32 %v3287_v28, %v7709_v7  ;;  %v7851_v36 = vadd.f32 %v3299_v61, %v7712_v2  ;;  %v2960_v7 = vmul.f32 %v2959_v47, %v7288_v17  ;;  %v8701_v2 = vld [vmem:[#allocation57_spill] sm:$0xff] }
 0x436   : > { %v2597_v27 = vadd.f32 %v8701_v2, %v2457_v57 }
 0x438   : > { %v3413_v46 = vpop.permute.xlu1 %3412  ;;  %v3425_v21 = vpop.permute.xlu0 %3424  ;;  %v2737_v14 = vadd.f32 %v8703_v40, %v2597_v27  ;;  %v8708_v40 = vld [vmem:[#allocation41_spill] sm:$0xff] }
 0x439   : > { %v3417_v19 = vadd.f32 %v3413_v46, %v7737_v41  ;;  %v3430_v1 = vadd.f32 %v3425_v21, %v7740_v3  ;;  %v3643_v41 = vadd.f32 %v3641_v8, %v3637_v59  ;;  %v3709_v3 = vadd.f32 %v3707_v60, %v3703_v37  ;;  %v8706_v21 = vld [vmem:[#allocation49_spill] sm:$0xff] }
 0x43a   : > { %v2965_v46 = vstv %s7915_s18  ;;  %s4953_s18 = smov 120  }
 0x43b   : > { %vm3535_vm6 = vcmp.ge.f32.partialorder %v3417_v19, 0.0  ;;  %vm3538_vm7 = vcmp.ge.f32.partialorder %v3430_v1, 0.0  ;;  %v8707_v1 = vld [vmem:[#allocation53_spill] sm:$0xff] }
 0x43c   : > { %v3537_v48 = vsel %vm3535_vm6, 1.0, %v4952_v42  ;;  %v3540_v43 = vsel %vm3538_vm7, 1.0, %v4952_v42  ;;  %v2873_v44 = vpop.permute.xlu1 %2872  ;;  %v2885_v28 = vpop.permute.xlu0 %2884  ;;  %vm3844_vm7 = vcmask 1040384  }
 0x43d   : > { %v3581_v61 = vmul.f32 %v3579_v51, %v3537_v48  ;;  %v3647_v12 = vmul.f32 %v3645_v0, %v3537_v48  ;;  %v3713_v9 = vmul.f32 %v3711_v39, %v3537_v48  ;;  %v3779_v59 = vmul.f32 %v3777_v45, %v3537_v48  ;;  %v8710_v48 = vld [vmem:[#allocation34_spill] sm:$0xff] }
 0x43e   : > { %v3586_v33 = vmul.f32 %v3585_v58, %v3540_v43  ;;  %v3652_v37 = vmul.f32 %v3651_v31, %v3540_v43  ;;  %v3718_v30 = vmul.f32 %v3717_v34, %v3540_v43  ;;  %v3784_v57 = vmul.f32 %v3783_v10, %v3540_v43 }
 0x43f   : > { %v3583_v23 = vadd.f32 %v3581_v61, %v3577_v32  ;;  %v3649_v52 = vadd.f32 %v3647_v12, %v3643_v41  ;;  %v3715_v50 = vadd.f32 %v3713_v9, %v3709_v3  ;;  %v3781_v38 = vadd.f32 %v3779_v59, %v3775_v56  ;;  %v8709_v3 = vld [vmem:[#allocation42_spill] sm:$0xff] }
 0x440   : > { %v3588_v51 = vadd.f32 %v3586_v33, %v7805_v5  ;;  %v3654_v0 = vadd.f32 %v3652_v37, %v7807_v49  ;;  %v3720_v39 = vadd.f32 %v3718_v30, %v7809_v63  ;;  %v3786_v45 = vadd.f32 %v3784_v57, %v7811_v29  ;;  %v3049_v8 = vpop.permute.xlu1 %3048  ;;  %v3061_v2 = vpop.permute.xlu0 %3060 }
 0x441   : > { %v2877_v27 = vadd.f32 %v2873_v44, %v2737_v14  ;;  %v2890_v53 = vadd.f32 %v2885_v28, %v2750_v26  ;;  %v7910_v13 = vadd.f32 %v3049_v8, %v7685_v24  ;;  %v7913_v60 = vadd.f32 %v3061_v2, %v7687_v22 }
 0x442   : > { %v2484_v14 = vadd.f32 %v8708_v40, %v8707_v1  ;;  %v3591_v44 = vstv %s7921_s13  ;;  %v3657_v28 = vstv %s7929_s8  ;;  %v3789_v61 = vstv %s7933_s1  ;;  %s4954_s13 = smov 122   ;;  %s4955_s8 = smov 118  }
 0x443   : > { %v7917_v5 = vadd.f32 %v2955_v62, %v2877_v27  ;;  %v7919_v49 = vadd.f32 %v2960_v7, %v2890_v53  ;;  %s8166_s1 = sld [smem:[#allocation11]] }
 0x444   : > { %v3175_v63 = vpop.permute.xlu1 %3174  ;;  %v3187_v15 = vpop.permute.xlu0 %3186  ;;  %v2624_v43 = vadd.f32 %v8710_v48, %v2484_v14  ;;  %v3729_v48 = vstv %s7987_s3  ;;  %s8172_s3 = sld [smem:[#allocation11 + $0x3]] }
 0x445   : > { %v7924_v29 = vadd.f32 %v3175_v63, %v7816_v55  ;;  %v7927_v24 = vadd.f32 %v3187_v15, %v7819_v25  ;;  %v8705_v25 = vld [vmem:[#allocation44_spill] sm:$0xff] }
 0x446   : > { %v2471_v19 = vadd.f32 %v8706_v21, %v8705_v25 }
 0x448   : > { %v3301_v22 = vpop.permute.xlu1 %3300  ;;  %v3313_v62 = vpop.permute.xlu0 %3312  ;;  %v2611_v56 = vadd.f32 %v8709_v3, %v2471_v19  ;;  %v3597_v3 = vstv %s7980_s24  ;;  %s8168_s24 = sld [smem:[#allocation11 + $0x1]] }
 0x449   : > { %v3305_v7 = vadd.f32 %v3301_v22, %v7835_v35  ;;  %v3318_v55 = vadd.f32 %v3313_v62, %v7838_v20  ;;  %v2961_v35 = vmul.f32 %v2959_v47, %v7346_v11  ;;  %v2966_v20 = vmul.f32 %v2965_v46, %v7288_v17  ;;  %v8712_v11 = vld [vmem:[#allocation61_spill] sm:$0xff] }
 0x44a   : > { %v2764_v47 = vadd.f32 %v8712_v11, %v2624_v43  ;;  %v3795_v43 = vstv %s7989_s0  ;;  %s8176_s0 = sld [smem:[#allocation11 + $0x80]] }
 0x44c   : > { %v3427_v18 = vpop.permute.xlu1 %3426  ;;  %v3439_v26 = vpop.permute.xlu0 %3438 }
 0x44d   : > { %v3431_v32 = vadd.f32 %v3427_v18, %v7848_v16  ;;  %v3444_v41 = vadd.f32 %v3439_v26, %v7851_v36  ;;  %v3723_v16 = vstv %s7931_s19  ;;  %v8711_v36 = vld [vmem:[#allocation60_spill] sm:$0xff]  ;;  %s8164_s19 = sld [smem:[#allocation12]] }
 0x44e   : > { %v2751_v12 = vadd.f32 %v8711_v36, %v2611_v56  ;;  %v3663_v56 = vstv %s7985_s16  ;;  %s8170_s16 = sld [smem:[#allocation11 + $0x2]] }
 0x44f   : > { %vm3539_vm8 = vcmp.ge.f32.partialorder %v3431_v32, 0.0  ;;  %vm3542_vm9 = vcmp.ge.f32.partialorder %v3444_v41, 0.0 }
 0x450   : > { %v3541_v9 = vsel %vm3539_vm8, 1.0, %v4952_v42  ;;  %v3544_v17 = vsel %vm3542_vm9, 1.0, %v4952_v42  ;;  %v2887_v59 = vpop.permute.xlu1 %2886  ;;  %v2899_v33 = vpop.permute.xlu0 %2898  ;;  %vm3846_vm8 = vcmask 1041408   ;;  %vm3848_vm9 = vcmask 1042432  }
 0x451   : > { %v3587_v37 = vmul.f32 %v3585_v58, %v3541_v9  ;;  %v3653_v30 = vmul.f32 %v3651_v31, %v3541_v9  ;;  %v3719_v57 = vmul.f32 %v3717_v34, %v3541_v9  ;;  %v3785_v8 = vmul.f32 %v3783_v10, %v3541_v9 }
 0x452   : > { %v3592_v2 = vmul.f32 %v3591_v44, %v3544_v17  ;;  %v3658_v27 = vmul.f32 %v3657_v28, %v3544_v17  ;;  %v3724_v53 = vmul.f32 %v3723_v16, %v3544_v17  ;;  %v3790_v63 = vmul.f32 %v3789_v61, %v3544_v17 }
 0x453   : > { %v3589_v15 = vadd.f32 %v3587_v37, %v3583_v23  ;;  %v3655_v22 = vadd.f32 %v3653_v30, %v3649_v52  ;;  %v3721_v62 = vadd.f32 %v3719_v57, %v3715_v50  ;;  %v3787_v25 = vadd.f32 %v3785_v8, %v3781_v38  ;;  %p4006_p3 = scmp.ge.f32.partialorder %s8164_s19, 0.0 }
 0x454   : > { %v3594_v21 = vadd.f32 %v3592_v2, %v3588_v51  ;;  %v3660_v19 = vadd.f32 %v3658_v27, %v3654_v0  ;;  %v3726_v1 = vadd.f32 %v3724_v53, %v3720_v39  ;;  %v3792_v40 = vadd.f32 %v3790_v63, %v3786_v45  ;;  %v3063_v14 = vpop.permute.xlu1 %3062  ;;  %v3075_v58 = vpop.permute.xlu0 %3074  ;;  %v8713_v51 = vld [vmem:[#allocation43_spill] sm:$0xff]  ;;  %v8714_v0 = vld [vmem:[#allocation54_spill] sm:$0xff] }
 0x455   : > { %v2891_v18 = vadd.f32 %v2887_v59, %v2751_v12  ;;  %v2904_v31 = vadd.f32 %v2899_v33, %v2764_v47  ;;  %v7969_v34 = vadd.f32 %v3063_v14, %v7825_v54  ;;  %v7972_v10 = vadd.f32 %v3075_v58, %v7827_v4 }
 0x456   : > { %v2485_v39 = vadd.f32 %v8714_v0, %v8713_v51 }
 0x457   : > { %v7974_v26 = vadd.f32 %v2961_v35, %v2891_v18  ;;  %v7976_v23 = vadd.f32 %v2966_v20, %v2904_v31 }
 0x458   : > { %v3189_v52 = vpop.permute.xlu1 %3188  ;;  %v7978_v50 = vpop.permute.xlu0 %3200 }
 0x459   : > { %v7983_v38 = vadd.f32 %v3189_v52, %v7910_v13  ;;  %v8715_v13 = vld [vmem:[#allocation46_spill] sm:$0xff] }
 0x45a   : > { %v2625_v20 = vadd.f32 %v8715_v13, %v2485_v39 }
 0x45c   : > { %v3315_v54 = vpop.permute.xlu1 %3314  ;;  %v3327_v4 = vpop.permute.xlu0 %3326  ;;  %v2765_v36 = vadd.f32 %v7419_v6, %v2625_v20 }
 0x460   : > { %v3441_v45 = vpop.permute.xlu1 %3440  ;;  %v3453_v32 = vpop.permute.xlu0 %3452 }
 0x461   : > { %v3445_v41 = vadd.f32 %v3441_v45, %v3305_v7  ;;  %v3458_v35 = vadd.f32 %v3453_v32, %v3318_v55 }
 0x463   : > { %vm3543_vm10 = vcmp.ge.f32.partialorder %v3445_v41, 0.0  ;;  %vm3546_vm11 = vcmp.ge.f32.partialorder %v3458_v35, 0.0  ;;  %v3669_v41 = vstv %s8015_s5  ;;  %v3735_v35 = vstv %s8017_s7  ;;  %s8182_s5 = sld [smem:[#allocation11 + $0x83]] }
 0x464   : > { %v3545_v12 = vsel %vm3543_vm10, 1.0, %v4952_v42  ;;  %v3548_v11 = vsel %vm3546_vm11, 1.0, %v4952_v42  ;;  %v2901_v47 = vpop.permute.xlu1 %2900  ;;  %v8001_v9 = vpop.permute.xlu0 %3076  ;;  %s8184_s7 = sld [smem:[#allocation12 + $0x2]] }
 0x465   : > { %v3593_v17 = vmul.f32 %v3591_v44, %v3545_v12  ;;  %v3659_v7 = vmul.f32 %v3657_v28, %v3545_v12  ;;  %v3725_v55 = vmul.f32 %v3723_v16, %v3545_v12  ;;  %v3791_v59 = vmul.f32 %v3789_v61, %v3545_v12  ;;  %v4769_v28 = vld [vmem:[#allocation2 + $0x24] sm:$0xff] }
 0x466   : > { %v3598_v33 = vmul.f32 %v3597_v3, %v3548_v11  ;;  %v3664_v37 = vmul.f32 %v3663_v56, %v3548_v11  ;;  %v3730_v30 = vmul.f32 %v3729_v48, %v3548_v11  ;;  %v3796_v57 = vmul.f32 %v3795_v43, %v3548_v11 }
 0x467   : > { %v3595_v8 = vadd.f32 %v3593_v17, %v3589_v15  ;;  %v3661_v2 = vadd.f32 %v3659_v7, %v3655_v22  ;;  %v3727_v27 = vadd.f32 %v3725_v55, %v3721_v62  ;;  %v3793_v6 = vadd.f32 %v3791_v59, %v3787_v25 }
 0x468   : > { %v3600_v53 = vadd.f32 %v3598_v33, %v3594_v21  ;;  %v3666_v63 = vadd.f32 %v3664_v37, %v3660_v19  ;;  %v3732_v14 = vadd.f32 %v3730_v30, %v3726_v1  ;;  %v3798_v58 = vadd.f32 %v3796_v57, %v3792_v40  ;;  %v8003_v18 = vpop.permute.xlu1 %3088  ;;  %v8005_v31 = vpop.permute.xlu0 %3202 }
 0x469   : > { %v2905_v44 = vadd.f32 %v2901_v47, %v2765_v36  ;;  %v2967_v16 = vmul.f32 %v4769_v28, %v2965_v46  ;;  %v3319_v62 = vadd.f32 %v3315_v54, %v7924_v29  ;;  %v3332_v19 = vadd.f32 %v3327_v4, %v7927_v24 }
 0x46a   : > { %v3603_v40 = vstv %s8009_s4  ;;  %v3801_v29 = vstv %s8019_s26  ;;  %s8180_s4 = sld [smem:[#allocation11 + $0x82]]  ;;  %p4067_p2 = scmp.ge.f32.partialorder %s8184_s7, 0.0 }
 0x46b   : > { %v8011_v61 = vadd.f32 %v2967_v16, %v2905_v44  ;;  %v3675_v16 = vstv %s8039_s25  ;;  %s8186_s26 = sld [smem:[#allocation11 + $0x100]] }
 0x46c   : > { %v8013_v15 = vpop.permute.xlu1 %3214  ;;  %v3329_v22 = vpop.permute.xlu0 %3328  ;;  %s8190_s25 = sld [smem:[#allocation11 + $0x102]] }
 0x46d   : > { %v3333_v37 = vadd.f32 %v3329_v22, %v7983_v38  ;;  %v3741_v22 = vstv %s8041_s6  ;;  %s8192_s6 = sld [smem:[#allocation11 + $0x103]] }
 0x470   : > { %v3341_v46 = vpop.permute.xlu1 %3340  ;;  %v3455_v25 = vpop.permute.xlu0 %3454 }
 0x471   : > { %v3459_v21 = vadd.f32 %v3455_v25, %v3319_v62  ;;  %v3807_v62 = vstv %s8043_s27  ;;  %s8194_s27 = sld [smem:[#allocation12 + $0x3]] }
 0x473   : > { %vm3547_vm12 = vcmp.ge.f32.partialorder %v3459_v21, 0.0 }
 0x474   : > { %v3549_v1 = vsel %vm3547_vm12, 1.0, %v4952_v42  ;;  %v3467_v52 = vpop.permute.xlu1 %3466  ;;  %v8025_v51 = vpop.permute.xlu0 %3090 }
 0x475   : > { %v3599_v0 = vmul.f32 %v3597_v3, %v3549_v1  ;;  %v3665_v39 = vmul.f32 %v3663_v56, %v3549_v1  ;;  %v3731_v45 = vmul.f32 %v3729_v48, %v3549_v1  ;;  %v3797_v32 = vmul.f32 %v3795_v43, %v3549_v1 }
 0x476   : > { %v3472_v54 = vadd.f32 %v3467_v52, %v3332_v19 }
 0x477   : > { %v3601_v13 = vadd.f32 %v3599_v0, %v3595_v8  ;;  %v3667_v20 = vadd.f32 %v3665_v39, %v3661_v2  ;;  %v3733_v36 = vadd.f32 %v3731_v45, %v3727_v27  ;;  %v3799_v12 = vadd.f32 %v3797_v32, %v3793_v6  ;;  %p4097_p9 = scmp.ge.f32.partialorder %s8194_s27, 0.0 }
 0x478   : > { %vm3550_vm13 = vcmp.ge.f32.partialorder %v3472_v54, 0.0  ;;  %v8030_v24 = vpop.permute.xlu1 %3102  ;;  %v8032_v4 = vpop.permute.xlu0 %3216  ;;  %v3206_v2 = vadd.f32 %v7978_v50, %v7913_v60 }
 0x479   : > { %v3552_v11 = vsel %vm3550_vm13, 1.0, %v4952_v42 }
 0x47a   : > { %v3604_v47 = vmul.f32 %v3603_v40, %v3552_v11  ;;  %v3670_v3 = vmul.f32 %v3669_v41, %v3552_v11  ;;  %v3736_v56 = vmul.f32 %v3735_v35, %v3552_v11  ;;  %v3802_v48 = vmul.f32 %v3801_v29, %v3552_v11 }
 0x47b   : > { %v3346_v27 = vadd.f32 %v3341_v46, %v3206_v2 }
 0x47c   : > { %v3606_v43 = vadd.f32 %v3604_v47, %v3600_v53  ;;  %v3672_v17 = vadd.f32 %v3670_v3, %v3666_v63  ;;  %v3738_v7 = vadd.f32 %v3736_v56, %v3732_v14  ;;  %v3804_v55 = vadd.f32 %v3802_v48, %v3798_v58  ;;  %v8037_v59 = vpop.permute.xlu1 %3228  ;;  %v3343_v33 = vpop.permute.xlu0 %3342 }
 0x47d   : > { %v3609_v53 = vstv %s8035_s21  ;;  %v3081_v47 = vadd.f32 %v8001_v9, %v7917_v5  ;;  %v3094_v5 = vadd.f32 %v8003_v18, %v7919_v49  ;;  %s8188_s21 = sld [smem:[#allocation11 + $0x101]] }
 0x480   : > { %v3355_v30 = vpop.permute.xlu1 %3354  ;;  %v3469_v57 = vpop.permute.xlu0 %3468 }
 0x481   : > { %v3473_v8 = vadd.f32 %v3469_v57, %v3333_v37 }
 0x483   : > { %vm3551_vm14 = vcmp.ge.f32.partialorder %v3473_v8, 0.0 }
 0x484   : > { %v3553_v6 = vsel %vm3551_vm14, 1.0, %v4952_v42  ;;  %v3481_v63 = vpop.permute.xlu1 %3480  ;;  %v8050_v14 = vpop.permute.xlu0 %3104  ;;  %vm3850_vm14 = vcmask 1043456  }
 0x485   : > { %v3605_v58 = vmul.f32 %v3603_v40, %v3553_v6  ;;  %v3671_v44 = vmul.f32 %v3669_v41, %v3553_v6  ;;  %v3737_v28 = vmul.f32 %v3735_v35, %v3553_v6  ;;  %v3803_v38 = vmul.f32 %v3801_v29, %v3553_v6 }
 0x486   : > { %v3486_v25 = vadd.f32 %v3481_v63, %v3346_v27 }
 0x487   : > { %v3607_v21 = vadd.f32 %v3605_v58, %v3601_v13  ;;  %v3673_v19 = vadd.f32 %v3671_v44, %v3667_v20  ;;  %v3739_v1 = vadd.f32 %v3737_v28, %v3733_v36  ;;  %v3805_v60 = vadd.f32 %v3803_v38, %v3799_v12 }
 0x488   : > { %vm3554_vm15 = vcmp.ge.f32.partialorder %v3486_v25, 0.0  ;;  %v8055_v50 = vpop.permute.xlu1 %3230  ;;  %v8057_v46 = vpop.permute.xlu0 %3242  ;;  %v3207_v20 = vadd.f32 %v8005_v31, %v7969_v34  ;;  %v3220_v36 = vadd.f32 %v8013_v15, %v7972_v10  ;;  %v3221_v34 = vadd.f32 %v8032_v4, %v3081_v47 }
 0x489   : > { %v3556_v40 = vsel %vm3554_vm15, 1.0, %v4952_v42  ;;  %v3615_v31 = vstv %s8059_s28  ;;  %v3747_v10 = vstv %s8064_s11  ;;  %v3813_v15 = vstv %s8066_s12  ;;  %s8196_s28 = sld [smem:[#allocation11 + $0x180]] }
 0x48a   : > { %v3610_v52 = vmul.f32 %v3609_v53, %v3556_v40  ;;  %v3676_v0 = vmul.f32 %v3675_v16, %v3556_v40  ;;  %v3742_v39 = vmul.f32 %v3741_v22, %v3556_v40  ;;  %v3808_v45 = vmul.f32 %v3807_v62, %v3556_v40  ;;  %s8208_s11 = sld [smem:[#allocation11 + $0x182]] }
 0x48b   : > { %v3347_v12 = vadd.f32 %v3343_v33, %v3207_v20  ;;  %v3360_v11 = vadd.f32 %v3355_v30, %v3220_v36  ;;  %v3753_v40 = vstv %s8081_s20  ;;  %v3627_v47 = vstv %s8091_s2  ;;  %s8222_s12 = scalar_select %p4067_p2, 1.0, -1.0 }
 0x48c   : > { %v3612_v32 = vadd.f32 %v3610_v52, %v3606_v43  ;;  %v3678_v41 = vadd.f32 %v3676_v0, %v3672_v17  ;;  %v3744_v35 = vadd.f32 %v3742_v39, %v3738_v7  ;;  %v3810_v29 = vadd.f32 %v3808_v45, %v3804_v55  ;;  %v3357_v54 = vpop.permute.xlu1 %3356  ;;  %v3369_v13 = vpop.permute.xlu0 %3368  ;;  %s8716_s20 = sld [smem:[#allocation21_spill]] }
 0x48d   : > { %v3681_v17 = vstv %s8062_s30  ;;  %v3361_v9 = vadd.f32 %v3357_v54, %v3221_v34  ;;  %v3819_v52 = vstv %s8085_s23  ;;  %v3108_v0 = vadd.f32 %v8030_v24, %v7976_v23  ;;  %s8202_s30 = sld [smem:[#allocation11 + $0x181]] }
 0x48e   : > { %v3109_v54 = vadd.f32 %v8050_v14, %v8011_v61  ;;  %vm3852_vm15 = vcmask 1044480  }
 0x48f   : > { %v3248_v23 = vadd.f32 %v8057_v46, %v3108_v0 }
 0x490   : > { %v3483_v3 = vpop.permute.xlu1 %3482  ;;  %v3495_v56 = vpop.permute.xlu0 %3494 }
 0x491   : > { %v3487_v48 = vadd.f32 %v3483_v3, %v3347_v12  ;;  %v3500_v43 = vadd.f32 %v3495_v56, %v3360_v11  ;;  %v3693_v3 = vstv %s8093_s22 }
 0x492   : > { %s348_s23 = sand.u32 1, %s8716_s20  }
 0x493   : > { %vm3555_vm0 = vcmp.ge.f32.partialorder %v3487_v48, 0.0  ;;  %vm3558_vm1 = vcmp.ge.f32.partialorder %v3500_v43, 0.0  ;;  %s4261_s2 = sshll.u32 %s348_s23, 5 }
 0x494   : > { %v3557_v7 = vsel %vm3555_vm0, 1.0, %v4952_v42  ;;  %v3560_v55 = vsel %vm3558_vm1, 1.0, %v4952_v42  ;;  %v3245_v33 = vpop.permute.xlu1 %3244  ;;  %v3371_v4 = vpop.permute.xlu0 %3370  ;;  %s8276_s22 = scalar_lea.vmem [#allocation14], %s4261_s2 }
 0x495   : > { %v3611_v37 = vmul.f32 %v3609_v53, %v3557_v7  ;;  %v3677_v30 = vmul.f32 %v3675_v16, %v3557_v7  ;;  %v3743_v57 = vmul.f32 %v3741_v22, %v3557_v7  ;;  %v3809_v8 = vmul.f32 %v3807_v62, %v3557_v7 }
 0x496   : > { %v3616_v2 = vmul.f32 %v3615_v31, %v3560_v55  ;;  %v3682_v27 = vmul.f32 %v3681_v17, %v3560_v55  ;;  %v3748_v6 = vmul.f32 %v3747_v10, %v3560_v55  ;;  %v3814_v63 = vmul.f32 %v3813_v15, %v3560_v55 }
 0x497   : > { %v3613_v58 = vadd.f32 %v3611_v37, %v3607_v21  ;;  %v3679_v44 = vadd.f32 %v3677_v30, %v3673_v19  ;;  %v3745_v49 = vadd.f32 %v3743_v57, %v3739_v1  ;;  %v3811_v18 = vadd.f32 %v3809_v8, %v3805_v60 }
 0x498   : > { %v3618_v28 = vadd.f32 %v3616_v2, %v3612_v32  ;;  %v3684_v38 = vadd.f32 %v3682_v27, %v3678_v41  ;;  %v3750_v53 = vadd.f32 %v3748_v6, %v3744_v35  ;;  %v3816_v16 = vadd.f32 %v3814_v63, %v3810_v29  ;;  %v3383_v22 = vpop.permute.xlu1 %3382  ;;  %v3497_v62 = vpop.permute.xlu0 %3496 }
 0x499   : > { %v3501_v25 = vadd.f32 %v3497_v62, %v3361_v9  ;;  %v3095_v21 = vadd.f32 %v8025_v51, %v7974_v26  ;;  %v3234_v19 = vadd.f32 %v8037_v59, %v3094_v5  ;;  %v3621_v1 = vstv %s8074_s15  ;;  %s8227_s15 = sld [smem:[#allocation11 + $0x183]] }
 0x49a   : > { %v3687_v60 = vstv %s8076_s29  ;;  %v3249_v56 = vadd.f32 %v3245_v33, %v3109_v54  ;;  %v3388_v48 = vadd.f32 %v3383_v22, %v3248_v23  ;;  %v3825_v30 = vstv %s8108_s14  ;;  %s8251_s29 = scalar_select %p4097_p9, 1.0, -1.0 }
 0x49b   : > { %vm3559_vm2 = vcmp.ge.f32.partialorder %v3501_v25, 0.0  ;;  %v3235_v39 = vadd.f32 %v8055_v50, %v3095_v21  ;;  %v3374_v45 = vadd.f32 %v3369_v13, %v3234_v19 }
 0x49c   : > { %v3561_v32 = vsel %vm3559_vm2, 1.0, %v4952_v42  ;;  %v3509_v41 = vpop.permute.xlu1 %3508  ;;  %v3385_v29 = vpop.permute.xlu0 %3384 }
 0x49d   : > { %v3617_v35 = vmul.f32 %v3615_v31, %v3561_v32  ;;  %v3683_v26 = vmul.f32 %v3681_v17, %v3561_v32  ;;  %v3749_v51 = vmul.f32 %v3747_v10, %v3561_v32  ;;  %v3815_v59 = vmul.f32 %v3813_v15, %v3561_v32 }
 0x49e   : > { %v3375_v24 = vadd.f32 %v3371_v4, %v3235_v39  ;;  %v3514_v50 = vadd.f32 %v3509_v41, %v3374_v45  ;;  %v3389_v10 = vadd.f32 %v3385_v29, %v3249_v56  ;;  %v3759_v15 = vstv %s8102_s9  ;;  %s4007_s9 = scalar_select %p4006_p3, 1.0, -1.0 }
 0x49f   : > { %v3619_v13 = vadd.f32 %v3617_v35, %v3613_v58  ;;  %v3685_v20 = vadd.f32 %v3683_v26, %v3679_v44  ;;  %v3751_v36 = vadd.f32 %v3749_v51, %v3745_v49  ;;  %v3817_v12 = vadd.f32 %v3815_v59, %v3811_v18 }
 0x4a0   : > { %vm3562_vm3 = vcmp.ge.f32.partialorder %v3514_v50, 0.0  ;;  %v3511_v11 = vpop.permute.xlu1 %3510  ;;  %v3523_v61 = vpop.permute.xlu0 %3522 }
 0x4a1   : > { %v3564_v43 = vsel %vm3562_vm3, 1.0, %v4952_v42  ;;  %v3515_v34 = vadd.f32 %v3511_v11, %v3375_v24  ;;  %v3528_v5 = vadd.f32 %v3523_v61, %v3388_v48 }
 0x4a2   : > { %v3622_v14 = vmul.f32 %v3621_v1, %v3564_v43  ;;  %v3688_v46 = vmul.f32 %v3687_v60, %v3564_v43  ;;  %v3754_v31 = vmul.f32 %v3753_v40, %v3564_v43  ;;  %v3820_v17 = vmul.f32 %v3819_v52, %v3564_v43 }
 0x4a3   : > { %vm3563_vm4 = vcmp.ge.f32.partialorder %v3515_v34, 0.0  ;;  %vm3566_vm5 = vcmp.ge.f32.partialorder %v3528_v5, 0.0 }
 0x4a4   : > { %v3624_v9 = vadd.f32 %v3622_v14, %v3618_v28  ;;  %v3690_v7 = vadd.f32 %v3688_v46, %v3684_v38  ;;  %v3756_v55 = vadd.f32 %v3754_v31, %v3750_v53  ;;  %v3822_v4 = vadd.f32 %v3820_v17, %v3816_v16  ;;  %v3525_v37 = vpop.permute.xlu1 %3524 }
 0x4a5   : > { %v3565_v33 = vsel %vm3563_vm4, 1.0, %v4952_v42  ;;  %v3529_v57 = vadd.f32 %v3525_v37, %v3389_v10  ;;  %v3568_v63 = vsel %vm3566_vm5, 1.0, %v4952_v42  ;;  %vm3870_vm4 = vcmask 7168  }
 0x4a6   : > { %v3623_v8 = vmul.f32 %v3621_v1, %v3565_v33  ;;  %v3689_v2 = vmul.f32 %v3687_v60, %v3565_v33  ;;  %v3755_v27 = vmul.f32 %v3753_v40, %v3565_v33  ;;  %v3821_v6 = vmul.f32 %v3819_v52, %v3565_v33 }
 0x4a7   : > { %vm3567_vm6 = vcmp.ge.f32.partialorder %v3529_v57, 0.0  ;;  %v3628_v28 = vmul.f32 %v3627_v47, %v3568_v63  ;;  %v3694_v38 = vmul.f32 %v3693_v3, %v3568_v63  ;;  %v3760_v53 = vmul.f32 %v3759_v15, %v3568_v63 }
 0x4a8   : > { %v3625_v58 = vadd.f32 %v3623_v8, %v3619_v13  ;;  %v3691_v44 = vadd.f32 %v3689_v2, %v3685_v20  ;;  %v3757_v49 = vadd.f32 %v3755_v27, %v3751_v36  ;;  %v3823_v18 = vadd.f32 %v3821_v6, %v3817_v12 }
 0x4a9   : > { %v3826_v16 = vmul.f32 %v3825_v30, %v3568_v63  ;;  %v3569_v22 = vsel %vm3567_vm6, 1.0, %v4952_v42  ;;  %v3630_v62 = vadd.f32 %v3628_v28, %v3624_v9  ;;  %v3696_v25 = vadd.f32 %v3694_v38, %v3690_v7 }
 0x4aa   : > { %v3762_v21 = vadd.f32 %v3760_v53, %v3756_v55  ;;  %v3629_v1 = vmul.f32 %v3627_v47, %v3569_v22  ;;  %v3695_v60 = vmul.f32 %v3693_v3, %v3569_v22  ;;  %v3761_v59 = vmul.f32 %v3759_v15, %v3569_v22 }
 0x4ab   : > { %v3828_v19 = vadd.f32 %v3826_v16, %v3822_v4  ;;  %vm3632_vm10 = vcmp.ge.f32.partialorder %v3630_v62, 0.0  ;;  %vm3698_vm11 = vcmp.ge.f32.partialorder %v3696_v25, 0.0  ;;  %v3827_v29 = vmul.f32 %v3825_v30, %v3569_v22 }
 0x4ac   : > { %vm3764_vm12 = vcmp.ge.f32.partialorder %v3762_v21, 0.0  ;;  %v3634_v40 = vsel %vm3632_vm10, 1.0, %v4952_v42  ;;  %v3700_v52 = vsel %vm3698_vm11, 1.0, %v4952_v42  ;;  %v3631_v24 = vadd.f32 %v3629_v1, %v3625_v58 }
 0x4ad   : > { %vm3830_vm13 = vcmp.ge.f32.partialorder %v3828_v19, 0.0  ;;  %v3766_v0 = vsel %vm3764_vm12, 1.0, %v4952_v42  ;;  %v3835_v45 = vrot.slane %v3634_v40, 2  ;;  %v3837_v32 = vrot.slane %v3634_v40, 4 }
 0x4ae   : > { %v3832_v39 = vsel %vm3830_vm13, 1.0, %v4952_v42  ;;  %v3881_v41 = vrot.slane %v3700_v52, 2  ;;  %v3883_v35 = vrot.slane %v3700_v52, 4  ;;  %v3917_v26 = vrot.slane %v3766_v0, 2 }
 0x4af   : > { %v3953_v51 = vrot.slane %v3832_v39, 2  ;;  %v3845_v54 = vsel %vm3844_vm7, %v3634_v40, %v3835_v45  ;;  %v3697_v50 = vadd.f32 %v3695_v60, %v3691_v44  ;;  %v3919_v13 = vrot.slane %v3766_v0, 4 }
 0x4b0   : > { %v3890_v23 = vsel %vm3844_vm7, %v3700_v52, %v3881_v41  ;;  %v3955_v20 = vrot.slane %v3832_v39, 4  ;;  %v3847_v36 = vsel %vm3846_vm8, %v3845_v54, %v3837_v32  ;;  %vm3633_vm0 = vcmp.ge.f32.partialorder %v3631_v24, 0.0 }
 0x4b1   : > { %v3891_v12 = vsel %vm3846_vm8, %v3890_v23, %v3883_v35  ;;  %vm3699_vm1 = vcmp.ge.f32.partialorder %v3697_v50, 0.0  ;;  %v3635_v11 = vsel %vm3633_vm0, 1.0, %v4952_v42  ;;  %v3763_v3 = vadd.f32 %v3761_v59, %v3757_v49 }
 0x4b2   : > { %v3701_v47 = vsel %vm3699_vm1, 1.0, %v4952_v42  ;;  %v3829_v56 = vadd.f32 %v3827_v29, %v3823_v18  ;;  %v3926_v48 = vsel %vm3844_vm7, %v3766_v0, %v3917_v26  ;;  %v3962_v43 = vsel %vm3844_vm7, %v3832_v39, %v3953_v51 }
 0x4b3   : > { %v3840_v34 = vrot.slane %v3635_v11, 6  ;;  %v3886_v61 = vrot.slane %v3701_v47, 6  ;;  %vm3765_vm2 = vcmp.ge.f32.partialorder %v3763_v3, 0.0  ;;  %v3842_v14 = vrot.slane %v3635_v11, 2 }
 0x4b4   : > { %vm3831_vm3 = vcmp.ge.f32.partialorder %v3829_v56, 0.0  ;;  %v3888_v46 = vrot.slane %v3701_v47, 2  ;;  %v3767_v31 = vsel %vm3765_vm2, 1.0, %v4952_v42  ;;  %v3927_v5 = vsel %vm3846_vm8, %v3926_v48, %v3919_v13 }
 0x4b5   : > { %v3833_v17 = vsel %vm3831_vm3, 1.0, %v4952_v42  ;;  %v3849_v10 = vsel %vm3848_vm9, %v3847_v36, %v3840_v34  ;;  %v3892_v15 = vsel %vm3848_vm9, %v3891_v12, %v3886_v61  ;;  %v3922_v55 = vrot.slane %v3767_v31, 6 }
 0x4b6   : > { %v3851_v9 = vsel %vm3850_vm14, %v3849_v10, %v3635_v11  ;;  %v3893_v7 = vsel %vm3850_vm14, %v3892_v15, %v3701_v47  ;;  %v3963_v4 = vsel %vm3846_vm8, %v3962_v43, %v3955_v20  ;;  %v3958_v30 = vrot.slane %v3833_v17, 6 }
 0x4b7   : > { %v3853_v37 = vsel %vm3852_vm15, %v3851_v9, %v3842_v14  ;;  %v8143_v33 = vsel %vm3852_vm15, %v3893_v7, %v3888_v46  ;;  %v3924_v57 = vrot.slane %v3767_v31, 2  ;;  %v3928_v8 = vsel %vm3848_vm9, %v3927_v5, %v3922_v55 }
 0x4b8   : > { %v4715_v2 = vpack.i.bf16 %v8143_v33, %v3853_v37  ;;  %v3929_v27 = vsel %vm3850_vm14, %v3928_v8, %v3767_v31  ;;  %v3960_v6 = vrot.slane %v3833_v17, 2  ;;  %v3964_v63 = vsel %vm3848_vm9, %v3963_v4, %v3958_v30 }
 0x4b9   : > { %v8150_v58 = vsel %vm3852_vm15, %v3929_v27, %v3924_v57  ;;  %v3965_v44 = vsel %vm3850_vm14, %v3964_v63, %v3833_v17  ;;  %vm3872_vm5 = vcmask 15360   ;;  %vm3874_vm6 = vcmask 23552  }
 0x4ba   : > { %4716 = vrot.lane.b32.xlu1 %v4715_v2, %s8534_s17  ;;  %4711 = vrot.lane.b32.xlu0 %v4715_v2, %s8438_s10  ;;  %v8156_v49 = vsel %vm3852_vm15, %v3965_v44, %v3960_v6  ;;  %vm3876_vm7 = vcmask 31744   ;;  %vm3878_vm8 = vcmask 39936   ;;  %v3989_v25 = vstv %s8164_s19  ;;  %s4123_s19 = sshll.u32 %s8276_s22, 4  ;;  %s8299_s19 = int_to_ptr.vmem [resolvable:$true] %s4123_s19 }
 0x4bb   : > { %v4735_v18 = vpack.i.bf16 %v8156_v49, %v8150_v58  ;;  %v3991_v21 = vstv %s8166_s1  ;;  %v3995_v19 = vstv %s8168_s24  ;;  %v3999_v52 = vstv %s8170_s16  ;;  %s8718_s1 = sld [smem:[#allocation27_spill]] }
 0x4bc   : > { %v4003_v0 = vstv %s8172_s3  ;;  %v4022_v35 = vstv %s8176_s0  ;;  %v4030_v29 = vstv %s8180_s4  ;;  %v4034_v23 = vstv %s8182_s5  ;;  %s8719_s3 = sld [smem:[#allocation69_spill]]  ;;  %s8307_s0 = scalar_lea.sflag [#allocation4], %s348_s23 }
 0x4bd   : > { %v4050_v24 = vstv %s8184_s7  ;;  %v4052_v50 = vstv %s8186_s26  ;;  %v4056_v11 = vstv %s8188_s21  ;;  %v4060_v47 = vstv %s8190_s25  ;;  %s4957_s4 = smov [#allocation14]  }
 0x4be   : > { %4726 = vrot.lane.b32.xlu1 %v4715_v2, %s4953_s18  ;;  %4721 = vrot.lane.b32.xlu0 %v4715_v2, %s4954_s13  ;;  %v4064_v61 = vstv %s8192_s6  ;;  %v4080_v14 = vstv %s8194_s27  ;;  %vm4009_vm9 = vcmask 64512   ;;  %vm4017_vm14 = vcmask 54280   ;;  %s4864_s5 = sshll.u32 %s4957_s4, 4  ;;  %s4865_s5 = int_to_ptr.vmem [resolvable:$false] %s4864_s5 }
 0x4bf   : > { %v4082_v31 = vstv %s8196_s28  ;;  %v4086_v17 = vstv %s8202_s30  ;;  %v4069_v15 = vstv %s8222_s12  ;;  %v4090_v7 = vstv %s8208_s11  ;;  %s4866_s7 = scalar_lea.vmem %s4865_s5, 1024  ;;  %p4867_p7 = scmp.lt.s32.totalorder %s8299_s19, %s4865_s5 }
 0x4c0   : > { %4579 = vst.msk [vmem:[%s8276_s22 + $0x10] sm:$0xff] %vm4009_vm9, %v4069_v15 }
 0x4c1   : > { %p8720_p10 = scmp.ne.s32.totalorder %s8718_s1, 0 }
 0x4c2   : > { %4736 = vrot.lane.b32.xlu1 %v4735_v18, %s8438_s10  ;;  %4731 = vrot.lane.b32.xlu0 %v4715_v2, %s4955_s8  ;;  %s8174_s10 = sld [smem:[#allocation12 + $0x1]] }
 0x4c6   : > { %4746 = vrot.lane.b32.xlu1 %v4735_v18, %s4954_s13  ;;  %4741 = vrot.lane.b32.xlu0 %v4735_v18, %s8534_s17  ;;  %s8178_s17 = sld [smem:[#allocation11 + $0x81]]  ;;  %s4956_s13 = smov 1  }
 0x4c8   : > { %v4020_v39 = vstv %s8174_s10  ;;  %p4037_p5 = scmp.ge.f32.partialorder %s8174_s10, 0.0 }
 0x4ca   : > { %3944 = vrot.lane.b32.xlu1 %v8150_v58, %s4955_s8  ;;  %4751 = vrot.lane.b32.xlu0 %v4735_v18, %s4953_s18  ;;  %s4038_s14 = scalar_select %p4037_p5, 1.0, -1.0 }
 0x4cb   : > { %s8717_s18 = sld [smem:[#allocation24_spill]] }
 0x4cc   : > { %v4026_v59 = vstv %s8178_s17  ;;  %s4860_s17 = scalar_lea.vmem %s8299_s19, 512 }
 0x4cd   : > { %p4861_p6 = scmp.ne.s32.totalorder %s8299_s19, %s4860_s17  ;;  %p4868_p8 = scmp.lt.s32.totalorder %s4866_s7, %s4860_s17 }
 0x4ce   : > { %3980 = vrot.lane.b32.xlu0 %v8156_v49, %s4955_s8 }
 0x4cf   : > { %p4862_p4 = pnand %p4861_p6, %p8720_p10  ;;  %p4869_p12 = por %p4868_p8, %p4867_p7 }
 0x4d1   : > { %s4594_s8 = sshll.u32 %s8717_s18, 9  ;;  %p4863_p0 = pneg %p4862_p4 }
 0x4d2   : > { %s8297_s10 = scalar_lea.hbm %s8719_s3, %s4594_s8 }
 0x4d3   : > { %p4870_p11 = pnand %p4869_p12, %p4863_p0 }
 0x52c   : > { %v4717_v28 = vpop.permute.xlu1 %4716  ;;  %v4712_v38 = vpop.permute.xlu0 %4711 }
 0x52d   : > { %v4714_v53 = vunpack.i.h.bf16 %v4712_v38  ;;  %v4713_v16 = vunpack.i.l.bf16 %v4712_v38  ;;  %v4718_v22 = vunpack.i.l.bf16 %v4717_v28  ;;  %v4719_v1 = vunpack.i.h.bf16 %v4717_v28 }
 0x52f   : > { %v3871_v62 = vsel %vm3870_vm4, %v3853_v37, %v4713_v16  ;;  %v3911_v45 = vsel %vm3870_vm4, %v8143_v33, %v4714_v53  ;;  %v4094_v53 = vstv %s8227_s15 }
 0x530   : > { %v4727_v60 = vpop.permute.xlu1 %4726  ;;  %v4722_v40 = vpop.permute.xlu0 %4721  ;;  %v3873_v51 = vsel %vm3872_vm5, %v3871_v62, %v4718_v22  ;;  %v3912_v20 = vsel %vm3872_vm5, %v3911_v45, %v4719_v1 }
 0x531   : > { %v4724_v32 = vunpack.i.h.bf16 %v4722_v40  ;;  %v4723_v41 = vunpack.i.l.bf16 %v4722_v40  ;;  %v4728_v26 = vunpack.i.l.bf16 %v4727_v60  ;;  %v4729_v13 = vunpack.i.h.bf16 %v4727_v60 }
 0x533   : > { %v3875_v54 = vsel %vm3874_vm6, %v3873_v51, %v4723_v41  ;;  %v3913_v3 = vsel %vm3874_vm6, %v3912_v20, %v4724_v32 }
 0x534   : > { %v4737_v36 = vpop.permute.xlu1 %4736  ;;  %v4732_v12 = vpop.permute.xlu0 %4731  ;;  %v3877_v46 = vsel %vm3876_vm7, %v3875_v54, %v4728_v26  ;;  %v3914_v55 = vsel %vm3876_vm7, %v3913_v3, %v4729_v13  ;;  %v4099_v26 = vstv %s8251_s29 }
 0x535   : > { %v4739_v56 = vunpack.i.h.bf16 %v4737_v36  ;;  %v4734_v48 = vunpack.i.h.bf16 %v4732_v12  ;;  %v4733_v43 = vunpack.i.l.bf16 %v4732_v12  ;;  %v4738_v34 = vunpack.i.l.bf16 %v4737_v36  ;;  %4586 = vst.msk [vmem:[%s8276_s22 + $0x18] sm:$0xff] %vm4009_vm9, %v4099_v26 }
 0x537   : > { %v3879_v10 = vsel %vm3878_vm8, %v3877_v46, %v4733_v43  ;;  %v3983_v33 = vsel %vm3870_vm4, %v8156_v49, %v4739_v56  ;;  %v3915_v8 = vsel %vm3878_vm8, %v3914_v55, %v4734_v48  ;;  %v3947_v2 = vsel %vm3870_vm4, %v8150_v58, %v4738_v34 }
 0x538   : > { %v4747_v5 = vpop.permute.xlu1 %4746  ;;  %v4742_v9 = vpop.permute.xlu0 %4741  ;;  %v3992_v4 = vmul.f32 %v3991_v21, %v3879_v10  ;;  %v4023_v37 = vmul.f32 %v4022_v35, %v3879_v10  ;;  %v4053_v63 = vmul.f32 %v4052_v50, %v3879_v10  ;;  %v4083_v38 = vmul.f32 %v4082_v31, %v3879_v10 }
 0x539   : > { %v4744_v30 = vunpack.i.h.bf16 %v4742_v9  ;;  %v4743_v57 = vunpack.i.l.bf16 %v4742_v9  ;;  %v4749_v27 = vunpack.i.h.bf16 %v4747_v5  ;;  %v4748_v6 = vunpack.i.l.bf16 %v4747_v5 }
 0x53a   : > { %v3993_v28 = vadd.f32 %v3992_v4, %v3989_v25  ;;  %v3996_v16 = vmul.f32 %v3995_v19, %v3915_v8  ;;  %v4024_v58 = vadd.f32 %v4023_v37, %v4020_v39  ;;  %v4027_v22 = vmul.f32 %v4026_v59, %v3915_v8 }
 0x53b   : > { %v3984_v44 = vsel %vm3872_vm5, %v3983_v33, %v4744_v30  ;;  %v3948_v18 = vsel %vm3872_vm5, %v3947_v2, %v4743_v57  ;;  %v4054_v1 = vadd.f32 %v4053_v63, %v4050_v24  ;;  %v4084_v60 = vadd.f32 %v4083_v38, %v4080_v14 }
 0x53c   : > { %v4752_v49 = vpop.permute.xlu0 %4751  ;;  %v3949_v40 = vsel %vm3874_vm6, %v3948_v18, %v4748_v6  ;;  %v3985_v25 = vsel %vm3874_vm6, %v3984_v44, %v4749_v27  ;;  %v4057_v45 = vmul.f32 %v4056_v11, %v3915_v8  ;;  %v4087_v32 = vmul.f32 %v4086_v17, %v3915_v8  ;;  %v3945_v41 = vpop.permute.xlu1 %3944 }
 0x53d   : > { %v4754_v62 = vunpack.i.h.bf16 %v4752_v49  ;;  %v4753_v21 = vunpack.i.l.bf16 %v4752_v49  ;;  %v3997_v35 = vadd.f32 %v3996_v16, %v3993_v28  ;;  %v4028_v54 = vadd.f32 %v4027_v22, %v4024_v58 }
 0x53e   : > { %v4058_v24 = vadd.f32 %v4057_v45, %v4054_v1  ;;  %v4088_v50 = vadd.f32 %v4087_v32, %v4084_v60  ;;  %v4008_v46 = vstv %s4007_s9  ;;  %v4039_v31 = vstv %s4038_s14 }
 0x53f   : > { %v3950_v19 = vsel %vm3876_vm7, %v3949_v40, %v4753_v21  ;;  %v3986_v39 = vsel %vm3876_vm7, %v3985_v25, %v4754_v62  ;;  %4010 = vst.msk [vmem:[%s8276_s22] sm:$0xff] %vm4009_vm9, %v4008_v46  ;;  %4572 = vst.msk [vmem:[%s8276_s22 + $0x8] sm:$0xff] %vm4009_vm9, %v4039_v31 }
 0x540   : > { %v3981_v51 = vpop.permute.xlu0 %3980  ;;  %v3951_v59 = vsel %vm3878_vm8, %v3950_v19, %v3945_v41 }
 0x541   : > { %v3987_v13 = vsel %vm3878_vm8, %v3986_v39, %v3981_v51  ;;  %v4000_v20 = vmul.f32 %v3999_v52, %v3951_v59  ;;  %v4031_v36 = vmul.f32 %v4030_v29, %v3951_v59  ;;  %v4061_v12 = vmul.f32 %v4060_v47, %v3951_v59 }
 0x542   : > { %v4004_v11 = vmul.f32 %v4003_v0, %v3987_v13  ;;  %v4035_v3 = vmul.f32 %v4034_v23, %v3987_v13  ;;  %v4065_v56 = vmul.f32 %v4064_v61, %v3987_v13  ;;  %v4091_v48 = vmul.f32 %v4090_v7, %v3951_v59 }
 0x543   : > { %v4001_v52 = vadd.f32 %v4000_v20, %v3997_v35  ;;  %v4032_v29 = vadd.f32 %v4031_v36, %v4028_v54  ;;  %v4062_v47 = vadd.f32 %v4061_v12, %v4058_v24  ;;  %v4095_v43 = vmul.f32 %v4094_v53, %v3987_v13 }
 0x544   : > { %v4092_v0 = vadd.f32 %v4091_v48, %v4088_v50 }
 0x545   : > { %v4005_v23 = vadd.f32 %v4004_v11, %v4001_v52  ;;  %v4036_v34 = vadd.f32 %v4035_v3, %v4032_v29  ;;  %v4066_v61 = vadd.f32 %v4065_v56, %v4062_v47 }
 0x546   : > { %v4096_v14 = vadd.f32 %v4095_v43, %v4092_v0 }
 0x547   : > { %vm4011_vm10 = vcmp.ge.f32.partialorder %v4005_v23, 0.0  ;;  %vm4042_vm11 = vcmp.ge.f32.partialorder %v4036_v34, 0.0  ;;  %vm4072_vm12 = vcmp.ge.f32.partialorder %v4066_v61, 0.0 }
 0x548   : > { %vm4102_vm13 = vcmp.ge.f32.partialorder %v4096_v14, 0.0  ;;  %v4073_v17 = vsel %vm4072_vm12, 1.0, %v4952_v42  ;;  %v4012_v10 = vsel %vm4011_vm10, 1.0, %v4952_v42  ;;  %v4043_v15 = vsel %vm4042_vm11, 1.0, %v4952_v42 }
 0x549   : > { %v4103_v5 = vsel %vm4102_vm13, 1.0, %v4952_v42  ;;  %v4755_v9 = vpack.i.bf16 %v4043_v15, %v4012_v10 }
 0x54a   : > { %v4760_v7 = vpack.i.bf16 %v4103_v5, %v4073_v17 }
 0x54b   : > { %4756 = vrot.lane.b32.xlu1 %v4755_v9, %s4956_s13 }
 0x54c   : > { %4761 = vrot.lane.b32.xlu0 %v4760_v7, %s4956_s13 }
 0x5bd   : > { %v4757_v55 = vpop.permute.xlu1 %4756 }
 0x5be   : > { %v4762_v4 = vpop.permute.xlu0 %4761  ;;  %v4759_v37 = vunpack.i.h.bf16 %v4757_v55  ;;  %v4758_v33 = vunpack.i.l.bf16 %v4757_v55 }
 0x5bf   : > { %v4764_v42 = vunpack.i.h.bf16 %v4762_v4  ;;  %v4763_v30 = vunpack.i.l.bf16 %v4762_v4 }
 0x5c0   : > { %4018 = vst.msk [vmem:[%s8276_s22 + $0x1] sm:$0x3f] %vm4017_vm14, %v4758_v33  ;;  %4573 = vst.msk [vmem:[%s8276_s22 + $0x9] sm:$0x3f] %vm4017_vm14, %v4759_v37 }
 0x5c1   : > { %4580 = vst.msk [vmem:[%s8276_s22 + $0x11] sm:$0x3f] %vm4017_vm14, %v4763_v30  ;;  %4587 = vst.msk [vmem:[%s8276_s22 + $0x19] sm:$0x3f] %vm4017_vm14, %v4764_v42 }
 0x5c2   : > { %4873 = shalt.err (!%p4870_p11)
}
 0x5c3   : > { %s4874_s26 = scalar_lea.hbm %s8297_s10, 512  ;;  %s4878_s6 = scalar_lea.hbm %s8719_s3, 1024 }
 0x5c4   : > { %p4875_p13 = scmp.ne.s32.totalorder %s8297_s10, %s4874_s26  ;;  %p4879_p9 = scmp.lt.s32.totalorder %s8297_s10, %s8719_s3 }
 0x5c5   : > { %p4880_p3 = scmp.lt.s32.totalorder %s4878_s6, %s4874_s26 }
 0x5c6   : > { %p4876_p1 = pnand %p4875_p13, %p8720_p10 }
 0x5c7   : > { %p4881_p5 = por %p4880_p3, %p4879_p9 }
 0x5c8   : > { %p4877_p2 = pneg %p4876_p1 }
 0x5ca   : > { %p4882_p6 = pnand %p4881_p5, %p4877_p2 }
 0x5cc   : > { %4885 = shalt.err (!%p4882_p6)
}
 0x5cd   : > { %s4958_s30 = smov 128   ;;  %s4959_s11 = smov 8  }
 0x5ce   : > { %4619 = dma.vmem_to_hbm [thread:$0]  (%p8720_p10), %s8299_s19, 512, %s8297_s10, %s8307_s0, %s4958_s30, %s4958_s30, %s4959_s11  }
 0x5cf PF: > { %s8721_s12 = sld [smem:[#allocation23_spill]] }
 0x5d0   : > { %s8722_s15 = sld [smem:[#allocation20_spill]] }
 0x5d1   : > { %s8723_s29 = sld [smem:[#allocation28_spill]] }
 0x5d5   : > { %p4656_p4 = scmp.ge.s32.totalorder %s8721_s12, 2 }
 0x5d6   : > { %s4138_s20 = sand.u32 1, %s8722_s15  }
 0x5d7   : > { %p8724_p0 = scmp.ne.s32.totalorder %s8723_s29, 0  ;;  %s4139_s23 = scalar_lea.sflag [#allocation4], %s4138_s20 }
 0x5d9   : > { %p4641_p7 = pnand %p4656_p4, %p8724_p0 }
 0x5db   : > { %p4642_p8 = pneg %p4641_p7 }
 0x5dd   : > { %4919 = dma.done.wait (%p4642_p8), %s4139_s23, 512  }
 0x5de   : > { %4921 = vsyncadd (%p4642_p8), %s4139_s23, 4294966784  ;;  %s8725_s27 = sld [smem:[#allocation25_spill]] }
 0x5df   : > { %s8726_s24 = sld [smem:[#allocation21_spill]] }
 0x5e0   : > { %s8727_s25 = sld [smem:[#allocation22_spill]] }
 0x5e1   : > { %s8728_s26 = sld [smem:[#allocation26_spill]] }
 0x5e4   : > { %p21_p12 = scmp.ge.s32.totalorder %s8725_s27, 4  }
 0x5e6   :  { %23 = sbr.rel (!%p21_p12) target bundleno = 16 (0x10), region = 112 }
 0x5eb   :  { %4144 = vsyncpa [#allocation4], 1 }
 0x5ec   :  { %4146 = vsyncpa [#allocation4 + $0x1], 1 }
 0x5ed   :  { %4147 = vsyncpa [#allocation5], 1 }
 0x5ee   :  { %4149 = vsyncpa [#allocation5 + $0x1], 1 }
 0x5ef   :  { %4150 = vsyncpa [#allocation7], 1 }
 0x5f0   :  { %4151 = vsyncpa [#allocation10], 1 }
 0x5f1   :  { %4152 = vsyncpa [#allocation13], 1 }

</bundles_post_ra>
